<compile_context>
chip_gen: v7x
topology: tpu7x:2x2x1
jax: 0.10.0
libtpu: 0.0.40
codegen_flags: <defaults>
</compile_context>

<pallas_src>
import functools

import jax
import jax.numpy as jnp
from jax.experimental import pallas as pl
from jax.experimental.pallas import tpu as pltpu


def _round_up(v, m):
    return -(-v // m) * m


# ---------------------------------------------------------------------------
# Fused kernel. One grid step processes a tile of `tb` images.
#
# In-kernel layouts (chosen so only full-block reads, leading-int indexing
# and 8-aligned contiguous sublane slices are needed -- no gathers, strided
# loads, reshapes or transposes inside the kernel):
#   xs   : (1, 2, 10*tb, 672) rows = (j, n) with conv1 output row oh1 = 2*j+p;
#          cols = (kh, w): the 8 input rows feeding that output row, concat.
#   h1   : (2, 10*tb, 320)    conv1 output, cols = (ow1, c1)     [VMEM scratch]
#   part : (4, 10*tb, 384)    conv2 partial sums, one per kernel row kh2,
#          cols = (ow2 padded 9->12, c2)                          [VMEM scratch]
#   out  : (tb, 128)          fc2 output, num_actions padded to 128 lanes.
# ---------------------------------------------------------------------------
def _dqn_fused_kernel(xs_ref, a1_ref, b1_ref, b2w_ref, b2_ref,
                      w3_ref, b3_ref, w4_ref, b4_ref,
                      o_ref, h1_s, part_s, *, tb):
    f32 = jnp.float32
    bf16 = jnp.bfloat16

    # --- conv1 (+ReLU): 2 MXU matmuls, one per output-row parity -----------
    # (10*tb, 672) @ (672, 320): rows (j, n), cols (ow1, c1).
    for p in range(2):
        acc = jnp.dot(xs_ref[0, p], a1_ref[...], preferred_element_type=f32)
        acc = jnp.maximum(acc + b1_ref[...], 0.0)
        h1_s[p] = acc.astype(bf16)

    # --- conv2 partial sums: 4 MXU matmuls, one per kernel row kh2 ----------
    # part_k uses the h1 parity kh2 % 2; the row shift kh2 // 2 is applied
    # when the partials are combined below.
    for k in range(4):
        part_s[k] = jnp.dot(h1_s[k % 2], b2w_ref[k],
                            preferred_element_type=f32)

    # --- combine partials per conv2 output row, ReLU, fc1 (+ fc2 epilogue) --
    # For conv2 output row r (= oh2) the needed parity-row index is
    # j = r + kh2//2, i.e. rows [r*tb:(r+1)*tb] of part_0/part_1 and rows
    # [(r+1)*tb:(r+2)*tb] of part_2/part_3 (8-aligned since tb % 8 == 0).
    acc3 = jnp.zeros((tb, 256), dtype=f32)
    for r in range(9):
        lo, mid, hi = r * tb, (r + 1) * tb, (r + 2) * tb
        slab = (part_s[0, lo:mid, :] + part_s[1, lo:mid, :]
                + part_s[2, mid:hi, :] + part_s[3, mid:hi, :])
        slab = jnp.maximum(slab + b2_ref[...], 0.0).astype(bf16)   # (tb, 384)
        acc3 = acc3 + jnp.dot(slab, w3_ref[r], preferred_element_type=f32)

    h3 = jnp.maximum(acc3 + b3_ref[...], 0.0).astype(bf16)          # (tb, 256)
    out = jnp.dot(h3, w4_ref[...], preferred_element_type=f32) + b4_ref[...]
    o_ref[...] = out.astype(o_ref.dtype)


# ---------------------------------------------------------------------------
# Weight repacking (pure JAX, once per parameter set; cacheable in practice).
# ---------------------------------------------------------------------------
def prepare_weights(params):
    f32, bf16 = jnp.float32, jnp.bfloat16
    num_actions = params["fc2_w"].shape[0]

    # conv1 -> A1 (672, 320): rows (kh, w_in), cols (ow1, c1).
    wt1 = jnp.transpose(params["conv1_w"].astype(f32)[:, 0], (1, 2, 0))  # (kh, kw, c1)
    widx1 = jnp.arange(84)[:, None] - 4 * jnp.arange(20)[None, :]        # (w_in, ow1)
    ok1 = (widx1 >= 0) & (widx1 < 8)
    a1 = wt1[:, jnp.clip(widx1, 0, 7), :]                                # (8, 84, 20, 16)
    a1 = jnp.where(ok1[None, :, :, None], a1, 0.0).reshape(672, 320)
    b1 = jnp.tile(params["conv1_b"].astype(f32), (20,)).reshape(1, 320)

    # conv2 -> B2 (4, 320, 384): per kh2, rows (w_h1, c1), cols (ow2 pad 12, c2).
    wt2 = jnp.transpose(params["conv2_w"].astype(f32), (2, 3, 1, 0))     # (kh2, kw2, c1, c2)
    widx2 = jnp.arange(20)[:, None] - 2 * jnp.arange(12)[None, :]        # (w_h1, ow2)
    ok2 = (widx2 >= 0) & (widx2 < 4) & (jnp.arange(12)[None, :] < 9)
    b2w = wt2[:, jnp.clip(widx2, 0, 3), :, :]                            # (4, 20, 12, 16, 32)
    b2w = jnp.where(ok2[None, :, :, None, None], b2w, 0.0)
    b2w = jnp.transpose(b2w, (0, 1, 3, 2, 4)).reshape(4, 320, 384)
    b2 = jnp.concatenate(
        [jnp.tile(params["conv2_b"].astype(f32), (9,)), jnp.zeros((96,), f32)]
    ).reshape(1, 384)

    # fc1 -> W3 (9, 384, 256): permuted from PyTorch NCHW-flatten order to
    # the kernel's (oh2, ow2 padded, c2) layout (zero rows for the padding).
    w3 = params["fc1_w"].astype(f32).reshape(256, 32, 9, 9)              # (o, c, h, w)
    w3 = jnp.transpose(w3, (2, 3, 1, 0))                                 # (h, w, c, o)
    w3 = jnp.pad(w3, ((0, 0), (0, 3), (0, 0), (0, 0))).reshape(9, 384, 256)
    b3 = params["fc1_b"].astype(f32).reshape(1, 256)

    # fc2 -> (256, 128): pad num_actions up to a full 128-lane store.
    pad_a = 128 - num_actions
    w4 = jnp.pad(params["fc2_w"].astype(f32).T, ((0, 0), (0, pad_a)))
    b4 = jnp.pad(params["fc2_b"].astype(f32), (0, pad_a)).reshape(1, 128)

    return dict(a1=a1.astype(bf16), b1=b1, b2w=b2w.astype(bf16), b2=b2,
                w3=w3.astype(bf16), b3=b3, w4=w4.astype(bf16), b4=b4)


# ---------------------------------------------------------------------------
# Input prep: static strided row slices only (no gather, no 6-D transpose).
# xs[g, p, j*tb + n, kh*84 + w] = x[g*tb + n, 0, 8*j + 4*p + kh, w]
# ---------------------------------------------------------------------------
def prepare_input(x, tb):
    n = x.shape[0]
    xr = x.reshape(n, 84, 84).astype(jnp.bfloat16)
    per_parity = []
    for p in range(2):
        chunks = []
        for kh in range(8):
            s = 4 * p + kh
            chunks.append(jax.lax.slice(xr, (0, s, 0), (n, s + 73, 84), (1, 8, 1)))
        per_parity.append(jnp.concatenate(chunks, axis=-1))        # (n, 10, 672)
    xs = jnp.stack(per_parity, axis=1)                             # (n, 2, 10, 672)

    n_pad = _round_up(n, tb)
    xs = jnp.pad(xs, ((0, n_pad - n), (0, 0), (0, 0), (0, 0)))
    g = n_pad // tb
    # Regroup rows as (tile, parity, j, image-in-tile) so the conv2/fc1 slabs
    # in the kernel are contiguous, 8-aligned sublane slices.
    xs = xs.reshape(g, tb, 2, 10, 672).transpose(0, 2, 3, 1, 4)
    return xs.reshape(g, 2, 10 * tb, 672), n_pad, g


def dqn_forward(x, params, *, tb=None):
    n = x.shape[0]
    num_actions = params["fc2_w"].shape[0]
    assert x.shape[1:] == (1, 84, 84), x.shape
    assert num_actions <= 128
    if tb is None:
        tb = min(32, _round_up(n, 8))   # 8..32 images per grid step

    w = prepare_weights(params)
    xs, n_pad, g = prepare_input(x, tb)
    rows = 10 * tb

    out = pl.pallas_call(
        functools.partial(_dqn_fused_kernel, tb=tb),
        out_shape=jax.ShapeDtypeStruct((n_pad, 128), jnp.float32),
        grid=(g,),
        in_specs=[
            pl.BlockSpec((1, 2, rows, 672), lambda i: (i, 0, 0, 0)),  # input tile
            pl.BlockSpec((672, 320), lambda i: (0, 0)),               # conv1 Toeplitz W
            pl.BlockSpec((1, 320), lambda i: (0, 0)),                 # conv1 bias
            pl.BlockSpec((4, 320, 384), lambda i: (0, 0, 0)),         # conv2 Toeplitz W
            pl.BlockSpec((1, 384), lambda i: (0, 0)),                 # conv2 bias
            pl.BlockSpec((9, 384, 256), lambda i: (0, 0, 0)),         # fc1 (permuted)
            pl.BlockSpec((1, 256), lambda i: (0, 0)),                 # fc1 bias
            pl.BlockSpec((256, 128), lambda i: (0, 0)),               # fc2 (padded)
            pl.BlockSpec((1, 128), lambda i: (0, 0)),                 # fc2 bias
        ],
        out_specs=pl.BlockSpec((tb, 128), lambda i: (i, 0)),
        scratch_shapes=[
            pltpu.VMEM((2, rows, 320), jnp.bfloat16),   # h1: never touches HBM
            pltpu.VMEM((4, rows, 384), jnp.float32),    # conv2 partial sums
        ],
        compiler_params=pltpu.CompilerParams(
            dimension_semantics=("parallel",)),          # batch tiles -> both v7x TCs
    )(xs, w["a1"], w["b1"], w["b2w"], w["b2"],
      w["w3"], w["b3"], w["w4"], w["b4"])

    return out[:n, :num_actions]


# ---------------------------------------------------------------------------
# PyTorch-equivalent init and a pure-JAX f32 reference for self-checking.
# ---------------------------------------------------------------------------
def init_params(key, num_actions):
    ks = jax.random.split(key, 8)

    def uniform(k, shape, fan_in):
        bound = 1.0 / jnp.sqrt(fan_in)
        return jax.random.uniform(k, shape, jnp.float32, -bound, bound)

    return {
        "conv1_w": uniform(ks[0], (16, 1, 8, 8), 1 * 8 * 8),
        "conv1_b": uniform(ks[1], (16,), 1 * 8 * 8),
        "conv2_w": uniform(ks[2], (32, 16, 4, 4), 16 * 4 * 4),
        "conv2_b": uniform(ks[3], (32,), 16 * 4 * 4),
        "fc1_w": uniform(ks[4], (256, 2592), 2592),
        "fc1_b": uniform(ks[5], (256,), 2592),
        "fc2_w": uniform(ks[6], (num_actions, 256), 256),
        "fc2_b": uniform(ks[7], (num_actions,), 256),
    }


def dqn_reference(x, params):
    dn = ("NCHW", "OIHW", "NCHW")
    h = jax.lax.conv_general_dilated(x, params["conv1_w"], (4, 4), "VALID",
                                     dimension_numbers=dn)
    h = jax.nn.relu(h + params["conv1_b"][None, :, None, None])
    h = jax.lax.conv_general_dilated(h, params["conv2_w"], (2, 2), "VALID",
                                     dimension_numbers=dn)
    h = jax.nn.relu(h + params["conv2_b"][None, :, None, None])
    h = h.reshape(h.shape[0], -1)
    h = jax.nn.relu(h @ params["fc1_w"].T + params["fc1_b"])
    return h @ params["fc2_w"].T + params["fc2_b"]


if __name__ == "__main__":
    num_actions = 4
    key = jax.random.PRNGKey(0)
    k_params, k_x = jax.random.split(key)

    params = init_params(k_params, num_actions)
    # Spatial size must be 84x84 so the conv stack flattens to 2592 features,
    # as required by Linear(2592, 256).  Keep the batch small for the demo.
    x = jax.random.normal(k_x, (2, 1, 84, 84), jnp.float32)

    out = jax.block_until_ready(jax.jit(dqn_forward)(x, params))
    assert out.shape == (2, num_actions), out.shape

    # Loose tolerance: kernel uses bf16 MXU inputs with f32 accumulation.
    ref = dqn_reference(x, params)
    rel = jnp.linalg.norm(out - ref) / (jnp.linalg.norm(ref) + 1e-12)
    assert float(rel) < 0.08, f"relative error vs f32 reference: {rel}"
    print("KERNEL_OK")
</pallas_src>

<mosaic_0001>
module attributes {stable_mosaic.version = 11 : i64} {
  func.func @_dqn_fused_kernel(%arg0: i32, %arg1: memref<1x2x80x672xbf16, #tpu.memory_space<vmem>>, %arg2: memref<672x320xbf16, #tpu.memory_space<vmem>>, %arg3: memref<1x320xf32, #tpu.memory_space<vmem>>, %arg4: memref<4x320x384xbf16, #tpu.memory_space<vmem>>, %arg5: memref<1x384xf32, #tpu.memory_space<vmem>>, %arg6: memref<9x384x256xbf16, #tpu.memory_space<vmem>>, %arg7: memref<1x256xf32, #tpu.memory_space<vmem>>, %arg8: memref<256x128xbf16, #tpu.memory_space<vmem>>, %arg9: memref<1x128xf32, #tpu.memory_space<vmem>>, %arg10: memref<8x128xf32, #tpu.memory_space<vmem>>, %arg11: memref<2x80x320xbf16, #tpu.memory_space<vmem>>, %arg12: memref<4x80x384xf32, #tpu.memory_space<vmem>>) attributes {dimension_semantics = [#tpu.dimension_semantics<parallel>], iteration_bounds = array<i64: 1>, scalar_prefetch = 0 : i64, scratch_operands = 2 : i64, tpu.core_type = #tpu.core_type<tc>, window_params = [{transform_indices = @transform_0, window_bounds = array<i64: 1, 2, 80, 672>}, {pipeline_mode = #tpu.pipeline_mode<synchronous>, transform_indices = @transform_1, window_bounds = array<i64: 672, 320>}, {pipeline_mode = #tpu.pipeline_mode<synchronous>, transform_indices = @transform_2, window_bounds = array<i64: 1, 320>}, {pipeline_mode = #tpu.pipeline_mode<synchronous>, transform_indices = @transform_3, window_bounds = array<i64: 4, 320, 384>}, {pipeline_mode = #tpu.pipeline_mode<synchronous>, transform_indices = @transform_4, window_bounds = array<i64: 1, 384>}, {pipeline_mode = #tpu.pipeline_mode<synchronous>, transform_indices = @transform_5, window_bounds = array<i64: 9, 384, 256>}, {pipeline_mode = #tpu.pipeline_mode<synchronous>, transform_indices = @transform_6, window_bounds = array<i64: 1, 256>}, {pipeline_mode = #tpu.pipeline_mode<synchronous>, transform_indices = @transform_7, window_bounds = array<i64: 256, 128>}, {pipeline_mode = #tpu.pipeline_mode<synchronous>, transform_indices = @transform_8, window_bounds = array<i64: 1, 128>}, {transform_indices = @transform_9, window_bounds = array<i64: 8, 128>}]} {
    %c0 = arith.constant 0 : index
    %c0_0 = arith.constant 0 : index
    %c0_1 = arith.constant 0 : index
    %c0_2 = arith.constant 0 : index
    %0 = vector.load %arg1[%c0, %c0_0, %c0_1, %c0_2] : memref<1x2x80x672xbf16, #tpu.memory_space<vmem>>, vector<1x1x80x672xbf16>
    %1 = vector.shape_cast %0 : vector<1x1x80x672xbf16> to vector<80x672xbf16>
    %c0_3 = arith.constant 0 : index
    %c0_4 = arith.constant 0 : index
    %2 = vector.load %arg2[%c0_3, %c0_4] : memref<672x320xbf16, #tpu.memory_space<vmem>>, vector<672x320xbf16>
    %cst = arith.constant dense<0.000000e+00> : vector<80x320xf32>
    %3 = tpu.matmul %1, %2, %cst {dimension_numbers = #tpu.dot_dimension_numbers<[1], [0], [0], [1], [0, 0, 1, 1], [], []>} : vector<80x672xbf16>, vector<672x320xbf16>, vector<80x320xf32> -> vector<80x320xf32>
    %c0_5 = arith.constant 0 : index
    %c0_6 = arith.constant 0 : index
    %4 = vector.load %arg3[%c0_5, %c0_6] : memref<1x320xf32, #tpu.memory_space<vmem>>, vector<1x320xf32>
    %5 = vector.broadcast %4 : vector<1x320xf32> to vector<80x320xf32>
    %6 = arith.addf %3, %5 : vector<80x320xf32>
    %cst_7 = arith.constant 0.000000e+00 : f32
    %7 = vector.broadcast %cst_7 : f32 to vector<80x320xf32>
    %8 = arith.maximumf %6, %7 : vector<80x320xf32>
    %9 = arith.truncf %8 : vector<80x320xf32> to vector<80x320xbf16>
    %c0_8 = arith.constant 0 : index
    %c0_9 = arith.constant 0 : index
    %c0_10 = arith.constant 0 : index
    %10 = vector.load %arg11[%c0_8, %c0_9, %c0_10] : memref<2x80x320xbf16, #tpu.memory_space<vmem>>, vector<1x80x320xbf16>
    %11 = vector.shape_cast %10 : vector<1x80x320xbf16> to vector<80x320xbf16>
    %12 = vector.shape_cast %9 : vector<80x320xbf16> to vector<1x80x320xbf16>
    tpu.vector_store %arg11[%c0_8, %c0_9, %c0_10], %12 {strides = array<i32>} : memref<2x80x320xbf16, #tpu.memory_space<vmem>>, vector<1x80x320xbf16>,
    %c0_11 = arith.constant 0 : index
    %c1 = arith.constant 1 : index
    %c0_12 = arith.constant 0 : index
    %c0_13 = arith.constant 0 : index
    %13 = vector.load %arg1[%c0_11, %c1, %c0_12, %c0_13] : memref<1x2x80x672xbf16, #tpu.memory_space<vmem>>, vector<1x1x80x672xbf16>
    %14 = vector.shape_cast %13 : vector<1x1x80x672xbf16> to vector<80x672xbf16>
    %c0_14 = arith.constant 0 : index
    %c0_15 = arith.constant 0 : index
    %15 = vector.load %arg2[%c0_14, %c0_15] : memref<672x320xbf16, #tpu.memory_space<vmem>>, vector<672x320xbf16>
    %cst_16 = arith.constant dense<0.000000e+00> : vector<80x320xf32>
    %16 = tpu.matmul %14, %15, %cst_16 {dimension_numbers = #tpu.dot_dimension_numbers<[1], [0], [0], [1], [0, 0, 1, 1], [], []>} : vector<80x672xbf16>, vector<672x320xbf16>, vector<80x320xf32> -> vector<80x320xf32>
    %c0_17 = arith.constant 0 : index
    %c0_18 = arith.constant 0 : index
    %17 = vector.load %arg3[%c0_17, %c0_18] : memref<1x320xf32, #tpu.memory_space<vmem>>, vector<1x320xf32>
    %18 = vector.broadcast %17 : vector<1x320xf32> to vector<80x320xf32>
    %19 = arith.addf %16, %18 : vector<80x320xf32>
    %cst_19 = arith.constant 0.000000e+00 : f32
    %20 = vector.broadcast %cst_19 : f32 to vector<80x320xf32>
    %21 = arith.maximumf %19, %20 : vector<80x320xf32>
    %22 = arith.truncf %21 : vector<80x320xf32> to vector<80x320xbf16>
    %c1_20 = arith.constant 1 : index
    %c0_21 = arith.constant 0 : index
    %c0_22 = arith.constant 0 : index
    %23 = vector.load %arg11[%c1_20, %c0_21, %c0_22] : memref<2x80x320xbf16, #tpu.memory_space<vmem>>, vector<1x80x320xbf16>
    %24 = vector.shape_cast %23 : vector<1x80x320xbf16> to vector<80x320xbf16>
    %25 = vector.shape_cast %22 : vector<80x320xbf16> to vector<1x80x320xbf16>
    tpu.vector_store %arg11[%c1_20, %c0_21, %c0_22], %25 {strides = array<i32>} : memref<2x80x320xbf16, #tpu.memory_space<vmem>>, vector<1x80x320xbf16>,
    %c0_23 = arith.constant 0 : index
    %c0_24 = arith.constant 0 : index
    %c0_25 = arith.constant 0 : index
    %26 = vector.load %arg11[%c0_23, %c0_24, %c0_25] : memref<2x80x320xbf16, #tpu.memory_space<vmem>>, vector<1x80x320xbf16>
    %27 = vector.shape_cast %26 : vector<1x80x320xbf16> to vector<80x320xbf16>
    %c0_26 = arith.constant 0 : index
    %c0_27 = arith.constant 0 : index
    %c0_28 = arith.constant 0 : index
    %28 = vector.load %arg4[%c0_26, %c0_27, %c0_28] : memref<4x320x384xbf16, #tpu.memory_space<vmem>>, vector<1x320x384xbf16>
    %29 = vector.shape_cast %28 : vector<1x320x384xbf16> to vector<320x384xbf16>
    %cst_29 = arith.constant dense<0.000000e+00> : vector<80x384xf32>
    %30 = tpu.matmul %27, %29, %cst_29 {dimension_numbers = #tpu.dot_dimension_numbers<[1], [0], [0], [1], [0, 0, 1, 1], [], []>} : vector<80x320xbf16>, vector<320x384xbf16>, vector<80x384xf32> -> vector<80x384xf32>
    %c0_30 = arith.constant 0 : index
    %c0_31 = arith.constant 0 : index
    %c0_32 = arith.constant 0 : index
    %31 = vector.load %arg12[%c0_30, %c0_31, %c0_32] : memref<4x80x384xf32, #tpu.memory_space<vmem>>, vector<1x80x384xf32>
    %32 = vector.shape_cast %31 : vector<1x80x384xf32> to vector<80x384xf32>
    %33 = vector.shape_cast %30 : vector<80x384xf32> to vector<1x80x384xf32>
    tpu.vector_store %arg12[%c0_30, %c0_31, %c0_32], %33 {strides = array<i32>} : memref<4x80x384xf32, #tpu.memory_space<vmem>>, vector<1x80x384xf32>,
    %c1_33 = arith.constant 1 : index
    %c0_34 = arith.constant 0 : index
    %c0_35 = arith.constant 0 : index
    %34 = vector.load %arg11[%c1_33, %c0_34, %c0_35] : memref<2x80x320xbf16, #tpu.memory_space<vmem>>, vector<1x80x320xbf16>
    %35 = vector.shape_cast %34 : vector<1x80x320xbf16> to vector<80x320xbf16>
    %c1_36 = arith.constant 1 : index
    %c0_37 = arith.constant 0 : index
    %c0_38 = arith.constant 0 : index
    %36 = vector.load %arg4[%c1_36, %c0_37, %c0_38] : memref<4x320x384xbf16, #tpu.memory_space<vmem>>, vector<1x320x384xbf16>
    %37 = vector.shape_cast %36 : vector<1x320x384xbf16> to vector<320x384xbf16>
    %cst_39 = arith.constant dense<0.000000e+00> : vector<80x384xf32>
    %38 = tpu.matmul %35, %37, %cst_39 {dimension_numbers = #tpu.dot_dimension_numbers<[1], [0], [0], [1], [0, 0, 1, 1], [], []>} : vector<80x320xbf16>, vector<320x384xbf16>, vector<80x384xf32> -> vector<80x384xf32>
    %c1_40 = arith.constant 1 : index
    %c0_41 = arith.constant 0 : index
    %c0_42 = arith.constant 0 : index
    %39 = vector.load %arg12[%c1_40, %c0_41, %c0_42] : memref<4x80x384xf32, #tpu.memory_space<vmem>>, vector<1x80x384xf32>
    %40 = vector.shape_cast %39 : vector<1x80x384xf32> to vector<80x384xf32>
    %41 = vector.shape_cast %38 : vector<80x384xf32> to vector<1x80x384xf32>
    tpu.vector_store %arg12[%c1_40, %c0_41, %c0_42], %41 {strides = array<i32>} : memref<4x80x384xf32, #tpu.memory_space<vmem>>, vector<1x80x384xf32>,
    %c0_43 = arith.constant 0 : index
    %c0_44 = arith.constant 0 : index
    %c0_45 = arith.constant 0 : index
    %42 = vector.load %arg11[%c0_43, %c0_44, %c0_45] : memref<2x80x320xbf16, #tpu.memory_space<vmem>>, vector<1x80x320xbf16>
    %43 = vector.shape_cast %42 : vector<1x80x320xbf16> to vector<80x320xbf16>
    %c2 = arith.constant 2 : index
    %c0_46 = arith.constant 0 : index
    %c0_47 = arith.constant 0 : index
    %44 = vector.load %arg4[%c2, %c0_46, %c0_47] : memref<4x320x384xbf16, #tpu.memory_space<vmem>>, vector<1x320x384xbf16>
    %45 = vector.shape_cast %44 : vector<1x320x384xbf16> to vector<320x384xbf16>
    %cst_48 = arith.constant dense<0.000000e+00> : vector<80x384xf32>
    %46 = tpu.matmul %43, %45, %cst_48 {dimension_numbers = #tpu.dot_dimension_numbers<[1], [0], [0], [1], [0, 0, 1, 1], [], []>} : vector<80x320xbf16>, vector<320x384xbf16>, vector<80x384xf32> -> vector<80x384xf32>
    %c2_49 = arith.constant 2 : index
    %c0_50 = arith.constant 0 : index
    %c0_51 = arith.constant 0 : index
    %47 = vector.load %arg12[%c2_49, %c0_50, %c0_51] : memref<4x80x384xf32, #tpu.memory_space<vmem>>, vector<1x80x384xf32>
    %48 = vector.shape_cast %47 : vector<1x80x384xf32> to vector<80x384xf32>
    %49 = vector.shape_cast %46 : vector<80x384xf32> to vector<1x80x384xf32>
    tpu.vector_store %arg12[%c2_49, %c0_50, %c0_51], %49 {strides = array<i32>} : memref<4x80x384xf32, #tpu.memory_space<vmem>>, vector<1x80x384xf32>,
    %c1_52 = arith.constant 1 : index
    %c0_53 = arith.constant 0 : index
    %c0_54 = arith.constant 0 : index
    %50 = vector.load %arg11[%c1_52, %c0_53, %c0_54] : memref<2x80x320xbf16, #tpu.memory_space<vmem>>, vector<1x80x320xbf16>
    %51 = vector.shape_cast %50 : vector<1x80x320xbf16> to vector<80x320xbf16>
    %c3 = arith.constant 3 : index
    %c0_55 = arith.constant 0 : index
    %c0_56 = arith.constant 0 : index
    %52 = vector.load %arg4[%c3, %c0_55, %c0_56] : memref<4x320x384xbf16, #tpu.memory_space<vmem>>, vector<1x320x384xbf16>
    %53 = vector.shape_cast %52 : vector<1x320x384xbf16> to vector<320x384xbf16>
    %cst_57 = arith.constant dense<0.000000e+00> : vector<80x384xf32>
    %54 = tpu.matmul %51, %53, %cst_57 {dimension_numbers = #tpu.dot_dimension_numbers<[1], [0], [0], [1], [0, 0, 1, 1], [], []>} : vector<80x320xbf16>, vector<320x384xbf16>, vector<80x384xf32> -> vector<80x384xf32>
    %c3_58 = arith.constant 3 : index
    %c0_59 = arith.constant 0 : index
    %c0_60 = arith.constant 0 : index
    %55 = vector.load %arg12[%c3_58, %c0_59, %c0_60] : memref<4x80x384xf32, #tpu.memory_space<vmem>>, vector<1x80x384xf32>
    %56 = vector.shape_cast %55 : vector<1x80x384xf32> to vector<80x384xf32>
    %57 = vector.shape_cast %54 : vector<80x384xf32> to vector<1x80x384xf32>
    tpu.vector_store %arg12[%c3_58, %c0_59, %c0_60], %57 {strides = array<i32>} : memref<4x80x384xf32, #tpu.memory_space<vmem>>, vector<1x80x384xf32>,
    %cst_61 = arith.constant 0.000000e+00 : f32
    %58 = vector.broadcast %cst_61 : f32 to vector<8x256xf32>
    %c0_62 = arith.constant 0 : index
    %c0_63 = arith.constant 0 : index
    %c0_64 = arith.constant 0 : index
    %59 = vector.load %arg12[%c0_62, %c0_63, %c0_64] : memref<4x80x384xf32, #tpu.memory_space<vmem>>, vector<1x8x384xf32>
    %60 = vector.shape_cast %59 : vector<1x8x384xf32> to vector<8x384xf32>
    %c1_65 = arith.constant 1 : index
    %c0_66 = arith.constant 0 : index
    %c0_67 = arith.constant 0 : index
    %61 = vector.load %arg12[%c1_65, %c0_66, %c0_67] : memref<4x80x384xf32, #tpu.memory_space<vmem>>, vector<1x8x384xf32>
    %62 = vector.shape_cast %61 : vector<1x8x384xf32> to vector<8x384xf32>
    %63 = arith.addf %60, %62 : vector<8x384xf32>
    %c2_68 = arith.constant 2 : index
    %c8 = arith.constant 8 : index
    %c0_69 = arith.constant 0 : index
    %64 = vector.load %arg12[%c2_68, %c8, %c0_69] : memref<4x80x384xf32, #tpu.memory_space<vmem>>, vector<1x8x384xf32>
    %65 = vector.shape_cast %64 : vector<1x8x384xf32> to vector<8x384xf32>
    %66 = arith.addf %63, %65 : vector<8x384xf32>
    %c3_70 = arith.constant 3 : index
    %c8_71 = arith.constant 8 : index
    %c0_72 = arith.constant 0 : index
    %67 = vector.load %arg12[%c3_70, %c8_71, %c0_72] : memref<4x80x384xf32, #tpu.memory_space<vmem>>, vector<1x8x384xf32>
    %68 = vector.shape_cast %67 : vector<1x8x384xf32> to vector<8x384xf32>
    %69 = arith.addf %66, %68 : vector<8x384xf32>
    %c0_73 = arith.constant 0 : index
    %c0_74 = arith.constant 0 : index
    %70 = vector.load %arg5[%c0_73, %c0_74] : memref<1x384xf32, #tpu.memory_space<vmem>>, vector<1x384xf32>
    %71 = vector.broadcast %70 : vector<1x384xf32> to vector<8x384xf32>
    %72 = arith.addf %69, %71 : vector<8x384xf32>
    %cst_75 = arith.constant 0.000000e+00 : f32
    %73 = vector.broadcast %cst_75 : f32 to vector<8x384xf32>
    %74 = arith.maximumf %72, %73 : vector<8x384xf32>
    %75 = arith.truncf %74 : vector<8x384xf32> to vector<8x384xbf16>
    %c0_76 = arith.constant 0 : index
    %c0_77 = arith.constant 0 : index
    %c0_78 = arith.constant 0 : index
    %76 = vector.load %arg6[%c0_76, %c0_77, %c0_78] : memref<9x384x256xbf16, #tpu.memory_space<vmem>>, vector<1x384x256xbf16>
    %77 = vector.shape_cast %76 : vector<1x384x256xbf16> to vector<384x256xbf16>
    %cst_79 = arith.constant dense<0.000000e+00> : vector<8x256xf32>
    %78 = tpu.matmul %75, %77, %cst_79 {dimension_numbers = #tpu.dot_dimension_numbers<[1], [0], [0], [1], [0, 0, 1, 1], [], []>} : vector<8x384xbf16>, vector<384x256xbf16>, vector<8x256xf32> -> vector<8x256xf32>
    %79 = arith.addf %58, %78 : vector<8x256xf32>
    %c0_80 = arith.constant 0 : index
    %c8_81 = arith.constant 8 : index
    %c0_82 = arith.constant 0 : index
    %80 = vector.load %arg12[%c0_80, %c8_81, %c0_82] : memref<4x80x384xf32, #tpu.memory_space<vmem>>, vector<1x8x384xf32>
    %81 = vector.shape_cast %80 : vector<1x8x384xf32> to vector<8x384xf32>
    %c1_83 = arith.constant 1 : index
    %c8_84 = arith.constant 8 : index
    %c0_85 = arith.constant 0 : index
    %82 = vector.load %arg12[%c1_83, %c8_84, %c0_85] : memref<4x80x384xf32, #tpu.memory_space<vmem>>, vector<1x8x384xf32>
    %83 = vector.shape_cast %82 : vector<1x8x384xf32> to vector<8x384xf32>
    %84 = arith.addf %81, %83 : vector<8x384xf32>
    %c2_86 = arith.constant 2 : index
    %c16 = arith.constant 16 : index
    %c0_87 = arith.constant 0 : index
    %85 = vector.load %arg12[%c2_86, %c16, %c0_87] : memref<4x80x384xf32, #tpu.memory_space<vmem>>, vector<1x8x384xf32>
    %86 = vector.shape_cast %85 : vector<1x8x384xf32> to vector<8x384xf32>
    %87 = arith.addf %84, %86 : vector<8x384xf32>
    %c3_88 = arith.constant 3 : index
    %c16_89 = arith.constant 16 : index
    %c0_90 = arith.constant 0 : index
    %88 = vector.load %arg12[%c3_88, %c16_89, %c0_90] : memref<4x80x384xf32, #tpu.memory_space<vmem>>, vector<1x8x384xf32>
    %89 = vector.shape_cast %88 : vector<1x8x384xf32> to vector<8x384xf32>
    %90 = arith.addf %87, %89 : vector<8x384xf32>
    %c0_91 = arith.constant 0 : index
    %c0_92 = arith.constant 0 : index
    %91 = vector.load %arg5[%c0_91, %c0_92] : memref<1x384xf32, #tpu.memory_space<vmem>>, vector<1x384xf32>
    %92 = vector.broadcast %91 : vector<1x384xf32> to vector<8x384xf32>
    %93 = arith.addf %90, %92 : vector<8x384xf32>
    %cst_93 = arith.constant 0.000000e+00 : f32
    %94 = vector.broadcast %cst_93 : f32 to vector<8x384xf32>
    %95 = arith.maximumf %93, %94 : vector<8x384xf32>
    %96 = arith.truncf %95 : vector<8x384xf32> to vector<8x384xbf16>
    %c1_94 = arith.constant 1 : index
    %c0_95 = arith.constant 0 : index
    %c0_96 = arith.constant 0 : index
    %97 = vector.load %arg6[%c1_94, %c0_95, %c0_96] : memref<9x384x256xbf16, #tpu.memory_space<vmem>>, vector<1x384x256xbf16>
    %98 = vector.shape_cast %97 : vector<1x384x256xbf16> to vector<384x256xbf16>
    %cst_97 = arith.constant dense<0.000000e+00> : vector<8x256xf32>
    %99 = tpu.matmul %96, %98, %cst_97 {dimension_numbers = #tpu.dot_dimension_numbers<[1], [0], [0], [1], [0, 0, 1, 1], [], []>} : vector<8x384xbf16>, vector<384x256xbf16>, vector<8x256xf32> -> vector<8x256xf32>
    %100 = arith.addf %79, %99 : vector<8x256xf32>
    %c0_98 = arith.constant 0 : index
    %c16_99 = arith.constant 16 : index
    %c0_100 = arith.constant 0 : index
    %101 = vector.load %arg12[%c0_98, %c16_99, %c0_100] : memref<4x80x384xf32, #tpu.memory_space<vmem>>, vector<1x8x384xf32>
    %102 = vector.shape_cast %101 : vector<1x8x384xf32> to vector<8x384xf32>
    %c1_101 = arith.constant 1 : index
    %c16_102 = arith.constant 16 : index
    %c0_103 = arith.constant 0 : index
    %103 = vector.load %arg12[%c1_101, %c16_102, %c0_103] : memref<4x80x384xf32, #tpu.memory_space<vmem>>, vector<1x8x384xf32>
    %104 = vector.shape_cast %103 : vector<1x8x384xf32> to vector<8x384xf32>
    %105 = arith.addf %102, %104 : vector<8x384xf32>
    %c2_104 = arith.constant 2 : index
    %c24 = arith.constant 24 : index
    %c0_105 = arith.constant 0 : index
    %106 = vector.load %arg12[%c2_104, %c24, %c0_105] : memref<4x80x384xf32, #tpu.memory_space<vmem>>, vector<1x8x384xf32>
    %107 = vector.shape_cast %106 : vector<1x8x384xf32> to vector<8x384xf32>
    %108 = arith.addf %105, %107 : vector<8x384xf32>
    %c3_106 = arith.constant 3 : index
    %c24_107 = arith.constant 24 : index
    %c0_108 = arith.constant 0 : index
    %109 = vector.load %arg12[%c3_106, %c24_107, %c0_108] : memref<4x80x384xf32, #tpu.memory_space<vmem>>, vector<1x8x384xf32>
    %110 = vector.shape_cast %109 : vector<1x8x384xf32> to vector<8x384xf32>
    %111 = arith.addf %108, %110 : vector<8x384xf32>
    %c0_109 = arith.constant 0 : index
    %c0_110 = arith.constant 0 : index
    %112 = vector.load %arg5[%c0_109, %c0_110] : memref<1x384xf32, #tpu.memory_space<vmem>>, vector<1x384xf32>
    %113 = vector.broadcast %112 : vector<1x384xf32> to vector<8x384xf32>
    %114 = arith.addf %111, %113 : vector<8x384xf32>
    %cst_111 = arith.constant 0.000000e+00 : f32
    %115 = vector.broadcast %cst_111 : f32 to vector<8x384xf32>
    %116 = arith.maximumf %114, %115 : vector<8x384xf32>
    %117 = arith.truncf %116 : vector<8x384xf32> to vector<8x384xbf16>
    %c2_112 = arith.constant 2 : index
    %c0_113 = arith.constant 0 : index
    %c0_114 = arith.constant 0 : index
    %118 = vector.load %arg6[%c2_112, %c0_113, %c0_114] : memref<9x384x256xbf16, #tpu.memory_space<vmem>>, vector<1x384x256xbf16>
    %119 = vector.shape_cast %118 : vector<1x384x256xbf16> to vector<384x256xbf16>
    %cst_115 = arith.constant dense<0.000000e+00> : vector<8x256xf32>
    %120 = tpu.matmul %117, %119, %cst_115 {dimension_numbers = #tpu.dot_dimension_numbers<[1], [0], [0], [1], [0, 0, 1, 1], [], []>} : vector<8x384xbf16>, vector<384x256xbf16>, vector<8x256xf32> -> vector<8x256xf32>
    %121 = arith.addf %100, %120 : vector<8x256xf32>
    %c0_116 = arith.constant 0 : index
    %c24_117 = arith.constant 24 : index
    %c0_118 = arith.constant 0 : index
    %122 = vector.load %arg12[%c0_116, %c24_117, %c0_118] : memref<4x80x384xf32, #tpu.memory_space<vmem>>, vector<1x8x384xf32>
    %123 = vector.shape_cast %122 : vector<1x8x384xf32> to vector<8x384xf32>
    %c1_119 = arith.constant 1 : index
    %c24_120 = arith.constant 24 : index
    %c0_121 = arith.constant 0 : index
    %124 = vector.load %arg12[%c1_119, %c24_120, %c0_121] : memref<4x80x384xf32, #tpu.memory_space<vmem>>, vector<1x8x384xf32>
    %125 = vector.shape_cast %124 : vector<1x8x384xf32> to vector<8x384xf32>
    %126 = arith.addf %123, %125 : vector<8x384xf32>
    %c2_122 = arith.constant 2 : index
    %c32 = arith.constant 32 : index
    %c0_123 = arith.constant 0 : index
    %127 = vector.load %arg12[%c2_122, %c32, %c0_123] : memref<4x80x384xf32, #tpu.memory_space<vmem>>, vector<1x8x384xf32>
    %128 = vector.shape_cast %127 : vector<1x8x384xf32> to vector<8x384xf32>
    %129 = arith.addf %126, %128 : vector<8x384xf32>
    %c3_124 = arith.constant 3 : index
    %c32_125 = arith.constant 32 : index
    %c0_126 = arith.constant 0 : index
    %130 = vector.load %arg12[%c3_124, %c32_125, %c0_126] : memref<4x80x384xf32, #tpu.memory_space<vmem>>, vector<1x8x384xf32>
    %131 = vector.shape_cast %130 : vector<1x8x384xf32> to vector<8x384xf32>
    %132 = arith.addf %129, %131 : vector<8x384xf32>
    %c0_127 = arith.constant 0 : index
    %c0_128 = arith.constant 0 : index
    %133 = vector.load %arg5[%c0_127, %c0_128] : memref<1x384xf32, #tpu.memory_space<vmem>>, vector<1x384xf32>
    %134 = vector.broadcast %133 : vector<1x384xf32> to vector<8x384xf32>
    %135 = arith.addf %132, %134 : vector<8x384xf32>
    %cst_129 = arith.constant 0.000000e+00 : f32
    %136 = vector.broadcast %cst_129 : f32 to vector<8x384xf32>
    %137 = arith.maximumf %135, %136 : vector<8x384xf32>
    %138 = arith.truncf %137 : vector<8x384xf32> to vector<8x384xbf16>
    %c3_130 = arith.constant 3 : index
    %c0_131 = arith.constant 0 : index
    %c0_132 = arith.constant 0 : index
    %139 = vector.load %arg6[%c3_130, %c0_131, %c0_132] : memref<9x384x256xbf16, #tpu.memory_space<vmem>>, vector<1x384x256xbf16>
    %140 = vector.shape_cast %139 : vector<1x384x256xbf16> to vector<384x256xbf16>
    %cst_133 = arith.constant dense<0.000000e+00> : vector<8x256xf32>
    %141 = tpu.matmul %138, %140, %cst_133 {dimension_numbers = #tpu.dot_dimension_numbers<[1], [0], [0], [1], [0, 0, 1, 1], [], []>} : vector<8x384xbf16>, vector<384x256xbf16>, vector<8x256xf32> -> vector<8x256xf32>
    %142 = arith.addf %121, %141 : vector<8x256xf32>
    %c0_134 = arith.constant 0 : index
    %c32_135 = arith.constant 32 : index
    %c0_136 = arith.constant 0 : index
    %143 = vector.load %arg12[%c0_134, %c32_135, %c0_136] : memref<4x80x384xf32, #tpu.memory_space<vmem>>, vector<1x8x384xf32>
    %144 = vector.shape_cast %143 : vector<1x8x384xf32> to vector<8x384xf32>
    %c1_137 = arith.constant 1 : index
    %c32_138 = arith.constant 32 : index
    %c0_139 = arith.constant 0 : index
    %145 = vector.load %arg12[%c1_137, %c32_138, %c0_139] : memref<4x80x384xf32, #tpu.memory_space<vmem>>, vector<1x8x384xf32>
    %146 = vector.shape_cast %145 : vector<1x8x384xf32> to vector<8x384xf32>
    %147 = arith.addf %144, %146 : vector<8x384xf32>
    %c2_140 = arith.constant 2 : index
    %c40 = arith.constant 40 : index
    %c0_141 = arith.constant 0 : index
    %148 = vector.load %arg12[%c2_140, %c40, %c0_141] : memref<4x80x384xf32, #tpu.memory_space<vmem>>, vector<1x8x384xf32>
    %149 = vector.shape_cast %148 : vector<1x8x384xf32> to vector<8x384xf32>
    %150 = arith.addf %147, %149 : vector<8x384xf32>
    %c3_142 = arith.constant 3 : index
    %c40_143 = arith.constant 40 : index
    %c0_144 = arith.constant 0 : index
    %151 = vector.load %arg12[%c3_142, %c40_143, %c0_144] : memref<4x80x384xf32, #tpu.memory_space<vmem>>, vector<1x8x384xf32>
    %152 = vector.shape_cast %151 : vector<1x8x384xf32> to vector<8x384xf32>
    %153 = arith.addf %150, %152 : vector<8x384xf32>
    %c0_145 = arith.constant 0 : index
    %c0_146 = arith.constant 0 : index
    %154 = vector.load %arg5[%c0_145, %c0_146] : memref<1x384xf32, #tpu.memory_space<vmem>>, vector<1x384xf32>
    %155 = vector.broadcast %154 : vector<1x384xf32> to vector<8x384xf32>
    %156 = arith.addf %153, %155 : vector<8x384xf32>
    %cst_147 = arith.constant 0.000000e+00 : f32
    %157 = vector.broadcast %cst_147 : f32 to vector<8x384xf32>
    %158 = arith.maximumf %156, %157 : vector<8x384xf32>
    %159 = arith.truncf %158 : vector<8x384xf32> to vector<8x384xbf16>
    %c4 = arith.constant 4 : index
    %c0_148 = arith.constant 0 : index
    %c0_149 = arith.constant 0 : index
    %160 = vector.load %arg6[%c4, %c0_148, %c0_149] : memref<9x384x256xbf16, #tpu.memory_space<vmem>>, vector<1x384x256xbf16>
    %161 = vector.shape_cast %160 : vector<1x384x256xbf16> to vector<384x256xbf16>
    %cst_150 = arith.constant dense<0.000000e+00> : vector<8x256xf32>
    %162 = tpu.matmul %159, %161, %cst_150 {dimension_numbers = #tpu.dot_dimension_numbers<[1], [0], [0], [1], [0, 0, 1, 1], [], []>} : vector<8x384xbf16>, vector<384x256xbf16>, vector<8x256xf32> -> vector<8x256xf32>
    %163 = arith.addf %142, %162 : vector<8x256xf32>
    %c0_151 = arith.constant 0 : index
    %c40_152 = arith.constant 40 : index
    %c0_153 = arith.constant 0 : index
    %164 = vector.load %arg12[%c0_151, %c40_152, %c0_153] : memref<4x80x384xf32, #tpu.memory_space<vmem>>, vector<1x8x384xf32>
    %165 = vector.shape_cast %164 : vector<1x8x384xf32> to vector<8x384xf32>
    %c1_154 = arith.constant 1 : index
    %c40_155 = arith.constant 40 : index
    %c0_156 = arith.constant 0 : index
    %166 = vector.load %arg12[%c1_154, %c40_155, %c0_156] : memref<4x80x384xf32, #tpu.memory_space<vmem>>, vector<1x8x384xf32>
    %167 = vector.shape_cast %166 : vector<1x8x384xf32> to vector<8x384xf32>
    %168 = arith.addf %165, %167 : vector<8x384xf32>
    %c2_157 = arith.constant 2 : index
    %c48 = arith.constant 48 : index
    %c0_158 = arith.constant 0 : index
    %169 = vector.load %arg12[%c2_157, %c48, %c0_158] : memref<4x80x384xf32, #tpu.memory_space<vmem>>, vector<1x8x384xf32>
    %170 = vector.shape_cast %169 : vector<1x8x384xf32> to vector<8x384xf32>
    %171 = arith.addf %168, %170 : vector<8x384xf32>
    %c3_159 = arith.constant 3 : index
    %c48_160 = arith.constant 48 : index
    %c0_161 = arith.constant 0 : index
    %172 = vector.load %arg12[%c3_159, %c48_160, %c0_161] : memref<4x80x384xf32, #tpu.memory_space<vmem>>, vector<1x8x384xf32>
    %173 = vector.shape_cast %172 : vector<1x8x384xf32> to vector<8x384xf32>
    %174 = arith.addf %171, %173 : vector<8x384xf32>
    %c0_162 = arith.constant 0 : index
    %c0_163 = arith.constant 0 : index
    %175 = vector.load %arg5[%c0_162, %c0_163] : memref<1x384xf32, #tpu.memory_space<vmem>>, vector<1x384xf32>
    %176 = vector.broadcast %175 : vector<1x384xf32> to vector<8x384xf32>
    %177 = arith.addf %174, %176 : vector<8x384xf32>
    %cst_164 = arith.constant 0.000000e+00 : f32
    %178 = vector.broadcast %cst_164 : f32 to vector<8x384xf32>
    %179 = arith.maximumf %177, %178 : vector<8x384xf32>
    %180 = arith.truncf %179 : vector<8x384xf32> to vector<8x384xbf16>
    %c5 = arith.constant 5 : index
    %c0_165 = arith.constant 0 : index
    %c0_166 = arith.constant 0 : index
    %181 = vector.load %arg6[%c5, %c0_165, %c0_166] : memref<9x384x256xbf16, #tpu.memory_space<vmem>>, vector<1x384x256xbf16>
    %182 = vector.shape_cast %181 : vector<1x384x256xbf16> to vector<384x256xbf16>
    %cst_167 = arith.constant dense<0.000000e+00> : vector<8x256xf32>
    %183 = tpu.matmul %180, %182, %cst_167 {dimension_numbers = #tpu.dot_dimension_numbers<[1], [0], [0], [1], [0, 0, 1, 1], [], []>} : vector<8x384xbf16>, vector<384x256xbf16>, vector<8x256xf32> -> vector<8x256xf32>
    %184 = arith.addf %163, %183 : vector<8x256xf32>
    %c0_168 = arith.constant 0 : index
    %c48_169 = arith.constant 48 : index
    %c0_170 = arith.constant 0 : index
    %185 = vector.load %arg12[%c0_168, %c48_169, %c0_170] : memref<4x80x384xf32, #tpu.memory_space<vmem>>, vector<1x8x384xf32>
    %186 = vector.shape_cast %185 : vector<1x8x384xf32> to vector<8x384xf32>
    %c1_171 = arith.constant 1 : index
    %c48_172 = arith.constant 48 : index
    %c0_173 = arith.constant 0 : index
    %187 = vector.load %arg12[%c1_171, %c48_172, %c0_173] : memref<4x80x384xf32, #tpu.memory_space<vmem>>, vector<1x8x384xf32>
    %188 = vector.shape_cast %187 : vector<1x8x384xf32> to vector<8x384xf32>
    %189 = arith.addf %186, %188 : vector<8x384xf32>
    %c2_174 = arith.constant 2 : index
    %c56 = arith.constant 56 : index
    %c0_175 = arith.constant 0 : index
    %190 = vector.load %arg12[%c2_174, %c56, %c0_175] : memref<4x80x384xf32, #tpu.memory_space<vmem>>, vector<1x8x384xf32>
    %191 = vector.shape_cast %190 : vector<1x8x384xf32> to vector<8x384xf32>
    %192 = arith.addf %189, %191 : vector<8x384xf32>
    %c3_176 = arith.constant 3 : index
    %c56_177 = arith.constant 56 : index
    %c0_178 = arith.constant 0 : index
    %193 = vector.load %arg12[%c3_176, %c56_177, %c0_178] : memref<4x80x384xf32, #tpu.memory_space<vmem>>, vector<1x8x384xf32>
    %194 = vector.shape_cast %193 : vector<1x8x384xf32> to vector<8x384xf32>
    %195 = arith.addf %192, %194 : vector<8x384xf32>
    %c0_179 = arith.constant 0 : index
    %c0_180 = arith.constant 0 : index
    %196 = vector.load %arg5[%c0_179, %c0_180] : memref<1x384xf32, #tpu.memory_space<vmem>>, vector<1x384xf32>
    %197 = vector.broadcast %196 : vector<1x384xf32> to vector<8x384xf32>
    %198 = arith.addf %195, %197 : vector<8x384xf32>
    %cst_181 = arith.constant 0.000000e+00 : f32
    %199 = vector.broadcast %cst_181 : f32 to vector<8x384xf32>
    %200 = arith.maximumf %198, %199 : vector<8x384xf32>
    %201 = arith.truncf %200 : vector<8x384xf32> to vector<8x384xbf16>
    %c6 = arith.constant 6 : index
    %c0_182 = arith.constant 0 : index
    %c0_183 = arith.constant 0 : index
    %202 = vector.load %arg6[%c6, %c0_182, %c0_183] : memref<9x384x256xbf16, #tpu.memory_space<vmem>>, vector<1x384x256xbf16>
    %203 = vector.shape_cast %202 : vector<1x384x256xbf16> to vector<384x256xbf16>
    %cst_184 = arith.constant dense<0.000000e+00> : vector<8x256xf32>
    %204 = tpu.matmul %201, %203, %cst_184 {dimension_numbers = #tpu.dot_dimension_numbers<[1], [0], [0], [1], [0, 0, 1, 1], [], []>} : vector<8x384xbf16>, vector<384x256xbf16>, vector<8x256xf32> -> vector<8x256xf32>
    %205 = arith.addf %184, %204 : vector<8x256xf32>
    %c0_185 = arith.constant 0 : index
    %c56_186 = arith.constant 56 : index
    %c0_187 = arith.constant 0 : index
    %206 = vector.load %arg12[%c0_185, %c56_186, %c0_187] : memref<4x80x384xf32, #tpu.memory_space<vmem>>, vector<1x8x384xf32>
    %207 = vector.shape_cast %206 : vector<1x8x384xf32> to vector<8x384xf32>
    %c1_188 = arith.constant 1 : index
    %c56_189 = arith.constant 56 : index
    %c0_190 = arith.constant 0 : index
    %208 = vector.load %arg12[%c1_188, %c56_189, %c0_190] : memref<4x80x384xf32, #tpu.memory_space<vmem>>, vector<1x8x384xf32>
    %209 = vector.shape_cast %208 : vector<1x8x384xf32> to vector<8x384xf32>
    %210 = arith.addf %207, %209 : vector<8x384xf32>
    %c2_191 = arith.constant 2 : index
    %c64 = arith.constant 64 : index
    %c0_192 = arith.constant 0 : index
    %211 = vector.load %arg12[%c2_191, %c64, %c0_192] : memref<4x80x384xf32, #tpu.memory_space<vmem>>, vector<1x8x384xf32>
    %212 = vector.shape_cast %211 : vector<1x8x384xf32> to vector<8x384xf32>
    %213 = arith.addf %210, %212 : vector<8x384xf32>
    %c3_193 = arith.constant 3 : index
    %c64_194 = arith.constant 64 : index
    %c0_195 = arith.constant 0 : index
    %214 = vector.load %arg12[%c3_193, %c64_194, %c0_195] : memref<4x80x384xf32, #tpu.memory_space<vmem>>, vector<1x8x384xf32>
    %215 = vector.shape_cast %214 : vector<1x8x384xf32> to vector<8x384xf32>
    %216 = arith.addf %213, %215 : vector<8x384xf32>
    %c0_196 = arith.constant 0 : index
    %c0_197 = arith.constant 0 : index
    %217 = vector.load %arg5[%c0_196, %c0_197] : memref<1x384xf32, #tpu.memory_space<vmem>>, vector<1x384xf32>
    %218 = vector.broadcast %217 : vector<1x384xf32> to vector<8x384xf32>
    %219 = arith.addf %216, %218 : vector<8x384xf32>
    %cst_198 = arith.constant 0.000000e+00 : f32
    %220 = vector.broadcast %cst_198 : f32 to vector<8x384xf32>
    %221 = arith.maximumf %219, %220 : vector<8x384xf32>
    %222 = arith.truncf %221 : vector<8x384xf32> to vector<8x384xbf16>
    %c7 = arith.constant 7 : index
    %c0_199 = arith.constant 0 : index
    %c0_200 = arith.constant 0 : index
    %223 = vector.load %arg6[%c7, %c0_199, %c0_200] : memref<9x384x256xbf16, #tpu.memory_space<vmem>>, vector<1x384x256xbf16>
    %224 = vector.shape_cast %223 : vector<1x384x256xbf16> to vector<384x256xbf16>
    %cst_201 = arith.constant dense<0.000000e+00> : vector<8x256xf32>
    %225 = tpu.matmul %222, %224, %cst_201 {dimension_numbers = #tpu.dot_dimension_numbers<[1], [0], [0], [1], [0, 0, 1, 1], [], []>} : vector<8x384xbf16>, vector<384x256xbf16>, vector<8x256xf32> -> vector<8x256xf32>
    %226 = arith.addf %205, %225 : vector<8x256xf32>
    %c0_202 = arith.constant 0 : index
    %c64_203 = arith.constant 64 : index
    %c0_204 = arith.constant 0 : index
    %227 = vector.load %arg12[%c0_202, %c64_203, %c0_204] : memref<4x80x384xf32, #tpu.memory_space<vmem>>, vector<1x8x384xf32>
    %228 = vector.shape_cast %227 : vector<1x8x384xf32> to vector<8x384xf32>
    %c1_205 = arith.constant 1 : index
    %c64_206 = arith.constant 64 : index
    %c0_207 = arith.constant 0 : index
    %229 = vector.load %arg12[%c1_205, %c64_206, %c0_207] : memref<4x80x384xf32, #tpu.memory_space<vmem>>, vector<1x8x384xf32>
    %230 = vector.shape_cast %229 : vector<1x8x384xf32> to vector<8x384xf32>
    %231 = arith.addf %228, %230 : vector<8x384xf32>
    %c2_208 = arith.constant 2 : index
    %c72 = arith.constant 72 : index
    %c0_209 = arith.constant 0 : index
    %232 = vector.load %arg12[%c2_208, %c72, %c0_209] : memref<4x80x384xf32, #tpu.memory_space<vmem>>, vector<1x8x384xf32>
    %233 = vector.shape_cast %232 : vector<1x8x384xf32> to vector<8x384xf32>
    %234 = arith.addf %231, %233 : vector<8x384xf32>
    %c3_210 = arith.constant 3 : index
    %c72_211 = arith.constant 72 : index
    %c0_212 = arith.constant 0 : index
    %235 = vector.load %arg12[%c3_210, %c72_211, %c0_212] : memref<4x80x384xf32, #tpu.memory_space<vmem>>, vector<1x8x384xf32>
    %236 = vector.shape_cast %235 : vector<1x8x384xf32> to vector<8x384xf32>
    %237 = arith.addf %234, %236 : vector<8x384xf32>
    %c0_213 = arith.constant 0 : index
    %c0_214 = arith.constant 0 : index
    %238 = vector.load %arg5[%c0_213, %c0_214] : memref<1x384xf32, #tpu.memory_space<vmem>>, vector<1x384xf32>
    %239 = vector.broadcast %238 : vector<1x384xf32> to vector<8x384xf32>
    %240 = arith.addf %237, %239 : vector<8x384xf32>
    %cst_215 = arith.constant 0.000000e+00 : f32
    %241 = vector.broadcast %cst_215 : f32 to vector<8x384xf32>
    %242 = arith.maximumf %240, %241 : vector<8x384xf32>
    %243 = arith.truncf %242 : vector<8x384xf32> to vector<8x384xbf16>
    %c8_216 = arith.constant 8 : index
    %c0_217 = arith.constant 0 : index
    %c0_218 = arith.constant 0 : index
    %244 = vector.load %arg6[%c8_216, %c0_217, %c0_218] : memref<9x384x256xbf16, #tpu.memory_space<vmem>>, vector<1x384x256xbf16>
    %245 = vector.shape_cast %244 : vector<1x384x256xbf16> to vector<384x256xbf16>
    %cst_219 = arith.constant dense<0.000000e+00> : vector<8x256xf32>
    %246 = tpu.matmul %243, %245, %cst_219 {dimension_numbers = #tpu.dot_dimension_numbers<[1], [0], [0], [1], [0, 0, 1, 1], [], []>} : vector<8x384xbf16>, vector<384x256xbf16>, vector<8x256xf32> -> vector<8x256xf32>
    %247 = arith.addf %226, %246 : vector<8x256xf32>
    %c0_220 = arith.constant 0 : index
    %c0_221 = arith.constant 0 : index
    %248 = vector.load %arg7[%c0_220, %c0_221] : memref<1x256xf32, #tpu.memory_space<vmem>>, vector<1x256xf32>
    %249 = vector.broadcast %248 : vector<1x256xf32> to vector<8x256xf32>
    %250 = arith.addf %247, %249 : vector<8x256xf32>
    %cst_222 = arith.constant 0.000000e+00 : f32
    %251 = vector.broadcast %cst_222 : f32 to vector<8x256xf32>
    %252 = arith.maximumf %250, %251 : vector<8x256xf32>
    %253 = arith.truncf %252 : vector<8x256xf32> to vector<8x256xbf16>
    %c0_223 = arith.constant 0 : index
    %c0_224 = arith.constant 0 : index
    %254 = vector.load %arg8[%c0_223, %c0_224] : memref<256x128xbf16, #tpu.memory_space<vmem>>, vector<256x128xbf16>
    %cst_225 = arith.constant dense<0.000000e+00> : vector<8x128xf32>
    %255 = tpu.matmul %253, %254, %cst_225 {dimension_numbers = #tpu.dot_dimension_numbers<[1], [0], [0], [1], [0, 0, 1, 1], [], []>} : vector<8x256xbf16>, vector<256x128xbf16>, vector<8x128xf32> -> vector<8x128xf32>
    %c0_226 = arith.constant 0 : index
    %c0_227 = arith.constant 0 : index
    %256 = vector.load %arg9[%c0_226, %c0_227] : memref<1x128xf32, #tpu.memory_space<vmem>>, vector<1x128xf32>
    %257 = vector.broadcast %256 : vector<1x128xf32> to vector<8x128xf32>
    %258 = arith.addf %255, %257 : vector<8x128xf32>
    %c0_228 = arith.constant 0 : index
    %c0_229 = arith.constant 0 : index
    %259 = vector.load %arg10[%c0_228, %c0_229] : memref<8x128xf32, #tpu.memory_space<vmem>>, vector<8x128xf32>
    tpu.vector_store %arg10[%c0_228, %c0_229], %258 {strides = array<i32>} : memref<8x128xf32, #tpu.memory_space<vmem>>, vector<8x128xf32>,
    return
  }
  func.func @transform_0(%arg0: i32) -> (i32, i32, i32, i32) {
    %c0_i32 = arith.constant 0 : i32
    %c0_i32_0 = arith.constant 0 : i32
    %c0_i32_1 = arith.constant 0 : i32
    %c0_i32_2 = arith.constant 0 : i32
    return %arg0, %c0_i32, %c0_i32_0, %c0_i32_1 : i32, i32, i32, i32
  }
  func.func @transform_1(%arg0: i32) -> (i32, i32) {
    %c0_i32 = arith.constant 0 : i32
    %c0_i32_0 = arith.constant 0 : i32
    %c0_i32_1 = arith.constant 0 : i32
    return %c0_i32, %c0_i32_0 : i32, i32
  }
  func.func @transform_2(%arg0: i32) -> (i32, i32) {
    %c0_i32 = arith.constant 0 : i32
    %c0_i32_0 = arith.constant 0 : i32
    %c0_i32_1 = arith.constant 0 : i32
    return %c0_i32, %c0_i32_0 : i32, i32
  }
  func.func @transform_3(%arg0: i32) -> (i32, i32, i32) {
    %c0_i32 = arith.constant 0 : i32
    %c0_i32_0 = arith.constant 0 : i32
    %c0_i32_1 = arith.constant 0 : i32
    %c0_i32_2 = arith.constant 0 : i32
    return %c0_i32, %c0_i32_0, %c0_i32_1 : i32, i32, i32
  }
  func.func @transform_4(%arg0: i32) -> (i32, i32) {
    %c0_i32 = arith.constant 0 : i32
    %c0_i32_0 = arith.constant 0 : i32
    %c0_i32_1 = arith.constant 0 : i32
    return %c0_i32, %c0_i32_0 : i32, i32
  }
  func.func @transform_5(%arg0: i32) -> (i32, i32, i32) {
    %c0_i32 = arith.constant 0 : i32
    %c0_i32_0 = arith.constant 0 : i32
    %c0_i32_1 = arith.constant 0 : i32
    %c0_i32_2 = arith.constant 0 : i32
    return %c0_i32, %c0_i32_0, %c0_i32_1 : i32, i32, i32
  }
  func.func @transform_6(%arg0: i32) -> (i32, i32) {
    %c0_i32 = arith.constant 0 : i32
    %c0_i32_0 = arith.constant 0 : i32
    %c0_i32_1 = arith.constant 0 : i32
    return %c0_i32, %c0_i32_0 : i32, i32
  }
  func.func @transform_7(%arg0: i32) -> (i32, i32) {
    %c0_i32 = arith.constant 0 : i32
    %c0_i32_0 = arith.constant 0 : i32
    %c0_i32_1 = arith.constant 0 : i32
    return %c0_i32, %c0_i32_0 : i32, i32
  }
  func.func @transform_8(%arg0: i32) -> (i32, i32) {
    %c0_i32 = arith.constant 0 : i32
    %c0_i32_0 = arith.constant 0 : i32
    %c0_i32_1 = arith.constant 0 : i32
    return %c0_i32, %c0_i32_0 : i32, i32
  }
  func.func @transform_9(%arg0: i32) -> (i32, i32) {
    %c0_i32 = arith.constant 0 : i32
    %c0_i32_0 = arith.constant 0 : i32
    return %arg0, %c0_i32 : i32, i32
  }
}

</mosaic_0001>

<bundles_post_ra>
// kernel: tile.18
= control target key start
LH: loop header
LB: loop body
LE: loop exit
PB: predicated region body
PF: predicated region fallthrough
CT: control target
= control target key end

     0   :  { %s28_s0 = inlined_call_operand.vmem [shape: f32[32], index: 0, kind: input, shape index: {}]   ;;  %s29_s1 = inlined_call_operand.vmem [shape: f32[9,32], index: 1, kind: output, shape index: {}]  }
   0x1   :  { %v4_v0 = vld [vmem:[%s28_s0] ss:$0 sm:$0xff] }
   0x2   :  { %5 = vst [vmem:[%s29_s1] sm:$0xff] %v4_v0  ;;  %8 = vst [vmem:[%s29_s1 + $0x8] sm:$0xff] %v4_v0 }

// kernel: tile.19
= control target key start
LH: loop header
LB: loop body
LE: loop exit
PB: predicated region body
PF: predicated region fallthrough
CT: control target
= control target key end

     0   :  { %s6_s6 = smov 3  ;;  %s13_s11 = smov 3  ;;  %vm3_vm0 = vcmask 261120   ;;  %vm10_vm1 = vcmask 1048320   ;;  %vm17_vm2 = vcmask 785920   ;;  %vm24_vm3 = vcmask 523520   ;;  %s66_s0 = inlined_call_operand.vmem [shape: f32[9,32], index: 0, kind: input, shape index: {}]   ;;  %s67_s1 = inlined_call_operand.vmem [shape: f32[288], index: 1, kind: output, shape index: {}]  }
   0x1   :  { %v2_v0 = vld [vmem:[%s66_s0] ss:$4 sm:$0x7]   ;;  %v32_v1 = vld [vmem:[%s66_s0 + $0x3] ss:$4 sm:%s6_s6]   ;;  %s38_s12 = smov 96  }
   0x2   :  { %8 = vrot.lane.b32.xlu0 %v32_v1, %s38_s12  ;;  %s20_s13 = smov 3  ;;  %4 = vst.msk [vmem:[#allocation0] sm:$0x7] %vm3_vm0, %v2_v0   ;;  %v33_v2 = vld [vmem:[%s66_s0 + $0x2] ss:$4 sm:%s13_s11]   ;;  %s40_s18 = smov 64  }
   0x3   :  { %v34_v3 = vld [vmem:[%s66_s0 + $0x1] ss:$4 sm:%s20_s13]   ;;  %s39_s0 = smov 32  }
   0x4   :  { %22 = vrot.lane.b32.xlu1 %v34_v3, %s39_s0 }
   0x6   :  { %15 = vrot.lane.b32.xlu0 %v33_v2, %s40_s18 }
  0x74   :  { %v9_v4 = vpop.permute.xlu0 %8  }
  0x75   :  { %11 = vst.msk [vmem:[#allocation0] sm:$0x3] %vm10_vm1, %v9_v4  }
  0x76   :  { %v23_v5 = vpop.permute.xlu1 %22  }
  0x78   :  { %v16_v6 = vpop.permute.xlu0 %15  }
  0x79   :  { %18 = vst.msk [vmem:[#allocation0] sm:$0x3] %vm17_vm2, %v16_v6  }
  0x7a   :  { %25 = vst.msk [vmem:[#allocation0] sm:$0x3] %vm24_vm3, %v23_v5  }
  0x81   :  { %v29_v7 = vld [vmem:[#allocation0] sm:$0xf] }
  0x82   :  { %31 = vst [vmem:[%s67_s1] sm:$0xf] %v29_v7 }

// kernel: tile.13
= control target key start
LH: loop header
LB: loop body
LE: loop exit
PB: predicated region body
PF: predicated region fallthrough
CT: control target
= control target key end

     0   :  { %s34_s0 = inlined_call_operand.vmem [shape: f32[16], index: 0, kind: input, shape index: {}]   ;;  %s35_s1 = inlined_call_operand.vmem [shape: f32[20,16], index: 1, kind: output, shape index: {}]  }
   0x1   :  { %v4_v0 = vld [vmem:[%s34_s0] ss:$0 sm:$0xff] }
   0x2   :  { %5 = vst [vmem:[%s35_s1] sm:$0xff] %v4_v0  ;;  %10 = vst [vmem:[%s35_s1 + $0x8] sm:$0xff] %v4_v0 }
   0x3   :  { %11 = vst [vmem:[%s35_s1 + $0x10] sm:$0xff] %v4_v0 }

// kernel: tile.14
= control target key start
LH: loop header
LB: loop body
LE: loop exit
PB: predicated region body
PF: predicated region fallthrough
CT: control target
= control target key end

     0   :  { %s6_s6 = smov 3  ;;  %s20_s9 = smov 3  ;;  %vm3_vm0 = vcmask 130048   ;;  %vm10_vm1 = vcmask 1048448   ;;  %vm17_vm2 = vcmask 917248   ;;  %vm24_vm3 = vcmask 786048   ;;  %s135_s0 = inlined_call_operand.vmem [shape: f32[20,16], index: 0, kind: input, shape index: {}]   ;;  %s136_s1 = inlined_call_operand.vmem [shape: f32[1,320], index: 1, kind: output, shape index: {}]  }
   0x1   :  { %v69_v0 = vld [vmem:[%s135_s0 + $0x7] ss:$8 sm:%s6_s6]   ;;  %s85_s10 = smov 112   ;;  %v71_v1 = vld [vmem:[%s135_s0 + $0x5] ss:$8 sm:%s20_s9]   ;;  %s13_s13 = smov 3 }
   0x2   :  { %8 = vrot.lane.b32.xlu0 %v69_v0, %s85_s10  ;;  %s86_s14 = smov 80   ;;  %v70_v2 = vld [vmem:[%s135_s0 + $0x6] ss:$8 sm:%s13_s13]   ;;  %s27_s17 = smov 3  ;;  %vm31_vm4 = vcmask 654848   ;;  %vm37_vm5 = vcmask 523648  }
   0x3   :  { %22 = vrot.lane.b32.xlu1 %v71_v1, %s86_s14  ;;  %v72_v3 = vld [vmem:[%s135_s0 + $0x4] ss:$8 sm:%s27_s17]   ;;  %s87_s20 = smov 96   ;;  %v2_v4 = vld [vmem:[%s135_s0] ss:$8 sm:$0x7]  }
   0x4   :  { %s88_s23 = smov 64   ;;  %v73_v5 = vld [vmem:[%s135_s0 + $0x3] ss:$8 sm:$0x7]   ;;  %s89_s28 = smov 48   ;;  %vm43_vm6 = vcmask 392448  }
   0x5   :  { %4 = vst.msk [vmem:[#allocation0] ss:$8 sm:$0x7] %vm3_vm0, %v2_v4   ;;  %v74_v6 = vld [vmem:[%s135_s0 + $0x2] ss:$8 sm:$0x7]  }
   0x6   :  { %15 = vrot.lane.b32.xlu0 %v70_v2, %s87_s20  ;;  %s90_s29 = smov 32   ;;  %v75_v7 = vld [vmem:[%s135_s0 + $0x1] ss:$8 sm:$0x7]   ;;  %s91_s0 = smov 16   ;;  %vm49_vm7 = vcmask 261248  }
   0x7   :  { %29 = vrot.lane.b32.xlu1 %v72_v3, %s88_s23 }
   0xa   :  { %35 = vrot.lane.b32.xlu0 %v73_v5, %s89_s28 }
   0xb   :  { %41 = vrot.lane.b32.xlu1 %v74_v6, %s90_s29 }
   0xe   :  { %47 = vrot.lane.b32.xlu0 %v75_v7, %s91_s0 }
  0x74   :  { %v9_v8 = vpop.permute.xlu0 %8  }
  0x75   :  { %11 = vst.msk [vmem:[#allocation0] ss:$8 sm:$0x3] %vm10_vm1, %v9_v8   ;;  %v23_v9 = vpop.permute.xlu1 %22  }
  0x78   :  { %v16_v10 = vpop.permute.xlu0 %15  }
  0x79   :  { %18 = vst.msk [vmem:[#allocation0] ss:$8 sm:$0x3] %vm17_vm2, %v16_v10   ;;  %v30_v11 = vpop.permute.xlu1 %29  }
  0x7a   :  { %25 = vst.msk [vmem:[#allocation0] ss:$8 sm:$0x3] %vm24_vm3, %v23_v9  }
  0x7b   :  { %32 = vst.msk [vmem:[#allocation0] ss:$8 sm:$0x3] %vm31_vm4, %v30_v11  }
  0x7c   :  { %v36_v12 = vpop.permute.xlu0 %35  }
  0x7d   :  { %38 = vst.msk [vmem:[#allocation0] ss:$8 sm:$0x7] %vm37_vm5, %v36_v12   ;;  %v42_v13 = vpop.permute.xlu1 %41  }
  0x7e   :  { %44 = vst.msk [vmem:[#allocation0] ss:$8 sm:$0x7] %vm43_vm6, %v42_v13  }
  0x80   :  { %v48_v14 = vpop.permute.xlu0 %47  }
  0x81   :  { %50 = vst.msk [vmem:[#allocation0] ss:$8 sm:$0x7] %vm49_vm7, %v48_v14  }
  0x88   :  { %v54_v15 = vld [vmem:[#allocation0] sm:$0x1]  ;;  %v58_v16 = vld [vmem:[#allocation0 + $0x8] sm:$0x1]  ;;  %v63_v17 = vld [vmem:[#allocation0 + $0x10] sm:$0x1] }
  0x89   :  { %56 = vst [vmem:[%s136_s1] sm:$0x1] %v54_v15  ;;  %76 = vst [vmem:[%s136_s1 + $0x1] sm:$0x1] %v58_v16 }
  0x8a   :  { %77 = vst [vmem:[%s136_s1 + $0x2] sm:$0x1] %v63_v17 }

// kernel: dqn_forward.1
= control target key start
LH: loop header
LB: loop body
LE: loop exit
PB: predicated region body
PF: predicated region fallthrough
CT: control target
= control target key end

     0   :  { %vm1065_vm0 = vcmask 261120   ;;  %vm1596_vm1 = vcmask 523264   ;;  %vm13914_vm2 = vmmov 0   ;;  %s18041_s1 = inlined_call_operand.vmem [shape: bf16[672,320], index: 1, kind: input, shape index: {}]   ;;  %s18042_s0 = inlined_call_operand.vmem [shape: bf16[1,2,80,672], index: 0, kind: input, shape index: {}]   ;;  %s18043_s3 = inlined_call_operand.vmem [shape: bf16[4,320,384], index: 3, kind: input, shape index: {}]   ;;  %s18044_s2 = inlined_call_operand.vmem [shape: f32[1,320], index: 2, kind: input, shape index: {}]   ;;  %s18045_s5 = inlined_call_operand.vmem [shape: bf16[9,384,256], index: 5, kind: input, shape index: {}]   ;;  %s18046_s4 = inlined_call_operand.vmem [shape: f32[1,384], index: 4, kind: input, shape index: {}]   ;;  %s18047_s7 = inlined_call_operand.vmem [shape: bf16[256,128], index: 7, kind: input, shape index: {}]   ;;  %s18048_s6 = inlined_call_operand.vmem [shape: f32[1,256], index: 6, kind: input, shape index: {}]   ;;  %s18049_s8 = inlined_call_operand.vmem [shape: f32[1,128], index: 8, kind: input, shape index: {}]   ;;  %s18050_s9 = inlined_call_operand.vmem [shape: f32[8,128], index: 9, kind: output, shape index: {}]  }
   0x1   :  { %v13968_v0 = vld [vmem:[%s18041_s1 + $0x4] ss:$12 sps:$4 sm:$0xff]   ;;  %v12630_v1 = vld [vmem:[%s18041_s1 + $0xc8] ss:$12 sps:$4 sm:$0xff]   ;;  %v13977_v2 = vld [vmem:[%s18041_s1] ss:$12 sps:$4 sm:$0xff]  }
   0x2   :  { %1081 = vmatprep.subr.bf16.mxu0 %v13968_v0  ;;  %11833 = vmatprep.subr.bf16.mxu1 %v12630_v1  ;;  %v12632_v3 = vld [vmem:[%s18041_s1 + $0x8] ss:$12 sps:$4 sm:$0xff]   ;;  %v12635_v5 = vld [vmem:[%s18041_s1 + $0xe0] ss:$12 sps:$4 sm:$0xff]   ;;  %v13994_v6 = vld [vmem:[%s18041_s1 + $0x18] ss:$12 sps:$4 sm:$0xff]  }
   0x3   :  { %1082 = vmatpush1.bf16.msra.mxu0 %v13977_v2  ;;  %v13986_v4 = vld [vmem:[%s18041_s1 + $0x1c] ss:$12 sps:$4 sm:$0xff]   ;;  %11834 = vmatpush3.bf16.msra.mxu1 %v12632_v3  ;;  %v12637_v7 = vld [vmem:[%s18041_s1 + $0x20] ss:$12 sps:$4 sm:$0xff]   ;;  %v12640_v9 = vld [vmem:[%s18041_s1 + $0xf8] ss:$12 sps:$4 sm:$0xff]  }
   0x4   :  { %1083 = vmatprep.subr.bf16.mxu0 %v13986_v4  ;;  %11835 = vmatprep.subr.bf16.mxu1 %v12635_v5  ;;  %v14003_v8 = vld [vmem:[%s18041_s1 + $0x34] ss:$12 sps:$4 sm:$0xff]   ;;  %v14012_v10 = vld [vmem:[%s18041_s1 + $0x30] ss:$12 sps:$4 sm:$0xff]   ;;  %v12642_v11 = vld [vmem:[%s18041_s1 + $0x38] ss:$12 sps:$4 sm:$0xff]  }
   0x5   :  { %v14021_v12 = vld [vmem:[%s18041_s1 + $0x4c] ss:$12 sps:$4 sm:$0xff]   ;;  %v12645_v13 = vld [vmem:[%s18041_s1 + $0x110] ss:$12 sps:$4 sm:$0xff]   ;;  %v14030_v14 = vld [vmem:[%s18041_s1 + $0x48] ss:$12 sps:$4 sm:$0xff]  }
   0x6   :  { %v12647_v15 = vld [vmem:[%s18041_s1 + $0x50] ss:$12 sps:$4 sm:$0xff]   ;;  %v12650_v17 = vld [vmem:[%s18041_s1 + $0x128] ss:$12 sps:$4 sm:$0xff]   ;;  %v14047_v18 = vld [vmem:[%s18041_s1 + $0x60] ss:$12 sps:$4 sm:$0xff]  }
   0x7   :  { %1084 = vmatpush1.bf16.msra.mxu0 %v13994_v6  ;;  %11836 = vmatpush3.bf16.msra.mxu1 %v12637_v7  ;;  %v14039_v16 = vld [vmem:[%s18041_s1 + $0x64] ss:$12 sps:$4 sm:$0xff]   ;;  %v12652_v19 = vld [vmem:[%s18041_s1 + $0x68] ss:$12 sps:$4 sm:$0xff]   ;;  %v12655_v21 = vld [vmem:[%s18041_s1 + $0x140] ss:$12 sps:$4 sm:$0xff]  }
   0x8   :  { %1085 = vmatprep.subr.bf16.mxu0 %v14003_v8  ;;  %11837 = vmatprep.subr.bf16.mxu1 %v12640_v9  ;;  %v14057_v20 = vld [vmem:[%s18041_s1 + $0x7c] ss:$12 sps:$4 sm:$0xff]   ;;  %v14065_v22 = vld [vmem:[%s18041_s1 + $0x78] ss:$12 sps:$4 sm:$0xff]   ;;  %v12657_v23 = vld [vmem:[%s18041_s1 + $0x80] ss:$12 sps:$4 sm:$0xff]  }
   0x9   :  { %v14075_v24 = vld [vmem:[%s18041_s1 + $0x94] ss:$12 sps:$4 sm:$0xff]   ;;  %v12660_v25 = vld [vmem:[%s18041_s1 + $0x158] ss:$12 sps:$4 sm:$0xff]   ;;  %v14084_v26 = vld [vmem:[%s18041_s1 + $0x90] ss:$12 sps:$4 sm:$0xff]  }
   0xa   :  { %v12662_v27 = vld [vmem:[%s18041_s1 + $0x98] ss:$12 sps:$4 sm:$0xff]   ;;  %v12665_v29 = vld [vmem:[%s18041_s1 + $0x170] ss:$12 sps:$4 sm:$0xff]   ;;  %v14101_v30 = vld [vmem:[%s18041_s1 + $0xa8] ss:$12 sps:$4 sm:$0xff]  }
   0xb   :  { %1086 = vmatpush1.bf16.msra.mxu0 %v14012_v10  ;;  %11838 = vmatpush3.bf16.msra.mxu1 %v12642_v11  ;;  %v14093_v28 = vld [vmem:[%s18041_s1 + $0xac] ss:$12 sps:$4 sm:$0xff]   ;;  %v12670_v31 = vld [vmem:[%s18042_s0 + $0x4] ss:$24 sps:$4 sm:$0xff]   ;;  %v12673_v34 = vld [vmem:[%s18041_s1 + $0x248] ss:$12 sps:$4 sm:$0xff]  }
   0xc   :  { %1087 = vmatprep.subr.bf16.mxu0 %v14021_v12  ;;  %11839 = vmatprep.subr.bf16.mxu1 %v12645_v13  ;;  %v12667_v32 = vld [vmem:[%s18041_s1 + $0xb0] ss:$12 sps:$4 sm:$0xff]   ;;  %v14122_v35 = vld [vmem:[%s18042_s0] ss:$24 sps:$4 sm:$0xff]   ;;  %v12675_v37 = vld [vmem:[%s18041_s1 + $0x188] ss:$12 sps:$4 sm:$0xff]  }
   0xd   :  { %v14114_v33 = vld [vmem:[%s18041_s1 + $0xc4] ss:$12 sps:$4 sm:$0xff]   ;;  %1362 = vmatprep.mubr.bf16.mxu1 %v12670_v31  ;;  %1113 = vmatprep.mubr.bf16.mxu0 %v12670_v31  ;;  %v14128_v36 = vld [vmem:[%s18041_s1 + $0xc0] ss:$12 sps:$4 sm:$0xff]   ;;  %v14137_v38 = vld [vmem:[%s18041_s1 + $0xdc] ss:$12 sps:$4 sm:$0xff]  }
   0xe   :  { %v12679_v39 = vld [vmem:[%s18041_s1 + $0x260] ss:$12 sps:$4 sm:$0xff]   ;;  %v14152_v41 = vld [vmem:[%s18041_s1 + $0xd8] ss:$12 sps:$4 sm:$0xff]   ;;  %v14167_v44 = vld [vmem:[%s18042_s0 + $0x30] ss:$24 sps:$4 sm:$0xff]  }
   0xf   :  { %1088 = vmatpush1.bf16.msra.mxu0 %v14030_v14  ;;  %11840 = vmatpush3.bf16.msra.mxu1 %v12647_v15  ;;  %v14145_v40 = vld [vmem:[%s18042_s0 + $0x34] ss:$24 sps:$4 sm:$0xff]   ;;  %v12687_v45 = vld [vmem:[%s18041_s1 + $0x278] ss:$12 sps:$4 sm:$0xff]   ;;  %v14175_v46 = vld [vmem:[%s18041_s1 + $0xf0] ss:$12 sps:$4 sm:$0xff]  }
  0x10   :  { %1089 = vmatprep.subr.bf16.mxu0 %v14039_v16  ;;  %11841 = vmatprep.subr.bf16.mxu1 %v12650_v17  ;;  %v12680_v42 = vld [vmem:[%s18041_s1 + $0x1a0] ss:$12 sps:$4 sm:$0xff]   ;;  %v12688_v47 = vld [vmem:[%s18041_s1 + $0x1b8] ss:$12 sps:$4 sm:$0xff]   ;;  %v12694_v50 = vld [vmem:[%s18041_s1 + $0x290] ss:$12 sps:$4 sm:$0xff]  }
  0x11   :  { %v14161_v43 = vld [vmem:[%s18041_s1 + $0xf4] ss:$12 sps:$4 sm:$0xff]   ;;  %v14184_v48 = vld [vmem:[%s18041_s1 + $0x10c] ss:$12 sps:$4 sm:$0xff]   ;;  %v14190_v49 = vld [vmem:[%s18042_s0 + $0x64] ss:$24 sps:$4 sm:$0xff]  }
  0x12   :  { %v14198_v51 = vld [vmem:[%s18041_s1 + $0x108] ss:$12 sps:$4 sm:$0xff]   ;;  %v14205_v52 = vld [vmem:[%s18041_s1 + $0x124] ss:$12 sps:$4 sm:$0xff]   ;;  %v14215_v54 = vld [vmem:[%s18042_s0 + $0x60] ss:$24 sps:$4 sm:$0xff]  }
  0x13   :  { %1090 = vmatpush1.bf16.msra.mxu0 %v14047_v18  ;;  %11842 = vmatpush3.bf16.msra.mxu1 %v12652_v19  ;;  %v12698_v53 = vld [vmem:[%s18041_s1 + $0x1d0] ss:$12 sps:$4 sm:$0xff]   ;;  %v14220_v55 = vld [vmem:[%s18041_s1 + $0x120] ss:$12 sps:$4 sm:$0xff]   ;;  %v12702_v56 = vld [vmem:[%s18041_s1 + $0x2a8] ss:$12 sps:$4 sm:$0xff]  }
  0x14   :  { %1091 = vmatprep.subr.bf16.mxu0 %v14057_v20  ;;  %11843 = vmatprep.subr.bf16.mxu1 %v12655_v21  ;;  %v14229_v57 = vld [vmem:[%s18041_s1 + $0x13c] ss:$12 sps:$4 sm:$0xff]   ;;  %v14238_v59 = vld [vmem:[%s18041_s1 + $0x138] ss:$12 sps:$4 sm:$0xff]   ;;  %v14243_v60 = vld [vmem:[%s18042_s0 + $0x94] ss:$24 sps:$4 sm:$0xff]  }
  0x15   :  { %v12704_v58 = vld [vmem:[%s18041_s1 + $0x1e8] ss:$12 sps:$4 sm:$0xff]   ;;  %v12711_v62 = vld [vmem:[%s18041_s1 + $0x2c0] ss:$12 sps:$4 sm:$0xff]   ;;  %v14268_v3 = vld [vmem:[%s18041_s1 + $0x150] ss:$12 sps:$4 sm:$0xff]  }
  0x16   :  { %v14248_v61 = vld [vmem:[%s18041_s1 + $0x154] ss:$12 sps:$4 sm:$0xff]   ;;  %v14263_v1 = vld [vmem:[%s18042_s0 + $0x90] ss:$24 sps:$4 sm:$0xff]   ;;  %v12716_v5 = vld [vmem:[%s18041_s1 + $0x2d8] ss:$12 sps:$4 sm:$0xff]  }
  0x17   :  { %1092 = vmatpush1.bf16.msra.mxu0 %v14065_v22  ;;  %11844 = vmatpush3.bf16.msra.mxu1 %v12657_v23  ;;  %v12712_v63 = vld [vmem:[%s18041_s1 + $0x200] ss:$12 sps:$4 sm:$0xff]   ;;  %v14283_v9 = vld [vmem:[%s18042_s0 + $0xc4] ss:$24 sps:$4 sm:$0xff]   ;;  %v14291_v13 = vld [vmem:[%s18041_s1 + $0x168] ss:$12 sps:$4 sm:$0xff]  }
  0x18   :  { %1093 = vmatprep.subr.bf16.mxu0 %v14075_v24  ;;  %11845 = vmatprep.subr.bf16.mxu1 %v12660_v25  ;;  %v14277_v7 = vld [vmem:[%s18041_s1 + $0x16c] ss:$12 sps:$4 sm:$0xff]   ;;  %v12724_v15 = vld [vmem:[%s18041_s1 + $0x2f0] ss:$12 sps:$4 sm:$0xff]  }
  0x19   :  { %v12719_v11 = vld [vmem:[%s18041_s1 + $0x218] ss:$12 sps:$4 sm:$0xff]   ;;  %v12728_v19 = vld [vmem:[%s18041_s1 + $0x230] ss:$12 sps:$4 sm:$0xff]   ;;  %v14311_v21 = vld [vmem:[%s18041_s1 + $0x180] ss:$12 sps:$4 sm:$0xff]  }
  0x1a   :  { %v14303_v17 = vld [vmem:[%s18041_s1 + $0x184] ss:$12 sps:$4 sm:$0xff]   ;;  %v14316_v23 = vld [vmem:[%s18042_s0 + $0xc0] ss:$24 sps:$4 sm:$0xff]   ;;  %v14322_v25 = vld [vmem:[%s18041_s1 + $0x19c] ss:$12 sps:$4 sm:$0xff]  }
  0x1b   :  { %1094 = vmatpush1.bf16.msra.mxu0 %v14084_v26  ;;  %11846 = vmatpush3.bf16.msra.mxu1 %v12662_v27  ;;  %v14328_v27 = vld [vmem:[%s18042_s0 + $0xc] ss:$24 sps:$4 sm:$0xff]  }
  0x1c   :  { %1095 = vmatprep.subr.bf16.mxu0 %v14093_v28  ;;  %11847 = vmatprep.subr.bf16.mxu1 %v12665_v29  ;;  %v18051_v29 = vmov 0   ;;  %v14337_v31 = vld [vmem:[%s18041_s1 + $0x198] ss:$12 sps:$4 sm:$0xff]  }
  0x1f   :  { %1096 = vmatpush1.bf16.msra.mxu0 %v14101_v30  ;;  %11848 = vmatpush3.bf16.msra.mxu1 %v12667_v32  ;;  %v14344_v32 = vld [vmem:[%s18041_s1 + $0x1b4] ss:$12 sps:$4 sm:$0xff]  }
  0x20   :  { %1097 = vmatprep.subr.bf16.mxu0 %v14114_v33  ;;  %11879 = vmatprep.subr.bf16.mxu1 %v12673_v34  ;;  %v14350_v34 = vld [vmem:[%s18042_s0 + $0x8] ss:$24 sps:$4 sm:$0xff]  }
  0x22   :  { %1363 = vmatmul.mubr.bf16.vlgmr.msra.gmra.mrb[0].mxu1 %v14122_v35 }
  0x23   :  { %1098 = vmatpush1.bf16.msra.mxu0 %v14128_v36  ;;  %11880 = vmatpush3.bf16.msra.mxu1 %v12675_v37  ;;  %v12735_v37 = vld [vmem:[%s18041_s1 + $0x308] ss:$12 sps:$4 sm:$0xff]  }
  0x24   :  { %1099 = vmatprep.subr.bf16.mxu0 %v14137_v38  ;;  %11881 = vmatprep.subr.bf16.mxu1 %v12679_v39  ;;  %v14365_v39 = vld [vmem:[%s18041_s1 + $0x1cc] ss:$12 sps:$4 sm:$0xff]  }
  0x25   :  { %1370 = vmatprep.mubr.bf16.mxu1 %v14145_v40 }
  0x27   :  { %1100 = vmatpush1.bf16.msra.mxu0 %v14152_v41  ;;  %11882 = vmatpush3.bf16.msra.mxu1 %v12680_v42  ;;  %v14378_v42 = vld [vmem:[%s18041_s1 + $0x1c8] ss:$12 sps:$4 sm:$0xff]  }
  0x28   :  { %1101 = vmatprep.subr.bf16.mxu0 %v14161_v43  ;;  %11883 = vmatprep.subr.bf16.mxu1 %v12687_v45  ;;  %v12739_v45 = vld [vmem:[%s18041_s1 + $0x320] ss:$12 sps:$4 sm:$0xff]  }
  0x2a   :  { %1371 = vmatmul.mubr.bf16.gmra.mrb[4].mxu1 %v14167_v44 }
  0x2b   :  { %1102 = vmatpush1.bf16.msra.mxu0 %v14175_v46  ;;  %11884 = vmatpush3.bf16.msra.mxu1 %v12688_v47  ;;  %v14394_v47 = vld [vmem:[%s18041_s1 + $0x1e0] ss:$12 sps:$4 sm:$0xff]  }
  0x2c   :  { %1103 = vmatprep.subr.bf16.mxu0 %v14184_v48  ;;  %1378 = vmatprep.mubr.bf16.mxu1 %v14190_v49 }
  0x2d   :  { %11885 = vmatprep.subr.bf16.mxu1 %v12694_v50  ;;  %v14399_v50 = vld [vmem:[%s18042_s0 + $0x38] ss:$24 sps:$4 sm:$0xff]  }
  0x2f   :  { %1104 = vmatpush1.bf16.msra.mxu0 %v14198_v51  ;;  %11886 = vmatpush3.bf16.msra.mxu1 %v12698_v53  ;;  %v12746_v53 = vld [vmem:[%s18041_s1 + $0x338] ss:$12 sps:$4 sm:$0xff]  }
  0x30   :  { %1105 = vmatprep.subr.bf16.mxu0 %v14205_v52  ;;  %11887 = vmatprep.subr.bf16.mxu1 %v12702_v56  ;;  %v14410_v56 = vld [vmem:[%s18041_s1 + $0x1fc] ss:$12 sps:$4 sm:$0xff]  }
  0x32   :  { %1379 = vmatmul.mubr.bf16.gmra.mrb[8].mxu1 %v14215_v54 }
  0x33   :  { %1106 = vmatpush1.bf16.msra.mxu0 %v14220_v55  ;;  %11888 = vmatpush3.bf16.msra.mxu1 %v12704_v58  ;;  %v14424_v58 = vld [vmem:[%s18041_s1 + $0x1f8] ss:$12 sps:$4 sm:$0xff]  }
  0x34   :  { %1107 = vmatprep.subr.bf16.mxu0 %v14229_v57  ;;  %1386 = vmatprep.mubr.bf16.mxu1 %v14243_v60 }
  0x35   :  { %11889 = vmatprep.subr.bf16.mxu1 %v12711_v62  ;;  %v12750_v62 = vld [vmem:[%s18041_s1 + $0x350] ss:$12 sps:$4 sm:$0xff]  }
  0x37   :  { %1108 = vmatpush1.bf16.msra.mxu0 %v14238_v59  ;;  %11890 = vmatpush3.bf16.msra.mxu1 %v12712_v63  ;;  %v14440_v63 = vld [vmem:[%s18041_s1 + $0x210] ss:$12 sps:$4 sm:$0xff]  }
  0x38   :  { %1109 = vmatprep.subr.bf16.mxu0 %v14248_v61  ;;  %11891 = vmatprep.subr.bf16.mxu1 %v12716_v5  ;;  %v14447_v5 = vld [vmem:[%s18042_s0 + $0x68] ss:$24 sps:$4 sm:$0xff]  }
  0x3a   :  { %1387 = vmatmul.mubr.bf16.gmra.mrb[12].mxu1 %v14263_v1 }
  0x3b   :  { %1110 = vmatpush1.bf16.msra.mxu0 %v14268_v3  ;;  %1394 = vmatprep.mubr.bf16.mxu1 %v14283_v9 }
  0x3c   :  { %1111 = vmatprep.subr.bf16.mxu0 %v14277_v7  ;;  %11892 = vmatpush3.bf16.msra.mxu1 %v12719_v11  ;;  %v12757_v11 = vld [vmem:[%s18041_s1 + $0x368] ss:$12 sps:$4 sm:$0xff]  }
  0x3d   :  { %11893 = vmatprep.subr.bf16.mxu1 %v12724_v15  ;;  %v14456_v15 = vld [vmem:[%s18041_s1 + $0x22c] ss:$12 sps:$4 sm:$0xff]  }
  0x3f   :  { %1112 = vmatpush1.bf16.msra.mxu0 %v14291_v13 }
  0x40   :  { %1164 = vmatprep.subr.bf16.mxu0 %v14303_v17  ;;  %11894 = vmatpush3.bf16.msra.mxu1 %v12728_v19  ;;  %v14470_v19 = vld [vmem:[%s18041_s1 + $0x228] ss:$12 sps:$4 sm:$0xff]  }
  0x41   :  { %1476 = vmatprep.subr.bf16.mxu1 %v18051_v29  ;;  %18066 = vst [vmem:[#allocation4_spill] sm:$0xff] %v14470_v19 }
  0x42   :  { %1114 = vmatmul.mubr.bf16.vlgmr.msra.gmra.mrb[0].mxu0 %v14122_v35  ;;  %1395 = vmatmul.mubr.bf16.gmra.mrb[16].mxu1 %v14316_v23  ;;  %v14356_v35 = vld [vmem:[%s18041_s1 + $0x1b0] ss:$12 sps:$4 sm:$0xff]  }
  0x43   :  { %1165 = vmatpush1.bf16.msra.mxu0 %v14311_v21  ;;  %1435 = vmatprep.mubr.bf16.mxu1 %v14328_v27 }
  0x44   :  { %1166 = vmatprep.subr.bf16.mxu0 %v14322_v25  ;;  %1123 = vmatprep.mubr.bf16.mxu0 %v14145_v40  ;;  %v14370_v40 = vld [vmem:[%s18042_s0 + $0x3c] ss:$24 sps:$4 sm:$0xff]  }
  0x47   :  { %1167 = vmatpush1.bf16.msra.mxu0 %v14337_v31 }
  0x48   :  { %1168 = vmatprep.subr.bf16.mxu0 %v14344_v32 }
  0x4a   :  { %1124 = vmatmul.mubr.bf16.gmra.mrb[4].mxu0 %v14167_v44  ;;  %1436 = vmatmul.mubr.bf16.vlgmr.msra.gmra.mrb[20].mxu1 %v14350_v34  ;;  %v14387_v44 = vld [vmem:[%s18041_s1 + $0x1e4] ss:$12 sps:$4 sm:$0xff]  }
  0x4b   :  { %1169 = vmatpush1.bf16.msra.mxu0 %v14356_v35  ;;  %1477 = vmatpush1.bf16.msra.mxu1 %v12735_v37  ;;  %v12761_v37 = vld [vmem:[%s18041_s1 + $0x380] ss:$12 sps:$4 sm:$0xff]  }
  0x4c   :  { %1170 = vmatprep.subr.bf16.mxu0 %v14365_v39  ;;  %1478 = vmatprep.subr.bf16.mxu1 %v18051_v29 }
  0x4d   :  { %1443 = vmatprep.mubr.bf16.mxu1 %v14370_v40  ;;  %1133 = vmatprep.mubr.bf16.mxu0 %v14190_v49  ;;  %v14416_v49 = vld [vmem:[%s18042_s0 + $0x6c] ss:$24 sps:$4 sm:$0xff]  }
  0x4f   :  { %1171 = vmatpush1.bf16.msra.mxu0 %v14378_v42  ;;  %1479 = vmatpush1.bf16.msra.mxu1 %v12739_v45  ;;  %v14486_v45 = vld [vmem:[%s18041_s1 + $0x240] ss:$12 sps:$4 sm:$0xff]  }
  0x50   :  { %1172 = vmatprep.subr.bf16.mxu0 %v14387_v44  ;;  %1480 = vmatprep.subr.bf16.mxu1 %v18051_v29  ;;  %18068 = vst [vmem:[#allocation6_spill] sm:$0xff] %v14486_v45 }
  0x52   :  { %1134 = vmatmul.mubr.bf16.gmra.mrb[8].mxu0 %v14215_v54  ;;  %1444 = vmatmul.mubr.bf16.gmra.mrb[24].mxu1 %v14399_v50  ;;  %v14433_v54 = vld [vmem:[%s18041_s1 + $0x214] ss:$12 sps:$4 sm:$0xff]  }
  0x53   :  { %1173 = vmatpush1.bf16.msra.mxu0 %v14394_v47  ;;  %1481 = vmatpush1.bf16.msra.mxu1 %v12746_v53  ;;  %v14493_v53 = vld [vmem:[%s18042_s0 + $0x98] ss:$24 sps:$4 sm:$0xff]  }
  0x54   :  { %1174 = vmatprep.subr.bf16.mxu0 %v14410_v56  ;;  %1482 = vmatprep.subr.bf16.mxu1 %v18051_v29 }
  0x55   :  { %1451 = vmatprep.mubr.bf16.mxu1 %v14416_v49  ;;  %1143 = vmatprep.mubr.bf16.mxu0 %v14243_v60  ;;  %v14462_v60 = vld [vmem:[%s18042_s0 + $0x9c] ss:$24 sps:$4 sm:$0xff]  }
  0x57   :  { %1175 = vmatpush1.bf16.msra.mxu0 %v14424_v58  ;;  %1483 = vmatpush1.bf16.msra.mxu1 %v12750_v62  ;;  %v12768_v62 = vld [vmem:[%s18041_s1 + $0x398] ss:$12 sps:$4 sm:$0xff]  }
  0x58   :  { %1176 = vmatprep.subr.bf16.mxu0 %v14433_v54  ;;  %1484 = vmatprep.subr.bf16.mxu1 %v18051_v29 }
  0x5a   :  { %1144 = vmatmul.mubr.bf16.gmra.mrb[12].mxu0 %v14263_v1  ;;  %1452 = vmatmul.mubr.bf16.gmra.mrb[28].mxu1 %v14447_v5  ;;  %v14479_v1 = vld [vmem:[%s18041_s1 + $0x244] ss:$12 sps:$4 sm:$0xff]  }
  0x5b   :  { %1177 = vmatpush1.bf16.msra.mxu0 %v14440_v63  ;;  %1485 = vmatpush1.bf16.msra.mxu1 %v12757_v11  ;;  %18067 = vst [vmem:[#allocation5_spill] sm:$0xff] %v14479_v1  ;;  %v14502_v11 = vld [vmem:[%s18041_s1 + $0x25c] ss:$12 sps:$4 sm:$0xff]  }
  0x5c   :  { %1178 = vmatprep.subr.bf16.mxu0 %v14456_v15  ;;  %1486 = vmatprep.subr.bf16.mxu1 %v18051_v29  ;;  %18069 = vst [vmem:[#allocation7_spill] sm:$0xff] %v14502_v11 }
  0x5d   :  { %1459 = vmatprep.mubr.bf16.mxu1 %v14462_v60  ;;  %1153 = vmatprep.mubr.bf16.mxu0 %v14283_v9  ;;  %v14508_v9 = vld [vmem:[%s18042_s0 + $0xcc] ss:$24 sps:$4 sm:$0xff]  }
  0x5f   :  { %1179 = vmatpush1.bf16.msra.mxu0 %v14470_v19  ;;  %1487 = vmatpush1.bf16.msra.mxu1 %v12761_v37  ;;  %v14516_v37 = vld [vmem:[%s18041_s1 + $0x258] ss:$12 sps:$4 sm:$0xff]  }
  0x60   :  { %1180 = vmatprep.subr.bf16.mxu0 %v14479_v1  ;;  %1488 = vmatprep.subr.bf16.mxu1 %v18051_v29  ;;  %18070 = vst [vmem:[#allocation8_spill] sm:$0xff] %v14516_v37  ;;  %v12772_v29 = vld [vmem:[%s18041_s1 + $0x3b0] ss:$12 sps:$4 sm:$0xff]   ;;  %v18072_v1 = vmov 0   ;;  %v14548_v19 = vld [vmem:[%s18041_s1 + $0x28c] ss:$12 sps:$4 sm:$0xff]  }
  0x62   :  { %1154 = vmatmul.mubr.bf16.gmra.mrb[16].mxu0 %v14316_v23  ;;  %1460 = vmatmul.mubr.bf16.gmra.mrb[32].mxu1 %v14493_v53  ;;  %v14525_v23 = vld [vmem:[%s18041_s1 + $0x274] ss:$12 sps:$4 sm:$0xff]  }
  0x63   :  { %1181 = vmatpush1.bf16.msra.mxu0 %v14486_v45  ;;  %1489 = vmatpush1.bf16.msra.mxu1 %v12768_v62  ;;  %18071 = vst [vmem:[#allocation9_spill] sm:$0xff] %v14525_v23  ;;  %v14532_v45 = vld [vmem:[%s18041_s1 + $0x270] ss:$12 sps:$4 sm:$0xff]   ;;  %v14539_v62 = vld [vmem:[%s18042_s0 + $0xc8] ss:$24 sps:$4 sm:$0xff]  }
  0x64   :  { %1182 = vmatprep.subr.bf16.mxu0 %v14502_v11  ;;  %1490 = vmatprep.subr.bf16.mxu1 %v18072_v1  ;;  %18073 = vst [vmem:[#allocation10_spill] sm:$0xff] %v14532_v45  ;;  %v12779_v11 = vld [vmem:[%s18041_s1 + $0x3c8] ss:$12 sps:$4 sm:$0xff]  }
  0x65   :  { %1467 = vmatprep.mubr.bf16.mxu1 %v14508_v9  ;;  %1196 = vmatprep.mubr.bf16.mxu0 %v14328_v27  ;;  %v14554_v27 = vld [vmem:[%s18042_s0 + $0x14] ss:$24 sps:$4 sm:$0xff]  }
  0x67   :  { %1183 = vmatpush1.bf16.msra.mxu0 %v14516_v37  ;;  %1491 = vmatpush1.bf16.msra.mxu1 %v12772_v29  ;;  %v14561_v29 = vld [vmem:[%s18041_s1 + $0x288] ss:$12 sps:$4 sm:$0xff]   ;;  %v14570_v37 = vld [vmem:[%s18041_s1 + $0x2a4] ss:$12 sps:$4 sm:$0xff]  }
  0x68   :  { %1184 = vmatprep.subr.bf16.mxu0 %v14525_v23  ;;  %1492 = vmatprep.subr.bf16.mxu1 %v18072_v1  ;;  %18074 = vst [vmem:[#allocation11_spill] sm:$0xff] %v14561_v29  ;;  %v12783_v23 = vld [vmem:[%s18041_s1 + $0x3e0] ss:$12 sps:$4 sm:$0xff]  }
  0x6a   :  { %1468 = vmatmul.mubr.bf16.gmra.mrb[36].mxu1 %v14539_v62 }
  0x6b   :  { %1185 = vmatpush1.bf16.msra.mxu0 %v14532_v45  ;;  %1493 = vmatpush1.bf16.msra.mxu1 %v12779_v11  ;;  %v14579_v45 = vld [vmem:[%s18042_s0 + $0x10] ss:$24 sps:$4 sm:$0xff]   ;;  %v14584_v11 = vld [vmem:[%s18041_s1 + $0x2a0] ss:$12 sps:$4 sm:$0xff]  }
  0x6c   :  { %1186 = vmatprep.subr.bf16.mxu0 %v14548_v19  ;;  %1494 = vmatprep.subr.bf16.mxu1 %v18072_v1  ;;  %18075 = vst [vmem:[#allocation12_spill] sm:$0xff] %v14584_v11  ;;  %v14590_v1 = vld [vmem:[%s18041_s1 + $0x2bc] ss:$12 sps:$4 sm:$0xff]  }
  0x6d   :  { %10279 = vmatprep.mubr.msk.bf16.mxu1 %vm1065_vm0, %v14554_v27 }
  0x6f   :  { %1187 = vmatpush1.bf16.msra.mxu0 %v14561_v29  ;;  %1495 = vmatpush1.bf16.msra.mxu1 %v12783_v23  ;;  %v14596_v29 = vld [vmem:[%s18042_s0 + $0x44] ss:$24 sps:$4 sm:$0xff]  }
  0x70   :  { %1188 = vmatprep.subr.bf16.mxu0 %v14570_v37  ;;  %2658 = vmatprep.subr.bf16.mxu1 %v13968_v0  ;;  %v14603_v23 = vld [vmem:[%s18041_s1 + $0x2b8] ss:$12 sps:$4 sm:$0xff]   ;;  %v14610_v0 = vld [vmem:[%s18041_s1 + $0x2d4] ss:$12 sps:$4 sm:$0xff]  }
  0x71   :  { %18076 = vst [vmem:[#allocation13_spill] sm:$0xff] %v14603_v23 }
  0x72   :  { %1509 = vmatmul.mubr.bf16.vlgmr.msra.gmra.mrb[40].mxu1 %v14579_v45 }
  0x73   :  { %1189 = vmatpush1.bf16.msra.mxu0 %v14584_v11  ;;  %2659 = vmatpush1.bf16.msra.mxu1 %v13977_v2  ;;  %v14618_v11 = vld [vmem:[%s18041_s1 + $0x2d0] ss:$12 sps:$4 sm:$0xff]   ;;  %v14624_v2 = vld [vmem:[%s18042_s0 + $0x40] ss:$24 sps:$4 sm:$0xff]  }
  0x74   :  { %1190 = vmatprep.subr.bf16.mxu0 %v14590_v1  ;;  %2660 = vmatprep.subr.bf16.mxu1 %v13986_v4  ;;  %18077 = vst [vmem:[#allocation14_spill] sm:$0xff] %v14618_v11  ;;  %v14631_v4 = vld [vmem:[%s18041_s1 + $0x2ec] ss:$12 sps:$4 sm:$0xff]  }
  0x75   :  { %10280 = vmatprep.mubr.msk.bf16.mxu1 %vm1065_vm0, %v14596_v29 }
  0x77   :  { %1191 = vmatpush1.bf16.msra.mxu0 %v14603_v23  ;;  %2661 = vmatpush1.bf16.msra.mxu1 %v13994_v6  ;;  %v14637_v23 = vld [vmem:[%s18042_s0 + $0x74] ss:$24 sps:$4 sm:$0xff]  }
  0x78   :  { %1192 = vmatprep.subr.bf16.mxu0 %v14610_v0  ;;  %2662 = vmatprep.subr.bf16.mxu1 %v14003_v8  ;;  %v14644_v6 = vld [vmem:[%s18041_s1 + $0x2e8] ss:$12 sps:$4 sm:$0xff]   ;;  %v14651_v8 = vld [vmem:[%s18041_s1 + $0x304] ss:$12 sps:$4 sm:$0xff]  }
  0x79   :  { %18078 = vst [vmem:[#allocation15_spill] sm:$0xff] %v14644_v6 }
  0x7a   :  { %1517 = vmatmul.mubr.bf16.gmra.mrb[44].mxu1 %v14624_v2 }
  0x7b   :  { %1193 = vmatpush1.bf16.msra.mxu0 %v14618_v11  ;;  %2663 = vmatpush1.bf16.msra.mxu1 %v14012_v10  ;;  %v14659_v11 = vld [vmem:[%s18041_s1 + $0x300] ss:$12 sps:$4 sm:$0xff]   ;;  %v14665_v10 = vld [vmem:[%s18042_s0 + $0x70] ss:$24 sps:$4 sm:$0xff]  }
  0x7c   :  { %1194 = vmatprep.subr.bf16.mxu0 %v14631_v4  ;;  %2664 = vmatprep.subr.bf16.mxu1 %v14021_v12  ;;  %v14672_v12 = vld [vmem:[%s18041_s1 + $0x31c] ss:$12 sps:$4 sm:$0xff]  }
  0x7d   :  { %10281 = vmatprep.mubr.msk.bf16.mxu1 %vm1065_vm0, %v14637_v23 }
  0x7f   :  { %1195 = vmatpush1.bf16.msra.mxu0 %v14644_v6  ;;  %2665 = vmatpush1.bf16.msra.mxu1 %v14030_v14  ;;  %v14679_v6 = vld [vmem:[%s18042_s0 + $0xa4] ss:$24 sps:$4 sm:$0xff]  }
  0x80   :  { %1247 = vmatprep.subr.bf16.mxu0 %v14651_v8  ;;  %2666 = vmatprep.subr.bf16.mxu1 %v14039_v16  ;;  %v14686_v14 = vld [vmem:[%s18041_s1 + $0x318] ss:$12 sps:$4 sm:$0xff]   ;;  %v14693_v16 = vld [vmem:[%s18041_s1 + $0x334] ss:$12 sps:$4 sm:$0xff]  }
  0x82   :  { %1197 = vmatmul.mubr.bf16.vlgmr.msra.gmra.mrb[0].mxu0 %v14350_v34  ;;  %1525 = vmatmul.mubr.bf16.gmra.mrb[48].mxu1 %v14665_v10  ;;  %v14708_v34 = vld [vmem:[%s18042_s0 + $0xa0] ss:$24 sps:$4 sm:$0xff]  }
  0x83   :  { %1248 = vmatpush1.bf16.msra.mxu0 %v14659_v11  ;;  %2667 = vmatpush1.bf16.msra.mxu1 %v14047_v18  ;;  %v14703_v18 = vld [vmem:[%s18041_s1 + $0x330] ss:$12 sps:$4 sm:$0xff]  }
  0x84   :  { %1249 = vmatprep.subr.bf16.mxu0 %v14672_v12  ;;  %2668 = vmatprep.subr.bf16.mxu1 %v14057_v20  ;;  %v14715_v20 = vld [vmem:[%s18041_s1 + $0x34c] ss:$12 sps:$4 sm:$0xff]  }
  0x85   :  { %1206 = vmatprep.mubr.bf16.mxu0 %v14370_v40  ;;  %10282 = vmatprep.mubr.msk.bf16.mxu1 %vm1065_vm0, %v14679_v6  ;;  %v14722_v40 = vld [vmem:[%s18042_s0 + $0xd4] ss:$24 sps:$4 sm:$0xff]  }
  0x87   :  { %1250 = vmatpush1.bf16.msra.mxu0 %v14686_v14  ;;  %2669 = vmatpush1.bf16.msra.mxu1 %v14065_v22  ;;  %v14729_v22 = vld [vmem:[%s18041_s1 + $0x348] ss:$12 sps:$4 sm:$0xff]  }
  0x88   :  { %1251 = vmatprep.subr.bf16.mxu0 %v14693_v16  ;;  %2670 = vmatprep.subr.bf16.mxu1 %v14075_v24  ;;  %v14736_v24 = vld [vmem:[%s18041_s1 + $0x364] ss:$12 sps:$4 sm:$0xff]  }
  0x8a   :  { %1207 = vmatmul.mubr.bf16.gmra.mrb[4].mxu0 %v14399_v50  ;;  %1533 = vmatmul.mubr.bf16.gmra.mrb[52].mxu1 %v14708_v34  ;;  %v14745_v50 = vld [vmem:[%s18041_s1 + $0x360] ss:$12 sps:$4 sm:$0xff]  }
  0x8b   :  { %1252 = vmatpush1.bf16.msra.mxu0 %v14703_v18  ;;  %2671 = vmatpush1.bf16.msra.mxu1 %v14084_v26  ;;  %v14751_v26 = vld [vmem:[%s18042_s0 + $0xd0] ss:$24 sps:$4 sm:$0xff]  }
  0x8c   :  { %1253 = vmatprep.subr.bf16.mxu0 %v14715_v20  ;;  %2672 = vmatprep.subr.bf16.mxu1 %v14093_v28  ;;  %v14758_v28 = vld [vmem:[%s18041_s1 + $0x37c] ss:$12 sps:$4 sm:$0xff]  }
  0x8d   :  { %1216 = vmatprep.mubr.bf16.mxu0 %v14416_v49  ;;  %10283 = vmatprep.mubr.msk.bf16.mxu1 %vm1065_vm0, %v14722_v40  ;;  %v14765_v49 = vld [vmem:[%s18042_s0 + $0xf4] ss:$24 sps:$4 sm:$0xff]  }
  0x8f   :  { %1254 = vmatpush1.bf16.msra.mxu0 %v14729_v22  ;;  %2673 = vmatpush1.bf16.msra.mxu1 %v14101_v30  ;;  %v14772_v30 = vld [vmem:[%s18041_s1 + $0x378] ss:$12 sps:$4 sm:$0xff]  }
  0x90   :  { %1255 = vmatprep.subr.bf16.mxu0 %v14736_v24  ;;  %2674 = vmatprep.subr.bf16.mxu1 %v14114_v33  ;;  %v14779_v33 = vld [vmem:[%s18041_s1 + $0x394] ss:$12 sps:$4 sm:$0xff]  }
  0x92   :  { %1217 = vmatmul.mubr.bf16.gmra.mrb[8].mxu0 %v14447_v5  ;;  %1541 = vmatmul.mubr.bf16.gmra.mrb[56].mxu1 %v14751_v26  ;;  %v14788_v5 = vld [vmem:[%s18041_s1 + $0x390] ss:$12 sps:$4 sm:$0xff]  }
  0x93   :  { %1256 = vmatpush1.bf16.msra.mxu0 %v14745_v50  ;;  %2675 = vmatpush1.bf16.msra.mxu1 %v14128_v36  ;;  %v14795_v36 = vld [vmem:[%s18041_s1 + $0x3ac] ss:$12 sps:$4 sm:$0xff]  }
  0x94   :  { %1257 = vmatprep.subr.bf16.mxu0 %v14758_v28  ;;  %2676 = vmatprep.subr.bf16.mxu1 %v14137_v38  ;;  %v14803_v38 = vld [vmem:[%s18041_s1 + $0x3a8] ss:$12 sps:$4 sm:$0xff]  }
  0x95   :  { %1226 = vmatprep.mubr.bf16.mxu0 %v14462_v60  ;;  %2690 = vmatprep.mubr.bf16.mxu1 %v14765_v49  ;;  %v12850_v60 = vld [vmem:[%s18041_s1 + $0x110] ss:$12 sps:$4 sm:$0xff]  }
  0x97   :  { %1258 = vmatpush1.bf16.msra.mxu0 %v14772_v30  ;;  %2677 = vmatpush1.bf16.msra.mxu1 %v14152_v41  ;;  %v14811_v41 = vld [vmem:[%s18041_s1 + $0x3c4] ss:$12 sps:$4 sm:$0xff]  }
  0x98   :  { %1259 = vmatprep.subr.bf16.mxu0 %v14779_v33  ;;  %2678 = vmatprep.subr.bf16.mxu1 %v14161_v43  ;;  %v14818_v43 = vld [vmem:[%s18041_s1 + $0x3c0] ss:$12 sps:$4 sm:$0xff]  }
  0x9a   :  { %1227 = vmatmul.mubr.bf16.gmra.mrb[12].mxu0 %v14493_v53  ;;  %v14911_v53 = vld [vmem:[%s18042_s0 + $0x154] ss:$24 sps:$4 sm:$0xff]  }
  0x9b   :  { %1260 = vmatpush1.bf16.msra.mxu0 %v14788_v5  ;;  %1236 = vmatprep.mubr.bf16.mxu0 %v14508_v9  ;;  %v14928_v9 = vld [vmem:[%s18042_s0 + $0x150] ss:$24 sps:$4 sm:$0xff]  }
  0x9c   :  { %2679 = vmatpush1.bf16.msra.mxu1 %v14175_v46  ;;  %1261 = vmatprep.subr.bf16.mxu0 %v14795_v36  ;;  %v14825_v46 = vld [vmem:[%s18041_s1 + $0x3dc] ss:$12 sps:$4 sm:$0xff]  }
  0x9d   :  { %2680 = vmatprep.subr.bf16.mxu1 %v14184_v48  ;;  %v14833_v48 = vld [vmem:[%s18041_s1 + $0x3d8] ss:$12 sps:$4 sm:$0xff]  }
  0x9f   :  { %1262 = vmatpush1.bf16.msra.mxu0 %v14803_v38 }
  0xa0   :  { %2681 = vmatpush1.bf16.msra.mxu1 %v14198_v51  ;;  %1263 = vmatprep.subr.bf16.mxu0 %v14811_v41  ;;  %v12844_v51 = vld [vmem:[%s18041_s1 + $0xc8] ss:$12 sps:$4 sm:$0xff]  }
  0xa1   :  { %2682 = vmatprep.subr.bf16.mxu1 %v14205_v52  ;;  %v12845_v52 = vld [vmem:[%s18041_s1 + $0x8] ss:$12 sps:$4 sm:$0xff]  }
  0xa2   :  { %1237 = vmatmul.mubr.bf16.gmra.mrb[16].mxu0 %v14539_v62  ;;  %v12870_v62 = vld [vmem:[%s18042_s0 + $0x184] ss:$24 sps:$4 sm:$0xff]  }
  0xa3   :  { %1264 = vmatpush1.bf16.msra.mxu0 %v14818_v43  ;;  %10274 = vmatprep.mubr.msk.bf16.mxu0 %vm1065_vm0, %v14554_v27  ;;  %v14956_v27 = vld [vmem:[%s18042_s0 + $0x180] ss:$24 sps:$4 sm:$0xff]  }
  0xa4   :  { %2683 = vmatpush1.bf16.msra.mxu1 %v14220_v55  ;;  %1265 = vmatprep.subr.bf16.mxu0 %v14825_v46  ;;  %v12846_v55 = vld [vmem:[%s18041_s1 + $0xe0] ss:$12 sps:$4 sm:$0xff]  }
  0xa5   :  { %2684 = vmatprep.subr.bf16.mxu1 %v14229_v57  ;;  %v12847_v57 = vld [vmem:[%s18041_s1 + $0x20] ss:$12 sps:$4 sm:$0xff]  }
  0xa7   :  { %1266 = vmatpush1.bf16.msra.mxu0 %v14833_v48 }
  0xa8   :  { %2685 = vmatpush1.bf16.msra.mxu1 %v14238_v59  ;;  %11925 = vmatprep.subr.bf16.mxu0 %v12844_v51  ;;  %v12848_v59 = vld [vmem:[%s18041_s1 + $0xf8] ss:$12 sps:$4 sm:$0xff]   ;;  %v12876_v51 = vld [vmem:[%s18041_s1 + $0x1d0] ss:$12 sps:$4 sm:$0xff]  }
  0xa9   :  { %2686 = vmatprep.subr.bf16.mxu1 %v14248_v61  ;;  %v14866_v61 = vld [vmem:[%s18042_s0 + $0xf0] ss:$24 sps:$4 sm:$0xff]  }
  0xaa   :  { %1280 = vmatmul.mubr.bf16.vlgmr.msra.gmra.mrb[0].mxu0 %v14579_v45  ;;  %v14897_v45 = vld [vmem:[%s18042_s0 + $0x120] ss:$24 sps:$4 sm:$0xff]  }
  0xab   :  { %10275 = vmatprep.mubr.msk.bf16.mxu0 %vm1065_vm0, %v14596_v29  ;;  %11926 = vmatpush3.bf16.msra.mxu0 %v12845_v52  ;;  %v12879_v29 = vld [vmem:[%s18042_s0 + $0x1b0] ss:$24 sps:$4 sm:$0xff]   ;;  %v18085_v52 = vld [vmem:[#allocation10_spill] sm:$0xff] }
  0xac   :  { %2687 = vmatpush1.bf16.msra.mxu1 %v14268_v3  ;;  %11927 = vmatprep.subr.bf16.mxu0 %v12846_v55  ;;  %v12849_v3 = vld [vmem:[%s18041_s1 + $0x38] ss:$12 sps:$4 sm:$0xff]   ;;  %v12880_v55 = vld [vmem:[%s18041_s1 + $0x2a8] ss:$12 sps:$4 sm:$0xff]  }
  0xad   :  { %2688 = vmatprep.subr.bf16.mxu1 %v14277_v7  ;;  %v14880_v7 = vld [vmem:[%s18042_s0 + $0x124] ss:$24 sps:$4 sm:$0xff]  }
  0xaf   :  { %11928 = vmatpush3.bf16.msra.mxu0 %v12847_v57  ;;  %v12881_v57 = vld [vmem:[%s18041_s1 + $0x1e8] ss:$12 sps:$4 sm:$0xff]  }
  0xb0   :  { %2689 = vmatpush1.bf16.msra.mxu1 %v14291_v13  ;;  %11929 = vmatprep.subr.bf16.mxu0 %v12848_v59  ;;  %v12851_v13 = vld [vmem:[%s18041_s1 + $0x50] ss:$12 sps:$4 sm:$0xff]   ;;  %v18086_v59 = vld [vmem:[#allocation11_spill] sm:$0xff] }
  0xb1   :  { %2741 = vmatprep.subr.bf16.mxu1 %v14303_v17  ;;  %v12852_v17 = vld [vmem:[%s18041_s1 + $0x128] ss:$12 sps:$4 sm:$0xff]  }
  0xb2   :  { %1290 = vmatmul.mubr.bf16.gmra.mrb[4].mxu0 %v14624_v2  ;;  %v18081_v2 = vld [vmem:[#allocation6_spill] sm:$0xff] }
  0xb3   :  { %2691 = vmatmul.mubr.bf16.vlgmr.msra.gmra.mrb[60].mxu1 %v14866_v61  ;;  %10276 = vmatprep.mubr.msk.bf16.mxu0 %vm1065_vm0, %v14637_v23  ;;  %v18080_v23 = vld [vmem:[#allocation5_spill] sm:$0xff] }
  0xb4   :  { %2742 = vmatpush1.bf16.msra.mxu1 %v14311_v21  ;;  %11930 = vmatpush3.bf16.msra.mxu0 %v12849_v3  ;;  %v12853_v21 = vld [vmem:[%s18041_s1 + $0x68] ss:$12 sps:$4 sm:$0xff]   ;;  %v12883_v3 = vld [vmem:[%s18041_s1 + $0x200] ss:$12 sps:$4 sm:$0xff]  }
  0xb5   :  { %2743 = vmatprep.subr.bf16.mxu1 %v14322_v25  ;;  %11931 = vmatprep.subr.bf16.mxu0 %v12850_v60  ;;  %v12854_v25 = vld [vmem:[%s18041_s1 + $0x140] ss:$12 sps:$4 sm:$0xff]   ;;  %v12887_v60 = vld [vmem:[%s18041_s1 + $0x2d8] ss:$12 sps:$4 sm:$0xff]  }
  0xb6   :  { %2700 = vmatprep.mubr.bf16.mxu1 %v14880_v7 }
  0xb8   :  { %2744 = vmatpush1.bf16.msra.mxu1 %v14337_v31  ;;  %11932 = vmatpush3.bf16.msra.mxu0 %v12851_v13  ;;  %v12855_v31 = vld [vmem:[%s18041_s1 + $0x80] ss:$12 sps:$4 sm:$0xff]   ;;  %v12889_v13 = vld [vmem:[%s18041_s1 + $0x2f0] ss:$12 sps:$4 sm:$0xff]  }
  0xb9   :  { %2745 = vmatprep.subr.bf16.mxu1 %v14344_v32  ;;  %11933 = vmatprep.subr.bf16.mxu0 %v12852_v17  ;;  %v12856_v32 = vld [vmem:[%s18041_s1 + $0x158] ss:$12 sps:$4 sm:$0xff]   ;;  %v12890_v17 = vld [vmem:[%s18041_s1 + $0x230] ss:$12 sps:$4 sm:$0xff]  }
  0xba   :  { %1300 = vmatmul.mubr.bf16.gmra.mrb[8].mxu0 %v14665_v10  ;;  %v18082_v10 = vld [vmem:[#allocation7_spill] sm:$0xff] }
  0xbb   :  { %10277 = vmatprep.mubr.msk.bf16.mxu0 %vm1065_vm0, %v14679_v6  ;;  %2701 = vmatmul.mubr.bf16.gmra.mrb[64].mxu1 %v14897_v45  ;;  %v12873_v6 = vld [vmem:[%s18041_s1 + $0x278] ss:$12 sps:$4 sm:$0xff]  }
  0xbc   :  { %2746 = vmatpush1.bf16.msra.mxu1 %v14356_v35  ;;  %11934 = vmatpush3.bf16.msra.mxu0 %v12853_v21  ;;  %v12857_v35 = vld [vmem:[%s18041_s1 + $0x98] ss:$12 sps:$4 sm:$0xff]   ;;  %v18090_v21 = vld [vmem:[#allocation15_spill] sm:$0xff] }
  0xbd   :  { %2747 = vmatprep.subr.bf16.mxu1 %v14365_v39  ;;  %11935 = vmatprep.subr.bf16.mxu0 %v12854_v25  ;;  %v12858_v39 = vld [vmem:[%s18041_s1 + $0x170] ss:$12 sps:$4 sm:$0xff]   ;;  %v18091_v25 = vmov 0  }
  0xbe   :  { %2710 = vmatprep.mubr.bf16.mxu1 %v14911_v53 }
  0xc0   :  { %2748 = vmatpush1.bf16.msra.mxu1 %v14378_v42  ;;  %11936 = vmatpush3.bf16.msra.mxu0 %v12855_v31  ;;  %v12859_v42 = vld [vmem:[%s18041_s1 + $0xb0] ss:$12 sps:$4 sm:$0xff]  }
  0xc1   :  { %2749 = vmatprep.subr.bf16.mxu1 %v14387_v44  ;;  %11937 = vmatprep.subr.bf16.mxu0 %v12856_v32  ;;  %v12866_v44 = vld [vmem:[%s18041_s1 + $0x248] ss:$12 sps:$4 sm:$0xff]  }
  0xc2   :  { %1310 = vmatmul.mubr.bf16.gmra.mrb[12].mxu0 %v14708_v34  ;;  %v12874_v34 = vld [vmem:[%s18041_s1 + $0x1b8] ss:$12 sps:$4 sm:$0xff]  }
  0xc3   :  { %10278 = vmatprep.mubr.msk.bf16.mxu0 %vm1065_vm0, %v14722_v40  ;;  %2711 = vmatmul.mubr.bf16.gmra.mrb[68].mxu1 %v14928_v9  ;;  %v18083_v40 = vld [vmem:[#allocation8_spill] sm:$0xff] }
  0xc4   :  { %2750 = vmatpush1.bf16.msra.mxu1 %v14394_v47  ;;  %11938 = vmatpush3.bf16.msra.mxu0 %v12857_v35  ;;  %v12877_v47 = vld [vmem:[%s18042_s0 + $0x1b4] ss:$24 sps:$4 sm:$0xff]  }
  0xc5   :  { %2751 = vmatprep.subr.bf16.mxu1 %v14410_v56  ;;  %11939 = vmatprep.subr.bf16.mxu0 %v12858_v39  ;;  %v12867_v56 = vld [vmem:[%s18041_s1 + $0x188] ss:$12 sps:$4 sm:$0xff]  }
  0xc6   :  { %2720 = vmatprep.mubr.bf16.mxu1 %v12870_v62 }
  0xc8   :  { %2752 = vmatpush1.bf16.msra.mxu1 %v14424_v58  ;;  %11940 = vmatpush3.bf16.msra.mxu0 %v12859_v42  ;;  %v12868_v58 = vld [vmem:[%s18041_s1 + $0x260] ss:$12 sps:$4 sm:$0xff]  }
  0xc9   :  { %2753 = vmatprep.subr.bf16.mxu1 %v14433_v54  ;;  %11971 = vmatprep.subr.bf16.mxu0 %v12866_v44  ;;  %v18079_v54 = vld [vmem:[#allocation4_spill] sm:$0xff] }
  0xca   :  { %1320 = vmatmul.mubr.bf16.gmra.mrb[16].mxu0 %v14751_v26  ;;  %v12875_v26 = vld [vmem:[%s18041_s1 + $0x290] ss:$12 sps:$4 sm:$0xff]  }
  0xcb   :  { %2939 = vmatprep.mubr.bf16.mxu0 %v14765_v49  ;;  %2721 = vmatmul.mubr.bf16.gmra.mrb[72].mxu1 %v14956_v27  ;;  %v18084_v49 = vld [vmem:[#allocation9_spill] sm:$0xff] }
  0xcc   :  { %2754 = vmatpush1.bf16.msra.mxu1 %v14440_v63  ;;  %2730 = vmatprep.mubr.bf16.mxu1 %v12877_v47  ;;  %v12869_v63 = vld [vmem:[%s18041_s1 + $0x1a0] ss:$12 sps:$4 sm:$0xff]  }
  0xcd   :  { %2755 = vmatprep.subr.bf16.mxu1 %v14456_v15  ;;  %v12886_v15 = vld [vmem:[%s18042_s0 + $0xfc] ss:$24 sps:$4 sm:$0xff]  }
  0xd0   :  { %2756 = vmatpush1.bf16.msra.mxu1 %v18079_v54 }
  0xd1   :  { %2757 = vmatprep.subr.bf16.mxu1 %v18080_v23 }
  0xd2   :  { %2940 = vmatmul.mubr.bf16.vlgmr.msra.gmra.mrb[20].mxu0 %v14866_v61  ;;  %v12882_v61 = vld [vmem:[%s18041_s1 + $0x2c0] ss:$12 sps:$4 sm:$0xff]  }
  0xd3   :  { %2947 = vmatprep.mubr.bf16.mxu0 %v14880_v7  ;;  %11972 = vmatpush3.bf16.msra.mxu0 %v12867_v56  ;;  %v18088_v7 = vld [vmem:[#allocation13_spill] sm:$0xff] }
  0xd4   :  { %2758 = vmatpush1.bf16.msra.mxu1 %v18081_v2  ;;  %11973 = vmatprep.subr.bf16.mxu0 %v12868_v58 }
  0xd5   :  { %2759 = vmatprep.subr.bf16.mxu1 %v18082_v10  ;;  %2731 = vmatmul.mubr.bf16.gmra.mrb[76].mxu1 %v12879_v29 }
  0xd6   :  { %2773 = vmatprep.mubr.bf16.mxu1 %v12886_v15 }
  0xd7   :  { %11974 = vmatpush3.bf16.msra.mxu0 %v12869_v63  ;;  %v12905_v63 = vld [vmem:[%s18041_s1 + $0x380] ss:$12 sps:$4 sm:$0xff]  }
  0xd8   :  { %2760 = vmatpush1.bf16.msra.mxu1 %v18083_v40  ;;  %11975 = vmatprep.subr.bf16.mxu0 %v12873_v6 }
  0xd9   :  { %2761 = vmatprep.subr.bf16.mxu1 %v18084_v49  ;;  %v12910_v49 = vld [vmem:[%s18041_s1 + $0x3b0] ss:$12 sps:$4 sm:$0xff]  }
  0xda   :  { %2948 = vmatmul.mubr.bf16.gmra.mrb[24].mxu0 %v14897_v45  ;;  %v12884_v45 = vld [vmem:[%s18042_s0 + $0xf8] ss:$24 sps:$4 sm:$0xff]  }
  0xdb   :  { %2955 = vmatprep.mubr.bf16.mxu0 %v14911_v53  ;;  %11976 = vmatpush3.bf16.msra.mxu0 %v12874_v34  ;;  %v12894_v53 = vld [vmem:[%s18041_s1 + $0x308] ss:$12 sps:$4 sm:$0xff]  }
  0xdc   :  { %2762 = vmatpush1.bf16.msra.mxu1 %v18085_v52  ;;  %11977 = vmatprep.subr.bf16.mxu0 %v12875_v26  ;;  %v12930_v52 = vld [vmem:[%s18043_s3 + $0x4] ss:$12 sps:$4 sm:$0xff]  }
  0xdd   :  { %2763 = vmatprep.subr.bf16.mxu1 %v14548_v19  ;;  %v18087_v19 = vld [vmem:[#allocation12_spill] sm:$0xff] }
  0xdf   :  { %11978 = vmatpush3.bf16.msra.mxu0 %v12876_v51 }
  0xe0   :  { %2764 = vmatpush1.bf16.msra.mxu1 %v18086_v59  ;;  %11979 = vmatprep.subr.bf16.mxu0 %v12880_v55  ;;  %v12914_v55 = vld [vmem:[%s18041_s1 + $0x3c8] ss:$12 sps:$4 sm:$0xff]  }
  0xe1   :  { %2765 = vmatprep.subr.bf16.mxu1 %v14570_v37  ;;  %v12888_v37 = vld [vmem:[%s18041_s1 + $0x218] ss:$12 sps:$4 sm:$0xff]  }
  0xe2   :  { %2956 = vmatmul.mubr.bf16.gmra.mrb[28].mxu0 %v14928_v9 }
  0xe3   :  { %2963 = vmatprep.mubr.bf16.mxu0 %v12870_v62  ;;  %11980 = vmatpush3.bf16.msra.mxu0 %v12881_v57 }
  0xe4   :  { %2766 = vmatpush1.bf16.msra.mxu1 %v18087_v19  ;;  %11981 = vmatprep.subr.bf16.mxu0 %v12882_v61  ;;  %v12928_v61 = vld [vmem:[%s18043_s3] ss:$12 sps:$4 sm:$0xff]  }
  0xe5   :  { %2767 = vmatprep.subr.bf16.mxu1 %v14590_v1  ;;  %v18089_v1 = vld [vmem:[#allocation14_spill] sm:$0xff] }
  0xe7   :  { %11982 = vmatpush3.bf16.msra.mxu0 %v12883_v3 }
  0xe8   :  { %2768 = vmatpush1.bf16.msra.mxu1 %v18088_v7  ;;  %11983 = vmatprep.subr.bf16.mxu0 %v12887_v60  ;;  %v12933_v60 = vld [vmem:[%s18043_s3 + $0x1c] ss:$12 sps:$4 sm:$0xff]   ;;  %v12915_v7 = vld [vmem:[%s18041_s1 + $0x3e0] ss:$12 sps:$4 sm:$0xff]  }
  0xe9   :  { %2769 = vmatprep.subr.bf16.mxu1 %v14610_v0  ;;  %v12891_v0 = vld [vmem:[%s18042_s0 + $0x12c] ss:$24 sps:$4 sm:$0xff]  }
  0xea   :  { %2964 = vmatmul.mubr.bf16.gmra.mrb[32].mxu0 %v14956_v27  ;;  %v12900_v27 = vld [vmem:[%s18041_s1 + $0x350] ss:$12 sps:$4 sm:$0xff]  }
  0xeb   :  { %2971 = vmatprep.mubr.bf16.mxu0 %v12877_v47  ;;  %11984 = vmatpush3.bf16.msra.mxu0 %v12888_v37  ;;  %v12901_v47 = vld [vmem:[%s18042_s0 + $0x18c] ss:$24 sps:$4 sm:$0xff]  }
  0xec   :  { %2770 = vmatpush1.bf16.msra.mxu1 %v18089_v1  ;;  %11985 = vmatprep.subr.bf16.mxu0 %v12889_v13 }
  0xed   :  { %2771 = vmatprep.subr.bf16.mxu1 %v14631_v4  ;;  %v12893_v4 = vld [vmem:[%s18042_s0 + $0x128] ss:$24 sps:$4 sm:$0xff]  }
  0xef   :  { %11986 = vmatpush3.bf16.msra.mxu0 %v12890_v17  ;;  %v12931_v17 = vld [vmem:[%s18043_s3 + $0x18] ss:$12 sps:$4 sm:$0xff]  }
  0xf0   :  { %2772 = vmatpush1.bf16.msra.mxu1 %v18090_v21  ;;  %3053 = vmatprep.subr.bf16.mxu0 %v18091_v25  ;;  %v12918_v21 = vld [vmem:[%s18042_s0 + $0x130] ss:$24 sps:$4 sm:$0xff]  }
  0xf1   :  { %2824 = vmatprep.subr.bf16.mxu1 %v14651_v8 }
  0xf2   :  { %2972 = vmatmul.mubr.bf16.gmra.mrb[36].mxu0 %v12879_v29 }
  0xf3   :  { %2774 = vmatmul.mubr.bf16.vlgmr.msra.gmra.mrb[60].mxu1 %v12884_v45  ;;  %3012 = vmatprep.mubr.bf16.mxu0 %v12886_v15  ;;  %v233_v15 = vlaneseq }
  0xf4   :  { %2825 = vmatpush1.bf16.msra.mxu1 %v14659_v11  ;;  %2783 = vmatprep.mubr.bf16.mxu1 %v12891_v0  ;;  %v12895_v11 = vld [vmem:[%s18041_s1 + $0x320] ss:$12 sps:$4 sm:$0xff]  }
  0xf5   :  { %2826 = vmatprep.subr.bf16.mxu1 %v14672_v12  ;;  %v11849_v31 = vpop.f32.mrb[0].mxu1  ;;  %v12896_v12 = vld [vmem:[%s18042_s0 + $0x15c] ss:$24 sps:$4 sm:$0xff]   ;;  %v15123_v6 = vshrl.u32 %v233_v15, 7 }
  0xf6   :  { %v11850_v32 = vpop.f32.mrb[1].mxu1 }
  0xf7   :  { %v15058_v9 = vadd.f32 %v11850_v32, %v11849_v31  ;;  %v11852_v8 = vpop.f32.mrb[2].mxu1  ;;  %v12934_v31 = vld [vmem:[%s18043_s3 + $0x30] ss:$12 sps:$4 sm:$0xff]  }
  0xf8   :  { %2827 = vmatpush1.bf16.msra.mxu1 %v14686_v14  ;;  %v11853_v35 = vpop.f32.mrb[3].mxu1  ;;  %v12898_v14 = vld [vmem:[%s18042_s0 + $0x158] ss:$24 sps:$4 sm:$0xff]  }
  0xf9   :  { %2828 = vmatprep.subr.bf16.mxu1 %v14693_v16  ;;  %v15068_v39 = vadd.f32 %v11853_v35, %v11852_v8  ;;  %v12899_v16 = vld [vmem:[%s18041_s1 + $0x338] ss:$12 sps:$4 sm:$0xff]  }
  0xfa   :  { %3013 = vmatmul.mubr.bf16.vlgmr.msra.gmra.mrb[40].mxu0 %v12884_v45  ;;  %v12936_v45 = vld [vmem:[%s18043_s3 + $0x34] ss:$12 sps:$4 sm:$0xff]  }
  0xfb   :  { %2784 = vmatmul.mubr.bf16.gmra.mrb[64].mxu1 %v12893_v4  ;;  %3054 = vmatpush1.bf16.msra.mxu0 %v12894_v53 }
  0xfc   :  { %2829 = vmatpush1.bf16.msra.mxu1 %v14703_v18  ;;  %3055 = vmatprep.subr.bf16.mxu0 %v18091_v25 }
  0xfd   :  { %2830 = vmatprep.subr.bf16.mxu1 %v14715_v20  ;;  %2793 = vmatprep.mubr.bf16.mxu1 %v12896_v12  ;;  %v11855_v62 = vpop.f32.mrb[4].mxu1 }
  0xfe   :  { %3020 = vmatprep.mubr.bf16.mxu0 %v12891_v0  ;;  %v11856_v42 = vpop.f32.mrb[5].mxu1 }
  0xff   :  { %3056 = vmatpush1.bf16.msra.mxu0 %v12895_v11  ;;  %v15079_v44 = vadd.f32 %v11856_v42, %v11855_v62  ;;  %v11858_v18 = vpop.f32.mrb[6].mxu1  ;;  %v12956_v11 = vld [vmem:[%s18043_s3 + $0x8] ss:$12 sps:$4 sm:$0xff]  }
 0x100   :  { %2831 = vmatpush1.bf16.msra.mxu1 %v14729_v22  ;;  %3057 = vmatprep.subr.bf16.mxu0 %v18091_v25  ;;  %v11859_v20 = vpop.f32.mrb[7].mxu1  ;;  %v12903_v22 = vld [vmem:[%s18042_s0 + $0x188] ss:$24 sps:$4 sm:$0xff]  }
 0x101   :  { %2832 = vmatprep.subr.bf16.mxu1 %v14736_v24  ;;  %v15090_v56 = vadd.f32 %v11859_v20, %v11858_v18  ;;  %v12904_v24 = vld [vmem:[%s18041_s1 + $0x368] ss:$12 sps:$4 sm:$0xff]  }
 0x102   :  { %3021 = vmatmul.mubr.bf16.gmra.mrb[44].mxu0 %v12893_v4  ;;  %v12919_v4 = vld [vmem:[%s18042_s0 + $0x164] ss:$24 sps:$4 sm:$0xff]   ;;  %v12937_v18 = vld [vmem:[%s18043_s3 + $0x48] ss:$12 sps:$4 sm:$0xff]  }
 0x103   :  { %2794 = vmatmul.mubr.bf16.gmra.mrb[68].mxu1 %v12898_v14  ;;  %3058 = vmatpush1.bf16.msra.mxu0 %v12899_v16  ;;  %v12960_v16 = vld [vmem:[%s18043_s3 + $0xe0] ss:$12 sps:$4 sm:$0xff]  }
 0x104   :  { %2833 = vmatpush1.bf16.msra.mxu1 %v14745_v50  ;;  %3059 = vmatprep.subr.bf16.mxu0 %v18091_v25  ;;  %v12906_v50 = vld [vmem:[%s18042_s0 + $0x1bc] ss:$24 sps:$4 sm:$0xff]  }
 0x105   :  { %2834 = vmatprep.subr.bf16.mxu1 %v14758_v28  ;;  %2803 = vmatprep.mubr.bf16.mxu1 %v12901_v47  ;;  %v11861_v58 = vpop.f32.mrb[8].mxu1 }
 0x106   :  { %3028 = vmatprep.mubr.bf16.mxu0 %v12896_v12  ;;  %v11862_v54 = vpop.f32.mrb[9].mxu1 }
 0x107   :  { %3060 = vmatpush1.bf16.msra.mxu0 %v12900_v27  ;;  %v15104_v29 = vadd.f32 %v11862_v54, %v11861_v58  ;;  %v11864_v28 = vpop.f32.mrb[10].mxu1  ;;  %v12921_v27 = vld [vmem:[%s18042_s0 + $0x160] ss:$24 sps:$4 sm:$0xff]  }
 0x108   :  { %2835 = vmatpush1.bf16.msra.mxu1 %v14772_v30  ;;  %3061 = vmatprep.subr.bf16.mxu0 %v18091_v25  ;;  %v11865_v23 = vpop.f32.mrb[11].mxu1  ;;  %v12908_v30 = vld [vmem:[%s18042_s0 + $0x1b8] ss:$24 sps:$4 sm:$0xff]  }
 0x109   :  { %2836 = vmatprep.subr.bf16.mxu1 %v14779_v33  ;;  %v15112_v2 = vadd.f32 %v11865_v23, %v11864_v28  ;;  %v12909_v33 = vld [vmem:[%s18041_s1 + $0x398] ss:$12 sps:$4 sm:$0xff]   ;;  %v12922_v23 = vld [vmem:[%s18042_s0 + $0x194] ss:$24 sps:$4 sm:$0xff]  }
 0x10a   :  { %3029 = vmatmul.mubr.bf16.gmra.mrb[48].mxu0 %v12898_v14  ;;  %v12939_v14 = vld [vmem:[%s18043_s3 + $0x4c] ss:$12 sps:$4 sm:$0xff]  }
 0x10b   :  { %2804 = vmatmul.mubr.bf16.gmra.mrb[72].mxu1 %v12903_v22  ;;  %3062 = vmatpush1.bf16.msra.mxu0 %v12904_v24 }
 0x10c   :  { %2837 = vmatpush1.bf16.msra.mxu1 %v14788_v5  ;;  %3063 = vmatprep.subr.bf16.mxu0 %v18091_v25  ;;  %v12913_v5 = vld [vmem:[%s18042_s0 + $0x104] ss:$24 sps:$4 sm:$0xff]  }
 0x10d   :  { %2838 = vmatprep.subr.bf16.mxu1 %v14795_v36  ;;  %2813 = vmatprep.mubr.bf16.mxu1 %v12906_v50  ;;  %v11867_v10 = vpop.f32.mrb[12].mxu1 }
 0x10e   :  { %3036 = vmatprep.mubr.bf16.mxu0 %v12901_v47  ;;  %v11868_v34 = vpop.f32.mrb[13].mxu1  ;;  %v12942_v47 = vld [vmem:[%s18043_s3 + $0x64] ss:$12 sps:$4 sm:$0xff]  }
 0x10f   :  { %3064 = vmatpush1.bf16.msra.mxu0 %v12905_v63  ;;  %v15128_v36 = vadd.f32 %v11868_v34, %v11867_v10  ;;  %v11870_v40 = vpop.f32.mrb[14].mxu1  ;;  %v12966_v63 = vld [vmem:[%s18043_s3 + $0x38] ss:$12 sps:$4 sm:$0xff]  }
 0x110   :  { %2839 = vmatpush1.bf16.msra.mxu1 %v14803_v38  ;;  %3065 = vmatprep.subr.bf16.mxu0 %v18091_v25  ;;  %v11871_v26 = vpop.f32.mrb[15].mxu1  ;;  %v15144_v38 = vsub.s32 2, %v15123_v6 }
 0x111   :  { %2840 = vmatprep.subr.bf16.mxu1 %v14811_v41  ;;  %v15136_v51 = vadd.f32 %v11871_v26, %v11870_v40  ;;  %v12911_v41 = vld [vmem:[%s18042_s0 + $0x100] ss:$24 sps:$4 sm:$0xff]   ;;  %v12971_v40 = vld [vmem:[%s18043_s3 + $0x50] ss:$12 sps:$4 sm:$0xff]   ;;  %v12975_v26 = vld [vmem:[%s18043_s3 + $0x128] ss:$12 sps:$4 sm:$0xff]  }
 0x112   :  { %3037 = vmatmul.mubr.bf16.gmra.mrb[52].mxu0 %v12903_v22  ;;  %v12965_v22 = vld [vmem:[%s18043_s3 + $0xf8] ss:$12 sps:$4 sm:$0xff]  }
 0x113   :  { %2814 = vmatmul.mubr.bf16.gmra.mrb[76].mxu1 %v12908_v30  ;;  %3066 = vmatpush1.bf16.msra.mxu0 %v12909_v33 }
 0x114   :  { %2841 = vmatpush1.bf16.msra.mxu1 %v14818_v43  ;;  %3067 = vmatprep.subr.bf16.mxu0 %v18091_v25  ;;  %v12916_v43 = vld [vmem:[%s18042_s0 + $0x134] ss:$24 sps:$4 sm:$0xff]  }
 0x115   :  { %2842 = vmatprep.subr.bf16.mxu1 %v14825_v46  ;;  %10470 = vmatprep.mubr.msk.bf16.mxu1 %vm1065_vm0, %v12913_v5  ;;  %v11873_v57 = vpop.f32.mrb[16].mxu1  ;;  %v15160_v46 = vld [vmem:[%s18044_s2] sm:$0x7] }
 0x116   :  { %3044 = vmatprep.mubr.bf16.mxu0 %v12906_v50  ;;  %v11874_v59 = vpop.f32.mrb[17].mxu1  ;;  %v15185_v1 = vrot.slane %v15160_v46, %v15144_v38 }
 0x117   :  { %3068 = vmatpush1.bf16.msra.mxu0 %v12910_v49  ;;  %v15165_v3 = vadd.f32 %v11874_v59, %v11873_v57  ;;  %v11876_v19 = vpop.f32.mrb[18].mxu1  ;;  %v12925_v57 = vld [vmem:[%s18042_s0 + $0x1c4] ss:$24 sps:$4 sm:$0xff]  }
 0x118   :  { %2843 = vmatpush1.bf16.msra.mxu1 %v14833_v48  ;;  %3069 = vmatprep.subr.bf16.mxu0 %v18091_v25  ;;  %v11877_v37 = vpop.f32.mrb[19].mxu1  ;;  %v12955_v48 = vld [vmem:[%s18043_s3 + $0xc8] ss:$12 sps:$4 sm:$0xff]   ;;  %v1365_v32 = vadd.f32 %v15058_v9, %v15185_v1  ;;  %v1368_v9 = vadd.f32 %v15068_v39, %v15185_v1  ;;  %v12961_v39 = vld [vmem:[%s18043_s3 + $0x20] ss:$12 sps:$4 sm:$0xff]   ;;  %v1373_v54 = vadd.f32 %v15079_v44, %v15185_v1 }
 0x119   :  { %3617 = vmatprep.subr.bf16.mxu1 %v12930_v52  ;;  %v15175_v13 = vadd.f32 %v11877_v37, %v11876_v19  ;;  %v12970_v44 = vld [vmem:[%s18043_s3 + $0x110] ss:$12 sps:$4 sm:$0xff]   ;;  %v1376_v33 = vadd.f32 %v15090_v56, %v15185_v1  ;;  %v12943_v56 = vld [vmem:[%s18043_s3 + $0x78] ss:$12 sps:$4 sm:$0xff]   ;;  %v12948_v52 = vld [vmem:[%s18043_s3 + $0x94] ss:$12 sps:$4 sm:$0xff]  }
 0x11a   :  { %3045 = vmatmul.mubr.bf16.gmra.mrb[56].mxu0 %v12908_v30  ;;  %v12940_v30 = vld [vmem:[%s18043_s3 + $0x60] ss:$12 sps:$4 sm:$0xff]   ;;  %v12946_v59 = vld [vmem:[%s18043_s3 + $0x90] ss:$12 sps:$4 sm:$0xff]   ;;  %v12976_v37 = vld [vmem:[%s18043_s3 + $0x68] ss:$12 sps:$4 sm:$0xff]  }
 0x11b   :  { %2857 = vmatmul.mubr.bf16.vlgmr.msra.gmra.mrb[60].mxu1 %v12911_v41  ;;  %3070 = vmatpush1.bf16.msra.mxu0 %v12914_v55 }
 0x11c   :  { %3071 = vmatprep.subr.bf16.mxu0 %v18091_v25  ;;  %10471 = vmatprep.mubr.msk.bf16.mxu1 %vm1065_vm0, %v12916_v43 }
 0x11d   :  { %10475 = vmatprep.mubr.msk.bf16.mxu0 %vm1065_vm0, %v12913_v5  ;;  %3618 = vmatpush1.bf16.msra.mxu1 %v12928_v61  ;;  %v11895_v0 = vpop.f32.mrb[20].mxu1  ;;  %v12945_v5 = vld [vmem:[%s18043_s3 + $0x7c] ss:$12 sps:$4 sm:$0xff]   ;;  %v1381_v61 = vadd.f32 %v15104_v29, %v15185_v1  ;;  %v1384_v29 = vadd.f32 %v15112_v2, %v15185_v1  ;;  %v12985_v2 = vld [vmem:[%s18043_s3 + $0x158] ss:$12 sps:$4 sm:$0xff]  }
 0x11e   :  { %3619 = vmatprep.subr.bf16.mxu1 %v12933_v60  ;;  %v11896_v53 = vpop.f32.mrb[21].mxu1 }
 0x11f   :  { %3072 = vmatpush1.bf16.msra.mxu0 %v12915_v7  ;;  %v11897_v8 = vadd.f32 %v11896_v53, %v11895_v0  ;;  %v11898_v35 = vpop.f32.mrb[22].mxu1  ;;  %v12981_v0 = vld [vmem:[%s18043_s3 + $0x80] ss:$12 sps:$4 sm:$0xff]  }
 0x120   :  { %12017 = vmatprep.subr.bf16.mxu0 %v12955_v48  ;;  %v11899_v12 = vpop.f32.mrb[23].mxu1  ;;  %v12951_v48 = vld [vmem:[%s18043_s3 + $0xac] ss:$12 sps:$4 sm:$0xff]  }
 0x121   :  { %3620 = vmatpush1.bf16.msra.mxu1 %v12931_v17  ;;  %v11900_v62 = vadd.f32 %v11899_v12, %v11898_v35  ;;  %v15215_v42 = vadd.f32 %v11897_v8, %v1365_v32  ;;  %v12980_v17 = vld [vmem:[%s18043_s3 + $0x140] ss:$12 sps:$4 sm:$0xff]   ;;  %v12986_v35 = vld [vmem:[%s18043_s3 + $0x98] ss:$12 sps:$4 sm:$0xff]  }
 0x122   :  { %3086 = vmatmul.mubr.bf16.vlgmr.msra.gmra.mrb[60].mxu0 %v12911_v41  ;;  %3621 = vmatprep.subr.bf16.mxu1 %v12936_v45  ;;  %v12924_v41 = vld [vmem:[%s18042_s0 + $0x190] ss:$24 sps:$4 sm:$0xff]   ;;  %v12927_v32 = vld [vmem:[%s18042_s0 + $0x1c0] ss:$24 sps:$4 sm:$0xff]  }
 0x123   :  { %2867 = vmatmul.mubr.bf16.gmra.mrb[64].mxu1 %v12918_v21  ;;  %10476 = vmatprep.mubr.msk.bf16.mxu0 %vm1065_vm0, %v12916_v43  ;;  %v15222_v20 = vadd.f32 %v11900_v62, %v1368_v9  ;;  %v12952_v12 = vld [vmem:[%s18043_s3 + $0xc0] ss:$12 sps:$4 sm:$0xff]  }
 0x124   :  { %10472 = vmatprep.mubr.msk.bf16.mxu1 %vm1065_vm0, %v12919_v4  ;;  %12018 = vmatpush3.bf16.msra.mxu0 %v12956_v11 }
 0x125   :  { %3622 = vmatpush1.bf16.msra.mxu1 %v12934_v31  ;;  %12019 = vmatprep.subr.bf16.mxu0 %v12960_v16  ;;  %v11901_v24 = vpop.f32.mrb[24].mxu1  ;;  %v12954_v31 = vld [vmem:[%s18043_s3 + $0xc4] ss:$12 sps:$4 sm:$0xff]  }
 0x126   :  { %3623 = vmatprep.subr.bf16.mxu1 %v12939_v14  ;;  %v11902_v58 = vpop.f32.mrb[25].mxu1  ;;  %v1389_v14 = vadd.f32 %v15128_v36, %v15185_v1 }
 0x127   :  { %v11903_v50 = vadd.f32 %v11902_v58, %v11901_v24  ;;  %v11904_v28 = vpop.f32.mrb[26].mxu1  ;;  %v12957_v24 = vld [vmem:[%s18043_s3 + $0xd8] ss:$12 sps:$4 sm:$0xff]  }
 0x128   :  { %12020 = vmatpush3.bf16.msra.mxu0 %v12961_v39  ;;  %v11905_v15 = vpop.f32.mrb[27].mxu1  ;;  %v12990_v39 = vld [vmem:[%s18043_s3 + $0x170] ss:$12 sps:$4 sm:$0xff]  }
 0x129   :  { %3624 = vmatpush1.bf16.msra.mxu1 %v12937_v18  ;;  %12021 = vmatprep.subr.bf16.mxu0 %v12965_v22  ;;  %v11906_v10 = vadd.f32 %v11905_v15, %v11904_v28  ;;  %v15252_v34 = vadd.f32 %v11903_v50, %v1373_v54  ;;  %v12959_v18 = vld [vmem:[%s18043_s3 + $0xdc] ss:$12 sps:$4 sm:$0xff]  }
 0x12a   :  { %3094 = vmatmul.mubr.bf16.gmra.mrb[64].mxu0 %v12918_v21  ;;  %3625 = vmatprep.subr.bf16.mxu1 %v12942_v47  ;;  %v12991_v22 = vld [vmem:[%s18043_s3 + $0xb0] ss:$12 sps:$4 sm:$0xff]  }
 0x12b   :  { %2877 = vmatmul.mubr.bf16.gmra.mrb[68].mxu1 %v12921_v27  ;;  %10477 = vmatprep.mubr.msk.bf16.mxu0 %vm1065_vm0, %v12919_v4  ;;  %v15268_v49 = vadd.f32 %v11906_v10, %v1376_v33  ;;  %v12949_v4 = vld [vmem:[%s18043_s3 + $0xa8] ss:$12 sps:$4 sm:$0xff]   ;;  %v12962_v28 = vld [vmem:[%s18043_s3 + $0xf0] ss:$12 sps:$4 sm:$0xff]   ;;  %v13913_v33 = vmov 0.0   ;;  %v1400_v10 = vadd.f32 %v15175_v13, %v15185_v1 }
 0x12c   :  { %10473 = vmatprep.mubr.msk.bf16.mxu1 %vm1065_vm0, %v12922_v23  ;;  %12022 = vmatpush3.bf16.msra.mxu0 %v12966_v63 }
 0x12d   :  { %3626 = vmatpush1.bf16.msra.mxu1 %v12940_v30  ;;  %12023 = vmatprep.subr.bf16.mxu0 %v12970_v44  ;;  %v11907_v55 = vpop.f32.mrb[28].mxu1  ;;  %v12969_v30 = vld [vmem:[%s18043_s3 + $0x10c] ss:$12 sps:$4 sm:$0xff]  }
 0x12e   :  { %3627 = vmatprep.subr.bf16.mxu1 %v12945_v5  ;;  %v11908_v43 = vpop.f32.mrb[29].mxu1 }
 0x12f   :  { %v11909_v19 = vadd.f32 %v11908_v43, %v11907_v55  ;;  %v11910_v60 = vpop.f32.mrb[30].mxu1 }
 0x130   :  { %12024 = vmatpush3.bf16.msra.mxu0 %v12971_v40  ;;  %v11911_v7 = vpop.f32.mrb[31].mxu1 }
 0x131   :  { %3628 = vmatpush1.bf16.msra.mxu1 %v12943_v56  ;;  %12025 = vmatprep.subr.bf16.mxu0 %v12975_v26  ;;  %v11912_v45 = vadd.f32 %v11911_v7, %v11910_v60  ;;  %v15295_v21 = vadd.f32 %v11909_v19, %v1381_v61  ;;  %v12974_v26 = vld [vmem:[%s18043_s3 + $0x124] ss:$12 sps:$4 sm:$0xff]   ;;  %v12984_v7 = vld [vmem:[%s18043_s3 + $0x154] ss:$12 sps:$4 sm:$0xff]  }
 0x132   :  { %3102 = vmatmul.mubr.bf16.gmra.mrb[68].mxu0 %v12921_v27  ;;  %3629 = vmatprep.subr.bf16.mxu1 %v12948_v52  ;;  %v1392_v27 = vadd.f32 %v15136_v51, %v15185_v1  ;;  %v12964_v51 = vld [vmem:[%s18043_s3 + $0xf4] ss:$12 sps:$4 sm:$0xff]  }
 0x133   :  { %2887 = vmatmul.mubr.bf16.gmra.mrb[72].mxu1 %v12924_v41  ;;  %10478 = vmatprep.mubr.msk.bf16.mxu0 %vm1065_vm0, %v12922_v23  ;;  %v15308_v53 = vadd.f32 %v11912_v45, %v1384_v29  ;;  %v1397_v23 = vadd.f32 %v15165_v3, %v15185_v1  ;;  %v12967_v3 = vld [vmem:[%s18043_s3 + $0x108] ss:$12 sps:$4 sm:$0xff]  }
 0x134   :  { %10474 = vmatprep.mubr.msk.bf16.mxu1 %vm1065_vm0, %v12925_v57  ;;  %12026 = vmatpush3.bf16.msra.mxu0 %v12976_v37 }
 0x135   :  { %3630 = vmatpush1.bf16.msra.mxu1 %v12946_v59  ;;  %12027 = vmatprep.subr.bf16.mxu0 %v12980_v17  ;;  %v11913_v8 = vpop.f32.mrb[32].mxu1 }
 0x136   :  { %3631 = vmatprep.subr.bf16.mxu1 %v12951_v48  ;;  %v11914_v11 = vpop.f32.mrb[33].mxu1 }
 0x137   :  { %v11915_v16 = vadd.f32 %v11914_v11, %v11913_v8  ;;  %v11916_v9 = vpop.f32.mrb[34].mxu1  ;;  %v12994_v8 = vld [vmem:[%s18043_s3 + $0x184] ss:$12 sps:$4 sm:$0xff]  }
 0x138   :  { %12028 = vmatpush3.bf16.msra.mxu0 %v12981_v0  ;;  %v11917_v62 = vpop.f32.mrb[35].mxu1  ;;  %v12982_v0 = vld [vmem:[%s18043_s3 + $0x150] ss:$12 sps:$4 sm:$0xff]  }
 0x139   :  { %3632 = vmatpush1.bf16.msra.mxu1 %v12949_v4  ;;  %12029 = vmatprep.subr.bf16.mxu0 %v12985_v2  ;;  %v11918_v47 = vadd.f32 %v11917_v62, %v11916_v9  ;;  %v15332_v36 = vadd.f32 %v11915_v16, %v1389_v14  ;;  %v12989_v4 = vld [vmem:[%s18043_s3 + $0x16c] ss:$12 sps:$4 sm:$0xff]  }
 0x13a   :  { %3110 = vmatmul.mubr.bf16.gmra.mrb[72].mxu0 %v12924_v41  ;;  %3633 = vmatprep.subr.bf16.mxu1 %v12954_v31  ;;  %v12972_v41 = vld [vmem:[%s18043_s3 + $0x120] ss:$12 sps:$4 sm:$0xff]  }
 0x13b   :  { %2897 = vmatmul.mubr.bf16.gmra.mrb[76].mxu1 %v12927_v32  ;;  %10479 = vmatprep.mubr.msk.bf16.mxu0 %vm1065_vm0, %v12925_v57  ;;  %v15341_v58 = vadd.f32 %v11918_v47, %v1392_v27  ;;  %v12979_v57 = vld [vmem:[%s18043_s3 + $0x13c] ss:$12 sps:$4 sm:$0xff]  }
 0x13c   :  { %12030 = vmatpush3.bf16.msra.mxu0 %v12986_v35 }
 0x13d   :  { %3634 = vmatpush1.bf16.msra.mxu1 %v12952_v12  ;;  %12031 = vmatprep.subr.bf16.mxu0 %v12990_v39  ;;  %v11919_v54 = vpop.f32.mrb[36].mxu1 }
 0x13e   :  { %3635 = vmatprep.subr.bf16.mxu1 %v12959_v18  ;;  %v11920_v50 = vpop.f32.mrb[37].mxu1 }
 0x13f   :  { %v11921_v63 = vadd.f32 %v11920_v50, %v11919_v54  ;;  %v11922_v15 = vpop.f32.mrb[38].mxu1 }
 0x140   :  { %12032 = vmatpush3.bf16.msra.mxu0 %v12991_v22  ;;  %v11923_v44 = vpop.f32.mrb[39].mxu1 }
 0x141   :  { %3636 = vmatpush1.bf16.msra.mxu1 %v12957_v24  ;;  %12259 = vmatprep.subr.bf16.mxu0 %v13913_v33  ;;  %v11924_v5 = vadd.f32 %v11923_v44, %v11922_v15  ;;  %v15357_v40 = vadd.f32 %v11921_v63, %v1397_v23 }
 0x142   :  { %3118 = vmatmul.mubr.bf16.gmra.mrb[76].mxu0 %v12927_v32  ;;  %3637 = vmatprep.subr.bf16.mxu1 %v12964_v51 }
 0x143   :  { %v15362_v56 = vadd.f32 %v11924_v5, %v1400_v10  ;;  %v15410_v5 = vsub.s32 1, %v15123_v6 }
 0x145   :  { %3638 = vmatpush1.bf16.msra.mxu1 %v12962_v28  ;;  %v1510_v52 = vpop.f32.mrb[40].mxu1 }
 0x146   :  { %3639 = vmatprep.subr.bf16.mxu1 %v12969_v30  ;;  %v1511_v13 = vadd.f32 %v1510_v52, %v15215_v42  ;;  %v1512_v1 = vpop.f32.mrb[41].mxu1  ;;  %v12977_v42 = vld [vmem:[%s18043_s3 + $0x138] ss:$12 sps:$4 sm:$0xff]  }
 0x147   :  { %v1513_v55 = vpop.f32.mrb[42].mxu1 }
 0x148   :  { %v1514_v43 = vadd.f32 %v1513_v55, %v15222_v20  ;;  %v1515_v59 = vpop.f32.mrb[43].mxu1  ;;  %v1551_v61 = vmax.f32 %v1511_v13, 0.0 }
 0x149   :  { %3640 = vmatpush1.bf16.msra.mxu1 %v12967_v3 }
 0x14a   :  { %3641 = vmatprep.subr.bf16.mxu1 %v12974_v26  ;;  %v1554_v19 = vmax.f32 %v1514_v43, 0.0 }
 0x14c   :  { %v1581_v60 = vpack.c.bf16 %v1554_v19, %v1551_v61 }
 0x14d   :  { %3642 = vmatpush1.bf16.msra.mxu1 %v12972_v41  ;;  %v1518_v37 = vpop.f32.mrb[44].mxu1 }
 0x14e   :  { %3643 = vmatprep.subr.bf16.mxu1 %v12979_v57  ;;  %1597 = vst.msk [vmem:[#allocation2 + $0x10] sm:$0xff] %vm1596_vm1, %v1581_v60  ;;  %v1519_v20 = vadd.f32 %v1518_v37, %v15252_v34  ;;  %v1520_v48 = vpop.f32.mrb[45].mxu1  ;;  %v12987_v34 = vld [vmem:[%s18043_s3 + $0x168] ss:$12 sps:$4 sm:$0xff]  }
 0x14f   :  { %v1521_v17 = vpop.f32.mrb[46].mxu1  ;;  %v12995_v37 = vld [vmem:[%s18043_s3 + $0x188] ss:$12 sps:$4 sm:$0xff]  }
 0x150   :  { %v1522_v29 = vadd.f32 %v1521_v17, %v15268_v49  ;;  %v1523_v45 = vpop.f32.mrb[47].mxu1  ;;  %v1557_v2 = vmax.f32 %v1519_v20, 0.0  ;;  %v12998_v48 = vld [vmem:[%s18043_s3 + $0x19c] ss:$12 sps:$4 sm:$0xff]  }
 0x151   :  { %3644 = vmatpush1.bf16.msra.mxu1 %v12977_v42  ;;  %v12992_v42 = vld [vmem:[%s18043_s3 + $0x180] ss:$12 sps:$4 sm:$0xff]  }
 0x152   :  { %3645 = vmatprep.subr.bf16.mxu1 %v12984_v7  ;;  %v1560_v31 = vmax.f32 %v1522_v29, 0.0 }
 0x154   :  { %v1584_v32 = vpack.c.bf16 %v1560_v31, %v1557_v2  ;;  %v12996_v2 = vld [vmem:[%s18043_s3 + $0x198] ss:$12 sps:$4 sm:$0xff]   ;;  %v12999_v31 = vld [vmem:[%s18043_s3 + $0x1a0] ss:$12 sps:$4 sm:$0xff]  }
 0x155   :  { %3646 = vmatpush1.bf16.msra.mxu1 %v12982_v0  ;;  %v1526_v49 = vpop.f32.mrb[48].mxu1 }
 0x156   :  { %3647 = vmatprep.subr.bf16.mxu1 %v12989_v4  ;;  %1600 = vst.msk [vmem:[#allocation2 + $0x28] sm:$0xff] %vm1596_vm1, %v1584_v32  ;;  %v1527_v35 = vadd.f32 %v1526_v49, %v15295_v21  ;;  %v1528_v11 = vpop.f32.mrb[49].mxu1  ;;  %v13002_v49 = vld [vmem:[%s18043_s3 + $0x1b4] ss:$12 sps:$4 sm:$0xff]  }
 0x157   :  { %v1529_v12 = vpop.f32.mrb[50].mxu1 }
 0x158   :  { %v1530_v14 = vadd.f32 %v1529_v12, %v15308_v53  ;;  %v1531_v16 = vpop.f32.mrb[51].mxu1  ;;  %v1563_v9 = vmax.f32 %v1527_v35, 0.0 }
 0x159   :  { %3648 = vmatpush1.bf16.msra.mxu1 %v12987_v34  ;;  %v13000_v16 = vld [vmem:[%s18043_s3 + $0x1b0] ss:$12 sps:$4 sm:$0xff]  }
 0x15a   :  { %3700 = vmatprep.subr.bf16.mxu1 %v12994_v8  ;;  %v1566_v62 = vmax.f32 %v1530_v14, 0.0 }
 0x15c   :  { %v1587_v18 = vpack.c.bf16 %v1566_v62, %v1563_v9  ;;  %v13003_v9 = vld [vmem:[%s18043_s3 + $0x1b8] ss:$12 sps:$4 sm:$0xff]  }
 0x15d   :  { %v1534_v39 = vpop.f32.mrb[52].mxu1 }
 0x15e   :  { %1603 = vst.msk [vmem:[#allocation2 + $0x40] sm:$0xff] %vm1596_vm1, %v1587_v18  ;;  %v1535_v27 = vadd.f32 %v1534_v39, %v15332_v36  ;;  %v1536_v47 = vpop.f32.mrb[53].mxu1  ;;  %v13006_v39 = vld [vmem:[%s18043_s3 + $0x1cc] ss:$12 sps:$4 sm:$0xff]  }
 0x15f   :  { %v1537_v22 = vpop.f32.mrb[54].mxu1 }
 0x160   :  { %v1538_v24 = vadd.f32 %v1537_v22, %v15341_v58  ;;  %v1539_v21 = vpop.f32.mrb[55].mxu1  ;;  %v1569_v51 = vmax.f32 %v1535_v27, 0.0  ;;  %v15407_v58 = vsub.s32 0, %v15123_v6 }
 0x162   :  { %v1572_v54 = vmax.f32 %v1538_v24, 0.0  ;;  %v15414_v3 = vrot.slane %v15160_v46, %v15407_v58 }
 0x164   :  { %v1590_v50 = vpack.c.bf16 %v1572_v54, %v1569_v51  ;;  %v13004_v51 = vld [vmem:[%s18043_s3 + $0x1c8] ss:$12 sps:$4 sm:$0xff]   ;;  %v13007_v54 = vld [vmem:[%s18043_s3 + $0x1d0] ss:$12 sps:$4 sm:$0xff]  }
 0x165   :  { %v1542_v53 = vpop.f32.mrb[56].mxu1 }
 0x166   :  { %1606 = vst.msk [vmem:[#allocation2 + $0x58] sm:$0xff] %vm1596_vm1, %v1590_v50  ;;  %v1543_v28 = vadd.f32 %v1542_v53, %v15357_v40  ;;  %v1544_v23 = vpop.f32.mrb[57].mxu1  ;;  %v15418_v40 = vrot.slane %v15160_v46, %v15410_v5 }
 0x167   :  { %v1545_v63 = vpop.f32.mrb[58].mxu1  ;;  %v13029_v23 = vld [vmem:[%s18043_s3 + $0x2a8] ss:$12 sps:$4 sm:$0xff]  }
 0x168   :  { %v1546_v15 = vadd.f32 %v1545_v63, %v15362_v56  ;;  %v1547_v30 = vpop.f32.mrb[59].mxu1  ;;  %v1575_v44 = vmax.f32 %v1543_v28, 0.0  ;;  %v13010_v28 = vld [vmem:[%s18043_s3 + $0x1e4] ss:$12 sps:$4 sm:$0xff]  }
 0x16a   :  { %v1578_v36 = vmax.f32 %v1546_v15, 0.0 }
 0x16c   :  { %v1593_v10 = vpack.c.bf16 %v1578_v36, %v1575_v44 }
 0x16e   :  { %1609 = vst.msk [vmem:[#allocation2 + $0x70] sm:$0xff] %vm1596_vm1, %v1593_v10 }
 0x17d   :  { %v1281_v56 = vpop.f32.mrb[0].mxu0 }
 0x17e   :  { %v12371_v26 = vadd.f32 %v1281_v56, %v15414_v3  ;;  %v1283_v52 = vpop.f32.mrb[1].mxu0 }
 0x17f   :  { %v12372_v13 = vadd.f32 %v1283_v52, %v15418_v40  ;;  %v1285_v1 = vpop.f32.mrb[2].mxu0 }
 0x180   :  { %v12373_v41 = vadd.f32 %v1285_v1, %v15414_v3  ;;  %v1287_v55 = vpop.f32.mrb[3].mxu0  ;;  %v1549_v57 = vmax.f32 %v12371_v26, 0.0 }
 0x181   :  { %v12374_v6 = vadd.f32 %v1287_v55, %v15418_v40  ;;  %v1550_v59 = vmax.f32 %v12372_v13, 0.0 }
 0x182   :  { %v1552_v43 = vmax.f32 %v12373_v41, 0.0 }
 0x183   :  { %v1553_v61 = vmax.f32 %v12374_v6, 0.0 }
 0x184   :  { %v1579_v19 = vpack.c.bf16 %v1552_v43, %v1549_v57 }
 0x185   :  { %v1580_v60 = vpack.c.bf16 %v1553_v61, %v1550_v59  ;;  %v1291_v46 = vpop.f32.mrb[4].mxu0 }
 0x186   :  { %1594 = vst [vmem:[#allocation2] sm:$0xff] %v1579_v19  ;;  %v12375_v7 = vadd.f32 %v1291_v46, %v15414_v3  ;;  %v1293_v20 = vpop.f32.mrb[5].mxu0 }
 0x187   :  { %1595 = vst [vmem:[#allocation2 + $0x8] sm:$0xff] %v1580_v60  ;;  %v12376_v17 = vadd.f32 %v1293_v20, %v15418_v40  ;;  %v1295_v29 = vpop.f32.mrb[6].mxu0  ;;  %3649 = vmatprep.mubr.bf16.mxu1 %v1580_v60  ;;  %3815 = vmatprep.mubr.bf16.mxu0 %v1580_v60 }
 0x188   :  { %v12377_v45 = vadd.f32 %v1295_v29, %v15414_v3  ;;  %v1297_v0 = vpop.f32.mrb[7].mxu0  ;;  %3650 = vmatmul.mubr.bf16.vlgmr.msra.gmra.mrb[80].mxu1 %v1579_v19  ;;  %3816 = vmatmul.mubr.bf16.vlgmr.msra.gmra.mrb[80].mxu0 %v1579_v19  ;;  %v1555_v32 = vmax.f32 %v12375_v7, 0.0 }
 0x189   :  { %v12378_v4 = vadd.f32 %v1297_v0, %v15418_v40  ;;  %3701 = vmatpush1.bf16.msra.mxu1 %v12992_v42  ;;  %12260 = vmatpush3.bf16.msra.mxu0 %v12995_v37  ;;  %v1556_v8 = vmax.f32 %v12376_v17, 0.0 }
 0x18a   :  { %v1558_v34 = vmax.f32 %v12377_v45, 0.0  ;;  %3702 = vmatprep.subr.bf16.mxu1 %v12998_v48  ;;  %12261 = vmatprep.subr.bf16.mxu0 %v13913_v33 }
 0x18b   :  { %v1559_v35 = vmax.f32 %v12378_v4, 0.0 }
 0x18c   :  { %v1582_v11 = vpack.c.bf16 %v1558_v34, %v1555_v32 }
 0x18d   :  { %v1583_v12 = vpack.c.bf16 %v1559_v35, %v1556_v8  ;;  %v1301_v14 = vpop.f32.mrb[8].mxu0  ;;  %3703 = vmatpush1.bf16.msra.mxu1 %v12996_v2  ;;  %12262 = vmatpush3.bf16.msra.mxu0 %v12999_v31 }
 0x18e   :  { %1598 = vst [vmem:[#allocation2 + $0x18] sm:$0xff] %v1582_v11  ;;  %v12379_v62 = vadd.f32 %v1301_v14, %v15414_v3  ;;  %v1303_v18 = vpop.f32.mrb[9].mxu0  ;;  %3704 = vmatprep.subr.bf16.mxu1 %v13002_v49  ;;  %12263 = vmatprep.subr.bf16.mxu0 %v13913_v33  ;;  %v3189_v14 = vld [vmem:[#allocation2 + $0x10] sm:$0xff] }
 0x18f   :  { %1599 = vst [vmem:[#allocation2 + $0x20] sm:$0xff] %v1583_v12  ;;  %v12380_v27 = vadd.f32 %v1303_v18, %v15418_v40  ;;  %v1305_v47 = vpop.f32.mrb[10].mxu0  ;;  %3659 = vmatprep.mubr.bf16.mxu1 %v1583_v12  ;;  %3823 = vmatprep.mubr.bf16.mxu0 %v1583_v12  ;;  %v13030_v12 = vld [vmem:[%s18043_s3 + $0x1e8] ss:$12 sps:$4 sm:$0xff]   ;;  %v13034_v18 = vld [vmem:[%s18043_s3 + $0x2c0] ss:$12 sps:$4 sm:$0xff]  }
 0x190   :  { %v12381_v22 = vadd.f32 %v1305_v47, %v15414_v3  ;;  %v1307_v24 = vpop.f32.mrb[11].mxu0  ;;  %3660 = vmatmul.mubr.bf16.gmra.mrb[84].mxu1 %v1582_v11  ;;  %3824 = vmatmul.mubr.bf16.gmra.mrb[84].mxu0 %v1582_v11  ;;  %v1561_v50 = vmax.f32 %v12379_v62, 0.0  ;;  %v13008_v11 = vld [vmem:[%s18043_s3 + $0x1e0] ss:$12 sps:$4 sm:$0xff]   ;;  %v13013_v62 = vld [vmem:[%s18043_s3 + $0x1fc] ss:$12 sps:$4 sm:$0xff]  }
 0x191   :  { %v12382_v21 = vadd.f32 %v1307_v24, %v15418_v40  ;;  %3705 = vmatpush1.bf16.msra.mxu1 %v13000_v16  ;;  %12264 = vmatpush3.bf16.msra.mxu0 %v13003_v9  ;;  %v1562_v63 = vmax.f32 %v12380_v27, 0.0  ;;  %v13011_v47 = vld [vmem:[%s18043_s3 + $0x1f8] ss:$12 sps:$4 sm:$0xff]   ;;  %v13016_v24 = vld [vmem:[%s18043_s3 + $0x214] ss:$12 sps:$4 sm:$0xff]  }
 0x192   :  { %v1564_v53 = vmax.f32 %v12381_v22, 0.0  ;;  %3706 = vmatprep.subr.bf16.mxu1 %v13006_v39  ;;  %12265 = vmatprep.subr.bf16.mxu0 %v13913_v33  ;;  %v13035_v22 = vld [vmem:[%s18043_s3 + $0x200] ss:$12 sps:$4 sm:$0xff]  }
 0x193   :  { %v1565_v15 = vmax.f32 %v12382_v21, 0.0  ;;  %v13039_v21 = vld [vmem:[%s18043_s3 + $0x2d8] ss:$12 sps:$4 sm:$0xff]  }
 0x194   :  { %v1585_v30 = vpack.c.bf16 %v1564_v53, %v1561_v50  ;;  %v13014_v50 = vld [vmem:[%s18043_s3 + $0x210] ss:$12 sps:$4 sm:$0xff]   ;;  %v13040_v53 = vld [vmem:[%s18043_s3 + $0x218] ss:$12 sps:$4 sm:$0xff]  }
 0x195   :  { %v1586_v44 = vpack.c.bf16 %v1565_v15, %v1562_v63  ;;  %v1311_v36 = vpop.f32.mrb[12].mxu0  ;;  %3707 = vmatpush1.bf16.msra.mxu1 %v13004_v51  ;;  %12266 = vmatpush3.bf16.msra.mxu0 %v13007_v54  ;;  %v13019_v15 = vld [vmem:[%s18043_s3 + $0x22c] ss:$12 sps:$4 sm:$0xff]  }
 0x196   :  { %1601 = vst [vmem:[#allocation2 + $0x30] sm:$0xff] %v1585_v30  ;;  %v12383_v10 = vadd.f32 %v1311_v36, %v15414_v3  ;;  %v1313_v56 = vpop.f32.mrb[13].mxu0  ;;  %4390 = vmatprep.subr.bf16.mxu1 %v13010_v28  ;;  %12072 = vmatprep.subr.bf16.mxu0 %v13029_v23  ;;  %v3192_v28 = vld [vmem:[#allocation2 + $0x28] sm:$0xff] }
 0x197   :  { %1602 = vst [vmem:[#allocation2 + $0x38] sm:$0xff] %v1586_v44  ;;  %v12384_v26 = vadd.f32 %v1313_v56, %v15418_v40  ;;  %v1315_v52 = vpop.f32.mrb[14].mxu0  ;;  %3669 = vmatprep.mubr.bf16.mxu1 %v1586_v44  ;;  %3831 = vmatprep.mubr.bf16.mxu0 %v1586_v44  ;;  %v13048_v56 = vld [vmem:[%s18043_s3 + $0x230] ss:$12 sps:$4 sm:$0xff]  }
 0x198   :  { %v12385_v13 = vadd.f32 %v1315_v52, %v15414_v3  ;;  %v1317_v1 = vpop.f32.mrb[15].mxu0  ;;  %3670 = vmatmul.mubr.bf16.gmra.mrb[88].mxu1 %v1585_v30  ;;  %3832 = vmatmul.mubr.bf16.gmra.mrb[88].mxu0 %v1585_v30  ;;  %v1567_v55 = vmax.f32 %v12383_v10, 0.0  ;;  %v13044_v30 = vld [vmem:[%s18043_s3 + $0x2f0] ss:$12 sps:$4 sm:$0xff]   ;;  %v13017_v10 = vld [vmem:[%s18043_s3 + $0x228] ss:$12 sps:$4 sm:$0xff]  }
 0x199   :  { %v12386_v41 = vadd.f32 %v1317_v1, %v15418_v40  ;;  %v1568_v57 = vmax.f32 %v12384_v26, 0.0  ;;  %v13022_v26 = vld [vmem:[%s18043_s3 + $0x244] ss:$12 sps:$4 sm:$0xff]   ;;  %v13052_v52 = vld [vmem:[%s18043_s3 + $0x308] ss:$12 sps:$4 sm:$0xff]  }
 0x19a   :  { %v1570_v6 = vmax.f32 %v12385_v13, 0.0 }
 0x19b   :  { %v1571_v43 = vmax.f32 %v12386_v41, 0.0  ;;  %v13020_v41 = vld [vmem:[%s18043_s3 + $0x240] ss:$12 sps:$4 sm:$0xff]  }
 0x19c   :  { %v1588_v59 = vpack.c.bf16 %v1570_v6, %v1567_v55  ;;  %v13053_v55 = vld [vmem:[%s18043_s3 + $0x248] ss:$12 sps:$4 sm:$0xff]  }
 0x19d   :  { %v1589_v61 = vpack.c.bf16 %v1571_v43, %v1568_v57  ;;  %v1321_v19 = vpop.f32.mrb[16].mxu0  ;;  %v3195_v43 = vld [vmem:[#allocation2 + $0x40] sm:$0xff] }
 0x19e   :  { %1604 = vst [vmem:[#allocation2 + $0x48] sm:$0xff] %v1588_v59  ;;  %v12387_v60 = vadd.f32 %v1321_v19, %v15414_v3  ;;  %v1323_v46 = vpop.f32.mrb[17].mxu0 }
 0x19f   :  { %1605 = vst [vmem:[#allocation2 + $0x50] sm:$0xff] %v1589_v61  ;;  %v12388_v42 = vadd.f32 %v1323_v46, %v15418_v40  ;;  %v1325_v37 = vpop.f32.mrb[18].mxu0  ;;  %3679 = vmatprep.mubr.bf16.mxu1 %v1589_v61  ;;  %3839 = vmatprep.mubr.bf16.mxu0 %v1589_v61  ;;  %v13057_v61 = vld [vmem:[%s18043_s3 + $0x320] ss:$12 sps:$4 sm:$0xff]   ;;  %v13023_v46 = vld [vmem:[%s18043_s3 + $0x258] ss:$12 sps:$4 sm:$0xff]  }
 0x1a0   :  { %v12389_v7 = vadd.f32 %v1325_v37, %v15414_v3  ;;  %v1327_v20 = vpop.f32.mrb[19].mxu0  ;;  %3680 = vmatmul.mubr.bf16.gmra.mrb[92].mxu1 %v1588_v59  ;;  %3840 = vmatmul.mubr.bf16.gmra.mrb[92].mxu0 %v1588_v59  ;;  %v1573_v17 = vmax.f32 %v12387_v60, 0.0  ;;  %v13025_v59 = vld [vmem:[%s18043_s3 + $0x25c] ss:$12 sps:$4 sm:$0xff]   ;;  %v13028_v37 = vld [vmem:[%s18043_s3 + $0x274] ss:$12 sps:$4 sm:$0xff]  }
 0x1a1   :  { %v12390_v48 = vadd.f32 %v1327_v20, %v15418_v40  ;;  %v1574_v45 = vmax.f32 %v12388_v42, 0.0  ;;  %v13058_v42 = vld [vmem:[%s18043_s3 + $0x260] ss:$12 sps:$4 sm:$0xff]  }
 0x1a2   :  { %v1576_v29 = vmax.f32 %v12389_v7, 0.0  ;;  %v13062_v7 = vld [vmem:[%s18043_s3 + $0x338] ss:$12 sps:$4 sm:$0xff]  }
 0x1a3   :  { %v1577_v0 = vmax.f32 %v12390_v48, 0.0 }
 0x1a4   :  { %v1591_v4 = vpack.c.bf16 %v1576_v29, %v1573_v17  ;;  %v13026_v17 = vld [vmem:[%s18043_s3 + $0x270] ss:$12 sps:$4 sm:$0xff]   ;;  %v13063_v29 = vld [vmem:[%s18043_s3 + $0x278] ss:$12 sps:$4 sm:$0xff]  }
 0x1a5   :  { %v1592_v2 = vpack.c.bf16 %v1577_v0, %v1574_v45  ;;  %v11941_v31 = vpop.f32.mrb[20].mxu0 }
 0x1a6   :  { %1607 = vst [vmem:[#allocation2 + $0x60] sm:$0xff] %v1591_v4  ;;  %v11942_v32 = vpop.f32.mrb[21].mxu0 }
 0x1a7   :  { %1608 = vst [vmem:[#allocation2 + $0x68] sm:$0xff] %v1592_v2  ;;  %3689 = vmatprep.mubr.bf16.mxu1 %v1592_v2  ;;  %3847 = vmatprep.mubr.bf16.mxu0 %v1592_v2  ;;  %v15482_v34 = vadd.f32 %v11942_v32, %v11941_v31  ;;  %v11944_v3 = vpop.f32.mrb[22].mxu0  ;;  %v13033_v2 = vld [vmem:[%s18043_s3 + $0x28c] ss:$12 sps:$4 sm:$0xff]   ;;  %v13067_v31 = vld [vmem:[%s18043_s3 + $0x350] ss:$12 sps:$4 sm:$0xff]  }
 0x1a8   :  { %3690 = vmatmul.mubr.bf16.gmra.mrb[96].mxu1 %v1591_v4  ;;  %3848 = vmatmul.mubr.bf16.gmra.mrb[96].mxu0 %v1591_v4  ;;  %v11945_v49 = vpop.f32.mrb[23].mxu0  ;;  %v3198_v4 = vld [vmem:[#allocation2 + $0x58] sm:$0xff]  ;;  %v15605_v32 = vld [vmem:[%s18044_s2] sm:$0x7] }
 0x1a9   :  { %3732 = vmatprep.mubr.bf16.mxu1 %v18091_v25  ;;  %12267 = vmatprep.mubr.msk.bf16.mxu0 %vm13914_vm2, %v13913_v33  ;;  %v15487_v40 = vadd.f32 %v11945_v49, %v11944_v3 }
 0x1ad   :  { %v11947_v8 = vpop.f32.mrb[24].mxu0 }
 0x1ae   :  { %v11948_v35 = vpop.f32.mrb[25].mxu0 }
 0x1af   :  { %v15495_v16 = vadd.f32 %v11948_v35, %v11947_v8  ;;  %v11950_v9 = vpop.f32.mrb[26].mxu0  ;;  %v13031_v8 = vld [vmem:[%s18043_s3 + $0x288] ss:$12 sps:$4 sm:$0xff]   ;;  %v13071_v35 = vld [vmem:[%s18043_s3 + $0x290] ss:$12 sps:$4 sm:$0xff]  }
 0x1b0   :  { %10540 = vmatmul.mubr.msk.bf16.vlgmr.msra.gmra.mrb[80].mxu1 %vm1596_vm1, %v3189_v14  ;;  %12268 = vmatmul.mubr.msk.bf16.vlgmr.msra.gmra.mrb[100].mxu0 %vm1596_vm1, %v3189_v14  ;;  %v11951_v39 = vpop.f32.mrb[27].mxu0 }
 0x1b1   :  { %3742 = vmatprep.mubr.bf16.mxu1 %v18091_v25  ;;  %12271 = vmatprep.mubr.msk.bf16.mxu0 %vm13914_vm2, %v13913_v33  ;;  %v15508_v27 = vadd.f32 %v11951_v39, %v11950_v9 }
 0x1b2   :  { %4391 = vmatpush1.bf16.msra.mxu1 %v13008_v11  ;;  %12073 = vmatpush3.bf16.msra.mxu0 %v13030_v12  ;;  %v15622_v11 = vrot.slane %v15605_v32, %v15144_v38  ;;  %v13038_v12 = vld [vmem:[%s18043_s3 + $0x2a4] ss:$12 sps:$4 sm:$0xff]  }
 0x1b3   :  { %4392 = vmatprep.subr.bf16.mxu1 %v13013_v62  ;;  %12074 = vmatprep.subr.bf16.mxu0 %v13034_v18  ;;  %v13036_v62 = vld [vmem:[%s18043_s3 + $0x2a0] ss:$12 sps:$4 sm:$0xff]  }
 0x1b4   :  { %v2942_v18 = vadd.f32 %v15482_v34, %v15622_v11 }
 0x1b5   :  { %v11953_v51 = vpop.f32.mrb[28].mxu0 }
 0x1b6   :  { %v11954_v54 = vpop.f32.mrb[29].mxu0  ;;  %4393 = vmatpush1.bf16.msra.mxu1 %v13011_v47  ;;  %12075 = vmatpush3.bf16.msra.mxu0 %v13035_v22  ;;  %v3201_v22 = vld [vmem:[#allocation2 + $0x70] sm:$0xff] }
 0x1b7   :  { %v15528_v23 = vadd.f32 %v11954_v54, %v11953_v51  ;;  %v11956_v63 = vpop.f32.mrb[30].mxu0  ;;  %4394 = vmatprep.subr.bf16.mxu1 %v13016_v24  ;;  %12076 = vmatprep.subr.bf16.mxu0 %v13039_v21  ;;  %v13043_v24 = vld [vmem:[%s18043_s3 + $0x2bc] ss:$12 sps:$4 sm:$0xff]   ;;  %v2945_v51 = vadd.f32 %v15487_v40, %v15622_v11 }
 0x1b8   :  { %10541 = vmatmul.mubr.msk.bf16.gmra.mrb[84].mxu1 %vm1596_vm1, %v3192_v28  ;;  %12272 = vmatmul.mubr.msk.bf16.gmra.mrb[104].mxu0 %vm1596_vm1, %v3192_v28  ;;  %v11957_v44 = vpop.f32.mrb[31].mxu0  ;;  %v13045_v40 = vld [vmem:[%s18043_s3 + $0x2d0] ss:$12 sps:$4 sm:$0xff]  }
 0x1b9   :  { %v15538_v36 = vadd.f32 %v11957_v44, %v11956_v63  ;;  %3752 = vmatprep.mubr.bf16.mxu1 %v18091_v25  ;;  %12275 = vmatprep.mubr.msk.bf16.mxu0 %vm13914_vm2, %v13913_v33 }
 0x1ba   :  { %4395 = vmatpush1.bf16.msra.mxu1 %v13014_v50  ;;  %12077 = vmatpush3.bf16.msra.mxu0 %v13040_v53  ;;  %v13041_v50 = vld [vmem:[%s18043_s3 + $0x2b8] ss:$12 sps:$4 sm:$0xff]   ;;  %v13047_v53 = vld [vmem:[%s18043_s3 + $0x2d4] ss:$12 sps:$4 sm:$0xff]  }
 0x1bb   :  { %4396 = vmatprep.subr.bf16.mxu1 %v13019_v15  ;;  %12078 = vmatprep.subr.bf16.mxu0 %v13044_v30  ;;  %v2950_v30 = vadd.f32 %v15495_v16, %v15622_v11  ;;  %v13056_v16 = vld [vmem:[%s18043_s3 + $0x304] ss:$12 sps:$4 sm:$0xff]  }
 0x1bd   :  { %v11959_v13 = vpop.f32.mrb[32].mxu0 }
 0x1be   :  { %v11960_v1 = vpop.f32.mrb[33].mxu0  ;;  %4397 = vmatpush1.bf16.msra.mxu1 %v13017_v10  ;;  %12079 = vmatpush3.bf16.msra.mxu0 %v13048_v56  ;;  %v13051_v56 = vld [vmem:[%s18043_s3 + $0x2ec] ss:$12 sps:$4 sm:$0xff]  }
 0x1bf   :  { %v15561_v6 = vadd.f32 %v11960_v1, %v11959_v13  ;;  %v11962_v57 = vpop.f32.mrb[34].mxu0  ;;  %4398 = vmatprep.subr.bf16.mxu1 %v13022_v26  ;;  %12080 = vmatprep.subr.bf16.mxu0 %v13052_v52  ;;  %v2953_v52 = vadd.f32 %v15508_v27, %v15622_v11  ;;  %v13054_v27 = vld [vmem:[%s18043_s3 + $0x300] ss:$12 sps:$4 sm:$0xff]  }
 0x1c0   :  { %v11963_v19 = vpop.f32.mrb[35].mxu0  ;;  %10542 = vmatmul.mubr.msk.bf16.gmra.mrb[88].mxu1 %vm1596_vm1, %v3195_v43  ;;  %12276 = vmatmul.mubr.msk.bf16.gmra.mrb[108].mxu0 %vm1596_vm1, %v3195_v43 }
 0x1c1   :  { %v15571_v60 = vadd.f32 %v11963_v19, %v11962_v57  ;;  %3762 = vmatprep.mubr.bf16.mxu1 %v18091_v25  ;;  %12279 = vmatprep.mubr.msk.bf16.mxu0 %vm13914_vm2, %v13913_v33 }
 0x1c2   :  { %4399 = vmatpush1.bf16.msra.mxu1 %v13020_v41  ;;  %12081 = vmatpush3.bf16.msra.mxu0 %v13053_v55  ;;  %v13049_v41 = vld [vmem:[%s18043_s3 + $0x2e8] ss:$12 sps:$4 sm:$0xff]  }
 0x1c3   :  { %4400 = vmatprep.subr.bf16.mxu1 %v13025_v59  ;;  %12082 = vmatprep.subr.bf16.mxu0 %v13057_v61  ;;  %v2958_v59 = vadd.f32 %v15528_v23, %v15622_v11  ;;  %v13066_v23 = vld [vmem:[%s18043_s3 + $0x334] ss:$12 sps:$4 sm:$0xff]  }
 0x1c5   :  { %v11965_v20 = vpop.f32.mrb[36].mxu0 }
 0x1c6   :  { %v11966_v48 = vpop.f32.mrb[37].mxu0  ;;  %4401 = vmatpush1.bf16.msra.mxu1 %v13023_v46  ;;  %12083 = vmatpush3.bf16.msra.mxu0 %v13058_v42  ;;  %v13061_v46 = vld [vmem:[%s18043_s3 + $0x31c] ss:$12 sps:$4 sm:$0xff]  }
 0x1c7   :  { %v15594_v45 = vadd.f32 %v11966_v48, %v11965_v20  ;;  %v11968_v0 = vpop.f32.mrb[38].mxu0  ;;  %4402 = vmatprep.subr.bf16.mxu1 %v13028_v37  ;;  %12084 = vmatprep.subr.bf16.mxu0 %v13062_v7  ;;  %v2961_v37 = vadd.f32 %v15538_v36, %v15622_v11  ;;  %v13059_v48 = vld [vmem:[%s18043_s3 + $0x318] ss:$12 sps:$4 sm:$0xff]   ;;  %v13064_v36 = vld [vmem:[%s18043_s3 + $0x330] ss:$12 sps:$4 sm:$0xff]  }
 0x1c8   :  { %v11969_v3 = vpop.f32.mrb[39].mxu0  ;;  %10543 = vmatmul.mubr.msk.bf16.gmra.mrb[92].mxu1 %vm1596_vm1, %v3198_v4  ;;  %12280 = vmatmul.mubr.msk.bf16.gmra.mrb[112].mxu0 %vm1596_vm1, %v3198_v4  ;;  %v2966_v4 = vadd.f32 %v15561_v6, %v15622_v11  ;;  %v15707_v6 = vrot.slane %v15605_v32, %v15407_v58 }
 0x1c9   :  { %v15609_v49 = vadd.f32 %v11969_v3, %v11968_v0  ;;  %3772 = vmatprep.mubr.bf16.mxu1 %v18091_v25  ;;  %12283 = vmatprep.mubr.msk.bf16.mxu0 %vm13914_vm2, %v13913_v33  ;;  %v13070_v3 = vld [vmem:[%s18043_s3 + $0x34c] ss:$12 sps:$4 sm:$0xff]  }
 0x1ca   :  { %4403 = vmatpush1.bf16.msra.mxu1 %v13026_v17  ;;  %12085 = vmatpush3.bf16.msra.mxu0 %v13063_v29 }
 0x1cb   :  { %4404 = vmatprep.subr.bf16.mxu1 %v13033_v2  ;;  %12086 = vmatprep.subr.bf16.mxu0 %v13067_v31 }
 0x1cd   :  { %v11987_v14 = vpop.f32.mrb[40].mxu0 }
 0x1ce   :  { %v11988_v9 = vpop.f32.mrb[41].mxu0  ;;  %4405 = vmatpush1.bf16.msra.mxu1 %v13031_v8  ;;  %12087 = vmatpush3.bf16.msra.mxu0 %v13071_v35  ;;  %v2969_v35 = vadd.f32 %v15571_v60, %v15622_v11  ;;  %v15716_v60 = vrot.slane %v15605_v32, %v15410_v5  ;;  %v2977_v32 = vadd.f32 %v15609_v49, %v15622_v11 }
 0x1cf   :  { %v11989_v39 = vadd.f32 %v11988_v9, %v11987_v14  ;;  %v11990_v47 = vpop.f32.mrb[42].mxu0  ;;  %4406 = vmatprep.subr.bf16.mxu1 %v13038_v12  ;;  %12287 = vmatprep.subr.bf16.mxu0 %v13913_v33  ;;  %v13068_v9 = vld [vmem:[%s18043_s3 + $0x348] ss:$12 sps:$4 sm:$0xff]  }
 0x1d0   :  { %v11991_v21 = vpop.f32.mrb[43].mxu0  ;;  %10544 = vmatmul.mubr.msk.bf16.gmra.mrb[96].mxu1 %vm1596_vm1, %v3201_v22  ;;  %12284 = vmatmul.mubr.msk.bf16.gmra.mrb[116].mxu0 %vm1596_vm1, %v3201_v22 }
 0x1d1   :  { %v11992_v54 = vadd.f32 %v11991_v21, %v11990_v47  ;;  %v15640_v34 = vadd.f32 %v11989_v39, %v2942_v18  ;;  %v13077_v18 = vld [vmem:[%s18043_s3 + $0x364] ss:$12 sps:$4 sm:$0xff]  }
 0x1d2   :  { %4407 = vmatpush1.bf16.msra.mxu1 %v13036_v62 }
 0x1d3   :  { %4408 = vmatprep.subr.bf16.mxu1 %v13043_v24  ;;  %v15648_v28 = vadd.f32 %v11992_v54, %v2945_v51  ;;  %v2974_v24 = vadd.f32 %v15594_v45, %v15622_v11 }
 0x1d5   :  { %v11993_v63 = vpop.f32.mrb[44].mxu0 }
 0x1d6   :  { %v11994_v15 = vpop.f32.mrb[45].mxu0  ;;  %4409 = vmatpush1.bf16.msra.mxu1 %v13041_v50 }
 0x1d7   :  { %v11995_v44 = vadd.f32 %v11994_v15, %v11993_v63  ;;  %v11996_v10 = vpop.f32.mrb[46].mxu0  ;;  %4410 = vmatprep.subr.bf16.mxu1 %v13047_v53 }
 0x1d8   :  { %v11997_v26 = vpop.f32.mrb[47].mxu0 }
 0x1d9   :  { %v11998_v13 = vadd.f32 %v11997_v26, %v11996_v10  ;;  %v15660_v1 = vadd.f32 %v11995_v44, %v2950_v30 }
 0x1da   :  { %4411 = vmatpush1.bf16.msra.mxu1 %v13045_v40 }
 0x1db   :  { %4412 = vmatprep.subr.bf16.mxu1 %v13051_v56  ;;  %v15668_v55 = vadd.f32 %v11998_v13, %v2953_v52 }
 0x1dd   :  { %v11999_v57 = vpop.f32.mrb[48].mxu0 }
 0x1de   :  { %v12000_v43 = vpop.f32.mrb[49].mxu0  ;;  %4413 = vmatpush1.bf16.msra.mxu1 %v13049_v41 }
 0x1df   :  { %v12001_v61 = vadd.f32 %v12000_v43, %v11999_v57  ;;  %v12002_v19 = vpop.f32.mrb[50].mxu0  ;;  %4414 = vmatprep.subr.bf16.mxu1 %v13056_v16 }
 0x1e0   :  { %v12003_v42 = vpop.f32.mrb[51].mxu0 }
 0x1e1   :  { %v12004_v7 = vadd.f32 %v12003_v42, %v12002_v19  ;;  %v15680_v20 = vadd.f32 %v12001_v61, %v2958_v59  ;;  %v13072_v59 = vld [vmem:[%s18043_s3 + $0x368] ss:$12 sps:$4 sm:$0xff]   ;;  %v13075_v61 = vld [vmem:[%s18043_s3 + $0x360] ss:$12 sps:$4 sm:$0xff]  }
 0x1e2   :  { %4415 = vmatpush1.bf16.msra.mxu1 %v13054_v27 }
 0x1e3   :  { %4416 = vmatprep.subr.bf16.mxu1 %v13061_v46  ;;  %v15688_v17 = vadd.f32 %v12004_v7, %v2961_v37  ;;  %v13080_v37 = vld [vmem:[%s18043_s3 + $0x37c] ss:$12 sps:$4 sm:$0xff]  }
 0x1e5   :  { %v12005_v29 = vpop.f32.mrb[52].mxu0 }
 0x1e6   :  { %v12006_v0 = vpop.f32.mrb[53].mxu0  ;;  %4417 = vmatpush1.bf16.msra.mxu1 %v13059_v48 }
 0x1e7   :  { %v12007_v2 = vadd.f32 %v12006_v0, %v12005_v29  ;;  %v12008_v31 = vpop.f32.mrb[54].mxu0  ;;  %4418 = vmatprep.subr.bf16.mxu1 %v13066_v23 }
 0x1e8   :  { %v12009_v8 = vpop.f32.mrb[55].mxu0 }
 0x1e9   :  { %v12010_v12 = vadd.f32 %v12009_v8, %v12008_v31  ;;  %v15700_v14 = vadd.f32 %v12007_v2, %v2966_v4  ;;  %v13073_v31 = vld [vmem:[%s18043_s3 + $0x380] ss:$12 sps:$4 sm:$0xff]  }
 0x1ea   :  { %4419 = vmatpush1.bf16.msra.mxu1 %v13064_v36 }
 0x1eb   :  { %4420 = vmatprep.subr.bf16.mxu1 %v13070_v3  ;;  %v15709_v62 = vadd.f32 %v12010_v12, %v2969_v35  ;;  %v13084_v35 = vld [vmem:[%s18043_s3 + $0x394] ss:$12 sps:$4 sm:$0xff]  }
 0x1ed   :  { %v12011_v39 = vpop.f32.mrb[56].mxu0 }
 0x1ee   :  { %v2858_v47 = vpop.f32.mrb[60].mxu1  ;;  %v12012_v22 = vpop.f32.mrb[57].mxu0  ;;  %4421 = vmatpush1.bf16.msra.mxu1 %v13068_v9 }
 0x1ef   :  { %v12391_v21 = vadd.f32 %v2858_v47, %v15707_v6  ;;  %v2860_v51 = vpop.f32.mrb[61].mxu1  ;;  %v12013_v54 = vadd.f32 %v12012_v22, %v12011_v39  ;;  %v12014_v50 = vpop.f32.mrb[58].mxu0  ;;  %4473 = vmatprep.subr.bf16.mxu1 %v13077_v18 }
 0x1f0   :  { %v12392_v53 = vadd.f32 %v2860_v51, %v15716_v60  ;;  %v2862_v63 = vpop.f32.mrb[62].mxu1  ;;  %v12015_v15 = vpop.f32.mrb[59].mxu0 }
 0x1f1   :  { %v12393_v40 = vadd.f32 %v2862_v63, %v15707_v6  ;;  %v2864_v30 = vpop.f32.mrb[63].mxu1  ;;  %v12016_v44 = vadd.f32 %v12015_v15, %v12014_v50  ;;  %v15725_v10 = vadd.f32 %v12013_v54, %v2974_v24  ;;  %v3126_v56 = vmax.f32 %v12391_v21, 0.0  ;;  %v13074_v54 = vld [vmem:[%s18043_s3 + $0x398] ss:$12 sps:$4 sm:$0xff]   ;;  %v13082_v50 = vld [vmem:[%s18043_s3 + $0x390] ss:$12 sps:$4 sm:$0xff]  }
 0x1f2   :  { %v12394_v45 = vadd.f32 %v2864_v30, %v15716_v60  ;;  %v3127_v13 = vmax.f32 %v12392_v53, 0.0 }
 0x1f3   :  { %v3129_v26 = vmax.f32 %v12393_v40, 0.0  ;;  %v15728_v52 = vadd.f32 %v12016_v44, %v2977_v32 }
 0x1f4   :  { %v3130_v41 = vmax.f32 %v12394_v45, 0.0 }
 0x1f5   :  { %v3156_v16 = vpack.c.bf16 %v3129_v26, %v3126_v56  ;;  %v3087_v57 = vpop.f32.mrb[60].mxu0 }
 0x1f6   :  { %v3157_v43 = vpack.c.bf16 %v3130_v41, %v3127_v13  ;;  %v2868_v27 = vpop.f32.mrb[64].mxu1  ;;  %v3088_v49 = vadd.f32 %v3087_v57, %v15640_v34  ;;  %v3089_v11 = vpop.f32.mrb[61].mxu0 }
 0x1f7   :  { %3172 = vst [vmem:[#allocation2 + $0x78] sm:$0xff] %v3156_v16  ;;  %v12395_v19 = vadd.f32 %v2868_v27, %v15707_v6  ;;  %v2870_v46 = vpop.f32.mrb[65].mxu1  ;;  %v3090_v42 = vpop.f32.mrb[62].mxu0  ;;  %v13090_v27 = vld [vmem:[%s18043_s3 + $0x3c4] ss:$12 sps:$4 sm:$0xff]  }
 0x1f8   :  { %3173 = vst [vmem:[#allocation2 + $0x80] sm:$0xff] %v3157_v43  ;;  %v12396_v34 = vadd.f32 %v2870_v46, %v15716_v60  ;;  %v2872_v7 = vpop.f32.mrb[66].mxu1  ;;  %v3091_v48 = vadd.f32 %v3090_v42, %v15648_v28  ;;  %v3092_v23 = vpop.f32.mrb[63].mxu0  ;;  %4422 = vmatprep.mubr.bf16.mxu1 %v3157_v43  ;;  %4588 = vmatprep.mubr.bf16.mxu0 %v3157_v43  ;;  %v3128_v36 = vmax.f32 %v3088_v49, 0.0  ;;  %v13078_v28 = vld [vmem:[%s18043_s3 + $0x378] ss:$12 sps:$4 sm:$0xff]  }
 0x1f9   :  { %v12397_v29 = vadd.f32 %v2872_v7, %v15707_v6  ;;  %v2874_v0 = vpop.f32.mrb[67].mxu1  ;;  %4423 = vmatmul.mubr.bf16.vlgmr.msra.gmra.mrb[80].mxu1 %v3156_v16  ;;  %4589 = vmatmul.mubr.bf16.vlgmr.msra.gmra.mrb[120].mxu0 %v3156_v16  ;;  %v3132_v3 = vmax.f32 %v12395_v19, 0.0  ;;  %v13081_v16 = vld [vmem:[%s18043_s3 + $0x3b0] ss:$12 sps:$4 sm:$0xff]   ;;  %v13097_v49 = vld [vmem:[%s18043_s3 + $0x488] ss:$12 sps:$4 sm:$0xff]  }
 0x1fa   :  { %v12398_v4 = vadd.f32 %v2874_v0, %v15716_v60  ;;  %v3131_v2 = vmax.f32 %v3091_v48, 0.0  ;;  %12288 = vmatpush3.bf16.msra.mxu0 %v13072_v59  ;;  %4474 = vmatpush1.bf16.msra.mxu1 %v13075_v61  ;;  %v3133_v12 = vmax.f32 %v12396_v34, 0.0 }
 0x1fb   :  { %v3135_v8 = vmax.f32 %v12397_v29, 0.0  ;;  %12289 = vmatprep.subr.bf16.mxu0 %v13913_v33  ;;  %4475 = vmatprep.subr.bf16.mxu1 %v13080_v37 }
 0x1fc   :  { %v3136_v9 = vmax.f32 %v12398_v4, 0.0  ;;  %v3158_v18 = vpack.c.bf16 %v3131_v2, %v3128_v36 }
 0x1fd   :  { %v3159_v39 = vpack.c.bf16 %v3135_v8, %v3132_v3  ;;  %v3095_v47 = vpop.f32.mrb[64].mxu0 }
 0x1fe   :  { %v3160_v22 = vpack.c.bf16 %v3136_v9, %v3133_v12  ;;  %3174 = vst.msk [vmem:[#allocation2 + $0x88] sm:$0xff] %vm1596_vm1, %v3158_v18  ;;  %v2878_v24 = vpop.f32.mrb[68].mxu1  ;;  %v3096_v21 = vadd.f32 %v3095_v47, %v15660_v1  ;;  %v3097_v51 = vpop.f32.mrb[65].mxu0  ;;  %12290 = vmatpush3.bf16.msra.mxu0 %v13073_v31  ;;  %4476 = vmatpush1.bf16.msra.mxu1 %v13078_v28  ;;  %v13087_v1 = vld [vmem:[%s18043_s3 + $0x3ac] ss:$12 sps:$4 sm:$0xff]  }
 0x1ff   :  { %3175 = vst [vmem:[#allocation2 + $0x90] sm:$0xff] %v3159_v39  ;;  %v12399_v53 = vadd.f32 %v2878_v24, %v15707_v6  ;;  %v2880_v63 = vpop.f32.mrb[69].mxu1  ;;  %v3098_v15 = vpop.f32.mrb[66].mxu0  ;;  %12291 = vmatprep.subr.bf16.mxu0 %v13913_v33  ;;  %4477 = vmatprep.subr.bf16.mxu1 %v13084_v35 }
 0x200   :  { %3176 = vst [vmem:[#allocation2 + $0x98] sm:$0xff] %v3160_v22  ;;  %v12400_v32 = vadd.f32 %v2880_v63, %v15716_v60  ;;  %v2882_v40 = vpop.f32.mrb[70].mxu1  ;;  %v3099_v30 = vadd.f32 %v3098_v15, %v15668_v55  ;;  %v3100_v44 = vpop.f32.mrb[67].mxu0  ;;  %4432 = vmatprep.mubr.bf16.mxu1 %v3160_v22  ;;  %4596 = vmatprep.mubr.bf16.mxu0 %v3160_v22  ;;  %v3134_v26 = vmax.f32 %v3096_v21, 0.0  ;;  %v13085_v55 = vld [vmem:[%s18043_s3 + $0x3a8] ss:$12 sps:$4 sm:$0xff]  }
 0x201   :  { %v12401_v45 = vadd.f32 %v2882_v40, %v15707_v6  ;;  %v2884_v56 = vpop.f32.mrb[71].mxu1  ;;  %4433 = vmatmul.mubr.bf16.gmra.mrb[84].mxu1 %v3159_v39  ;;  %4597 = vmatmul.mubr.bf16.gmra.mrb[124].mxu0 %v3159_v39  ;;  %v3138_v57 = vmax.f32 %v12399_v53, 0.0 }
 0x202   :  { %v12402_v13 = vadd.f32 %v2884_v56, %v15716_v60  ;;  %v3137_v41 = vmax.f32 %v3099_v30, 0.0  ;;  %12292 = vmatpush3.bf16.msra.mxu0 %v13074_v54  ;;  %4478 = vmatpush1.bf16.msra.mxu1 %v13082_v50  ;;  %v3139_v11 = vmax.f32 %v12400_v32, 0.0 }
 0x203   :  { %v3141_v43 = vmax.f32 %v12401_v45, 0.0  ;;  %12293 = vmatprep.subr.bf16.mxu0 %v13913_v33  ;;  %4479 = vmatprep.subr.bf16.mxu1 %v13087_v1 }
 0x204   :  { %v3142_v59 = vmax.f32 %v12402_v13, 0.0  ;;  %v3161_v61 = vpack.c.bf16 %v3137_v41, %v3134_v26 }
 0x205   :  { %v3162_v19 = vpack.c.bf16 %v3141_v43, %v3138_v57  ;;  %v3103_v46 = vpop.f32.mrb[68].mxu0 }
 0x206   :  { %v3163_v42 = vpack.c.bf16 %v3142_v59, %v3139_v11  ;;  %3177 = vst.msk [vmem:[#allocation2 + $0xa0] sm:$0xff] %vm1596_vm1, %v3161_v61  ;;  %v2888_v37 = vpop.f32.mrb[72].mxu1  ;;  %v3104_v34 = vadd.f32 %v3103_v46, %v15680_v20  ;;  %v3105_v7 = vpop.f32.mrb[69].mxu0  ;;  %12294 = vmatpush3.bf16.msra.mxu0 %v13081_v16  ;;  %4480 = vmatpush1.bf16.msra.mxu1 %v13085_v55  ;;  %v13098_v46 = vld [vmem:[%s18043_s3 + $0x3c8] ss:$12 sps:$4 sm:$0xff]  }
 0x207   :  { %3178 = vst [vmem:[#allocation2 + $0xa8] sm:$0xff] %v3162_v19  ;;  %v12403_v48 = vadd.f32 %v2888_v37, %v15707_v6  ;;  %v2890_v23 = vpop.f32.mrb[73].mxu1  ;;  %v3106_v29 = vpop.f32.mrb[70].mxu0  ;;  %5164 = vmatprep.subr.bf16.mxu0 %v13090_v27  ;;  %12127 = vmatprep.subr.bf16.mxu1 %v13097_v49  ;;  %v13091_v37 = vld [vmem:[%s18043_s3 + $0x3d8] ss:$12 sps:$4 sm:$0xff]  }
 0x208   :  { %3179 = vst [vmem:[#allocation2 + $0xb0] sm:$0xff] %v3163_v42  ;;  %v12404_v0 = vadd.f32 %v2890_v23, %v15716_v60  ;;  %v2892_v36 = vpop.f32.mrb[74].mxu1  ;;  %v3107_v4 = vadd.f32 %v3106_v29, %v15688_v17  ;;  %v3108_v2 = vpop.f32.mrb[71].mxu0  ;;  %4442 = vmatprep.mubr.bf16.mxu1 %v3163_v42  ;;  %4604 = vmatprep.mubr.bf16.mxu0 %v3163_v42  ;;  %v3140_v28 = vmax.f32 %v3104_v34, 0.0  ;;  %v13102_v42 = vld [vmem:[%s18043_s3 + $0x4a0] ss:$12 sps:$4 sm:$0xff]  }
 0x209   :  { %v12405_v20 = vadd.f32 %v2892_v36, %v15707_v6  ;;  %v2894_v31 = vpop.f32.mrb[75].mxu1  ;;  %4443 = vmatmul.mubr.bf16.gmra.mrb[88].mxu1 %v3162_v19  ;;  %4605 = vmatmul.mubr.bf16.gmra.mrb[128].mxu0 %v3162_v19  ;;  %v3144_v35 = vmax.f32 %v12403_v48, 0.0  ;;  %v15812_v19 = vld [vmem:[#allocation2 + $0x88] sm:$0xff]  ;;  %v13096_v34 = vld [vmem:[%s18043_s3 + $0x3f4] ss:$12 sps:$4 sm:$0xff]  }
 0x20a   :  { %v12406_v3 = vadd.f32 %v2894_v31, %v15716_v60  ;;  %v3143_v8 = vmax.f32 %v3107_v4, 0.0  ;;  %v3145_v9 = vmax.f32 %v12404_v0, 0.0  ;;  %v13103_v7 = vld [vmem:[%s18043_s3 + $0x3e0] ss:$12 sps:$4 sm:$0xff]   ;;  %v13094_v48 = vld [vmem:[%s18043_s3 + $0x3f0] ss:$12 sps:$4 sm:$0xff]  }
 0x20b   :  { %v3147_v12 = vmax.f32 %v12405_v20, 0.0  ;;  %v13101_v23 = vld [vmem:[%s18043_s3 + $0x40c] ss:$12 sps:$4 sm:$0xff]   ;;  %v13099_v4 = vld [vmem:[%s18043_s3 + $0x408] ss:$12 sps:$4 sm:$0xff]  }
 0x20c   :  { %v3148_v18 = vmax.f32 %v12406_v3, 0.0  ;;  %v3164_v39 = vpack.c.bf16 %v3143_v8, %v3140_v28  ;;  %v13107_v0 = vld [vmem:[%s18043_s3 + $0x4b8] ss:$12 sps:$4 sm:$0xff]   ;;  %v13112_v2 = vld [vmem:[%s18043_s3 + $0x4d0] ss:$12 sps:$4 sm:$0xff]  }
 0x20d   :  { %v3165_v47 = vpack.c.bf16 %v3147_v12, %v3144_v35  ;;  %v3111_v22 = vpop.f32.mrb[72].mxu0  ;;  %v15842_v29 = vld [vmem:[#allocation2 + $0xa0] sm:$0xff]  ;;  %v13113_v28 = vld [vmem:[%s18043_s3 + $0x410] ss:$12 sps:$4 sm:$0xff]   ;;  %v13117_v35 = vld [vmem:[%s18043_s3 + $0x4e8] ss:$12 sps:$4 sm:$0xff]  }
 0x20e   :  { %v3166_v17 = vpack.c.bf16 %v3148_v18, %v3145_v9  ;;  %3180 = vst.msk [vmem:[#allocation2 + $0xb8] sm:$0xff] %vm1596_vm1, %v3164_v39  ;;  %v2898_v24 = vpop.f32.mrb[76].mxu1  ;;  %v3112_v21 = vadd.f32 %v3111_v22, %v15700_v14  ;;  %v3113_v51 = vpop.f32.mrb[73].mxu0  ;;  %v13108_v36 = vld [vmem:[%s18043_s3 + $0x3f8] ss:$12 sps:$4 sm:$0xff]  }
 0x20f   :  { %3181 = vst [vmem:[#allocation2 + $0xc0] sm:$0xff] %v3165_v47  ;;  %v12407_v54 = vadd.f32 %v2898_v24, %v15707_v6  ;;  %v2900_v50 = vpop.f32.mrb[77].mxu1  ;;  %v3114_v53 = vpop.f32.mrb[74].mxu0  ;;  %v13106_v20 = vld [vmem:[%s18043_s3 + $0x424] ss:$12 sps:$4 sm:$0xff]  }
 0x210   :  { %3182 = vst [vmem:[#allocation2 + $0xc8] sm:$0xff] %v3166_v17  ;;  %v12408_v63 = vadd.f32 %v2900_v50, %v15716_v60  ;;  %v2902_v15 = vpop.f32.mrb[78].mxu1  ;;  %v3115_v1 = vadd.f32 %v3114_v53, %v15709_v62  ;;  %v3116_v32 = vpop.f32.mrb[75].mxu0  ;;  %4452 = vmatprep.mubr.bf16.mxu1 %v3166_v17  ;;  %4612 = vmatprep.mubr.bf16.mxu0 %v3166_v17  ;;  %v3146_v14 = vmax.f32 %v3112_v21, 0.0  ;;  %v13104_v31 = vld [vmem:[%s18043_s3 + $0x420] ss:$12 sps:$4 sm:$0xff]  }
 0x211   :  { %v12409_v40 = vadd.f32 %v2902_v15, %v15707_v6  ;;  %v2904_v30 = vpop.f32.mrb[79].mxu1  ;;  %4453 = vmatmul.mubr.bf16.gmra.mrb[92].mxu1 %v3165_v47  ;;  %4613 = vmatmul.mubr.bf16.gmra.mrb[132].mxu0 %v3165_v47  ;;  %v3150_v56 = vmax.f32 %v12407_v54, 0.0  ;;  %v13111_v3 = vld [vmem:[%s18043_s3 + $0x43c] ss:$12 sps:$4 sm:$0xff]   ;;  %v13109_v12 = vld [vmem:[%s18043_s3 + $0x438] ss:$12 sps:$4 sm:$0xff]  }
 0x212   :  { %v12410_v44 = vadd.f32 %v2904_v30, %v15716_v60  ;;  %v3149_v45 = vmax.f32 %v3115_v1, 0.0  ;;  %v3151_v13 = vmax.f32 %v12408_v63, 0.0  ;;  %v13118_v9 = vld [vmem:[%s18043_s3 + $0x428] ss:$12 sps:$4 sm:$0xff]   ;;  %v13122_v39 = vld [vmem:[%s18043_s3 + $0x500] ss:$12 sps:$4 sm:$0xff]  }
 0x213   :  { %v3153_v26 = vmax.f32 %v12409_v40, 0.0  ;;  %v13116_v18 = vld [vmem:[%s18043_s3 + $0x454] ss:$12 sps:$4 sm:$0xff]   ;;  %v13114_v47 = vld [vmem:[%s18043_s3 + $0x450] ss:$12 sps:$4 sm:$0xff]   ;;  %v4734_v40 = vld [vmem:[#allocation2 + $0x8] sm:$0xff] }
 0x214   :  { %v3154_v41 = vmax.f32 %v12410_v44, 0.0  ;;  %v3167_v16 = vpack.c.bf16 %v3149_v45, %v3146_v14  ;;  %v13123_v22 = vld [vmem:[%s18043_s3 + $0x440] ss:$12 sps:$4 sm:$0xff]   ;;  %v13127_v21 = vld [vmem:[%s18043_s3 + $0x518] ss:$12 sps:$4 sm:$0xff]  }
 0x215   :  { %v3168_v55 = vpack.c.bf16 %v3153_v26, %v3150_v56  ;;  %v3119_v57 = vpop.f32.mrb[76].mxu0  ;;  %v15875_v8 = vld [vmem:[#allocation2 + $0xb8] sm:$0xff]  ;;  %v13119_v51 = vld [vmem:[%s18043_s3 + $0x468] ss:$12 sps:$4 sm:$0xff]   ;;  %v13126_v50 = vld [vmem:[%s18043_s3 + $0x484] ss:$12 sps:$4 sm:$0xff]  }
 0x216   :  { %v3169_v62 = vpack.c.bf16 %v3154_v41, %v3151_v13  ;;  %3183 = vst.msk [vmem:[#allocation2 + $0xd0] sm:$0xff] %vm1596_vm1, %v3167_v16  ;;  %v3120_v43 = vadd.f32 %v3119_v57, %v15725_v10  ;;  %v3121_v6 = vpop.f32.mrb[77].mxu0  ;;  %v13088_v10 = vld [vmem:[%s18043_s3 + $0x3c0] ss:$12 sps:$4 sm:$0xff]   ;;  %v13128_v54 = vld [vmem:[%s18043_s3 + $0x458] ss:$12 sps:$4 sm:$0xff]  }
 0x217   :  { %3184 = vst [vmem:[#allocation2 + $0xd8] sm:$0xff] %v3168_v55  ;;  %v3122_v27 = vpop.f32.mrb[78].mxu0  ;;  %v13121_v17 = vld [vmem:[%s18043_s3 + $0x46c] ss:$12 sps:$4 sm:$0xff]   ;;  %v13132_v53 = vld [vmem:[%s18043_s3 + $0x530] ss:$12 sps:$4 sm:$0xff]  }
 0x218   :  { %3185 = vst [vmem:[#allocation2 + $0xe0] sm:$0xff] %v3169_v62  ;;  %v3123_v49 = vadd.f32 %v3122_v27, %v15728_v52  ;;  %4462 = vmatprep.mubr.bf16.mxu1 %v3169_v62  ;;  %4620 = vmatprep.mubr.bf16.mxu0 %v3169_v62  ;;  %v3124_v60 = vpop.f32.mrb[79].mxu0  ;;  %v3152_v11 = vmax.f32 %v3120_v43, 0.0  ;;  %v13093_v52 = vld [vmem:[%s18043_s3 + $0x3dc] ss:$12 sps:$4 sm:$0xff]   ;;  %v4733_v26 = vld [vmem:[#allocation2] sm:$0xff] }
 0x219   :  { %4463 = vmatmul.mubr.bf16.gmra.mrb[96].mxu1 %v3168_v55  ;;  %4621 = vmatmul.mubr.bf16.gmra.mrb[136].mxu0 %v3168_v55  ;;  %v13124_v63 = vld [vmem:[%s18043_s3 + $0x480] ss:$12 sps:$4 sm:$0xff]   ;;  %v13131_v15 = vld [vmem:[%s18043_s3 + $0x49c] ss:$12 sps:$4 sm:$0xff]   ;;  %v13129_v30 = vld [vmem:[%s18043_s3 + $0x498] ss:$12 sps:$4 sm:$0xff]  }
 0x21a   :  { %v3155_v59 = vmax.f32 %v3123_v49, 0.0  ;;  %4505 = vmatprep.mubr.bf16.mxu1 %v18091_v25  ;;  %12295 = vmatprep.mubr.msk.bf16.mxu0 %vm13914_vm2, %v13913_v33  ;;  %v13133_v32 = vld [vmem:[%s18043_s3 + $0x470] ss:$12 sps:$4 sm:$0xff]   ;;  %v13136_v14 = vld [vmem:[%s18043_s3 + $0x4b4] ss:$12 sps:$4 sm:$0xff]  }
 0x21b   :  { %v13134_v44 = vld [vmem:[%s18043_s3 + $0x4b0] ss:$12 sps:$4 sm:$0xff]   ;;  %v13139_v45 = vld [vmem:[%s18043_s3 + $0x4cc] ss:$12 sps:$4 sm:$0xff]   ;;  %v13155_v56 = vld [vmem:[%s18043_s3 + $0x548] ss:$12 sps:$4 sm:$0xff]  }
 0x21c   :  { %v3170_v61 = vpack.c.bf16 %v3155_v59, %v3152_v11  ;;  %v4737_v13 = vld [vmem:[#allocation2 + $0x20] sm:$0xff]  ;;  %v13137_v41 = vld [vmem:[%s18043_s3 + $0x4c8] ss:$12 sps:$4 sm:$0xff]   ;;  %v4736_v6 = vld [vmem:[#allocation2 + $0x18] sm:$0xff] }
 0x21d   :  { %v15908_v24 = vld [vmem:[#allocation2 + $0xd0] sm:$0xff]  ;;  %v13156_v55 = vld [vmem:[%s18043_s3 + $0x560] ss:$12 sps:$4 sm:$0xff]   ;;  %v13145_v62 = vld [vmem:[%s18043_s3 + $0x4fc] ss:$12 sps:$4 sm:$0xff]  }
 0x21e   :  { %3186 = vst.msk [vmem:[#allocation2 + $0xe8] sm:$0xff] %vm1596_vm1, %v3170_v61  ;;  %v13142_v16 = vld [vmem:[%s18043_s3 + $0x4e4] ss:$12 sps:$4 sm:$0xff]   ;;  %v13140_v57 = vld [vmem:[%s18043_s3 + $0x4e0] ss:$12 sps:$4 sm:$0xff]   ;;  %v4740_v27 = vld [vmem:[#allocation2 + $0x38] sm:$0xff] }
 0x21f   :  { %v13160_v43 = vld [vmem:[%s18043_s3 + $0x578] ss:$12 sps:$4 sm:$0xff]   ;;  %v13148_v60 = vld [vmem:[%s18043_s3 + $0x514] ss:$12 sps:$4 sm:$0xff]   ;;  %v13161_v11 = vld [vmem:[%s18043_s3 + $0x590] ss:$12 sps:$4 sm:$0xff]  }
 0x220   :  { %v13143_v49 = vld [vmem:[%s18043_s3 + $0x4f8] ss:$12 sps:$4 sm:$0xff]   ;;  %v13165_v59 = vld [vmem:[%s18043_s3 + $0x668] ss:$12 sps:$4 sm:$0xff]   ;;  %v13146_v61 = vld [vmem:[%s18043_s3 + $0x510] ss:$12 sps:$4 sm:$0xff]  }
 0x221   :  { %10690 = vmatmul.mubr.msk.bf16.vlgmr.msra.gmra.mrb[80].mxu1 %vm1596_vm1, %v15812_v19  ;;  %12296 = vmatmul.mubr.msk.bf16.vlgmr.msra.gmra.mrb[100].mxu0 %vm1596_vm1, %v15812_v19 }
 0x222   :  { %5165 = vmatpush1.bf16.msra.mxu0 %v13088_v10  ;;  %4515 = vmatprep.mubr.bf16.mxu1 %v18091_v25  ;;  %v13151_v10 = vld [vmem:[%s18043_s3 + $0x52c] ss:$12 sps:$4 sm:$0xff]  }
 0x223   :  { %5166 = vmatprep.subr.bf16.mxu0 %v13093_v52  ;;  %12299 = vmatprep.mubr.msk.bf16.mxu0 %vm13914_vm2, %v13913_v33  ;;  %v4739_v52 = vld [vmem:[#allocation2 + $0x30] sm:$0xff] }
 0x224   :  { %12128 = vmatpush3.bf16.msra.mxu1 %v13098_v46  ;;  %v4743_v46 = vld [vmem:[#allocation2 + $0x50] sm:$0xff] }
 0x225   :  { %12129 = vmatprep.subr.bf16.mxu1 %v13102_v42  ;;  %v15938_v1 = vld [vmem:[#allocation2 + $0xe8] sm:$0xff] }
 0x226   :  { %5167 = vmatpush1.bf16.msra.mxu0 %v13091_v37  ;;  %v13149_v42 = vld [vmem:[%s18043_s3 + $0x528] ss:$12 sps:$4 sm:$0xff]  }
 0x227   :  { %5168 = vmatprep.subr.bf16.mxu0 %v13096_v34  ;;  %v13154_v34 = vld [vmem:[%s18043_s3 + $0x544] ss:$12 sps:$4 sm:$0xff]  }
 0x228   :  { %12130 = vmatpush3.bf16.msra.mxu1 %v13103_v7 }
 0x229   :  { %10691 = vmatmul.mubr.msk.bf16.gmra.mrb[84].mxu1 %vm1596_vm1, %v15842_v29  ;;  %12300 = vmatmul.mubr.msk.bf16.gmra.mrb[104].mxu0 %vm1596_vm1, %v15842_v29 }
 0x22a   :  { %5169 = vmatpush1.bf16.msra.mxu0 %v13094_v48  ;;  %4525 = vmatprep.mubr.bf16.mxu1 %v18091_v25 }
 0x22b   :  { %5170 = vmatprep.subr.bf16.mxu0 %v13101_v23  ;;  %12303 = vmatprep.mubr.msk.bf16.mxu0 %vm13914_vm2, %v13913_v33 }
 0x22c   :  { %12131 = vmatprep.subr.bf16.mxu1 %v13107_v0 }
 0x22d   :  { %12132 = vmatpush3.bf16.msra.mxu1 %v13108_v36  ;;  %v13152_v36 = vld [vmem:[%s18043_s3 + $0x540] ss:$12 sps:$4 sm:$0xff]  }
 0x22e   :  { %5171 = vmatpush1.bf16.msra.mxu0 %v13099_v4  ;;  %12133 = vmatprep.subr.bf16.mxu1 %v13112_v2  ;;  %v13159_v2 = vld [vmem:[%s18043_s3 + $0x55c] ss:$12 sps:$4 sm:$0xff]  }
 0x22f   :  { %5172 = vmatprep.subr.bf16.mxu0 %v13106_v20  ;;  %v4742_v20 = vld [vmem:[#allocation2 + $0x48] sm:$0xff] }
 0x231   :  { %10692 = vmatmul.mubr.msk.bf16.gmra.mrb[88].mxu1 %vm1596_vm1, %v15875_v8  ;;  %12304 = vmatmul.mubr.msk.bf16.gmra.mrb[108].mxu0 %vm1596_vm1, %v15875_v8 }
 0x232   :  { %5173 = vmatpush1.bf16.msra.mxu0 %v13104_v31  ;;  %12134 = vmatpush3.bf16.msra.mxu1 %v13113_v28  ;;  %v4746_v31 = vld [vmem:[#allocation2 + $0x68] sm:$0xff]  ;;  %v13157_v28 = vld [vmem:[%s18043_s3 + $0x558] ss:$12 sps:$4 sm:$0xff]  }
 0x233   :  { %5174 = vmatprep.subr.bf16.mxu0 %v13111_v3  ;;  %4535 = vmatprep.mubr.bf16.mxu1 %v18091_v25 }
 0x234   :  { %12307 = vmatprep.mubr.msk.bf16.mxu0 %vm13914_vm2, %v13913_v33  ;;  %12135 = vmatprep.subr.bf16.mxu1 %v13117_v35  ;;  %v13164_v35 = vld [vmem:[%s18043_s3 + $0x574] ss:$12 sps:$4 sm:$0xff]  }
 0x236   :  { %5175 = vmatpush1.bf16.msra.mxu0 %v13109_v12  ;;  %12136 = vmatpush3.bf16.msra.mxu1 %v13118_v9 }
 0x237   :  { %5176 = vmatprep.subr.bf16.mxu0 %v13116_v18  ;;  %12137 = vmatprep.subr.bf16.mxu1 %v13122_v39 }
 0x239   :  { %10693 = vmatmul.mubr.msk.bf16.gmra.mrb[92].mxu1 %vm1596_vm1, %v15908_v24  ;;  %12308 = vmatmul.mubr.msk.bf16.gmra.mrb[112].mxu0 %vm1596_vm1, %v15908_v24 }
 0x23a   :  { %5177 = vmatpush1.bf16.msra.mxu0 %v13114_v47  ;;  %12138 = vmatpush3.bf16.msra.mxu1 %v13123_v22  ;;  %v13162_v22 = vld [vmem:[%s18043_s3 + $0x570] ss:$12 sps:$4 sm:$0xff]  }
 0x23b   :  { %5178 = vmatprep.subr.bf16.mxu0 %v13121_v17  ;;  %4545 = vmatprep.mubr.bf16.mxu1 %v18091_v25  ;;  %v4745_v17 = vld [vmem:[#allocation2 + $0x60] sm:$0xff] }
 0x23c   :  { %12311 = vmatprep.mubr.msk.bf16.mxu0 %vm13914_vm2, %v13913_v33  ;;  %12139 = vmatprep.subr.bf16.mxu1 %v13127_v21  ;;  %v13170_v21 = vld [vmem:[%s18043_s3 + $0x58c] ss:$12 sps:$4 sm:$0xff]  }
 0x23e   :  { %5179 = vmatpush1.bf16.msra.mxu0 %v13119_v51  ;;  %12140 = vmatpush3.bf16.msra.mxu1 %v13128_v54  ;;  %v13168_v54 = vld [vmem:[%s18043_s3 + $0x588] ss:$12 sps:$4 sm:$0xff]  }
 0x23f   :  { %5180 = vmatprep.subr.bf16.mxu0 %v13126_v50  ;;  %12141 = vmatprep.subr.bf16.mxu1 %v13132_v53  ;;  %v13178_v53 = vld [vmem:[%s18043_s3 + $0x5a4] ss:$12 sps:$4 sm:$0xff]  }
 0x241   :  { %10694 = vmatmul.mubr.msk.bf16.gmra.mrb[96].mxu1 %vm1596_vm1, %v15938_v1  ;;  %12312 = vmatmul.mubr.msk.bf16.gmra.mrb[116].mxu0 %vm1596_vm1, %v15938_v1 }
 0x242   :  { %5181 = vmatpush1.bf16.msra.mxu0 %v13124_v63  ;;  %5196 = vmatprep.mubr.bf16.mxu0 %v4734_v40 }
 0x243   :  { %5362 = vmatprep.mubr.bf16.mxu1 %v4734_v40  ;;  %5182 = vmatprep.subr.bf16.mxu0 %v13131_v15 }
 0x244   :  { %12142 = vmatpush3.bf16.msra.mxu1 %v13133_v32 }
 0x245   :  { %12315 = vmatprep.subr.bf16.mxu1 %v13913_v33 }
 0x246   :  { %5183 = vmatpush1.bf16.msra.mxu0 %v13129_v30  ;;  %v13166_v30 = vld [vmem:[%s18043_s3 + $0x5a8] ss:$12 sps:$4 sm:$0xff]  }
 0x247   :  { %5184 = vmatprep.subr.bf16.mxu0 %v13136_v14  ;;  %v4735_v14 = vld [vmem:[#allocation2 + $0x10] sm:$0xff] }
 0x249   :  { %5363 = vmatmul.mubr.bf16.vlgmr.msra.gmra.mrb[100].mxu1 %v4733_v26 }
 0x24a   :  { %5185 = vmatpush1.bf16.msra.mxu0 %v13134_v44  ;;  %5370 = vmatprep.mubr.bf16.mxu1 %v4737_v13  ;;  %v13167_v44 = vld [vmem:[%s18043_s3 + $0x680] ss:$12 sps:$4 sm:$0xff]  }
 0x24b   :  { %5186 = vmatprep.subr.bf16.mxu0 %v13139_v45  ;;  %12316 = vmatpush3.bf16.msra.mxu1 %v13155_v56  ;;  %v13171_v56 = vld [vmem:[%s18043_s3 + $0x5c0] ss:$12 sps:$4 sm:$0xff]  }
 0x24c   :  { %12317 = vmatprep.subr.bf16.mxu1 %v13913_v33 }
 0x24e   :  { %5187 = vmatpush1.bf16.msra.mxu0 %v13137_v41 }
 0x24f   :  { %5188 = vmatprep.subr.bf16.mxu0 %v13142_v16  ;;  %12318 = vmatpush3.bf16.msra.mxu1 %v13156_v55 }
 0x250   :  { %12319 = vmatprep.subr.bf16.mxu1 %v13913_v33 }
 0x251   :  { %5371 = vmatmul.mubr.bf16.gmra.mrb[104].mxu1 %v4736_v6 }
 0x252   :  { %5189 = vmatpush1.bf16.msra.mxu0 %v13140_v57  ;;  %5378 = vmatprep.mubr.bf16.mxu1 %v4740_v27 }
 0x253   :  { %5190 = vmatprep.subr.bf16.mxu0 %v13145_v62  ;;  %12320 = vmatpush3.bf16.msra.mxu1 %v13160_v43  ;;  %v13173_v62 = vld [vmem:[%s18043_s3 + $0x5d8] ss:$12 sps:$4 sm:$0xff]   ;;  %v4738_v43 = vld [vmem:[#allocation2 + $0x28] sm:$0xff] }
 0x254   :  { %12321 = vmatprep.subr.bf16.mxu1 %v13913_v33 }
 0x256   :  { %5191 = vmatpush1.bf16.msra.mxu0 %v13143_v49  ;;  %v13175_v49 = vld [vmem:[%s18043_s3 + $0x5f0] ss:$12 sps:$4 sm:$0xff]  }
 0x257   :  { %5192 = vmatprep.subr.bf16.mxu0 %v13148_v60  ;;  %12322 = vmatpush3.bf16.msra.mxu1 %v13161_v11  ;;  %v13179_v11 = vld [vmem:[%s18043_s3 + $0x6c8] ss:$12 sps:$4 sm:$0xff]  }
 0x258   :  { %12182 = vmatprep.subr.bf16.mxu1 %v13165_v59 }
 0x259   :  { %5379 = vmatmul.mubr.bf16.gmra.mrb[108].mxu1 %v4739_v52 }
 0x25a   :  { %5193 = vmatpush1.bf16.msra.mxu0 %v13146_v61  ;;  %5386 = vmatprep.mubr.bf16.mxu1 %v4743_v46 }
 0x25b   :  { %5194 = vmatprep.subr.bf16.mxu0 %v13151_v10  ;;  %v12033_v37 = vpop.f32.mrb[80].mxu0 }
 0x25c   :  { %v12034_v7 = vpop.f32.mrb[81].mxu0 }
 0x25d   :  { %v16008_v48 = vadd.f32 %v12034_v7, %v12033_v37  ;;  %v12036_v23 = vpop.f32.mrb[82].mxu0  ;;  %v13185_v37 = vld [vmem:[%s18043_s3 + $0x620] ss:$12 sps:$4 sm:$0xff]  }
 0x25e   :  { %5195 = vmatpush1.bf16.msra.mxu0 %v13149_v42  ;;  %v12037_v0 = vpop.f32.mrb[83].mxu0  ;;  %v13184_v42 = vld [vmem:[%s18043_s3 + $0x6e0] ss:$12 sps:$4 sm:$0xff]  }
 0x25f   :  { %v16013_v4 = vadd.f32 %v12037_v0, %v12036_v23  ;;  %5247 = vmatprep.subr.bf16.mxu0 %v13154_v34  ;;  %v13189_v34 = vld [vmem:[%s18043_s3 + $0x6f8] ss:$12 sps:$4 sm:$0xff]   ;;  %v13176_v7 = vld [vmem:[%s18043_s3 + $0x5a0] ss:$12 sps:$4 sm:$0xff]   ;;  %v13183_v23 = vld [vmem:[%s18043_s3 + $0x5bc] ss:$12 sps:$4 sm:$0xff]  }
 0x260   :  { %v4744_v0 = vld [vmem:[#allocation2 + $0x58] sm:$0xff] }
 0x261   :  { %5197 = vmatmul.mubr.bf16.vlgmr.msra.gmra.mrb[140].mxu0 %v4733_v26  ;;  %5387 = vmatmul.mubr.bf16.gmra.mrb[112].mxu1 %v4742_v20 }
 0x262   :  { %5206 = vmatprep.mubr.bf16.mxu0 %v4737_v13  ;;  %5248 = vmatpush1.bf16.msra.mxu0 %v13152_v36  ;;  %v13172_v13 = vld [vmem:[%s18043_s3 + $0x698] ss:$12 sps:$4 sm:$0xff]  }
 0x263   :  { %5394 = vmatprep.mubr.bf16.mxu1 %v4746_v31  ;;  %v12039_v3 = vpop.f32.mrb[84].mxu0  ;;  %5249 = vmatprep.subr.bf16.mxu0 %v13159_v2  ;;  %v13190_v36 = vld [vmem:[%s18043_s3 + $0x638] ss:$12 sps:$4 sm:$0xff]   ;;  %v13194_v2 = vld [vmem:[%s18043_s3 + $0x710] ss:$12 sps:$4 sm:$0xff]  }
 0x264   :  { %v12040_v12 = vpop.f32.mrb[85].mxu0 }
 0x265   :  { %v16024_v9 = vadd.f32 %v12040_v12, %v12039_v3  ;;  %v12042_v18 = vpop.f32.mrb[86].mxu0  ;;  %v13186_v3 = vld [vmem:[%s18043_s3 + $0x5d0] ss:$12 sps:$4 sm:$0xff]  }
 0x266   :  { %v12043_v39 = vpop.f32.mrb[87].mxu0  ;;  %5250 = vmatpush1.bf16.msra.mxu0 %v13157_v28  ;;  %v13195_v28 = vld [vmem:[%s18043_s3 + $0x650] ss:$12 sps:$4 sm:$0xff]  }
 0x267   :  { %v16026_v47 = vadd.f32 %v12043_v39, %v12042_v18  ;;  %5251 = vmatprep.subr.bf16.mxu0 %v13164_v35  ;;  %v13193_v35 = vld [vmem:[%s18043_s3 + $0x5ec] ss:$12 sps:$4 sm:$0xff]   ;;  %v4747_v12 = vld [vmem:[#allocation2 + $0x70] sm:$0xff]  ;;  %v5508_v18 = vld [vmem:[#allocation2 + $0x80] sm:$0xff] }
 0x268   :  { %v13191_v39 = vld [vmem:[%s18043_s3 + $0x5e8] ss:$12 sps:$4 sm:$0xff]  }
 0x269   :  { %5207 = vmatmul.mubr.bf16.gmra.mrb[144].mxu0 %v4736_v6  ;;  %5395 = vmatmul.mubr.bf16.gmra.mrb[116].mxu1 %v4745_v17  ;;  %v13174_v6 = vld [vmem:[%s18043_s3 + $0x6b0] ss:$12 sps:$4 sm:$0xff]  }
 0x26a   :  { %5216 = vmatprep.mubr.bf16.mxu0 %v4740_v27  ;;  %12323 = vmatprep.mubr.msk.bf16.mxu1 %vm13914_vm2, %v13913_v33 }
 0x26b   :  { %v12045_v51 = vpop.f32.mrb[88].mxu0  ;;  %5252 = vmatpush1.bf16.msra.mxu0 %v13162_v22  ;;  %v13198_v22 = vld [vmem:[%s18043_s3 + $0x604] ss:$12 sps:$4 sm:$0xff]  }
 0x26c   :  { %v12046_v50 = vpop.f32.mrb[89].mxu0  ;;  %5253 = vmatprep.subr.bf16.mxu0 %v13170_v21  ;;  %v13201_v21 = vld [vmem:[%s18043_s3 + $0x61c] ss:$12 sps:$4 sm:$0xff]  }
 0x26d   :  { %v16042_v63 = vadd.f32 %v12046_v50, %v12045_v51  ;;  %v12048_v15 = vpop.f32.mrb[90].mxu0  ;;  %v16146_v51 = vld [vmem:[#allocation2 + $0x78] sm:$0xff] }
 0x26e   :  { %v12049_v32 = vpop.f32.mrb[91].mxu0  ;;  %v16153_v50 = vld [vmem:[#allocation2 + $0x98] sm:$0xff] }
 0x26f   :  { %v16044_v40 = vadd.f32 %v12049_v32, %v12048_v15  ;;  %5254 = vmatpush1.bf16.msra.mxu0 %v13168_v54  ;;  %v13217_v54 = vld [vmem:[%s18043_s3 + $0x728] ss:$12 sps:$4 sm:$0xff]   ;;  %v13221_v32 = vld [vmem:[%s18043_s3 + $0x740] ss:$12 sps:$4 sm:$0xff]  }
 0x270   :  { %5938 = vmatprep.subr.bf16.mxu0 %v13178_v53  ;;  %v13199_v53 = vld [vmem:[%s18043_s3 + $0x618] ss:$12 sps:$4 sm:$0xff]   ;;  %v13204_v15 = vld [vmem:[%s18043_s3 + $0x634] ss:$12 sps:$4 sm:$0xff]  }
 0x271   :  { %5217 = vmatmul.mubr.bf16.gmra.mrb[148].mxu0 %v4739_v52  ;;  %12324 = vmatmul.mubr.msk.bf16.vlgmr.msra.gmra.mrb[120].mxu1 %vm1596_vm1, %v4735_v14  ;;  %v13180_v52 = vld [vmem:[%s18043_s3 + $0x608] ss:$12 sps:$4 sm:$0xff]  }
 0x272   :  { %5226 = vmatprep.mubr.bf16.mxu0 %v4743_v46  ;;  %12327 = vmatprep.mubr.msk.bf16.mxu1 %vm13914_vm2, %v13913_v33  ;;  %v4741_v46 = vld [vmem:[#allocation2 + $0x40] sm:$0xff] }
 0x273   :  { %v12051_v45 = vpop.f32.mrb[92].mxu0  ;;  %12183 = vmatpush3.bf16.msra.mxu1 %v13166_v30  ;;  %v13202_v30 = vld [vmem:[%s18043_s3 + $0x630] ss:$12 sps:$4 sm:$0xff]  }
 0x274   :  { %v12052_v26 = vpop.f32.mrb[93].mxu0  ;;  %12184 = vmatprep.subr.bf16.mxu1 %v13167_v44  ;;  %v16173_v44 = vld [vmem:[#allocation2 + $0x90] sm:$0xff] }
 0x275   :  { %v16061_v41 = vadd.f32 %v12052_v26, %v12051_v45  ;;  %v12054_v16 = vpop.f32.mrb[94].mxu0  ;;  %v16177_v45 = vld [vmem:[#allocation2 + $0xb0] sm:$0xff] }
 0x276   :  { %v12055_v55 = vpop.f32.mrb[95].mxu0  ;;  %v13205_v26 = vld [vmem:[%s18043_s3 + $0x648] ss:$12 sps:$4 sm:$0xff]  }
 0x277   :  { %v16063_v57 = vadd.f32 %v12055_v55, %v12054_v16  ;;  %12185 = vmatpush3.bf16.msra.mxu1 %v13171_v56  ;;  %v13225_v56 = vld [vmem:[%s18043_s3 + $0x758] ss:$12 sps:$4 sm:$0xff]   ;;  %v13208_v16 = vld [vmem:[%s18043_s3 + $0x660] ss:$12 sps:$4 sm:$0xff]   ;;  %v13213_v55 = vld [vmem:[%s18043_s3 + $0x67c] ss:$12 sps:$4 sm:$0xff]  }
 0x278   :  { %12186 = vmatprep.subr.bf16.mxu1 %v13172_v13  ;;  %v13210_v13 = vld [vmem:[%s18043_s3 + $0x664] ss:$12 sps:$4 sm:$0xff]  }
 0x279   :  { %5227 = vmatmul.mubr.bf16.gmra.mrb[152].mxu0 %v4742_v20  ;;  %12328 = vmatmul.mubr.msk.bf16.gmra.mrb[124].mxu1 %vm1596_vm1, %v4738_v43  ;;  %v13181_v20 = vld [vmem:[%s18043_s3 + $0x5b8] ss:$12 sps:$4 sm:$0xff]  }
 0x27a   :  { %5236 = vmatprep.mubr.bf16.mxu0 %v4746_v31  ;;  %12331 = vmatprep.mubr.msk.bf16.mxu1 %vm13914_vm2, %v13913_v33  ;;  %v13188_v31 = vld [vmem:[%s18043_s3 + $0x5d4] ss:$12 sps:$4 sm:$0xff]  }
 0x27b   :  { %v12057_v27 = vpop.f32.mrb[96].mxu0  ;;  %12187 = vmatpush3.bf16.msra.mxu1 %v13173_v62  ;;  %v16198_v62 = vld [vmem:[#allocation2 + $0xa8] sm:$0xff] }
 0x27c   :  { %v12058_v60 = vpop.f32.mrb[97].mxu0  ;;  %12188 = vmatprep.subr.bf16.mxu1 %v13174_v6  ;;  %v16205_v6 = vld [vmem:[#allocation2 + $0xc8] sm:$0xff] }
 0x27d   :  { %v16080_v59 = vadd.f32 %v12058_v60, %v12057_v27  ;;  %v12060_v61 = vpop.f32.mrb[98].mxu0  ;;  %v13211_v27 = vld [vmem:[%s18043_s3 + $0x678] ss:$12 sps:$4 sm:$0xff]   ;;  %v13214_v60 = vld [vmem:[%s18043_s3 + $0x690] ss:$12 sps:$4 sm:$0xff]  }
 0x27e   :  { %v12061_v10 = vpop.f32.mrb[99].mxu0  ;;  %v16220_v61 = vld [vmem:[#allocation2 + $0xc0] sm:$0xff] }
 0x27f   :  { %12189 = vmatpush3.bf16.msra.mxu1 %v13175_v49  ;;  %v13216_v49 = vld [vmem:[%s18043_s3 + $0x694] ss:$12 sps:$4 sm:$0xff]  }
 0x280   :  { %12190 = vmatprep.subr.bf16.mxu1 %v13179_v11  ;;  %v13220_v11 = vld [vmem:[%s18043_s3 + $0x6ac] ss:$12 sps:$4 sm:$0xff]   ;;  %v16223_v10 = vld [vmem:[#allocation2 + $0xe0] sm:$0xff] }
 0x281   :  { %5237 = vmatmul.mubr.bf16.gmra.mrb[156].mxu0 %v4745_v17  ;;  %12332 = vmatmul.mubr.msk.bf16.gmra.mrb[128].mxu1 %vm1596_vm1, %v4741_v46  ;;  %v13196_v17 = vld [vmem:[%s18043_s3 + $0x600] ss:$12 sps:$4 sm:$0xff]  }
 0x282   :  { %5279 = vmatprep.mubr.bf16.mxu0 %v18091_v25  ;;  %12335 = vmatprep.mubr.msk.bf16.mxu1 %vm13914_vm2, %v13913_v33 }
 0x283   :  { %12191 = vmatpush3.bf16.msra.mxu1 %v13180_v52  ;;  %v13218_v52 = vld [vmem:[%s18043_s3 + $0x6a8] ss:$12 sps:$4 sm:$0xff]  }
 0x284   :  { %12192 = vmatprep.subr.bf16.mxu1 %v13184_v42  ;;  %v13222_v42 = vld [vmem:[%s18043_s3 + $0x6c0] ss:$12 sps:$4 sm:$0xff]  }
 0x287   :  { %12193 = vmatpush3.bf16.msra.mxu1 %v13185_v37  ;;  %v13228_v37 = vld [vmem:[%s18043_s3 + $0x6dc] ss:$12 sps:$4 sm:$0xff]  }
 0x288   :  { %12194 = vmatprep.subr.bf16.mxu1 %v13189_v34  ;;  %v16238_v34 = vld [vmem:[#allocation2 + $0xd8] sm:$0xff] }
 0x289   :  { %10840 = vmatmul.mubr.msk.bf16.vlgmr.msra.gmra.mrb[140].mxu0 %vm1596_vm1, %v4735_v14  ;;  %12336 = vmatmul.mubr.msk.bf16.gmra.mrb[132].mxu1 %vm1596_vm1, %v4744_v0  ;;  %v13207_v14 = vld [vmem:[%s18043_s3 + $0x64c] ss:$12 sps:$4 sm:$0xff]  }
 0x28a   :  { %5939 = vmatpush1.bf16.msra.mxu0 %v13176_v7  ;;  %5289 = vmatprep.mubr.bf16.mxu0 %v18091_v25  ;;  %v13226_v7 = vld [vmem:[%s18043_s3 + $0x6d8] ss:$12 sps:$4 sm:$0xff]  }
 0x28b   :  { %5940 = vmatprep.subr.bf16.mxu0 %v13183_v23  ;;  %12339 = vmatprep.mubr.msk.bf16.mxu1 %vm13914_vm2, %v13913_v33  ;;  %v13232_v23 = vld [vmem:[%s18043_s3 + $0x6f4] ss:$12 sps:$4 sm:$0xff]  }
 0x28c   :  { %12195 = vmatpush3.bf16.msra.mxu1 %v13190_v36  ;;  %v13235_v36 = vld [vmem:[%s18043_s3 + $0x70c] ss:$12 sps:$4 sm:$0xff]  }
 0x28d   :  { %12196 = vmatprep.subr.bf16.mxu1 %v13194_v2  ;;  %v13233_v2 = vld [vmem:[%s18043_s3 + $0x708] ss:$12 sps:$4 sm:$0xff]  }
 0x28e   :  { %5941 = vmatpush1.bf16.msra.mxu0 %v13181_v20  ;;  %v13238_v20 = vld [vmem:[%s18043_s3 + $0x724] ss:$12 sps:$4 sm:$0xff]  }
 0x28f   :  { %5942 = vmatprep.subr.bf16.mxu0 %v13188_v31  ;;  %v13236_v31 = vld [vmem:[%s18043_s3 + $0x720] ss:$12 sps:$4 sm:$0xff]  }
 0x290   :  { %12197 = vmatpush3.bf16.msra.mxu1 %v13195_v28  ;;  %v13241_v28 = vld [vmem:[%s18043_s3 + $0x73c] ss:$12 sps:$4 sm:$0xff]  }
 0x291   :  { %10841 = vmatmul.mubr.msk.bf16.gmra.mrb[144].mxu0 %vm1596_vm1, %v4738_v43  ;;  %12340 = vmatmul.mubr.msk.bf16.gmra.mrb[136].mxu1 %vm1596_vm1, %v4747_v12  ;;  %v13229_v43 = vld [vmem:[%s18043_s3 + $0x770] ss:$12 sps:$4 sm:$0xff]  }
 0x292   :  { %5943 = vmatpush1.bf16.msra.mxu0 %v13186_v3  ;;  %6136 = vmatprep.mubr.bf16.mxu1 %v5508_v18  ;;  %v13239_v3 = vld [vmem:[%s18043_s3 + $0x738] ss:$12 sps:$4 sm:$0xff]  }
 0x293   :  { %5944 = vmatprep.subr.bf16.mxu0 %v13193_v35  ;;  %5299 = vmatprep.mubr.bf16.mxu0 %v18091_v25  ;;  %v13244_v35 = vld [vmem:[%s18043_s3 + $0x754] ss:$12 sps:$4 sm:$0xff]  }
 0x294   :  { %12343 = vmatprep.subr.bf16.mxu1 %v13913_v33 }
 0x296   :  { %5945 = vmatpush1.bf16.msra.mxu0 %v13191_v39 }
 0x297   :  { %5946 = vmatprep.subr.bf16.mxu0 %v13198_v22 }
 0x299   :  { %10842 = vmatmul.mubr.msk.bf16.gmra.mrb[148].mxu0 %vm1596_vm1, %v4741_v46  ;;  %6137 = vmatmul.mubr.bf16.vlgmr.msra.gmra.mrb[140].mxu1 %v16146_v51  ;;  %v13224_v46 = vld [vmem:[%s18043_s3 + $0x6c4] ss:$12 sps:$4 sm:$0xff]  }
 0x29a   :  { %5947 = vmatpush1.bf16.msra.mxu0 %v13196_v17  ;;  %6144 = vmatprep.mubr.bf16.mxu1 %v16153_v50 }
 0x29b   :  { %5948 = vmatprep.subr.bf16.mxu0 %v13201_v21  ;;  %5309 = vmatprep.mubr.bf16.mxu0 %v18091_v25  ;;  %v13242_v21 = vld [vmem:[%s18043_s3 + $0x750] ss:$12 sps:$4 sm:$0xff]  }
 0x29c   :  { %12344 = vmatpush3.bf16.msra.mxu1 %v13217_v54  ;;  %v13247_v54 = vld [vmem:[%s18043_s3 + $0x76c] ss:$12 sps:$4 sm:$0xff]  }
 0x29d   :  { %12345 = vmatprep.subr.bf16.mxu1 %v13913_v33 }
 0x29e   :  { %5949 = vmatpush1.bf16.msra.mxu0 %v13199_v53 }
 0x29f   :  { %5950 = vmatprep.subr.bf16.mxu0 %v13204_v15  ;;  %v13245_v15 = vld [vmem:[%s18043_s3 + $0x768] ss:$12 sps:$4 sm:$0xff]  }
 0x2a0   :  { %12346 = vmatpush3.bf16.msra.mxu1 %v13221_v32 }
 0x2a1   :  { %10843 = vmatmul.mubr.msk.bf16.gmra.mrb[152].mxu0 %vm1596_vm1, %v4744_v0  ;;  %6145 = vmatmul.mubr.bf16.gmra.mrb[144].mxu1 %v16173_v44  ;;  %v13230_v0 = vld [vmem:[%s18043_s3 + $0x6f0] ss:$12 sps:$4 sm:$0xff]  }
 0x2a2   :  { %5951 = vmatpush1.bf16.msra.mxu0 %v13202_v30  ;;  %6152 = vmatprep.mubr.bf16.mxu1 %v16177_v45 }
 0x2a3   :  { %5952 = vmatprep.subr.bf16.mxu0 %v13207_v14  ;;  %5319 = vmatprep.mubr.bf16.mxu0 %v18091_v25 }
 0x2a4   :  { %12347 = vmatprep.subr.bf16.mxu1 %v13913_v33 }
 0x2a5   :  { %12348 = vmatpush3.bf16.msra.mxu1 %v13225_v56 }
 0x2a6   :  { %5953 = vmatpush1.bf16.msra.mxu0 %v13205_v26  ;;  %12349 = vmatprep.subr.bf16.mxu1 %v13913_v33 }
 0x2a7   :  { %5954 = vmatprep.subr.bf16.mxu0 %v13210_v13 }
 0x2a9   :  { %10844 = vmatmul.mubr.msk.bf16.gmra.mrb[156].mxu0 %vm1596_vm1, %v4747_v12  ;;  %6153 = vmatmul.mubr.bf16.gmra.mrb[148].mxu1 %v16198_v62 }
 0x2aa   :  { %5955 = vmatpush1.bf16.msra.mxu0 %v13208_v16  ;;  %5970 = vmatprep.mubr.bf16.mxu0 %v5508_v18 }
 0x2ab   :  { %6160 = vmatprep.mubr.bf16.mxu1 %v16205_v6  ;;  %5956 = vmatprep.subr.bf16.mxu0 %v13213_v55 }
 0x2ac   :  { %12350 = vmatpush3.bf16.msra.mxu1 %v13229_v43 }
 0x2ae   :  { %5957 = vmatpush1.bf16.msra.mxu0 %v13211_v27 }
 0x2af   :  { %5958 = vmatprep.subr.bf16.mxu0 %v13216_v49 }
 0x2b1   :  { %6161 = vmatmul.mubr.bf16.gmra.mrb[152].mxu1 %v16220_v61 }
 0x2b2   :  { %5959 = vmatpush1.bf16.msra.mxu0 %v13214_v60  ;;  %6168 = vmatprep.mubr.bf16.mxu1 %v16223_v10 }
 0x2b3   :  { %5960 = vmatprep.subr.bf16.mxu0 %v13220_v11 }
 0x2b6   :  { %5961 = vmatpush1.bf16.msra.mxu0 %v13218_v52 }
 0x2b7   :  { %5962 = vmatprep.subr.bf16.mxu0 %v13224_v46 }
 0x2b9   :  { %6169 = vmatmul.mubr.bf16.gmra.mrb[156].mxu1 %v16238_v34 }
 0x2ba   :  { %5963 = vmatpush1.bf16.msra.mxu0 %v13222_v42  ;;  %12351 = vmatprep.mubr.msk.bf16.mxu1 %vm13914_vm2, %v13913_v33 }
 0x2bb   :  { %5964 = vmatprep.subr.bf16.mxu0 %v13228_v37 }
 0x2be   :  { %5965 = vmatpush1.bf16.msra.mxu0 %v13226_v7 }
 0x2bf   :  { %5966 = vmatprep.subr.bf16.mxu0 %v13232_v23 }
 0x2c1   :  { %12352 = vmatmul.mubr.msk.bf16.vlgmr.msra.gmra.mrb[160].mxu1 %vm1596_vm1, %v15812_v19 }
 0x2c2   :  { %5967 = vmatpush1.bf16.msra.mxu0 %v13230_v0  ;;  %12355 = vmatprep.mubr.msk.bf16.mxu1 %vm13914_vm2, %v13913_v33 }
 0x2c3   :  { %5968 = vmatprep.subr.bf16.mxu0 %v13235_v36 }
 0x2c6   :  { %5969 = vmatpush1.bf16.msra.mxu0 %v13233_v2 }
 0x2c7   :  { %6021 = vmatprep.subr.bf16.mxu0 %v13238_v20 }
 0x2c9   :  { %5971 = vmatmul.mubr.bf16.vlgmr.msra.gmra.mrb[160].mxu0 %v16146_v51  ;;  %12356 = vmatmul.mubr.msk.bf16.gmra.mrb[164].mxu1 %vm1596_vm1, %v15842_v29 }
 0x2ca   :  { %5980 = vmatprep.mubr.bf16.mxu0 %v16153_v50  ;;  %6022 = vmatpush1.bf16.msra.mxu0 %v13236_v31 }
 0x2cb   :  { %12359 = vmatprep.mubr.msk.bf16.mxu1 %vm13914_vm2, %v13913_v33  ;;  %6023 = vmatprep.subr.bf16.mxu0 %v13241_v28 }
 0x2cc   :  { %v12088_v12 = vpop.f32.mrb[120].mxu0 }
 0x2cd   :  { %v12089_v18 = vpop.f32.mrb[121].mxu0 }
 0x2ce   :  { %v12090_v39 = vadd.f32 %v12089_v18, %v12088_v12  ;;  %v12091_v22 = vpop.f32.mrb[122].mxu0  ;;  %6024 = vmatpush1.bf16.msra.mxu0 %v13239_v3 }
 0x2cf   :  { %v12092_v17 = vpop.f32.mrb[123].mxu0  ;;  %6025 = vmatprep.subr.bf16.mxu0 %v13244_v35 }
 0x2d0   :  { %v12093_v51 = vadd.f32 %v12092_v17, %v12091_v22  ;;  %v12411_v50 = vadd.f32 %v12090_v39, %v16008_v48 }
 0x2d1   :  { %5981 = vmatmul.mubr.bf16.gmra.mrb[164].mxu0 %v16173_v44  ;;  %12360 = vmatmul.mubr.msk.bf16.gmra.mrb[168].mxu1 %vm1596_vm1, %v15875_v8 }
 0x2d2   :  { %5990 = vmatprep.mubr.bf16.mxu0 %v16177_v45  ;;  %12363 = vmatprep.mubr.msk.bf16.mxu1 %vm13914_vm2, %v13913_v33  ;;  %v12413_v53 = vadd.f32 %v12093_v51, %v16013_v4 }
 0x2d3   :  { %6026 = vmatpush1.bf16.msra.mxu0 %v13242_v21 }
 0x2d4   :  { %v12094_v32 = vpop.f32.mrb[124].mxu0  ;;  %6027 = vmatprep.subr.bf16.mxu0 %v13247_v54 }
 0x2d5   :  { %v12095_v48 = vpop.f32.mrb[125].mxu0 }
 0x2d6   :  { %v12096_v30 = vadd.f32 %v12095_v48, %v12094_v32  ;;  %v12097_v14 = vpop.f32.mrb[126].mxu0  ;;  %v13248_v32 = vld [vmem:[%s18045_s5 + $0x280] ss:$8 sps:$4 sm:$0xff]  }
 0x2d7   :  { %v12098_v44 = vpop.f32.mrb[127].mxu0  ;;  %6028 = vmatpush1.bf16.msra.mxu0 %v13245_v15 }
 0x2d8   :  { %v12099_v56 = vadd.f32 %v12098_v44, %v12097_v14  ;;  %v12415_v45 = vadd.f32 %v12096_v30, %v16024_v9  ;;  %v13250_v14 = vld [vmem:[%s18045_s5 + $0x284] ss:$8 sps:$4 sm:$0xff]   ;;  %v13251_v44 = vld [vmem:[%s18045_s5 + $0x290] ss:$8 sps:$4 sm:$0xff]  }
 0x2d9   :  { %5991 = vmatmul.mubr.bf16.gmra.mrb[168].mxu0 %v16198_v62  ;;  %12364 = vmatmul.mubr.msk.bf16.gmra.mrb[172].mxu1 %vm1596_vm1, %v15908_v24 }
 0x2da   :  { %6000 = vmatprep.mubr.bf16.mxu0 %v16205_v6  ;;  %12367 = vmatprep.mubr.msk.bf16.mxu1 %vm13914_vm2, %v13913_v33  ;;  %v12417_v4 = vadd.f32 %v12099_v56, %v16026_v47  ;;  %v13253_v56 = vld [vmem:[%s18045_s5 + $0x294] ss:$8 sps:$4 sm:$0xff]  }
 0x2db   :  { %6736 = vmatprep.subr.bf16.mxu0 %v13250_v14 }
 0x2dc   :  { %v12100_v26 = vpop.f32.mrb[128].mxu0 }
 0x2dd   :  { %v12101_v13 = vpop.f32.mrb[129].mxu0 }
 0x2de   :  { %v12102_v16 = vadd.f32 %v12101_v13, %v12100_v26  ;;  %v12103_v55 = vpop.f32.mrb[130].mxu0 }
 0x2df   :  { %v12104_v43 = vpop.f32.mrb[131].mxu0 }
 0x2e0   :  { %v12105_v27 = vadd.f32 %v12104_v43, %v12103_v55  ;;  %v12419_v9 = vadd.f32 %v12102_v16, %v16042_v63 }
 0x2e1   :  { %6001 = vmatmul.mubr.bf16.gmra.mrb[172].mxu0 %v16220_v61  ;;  %12368 = vmatmul.mubr.msk.bf16.gmra.mrb[176].mxu1 %vm1596_vm1, %v15938_v1 }
 0x2e2   :  { %6010 = vmatprep.mubr.bf16.mxu0 %v16223_v10  ;;  %v12421_v62 = vadd.f32 %v12105_v27, %v16044_v40  ;;  %v13256_v27 = vld [vmem:[%s18045_s5 + $0x2a4] ss:$8 sps:$4 sm:$0xff]  }
 0x2e4   :  { %v12106_v33 = vpop.f32.mrb[132].mxu0 }
 0x2e5   :  { %v12107_v6 = vpop.f32.mrb[133].mxu0 }
 0x2e6   :  { %v12108_v47 = vadd.f32 %v12107_v6, %v12106_v33  ;;  %v12109_v49 = vpop.f32.mrb[134].mxu0  ;;  %v13257_v6 = vld [vmem:[%s18045_s5 + $0x2b0] ss:$8 sps:$4 sm:$0xff]  }
 0x2e7   :  { %v12110_v60 = vpop.f32.mrb[135].mxu0 }
 0x2e8   :  { %v12111_v11 = vadd.f32 %v12110_v60, %v12109_v49  ;;  %v12423_v52 = vadd.f32 %v12108_v47, %v16061_v41  ;;  %v13259_v47 = vld [vmem:[%s18045_s5 + $0x2b4] ss:$8 sps:$4 sm:$0xff]  }
 0x2e9   :  { %6011 = vmatmul.mubr.bf16.gmra.mrb[176].mxu0 %v16238_v34 }
 0x2ea   :  { %6053 = vmatprep.mubr.bf16.mxu0 %v18091_v25  ;;  %v16318_v63 = vadd.f32 %v12111_v11, %v16063_v57  ;;  %v13260_v11 = vld [vmem:[%s18045_s5 + $0x180] ss:$8 sps:$4 sm:$0xff]  }
 0x2ec   :  { %v12112_v61 = vpop.f32.mrb[136].mxu0 }
 0x2ed   :  { %v12113_v46 = vpop.f32.mrb[137].mxu0 }
 0x2ee   :  { %v12114_v10 = vadd.f32 %v12113_v46, %v12112_v61  ;;  %v12115_v42 = vpop.f32.mrb[138].mxu0 }
 0x2ef   :  { %v12116_v40 = vpop.f32.mrb[139].mxu0  ;;  %v13265_v42 = vld [vmem:[%s18045_s5 + $0x2c4] ss:$8 sps:$4 sm:$0xff]  }
 0x2f0   :  { %v16321_v37 = vadd.f32 %v12114_v10, %v16080_v59 }
 0x2f1   :  { %10990 = vmatmul.mubr.msk.bf16.vlgmr.msra.gmra.mrb[180].mxu0 %vm1596_vm1, %v15812_v19 }
 0x2f2   :  { %6063 = vmatprep.mubr.bf16.mxu0 %v18091_v25  ;;  %6737 = vmatpush1.bf16.msra.mxu0 %v13248_v32 }
 0x2f3   :  { %6738 = vmatprep.subr.bf16.mxu0 %v13253_v56  ;;  %v13278_v56 = vld [vmem:[%s18045_s5 + $0x1b0] ss:$8 sps:$4 sm:$0xff]  }
 0x2f4   :  { %v16326_v41 = vpop.f32.mrb[80].mxu1  ;;  %v4663_v34 = vpop.f32.mrb[100].mxu0 }
 0x2f5   :  { %v16328_v7 = vadd.f32 %v12411_v50, %v4663_v34  ;;  %v16330_v57 = vpop.f32.mrb[81].mxu1  ;;  %v12297_v23 = vpop.f32.mrb[101].mxu0 }
 0x2f6   :  { %v16332_v0 = vpop.f32.mrb[82].mxu1  ;;  %v4666_v36 = vpop.f32.mrb[102].mxu0  ;;  %6739 = vmatpush1.bf16.msra.mxu0 %v13251_v44  ;;  %v13263_v23 = vld [vmem:[%s18045_s5 + $0x2c0] ss:$8 sps:$4 sm:$0xff]   ;;  %v13280_v44 = vld [vmem:[%s18045_s5 + $0x1b4] ss:$8 sps:$4 sm:$0xff]  }
 0x2f7   :  { %v16334_v2 = vadd.f32 %v12413_v53, %v4666_v36  ;;  %v16336_v59 = vpop.f32.mrb[83].mxu1  ;;  %v12298_v20 = vpop.f32.mrb[103].mxu0  ;;  %6740 = vmatprep.subr.bf16.mxu0 %v13256_v27  ;;  %v13266_v36 = vld [vmem:[%s18045_s5 + $0x190] ss:$8 sps:$4 sm:$0xff]  }
 0x2f8   :  { %v13271_v20 = vld [vmem:[%s18045_s5 + $0x2d4] ss:$8 sps:$4 sm:$0xff]  }
 0x2f9   :  { %10991 = vmatmul.mubr.msk.bf16.gmra.mrb[164].mxu0 %vm1596_vm1, %v15842_v29 }
 0x2fa   :  { %6073 = vmatprep.mubr.bf16.mxu0 %v18091_v25 }
 0x2fc   :  { %v16341_v19 = vpop.f32.mrb[84].mxu1  ;;  %v4671_v31 = vpop.f32.mrb[104].mxu0 }
 0x2fd   :  { %v16343_v28 = vadd.f32 %v12415_v45, %v4671_v31  ;;  %v16345_v3 = vpop.f32.mrb[85].mxu1  ;;  %v12301_v35 = vpop.f32.mrb[105].mxu0  ;;  %v13269_v31 = vld [vmem:[%s18045_s5 + $0x2d0] ss:$8 sps:$4 sm:$0xff]  }
 0x2fe   :  { %v16347_v12 = vpop.f32.mrb[86].mxu1  ;;  %v4674_v18 = vpop.f32.mrb[106].mxu0 }
 0x2ff   :  { %v16349_v39 = vadd.f32 %v12417_v4, %v4674_v18  ;;  %v16351_v22 = vpop.f32.mrb[87].mxu1  ;;  %v12302_v17 = vpop.f32.mrb[107].mxu0  ;;  %v13274_v18 = vld [vmem:[%s18045_s5 + $0x1a4] ss:$8 sps:$4 sm:$0xff]  }
 0x301   :  { %10992 = vmatmul.mubr.msk.bf16.gmra.mrb[168].mxu0 %vm1596_vm1, %v15875_v8 }
 0x302   :  { %6083 = vmatprep.mubr.bf16.mxu0 %v18091_v25 }
 0x304   :  { %v16356_v29 = vpop.f32.mrb[88].mxu1  ;;  %v4679_v21 = vpop.f32.mrb[108].mxu0 }
 0x305   :  { %v16358_v51 = vadd.f32 %v12419_v9, %v4679_v21  ;;  %v16360_v54 = vpop.f32.mrb[89].mxu1  ;;  %v12305_v50 = vpop.f32.mrb[109].mxu0  ;;  %v13272_v21 = vld [vmem:[%s18045_s5 + $0x1a0] ss:$8 sps:$4 sm:$0xff]  }
 0x306   :  { %v16362_v53 = vpop.f32.mrb[90].mxu1  ;;  %v4682_v15 = vpop.f32.mrb[110].mxu0 }
 0x307   :  { %v16367_v48 = vadd.f32 %v12421_v62, %v4682_v15  ;;  %v16369_v8 = vpop.f32.mrb[91].mxu1  ;;  %v12306_v30 = vpop.f32.mrb[111].mxu0  ;;  %v13277_v15 = vld [vmem:[%s18045_s5 + $0x2e4] ss:$8 sps:$4 sm:$0xff]  }
 0x308   :  { %v13275_v30 = vld [vmem:[%s18045_s5 + $0x2e0] ss:$8 sps:$4 sm:$0xff]  }
 0x309   :  { %10993 = vmatmul.mubr.msk.bf16.gmra.mrb[172].mxu0 %vm1596_vm1, %v15908_v24  ;;  %v13254_v24 = vld [vmem:[%s18045_s5 + $0x2a0] ss:$8 sps:$4 sm:$0xff]  }
 0x30a   :  { %6093 = vmatprep.mubr.bf16.mxu0 %v18091_v25  ;;  %6741 = vmatpush1.bf16.msra.mxu0 %v13254_v24  ;;  %v13286_v24 = vld [vmem:[%s18045_s5 + $0x1c4] ss:$8 sps:$4 sm:$0xff]  }
 0x30b   :  { %6742 = vmatprep.subr.bf16.mxu0 %v13259_v47 }
 0x30c   :  { %v16383_v45 = vpop.f32.mrb[92].mxu1  ;;  %v4687_v4 = vpop.f32.mrb[112].mxu0 }
 0x30d   :  { %v16385_v26 = vadd.f32 %v12423_v52, %v4687_v4  ;;  %v16387_v13 = vpop.f32.mrb[93].mxu1  ;;  %v12309_v16 = vpop.f32.mrb[113].mxu0  ;;  %v13262_v52 = vld [vmem:[%s18045_s5 + $0x184] ss:$8 sps:$4 sm:$0xff]   ;;  %v13283_v4 = vld [vmem:[%s18045_s5 + $0x2f4] ss:$8 sps:$4 sm:$0xff]  }
 0x30e   :  { %v16389_v55 = vpop.f32.mrb[94].mxu1  ;;  %v4690_v43 = vpop.f32.mrb[114].mxu0  ;;  %6743 = vmatpush1.bf16.msra.mxu0 %v13257_v6  ;;  %6695 = vmatprep.subr.bf16.mxu1 %v13262_v52  ;;  %v13281_v16 = vld [vmem:[%s18045_s5 + $0x2f0] ss:$8 sps:$4 sm:$0xff]  }
 0x30f   :  { %v16398_v9 = vadd.f32 %v16318_v63, %v4690_v43  ;;  %v16400_v62 = vpop.f32.mrb[95].mxu1  ;;  %v12310_v33 = vpop.f32.mrb[115].mxu0  ;;  %6696 = vmatpush1.bf16.msra.mxu1 %v13260_v11  ;;  %6744 = vmatprep.subr.bf16.mxu0 %v13265_v42  ;;  %v13298_v42 = vld [vmem:[%s18045_s5 + $0x1e4] ss:$8 sps:$4 sm:$0xff]  }
 0x310   :  { %v13284_v33 = vld [vmem:[%s18045_s5 + $0x1c0] ss:$8 sps:$4 sm:$0xff]  }
 0x311   :  { %10994 = vmatmul.mubr.msk.bf16.gmra.mrb[176].mxu0 %vm1596_vm1, %v15938_v1 }
 0x312   :  { %6768 = vmatprep.mubr.bf16.mxu0 %v18091_v25  ;;  %6745 = vmatpush1.bf16.msra.mxu0 %v13263_v23 }
 0x313   :  { %6746 = vmatprep.subr.bf16.mxu0 %v13271_v20 }
 0x314   :  { %v16411_v49 = vpop.f32.mrb[96].mxu1  ;;  %v4695_v60 = vpop.f32.mrb[116].mxu0 }
 0x315   :  { %v16420_v63 = vadd.f32 %v16321_v37, %v4695_v60  ;;  %v16422_v61 = vpop.f32.mrb[97].mxu1  ;;  %v12313_v1 = vpop.f32.mrb[117].mxu0  ;;  %v13268_v37 = vld [vmem:[%s18045_s5 + $0x194] ss:$8 sps:$4 sm:$0xff]   ;;  %v13289_v60 = vld [vmem:[%s18045_s5 + $0x4] ss:$8 sps:$4 sm:$0xff]  }
 0x316   :  { %v4551_v46 = vpop.f32.mrb[98].mxu1  ;;  %v4698_v10 = vpop.f32.mrb[118].mxu0  ;;  %6697 = vmatprep.subr.bf16.mxu1 %v13268_v37  ;;  %6747 = vmatpush1.bf16.msra.mxu0 %v13269_v31  ;;  %v13292_v1 = vld [vmem:[%s18045_s5 + $0x1d4] ss:$8 sps:$4 sm:$0xff]  }
 0x317   :  { %v4553_v40 = vpop.f32.mrb[99].mxu1  ;;  %v12314_v34 = vpop.f32.mrb[119].mxu0  ;;  %6698 = vmatpush1.bf16.msra.mxu1 %v13266_v36  ;;  %6748 = vmatprep.subr.bf16.mxu0 %v13277_v15  ;;  %v13290_v46 = vld [vmem:[%s18045_s5 + $0x1d0] ss:$8 sps:$4 sm:$0xff]   ;;  %v13304_v31 = vld [vmem:[%s18045_s5 + $0x1f4] ss:$8 sps:$4 sm:$0xff]  }
 0x318   :  { %6699 = vmatprep.subr.bf16.mxu1 %v13274_v18  ;;  %v13296_v34 = vld [vmem:[%s18045_s5 + $0x1e0] ss:$8 sps:$4 sm:$0xff]  }
 0x31a   :  { %6749 = vmatpush1.bf16.msra.mxu0 %v13275_v30 }
 0x31b   :  { %6700 = vmatpush1.bf16.msra.mxu1 %v13272_v21  ;;  %6750 = vmatprep.subr.bf16.mxu0 %v13283_v4  ;;  %v13314_v4 = vld [vmem:[%s18045_s5 + $0x210] ss:$8 sps:$4 sm:$0xff]  }
 0x31c   :  { %v12143_v35 = vpop.f32.mrb[100].mxu1  ;;  %6701 = vmatprep.subr.bf16.mxu1 %v13280_v44 }
 0x31d   :  { %v12144_v17 = vpop.f32.mrb[101].mxu1  ;;  %v13302_v35 = vld [vmem:[%s18045_s5 + $0x1f0] ss:$8 sps:$4 sm:$0xff]  }
 0x31e   :  { %v12146_v50 = vpop.f32.mrb[102].mxu1  ;;  %6751 = vmatpush1.bf16.msra.mxu0 %v13281_v16  ;;  %v13310_v17 = vld [vmem:[%s18045_s5 + $0x204] ss:$8 sps:$4 sm:$0xff]  }
 0x31f   :  { %v12147_v32 = vpop.f32.mrb[103].mxu1  ;;  %6702 = vmatpush1.bf16.msra.mxu1 %v13278_v56  ;;  %7017 = vmatprep.subr.bf16.mxu0 %v13289_v60  ;;  %v13316_v56 = vld [vmem:[%s18045_s5 + $0x214] ss:$8 sps:$4 sm:$0xff]  }
 0x320   :  { %v16454_v14 = vadd.f32 %v12147_v32, %v12146_v50  ;;  %6703 = vmatprep.subr.bf16.mxu1 %v13286_v24  ;;  %v13308_v50 = vld [vmem:[%s18045_s5 + $0x200] ss:$8 sps:$4 sm:$0xff]  }
 0x323   :  { %6704 = vmatpush1.bf16.msra.mxu1 %v13284_v33 }
 0x324   :  { %v12149_v43 = vpop.f32.mrb[104].mxu1  ;;  %6705 = vmatprep.subr.bf16.mxu1 %v13292_v1  ;;  %v13326_v1 = vld [vmem:[%s18045_s5 + $0x230] ss:$8 sps:$4 sm:$0xff]  }
 0x325   :  { %v12150_v27 = vpop.f32.mrb[105].mxu1 }
 0x326   :  { %v16474_v6 = vadd.f32 %v12150_v27, %v12149_v43  ;;  %v12152_v47 = vpop.f32.mrb[106].mxu1  ;;  %v13322_v43 = vld [vmem:[%s18045_s5 + $0x224] ss:$8 sps:$4 sm:$0xff]   ;;  %v13320_v27 = vld [vmem:[%s18045_s5 + $0x220] ss:$8 sps:$4 sm:$0xff]  }
 0x327   :  { %v12153_v11 = vpop.f32.mrb[107].mxu1  ;;  %6706 = vmatpush1.bf16.msra.mxu1 %v13290_v46  ;;  %v13328_v46 = vld [vmem:[%s18045_s5 + $0x234] ss:$8 sps:$4 sm:$0xff]  }
 0x328   :  { %v16479_v52 = vadd.f32 %v12153_v11, %v12152_v47  ;;  %6707 = vmatprep.subr.bf16.mxu1 %v13298_v42  ;;  %v13334_v42 = vld [vmem:[%s18045_s5 + $0x244] ss:$8 sps:$4 sm:$0xff]  }
 0x32b   :  { %6708 = vmatpush1.bf16.msra.mxu1 %v13296_v34  ;;  %v13332_v34 = vld [vmem:[%s18045_s5 + $0x240] ss:$8 sps:$4 sm:$0xff]  }
 0x32c   :  { %v12155_v10 = vpop.f32.mrb[108].mxu1  ;;  %6709 = vmatprep.subr.bf16.mxu1 %v13304_v31 }
 0x32d   :  { %v12156_v40 = vpop.f32.mrb[109].mxu1 }
 0x32e   :  { %v16493_v23 = vadd.f32 %v12156_v40, %v12155_v10  ;;  %v12158_v37 = vpop.f32.mrb[110].mxu1 }
 0x32f   :  { %v12159_v36 = vpop.f32.mrb[111].mxu1  ;;  %6710 = vmatpush1.bf16.msra.mxu1 %v13302_v35  ;;  %v13340_v35 = vld [vmem:[%s18045_s5 + $0x254] ss:$8 sps:$4 sm:$0xff]  }
 0x330   :  { %v16495_v20 = vadd.f32 %v12159_v36, %v12158_v37  ;;  %6711 = vmatprep.subr.bf16.mxu1 %v13310_v17  ;;  %v13338_v17 = vld [vmem:[%s18045_s5 + $0x250] ss:$8 sps:$4 sm:$0xff]  }
 0x333   :  { %6712 = vmatpush1.bf16.msra.mxu1 %v13308_v50 }
 0x334   :  { %v12161_v18 = vpop.f32.mrb[112].mxu1  ;;  %6713 = vmatprep.subr.bf16.mxu1 %v13316_v56 }
 0x335   :  { %v12162_v21 = vpop.f32.mrb[113].mxu1 }
 0x336   :  { %v16509_v15 = vadd.f32 %v12162_v21, %v12161_v18  ;;  %v12164_v32 = vpop.f32.mrb[114].mxu1 }
 0x337   :  { %v12165_v30 = vpop.f32.mrb[115].mxu1  ;;  %6714 = vmatpush1.bf16.msra.mxu1 %v13314_v4 }
 0x338   :  { %v16511_v44 = vadd.f32 %v12165_v30, %v12164_v32  ;;  %6715 = vmatprep.subr.bf16.mxu1 %v13322_v43  ;;  %v13344_v30 = vld [vmem:[%s18045_s5 + $0x260] ss:$8 sps:$4 sm:$0xff]   ;;  %v13352_v43 = vld [vmem:[%s18045_s5 + $0x274] ss:$8 sps:$4 sm:$0xff]  }
 0x33b   :  { %6716 = vmatpush1.bf16.msra.mxu1 %v13320_v27 }
 0x33c   :  { %v12167_v16 = vpop.f32.mrb[116].mxu1  ;;  %6717 = vmatprep.subr.bf16.mxu1 %v13328_v46 }
 0x33d   :  { %v12168_v24 = vpop.f32.mrb[117].mxu1 }
 0x33e   :  { %v16525_v33 = vadd.f32 %v12168_v24, %v12167_v16  ;;  %v12170_v47 = vpop.f32.mrb[118].mxu1  ;;  %v13350_v24 = vld [vmem:[%s18045_s5 + $0x270] ss:$8 sps:$4 sm:$0xff]  }
 0x33f   :  { %v12171_v60 = vpop.f32.mrb[119].mxu1  ;;  %6718 = vmatpush1.bf16.msra.mxu1 %v13326_v1 }
 0x340   :  { %v16527_v11 = vadd.f32 %v12171_v60, %v12170_v47  ;;  %6719 = vmatprep.subr.bf16.mxu1 %v13334_v42 }
 0x343   :  { %6720 = vmatpush1.bf16.msra.mxu1 %v13332_v34 }
 0x344   :  { %v5437_v10 = vpop.f32.mrb[120].mxu1  ;;  %6721 = vmatprep.subr.bf16.mxu1 %v13340_v35 }
 0x345   :  { %v12325_v40 = vpop.f32.mrb[121].mxu1 }
 0x346   :  { %v5440_v37 = vpop.f32.mrb[122].mxu1 }
 0x347   :  { %v5441_v36 = vadd.f32 %v16454_v14, %v5440_v37  ;;  %v12326_v31 = vpop.f32.mrb[123].mxu1  ;;  %6722 = vmatpush1.bf16.msra.mxu1 %v13338_v17  ;;  %v13346_v14 = vld [vmem:[%s18045_s5 + $0x264] ss:$8 sps:$4 sm:$0xff]  }
 0x348   :  { %6723 = vmatprep.subr.bf16.mxu1 %v13346_v14 }
 0x349   :  { %v16546_v18 = vadd.f32 %v16328_v7, %v5441_v36 }
 0x34b   :  { %6724 = vmatpush1.bf16.msra.mxu1 %v13344_v30 }
 0x34c   :  { %v5445_v21 = vpop.f32.mrb[124].mxu1  ;;  %6725 = vmatprep.subr.bf16.mxu1 %v13352_v43 }
 0x34d   :  { %v5446_v50 = vadd.f32 %v16474_v6, %v5445_v21  ;;  %v12329_v32 = vpop.f32.mrb[125].mxu1 }
 0x34e   :  { %v5448_v7 = vpop.f32.mrb[126].mxu1 }
 0x34f   :  { %v16559_v56 = vadd.f32 %v16334_v2, %v5446_v50  ;;  %v5449_v4 = vadd.f32 %v16479_v52, %v5448_v7  ;;  %v12330_v16 = vpop.f32.mrb[127].mxu1  ;;  %6726 = vmatpush1.bf16.msra.mxu1 %v13350_v24  ;;  %v13358_v2 = vld [vmem:[%s18045_s5 + $0x104] ss:$8 sps:$4 sm:$0xff]  }
 0x350   :  { %7058 = vmatprep.subr.bf16.mxu1 %v13358_v2 }
 0x351   :  { %v16566_v6 = vadd.f32 %v16343_v28, %v5449_v4 }
 0x354   :  { %v5453_v27 = vpop.f32.mrb[128].mxu1 }
 0x355   :  { %v5454_v52 = vadd.f32 %v16493_v23, %v5453_v27  ;;  %v12333_v47 = vpop.f32.mrb[129].mxu1 }
 0x356   :  { %v5456_v60 = vpop.f32.mrb[130].mxu1 }
 0x357   :  { %v16576_v1 = vadd.f32 %v16349_v39, %v5454_v52  ;;  %v5457_v28 = vadd.f32 %v16495_v20, %v5456_v60  ;;  %v12334_v46 = vpop.f32.mrb[131].mxu1 }
 0x359   :  { %v16580_v10 = vadd.f32 %v16358_v51, %v5457_v28 }
 0x35c   :  { %v5281_v42 = vpop.f32.mrb[140].mxu0  ;;  %v5461_v40 = vpop.f32.mrb[132].mxu1 }
 0x35d   :  { %v5283_v34 = vpop.f32.mrb[141].mxu0  ;;  %v5462_v37 = vadd.f32 %v16509_v15, %v5461_v40  ;;  %v12337_v36 = vpop.f32.mrb[133].mxu1 }
 0x35e   :  { %v5285_v31 = vpop.f32.mrb[142].mxu0  ;;  %v5464_v23 = vpop.f32.mrb[134].mxu1 }
 0x35f   :  { %v16584_v35 = vadd.f32 %v16367_v48, %v5462_v37  ;;  %v16587_v39 = vadd.f32 %v5285_v31, %v16326_v41  ;;  %v5287_v17 = vpop.f32.mrb[143].mxu0  ;;  %v5465_v20 = vadd.f32 %v16511_v44, %v5464_v23  ;;  %v12338_v21 = vpop.f32.mrb[135].mxu1 }
 0x360   :  { %v16591_v51 = vadd.f32 %v5287_v17, %v16330_v57 }
 0x361   :  { %v16594_v14 = vadd.f32 %v16385_v26, %v5465_v20 }
 0x364   :  { %v5291_v15 = vpop.f32.mrb[144].mxu0  ;;  %v5469_v50 = vpop.f32.mrb[136].mxu1 }
 0x365   :  { %v16597_v32 = vadd.f32 %v5291_v15, %v16332_v0  ;;  %v5293_v48 = vpop.f32.mrb[145].mxu0  ;;  %v5470_v30 = vadd.f32 %v16525_v33, %v5469_v50  ;;  %v12341_v41 = vpop.f32.mrb[137].mxu1 }
 0x366   :  { %v16601_v7 = vadd.f32 %v5293_v48, %v16336_v59  ;;  %v5295_v44 = vpop.f32.mrb[146].mxu0  ;;  %v5472_v4 = vpop.f32.mrb[138].mxu1 }
 0x367   :  { %v16604_v57 = vadd.f32 %v16398_v9, %v5470_v30  ;;  %v16607_v26 = vadd.f32 %v5295_v44, %v16341_v19  ;;  %v5297_v16 = vpop.f32.mrb[147].mxu0  ;;  %v5473_v43 = vadd.f32 %v16527_v11, %v5472_v4  ;;  %v12342_v0 = vpop.f32.mrb[139].mxu1 }
 0x368   :  { %v16611_v24 = vadd.f32 %v5297_v16, %v16345_v3 }
 0x369   :  { %v16614_v33 = vadd.f32 %v16420_v63, %v5473_v43 }
 0x36c   :  { %v5301_v59 = vpop.f32.mrb[148].mxu0  ;;  %v12198_v27 = vpop.f32.mrb[140].mxu1 }
 0x36d   :  { %v16617_v2 = vadd.f32 %v5301_v59, %v16347_v12  ;;  %v5303_v9 = vpop.f32.mrb[149].mxu0  ;;  %v12199_v52 = vpop.f32.mrb[141].mxu1 }
 0x36e   :  { %v16620_v19 = vadd.f32 %v5303_v9, %v16351_v22  ;;  %v5305_v47 = vpop.f32.mrb[150].mxu0  ;;  %v12201_v60 = vpop.f32.mrb[142].mxu1 }
 0x36f   :  { %v16623_v11 = vadd.f32 %v5305_v47, %v16356_v29  ;;  %v5307_v3 = vpop.f32.mrb[151].mxu0  ;;  %v12202_v28 = vpop.f32.mrb[143].mxu1 }
 0x370   :  { %v16626_v63 = vadd.f32 %v5307_v3, %v16360_v54  ;;  %v12203_v46 = vadd.f32 %v12202_v28, %v12201_v60 }
 0x374   :  { %v5311_v42 = vpop.f32.mrb[152].mxu0  ;;  %v12204_v40 = vpop.f32.mrb[144].mxu1 }
 0x375   :  { %v16629_v12 = vadd.f32 %v5311_v42, %v16362_v53  ;;  %v5313_v34 = vpop.f32.mrb[153].mxu0  ;;  %v12205_v37 = vpop.f32.mrb[145].mxu1 }
 0x376   :  { %v16632_v22 = vadd.f32 %v5313_v34, %v16369_v8  ;;  %v5315_v36 = vpop.f32.mrb[154].mxu0  ;;  %v12206_v31 = vadd.f32 %v12205_v37, %v12204_v40  ;;  %v12207_v29 = vpop.f32.mrb[146].mxu1 }
 0x377   :  { %v16635_v23 = vadd.f32 %v5315_v36, %v16383_v45  ;;  %v5317_v17 = vpop.f32.mrb[155].mxu0  ;;  %v12208_v54 = vpop.f32.mrb[147].mxu1 }
 0x378   :  { %v16638_v20 = vadd.f32 %v5317_v17, %v16387_v13  ;;  %v12209_v21 = vadd.f32 %v12208_v54, %v12207_v29 }
 0x37c   :  { %v5321_v15 = vpop.f32.mrb[156].mxu0  ;;  %v12210_v53 = vpop.f32.mrb[148].mxu1 }
 0x37d   :  { %v16641_v50 = vadd.f32 %v5321_v15, %v16389_v55  ;;  %v5323_v48 = vpop.f32.mrb[157].mxu0  ;;  %v12211_v8 = vpop.f32.mrb[149].mxu1 }
 0x37e   :  { %v16644_v30 = vadd.f32 %v5323_v48, %v16400_v62  ;;  %v5325_v41 = vpop.f32.mrb[158].mxu0  ;;  %v12212_v44 = vadd.f32 %v12211_v8, %v12210_v53  ;;  %v12213_v45 = vpop.f32.mrb[150].mxu1 }
 0x37f   :  { %v16647_v4 = vadd.f32 %v5325_v41, %v16411_v49  ;;  %v5327_v16 = vpop.f32.mrb[159].mxu0  ;;  %v12214_v13 = vpop.f32.mrb[151].mxu1 }
 0x380   :  { %v16650_v43 = vadd.f32 %v5327_v16, %v16422_v61  ;;  %v12215_v0 = vadd.f32 %v12214_v13, %v12213_v45  ;;  %v16659_v61 = vld [vmem:[%s18046_s4] sm:$0x7] }
 0x381   :  { %v16663_v29 = vrot.slane %v16659_v61, %v15144_v38 }
 0x384   :  { %v12216_v59 = vpop.f32.mrb[152].mxu1 }
 0x385   :  { %v12217_v55 = vpop.f32.mrb[153].mxu1 }
 0x386   :  { %v12218_v27 = vadd.f32 %v12217_v55, %v12216_v59  ;;  %v12219_v9 = vpop.f32.mrb[154].mxu1 }
 0x387   :  { %v12220_v52 = vpop.f32.mrb[155].mxu1 }
 0x388   :  { %v12221_v47 = vadd.f32 %v12220_v52, %v12219_v9 }
 0x38c   :  { %v12222_v62 = vpop.f32.mrb[156].mxu1 }
 0x38d   :  { %v12223_v60 = vpop.f32.mrb[157].mxu1 }
 0x38e   :  { %v16652_v3 = vadd.f32 %v12223_v60, %v12222_v62  ;;  %v12225_v28 = vpop.f32.mrb[158].mxu1 }
 0x38f   :  { %v12226_v42 = vpop.f32.mrb[159].mxu1 }
 0x390   :  { %v16654_v49 = vadd.f32 %v12226_v42, %v12225_v28 }
 0x394   :  { %v6211_v40 = vpop.f32.mrb[160].mxu1 }
 0x395   :  { %v12353_v34 = vpop.f32.mrb[161].mxu1 }
 0x396   :  { %v6214_v37 = vpop.f32.mrb[162].mxu1 }
 0x397   :  { %v6215_v36 = vadd.f32 %v12203_v46, %v6214_v37  ;;  %v12354_v17 = vpop.f32.mrb[163].mxu1 }
 0x399   :  { %v6301_v54 = vadd.f32 %v16546_v18, %v6215_v36  ;;  %v13293_v36 = vld [vmem:[%s18045_s5 + $0x10] ss:$8 sps:$4 sm:$0xff]  }
 0x39b   :  { %v16667_v15 = vadd.f32 %v16663_v29, %v6301_v54  ;;  %v13301_v54 = vld [vmem:[%s18045_s5 + $0x24] ss:$8 sps:$4 sm:$0xff]  }
 0x39c   :  { %v5972_v53 = vpop.f32.mrb[160].mxu0  ;;  %v6219_v48 = vpop.f32.mrb[164].mxu1 }
 0x39d   :  { %v5974_v8 = vpop.f32.mrb[161].mxu0  ;;  %v6220_v41 = vadd.f32 %v12206_v31, %v6219_v48  ;;  %v12357_v45 = vpop.f32.mrb[165].mxu1  ;;  %v13287_v31 = vld [vmem:[%s18045_s5] ss:$8 sps:$4 sm:$0xff]  }
 0x39e   :  { %v16669_v16 = vpop.f32.mrb[162].mxu0  ;;  %v6222_v13 = vpop.f32.mrb[166].mxu1  ;;  %v13299_v53 = vld [vmem:[%s18045_s5 + $0x20] ss:$8 sps:$4 sm:$0xff]  }
 0x39f   :  { %v6396_v46 = vadd.f32 %v16559_v56, %v6220_v41  ;;  %v16672_v59 = vpop.f32.mrb[163].mxu0  ;;  %v6223_v38 = vadd.f32 %v12209_v21, %v6222_v13  ;;  %v12358_v55 = vpop.f32.mrb[167].mxu1  ;;  %v13295_v21 = vld [vmem:[%s18045_s5 + $0x14] ss:$8 sps:$4 sm:$0xff]  }
 0x3a1   :  { %v6399_v9 = vadd.f32 %v6396_v46, %v16663_v29  ;;  %v7119_v18 = vadd.f32 %v16566_v6, %v6223_v38  ;;  %v13305_v38 = vld [vmem:[%s18045_s5 + $0x30] ss:$8 sps:$4 sm:$0xff]  }
 0x3a3   :  { %v6402_v52 = vmax.f32 %v6399_v9, 0.0  ;;  %v16677_v62 = vadd.f32 %v7119_v18, %v16663_v29  ;;  %v13313_v9 = vld [vmem:[%s18045_s5 + $0x44] ss:$8 sps:$4 sm:$0xff]  }
 0x3a4   :  { %v6227_v60 = vpop.f32.mrb[168].mxu1 }
 0x3a5   :  { %v6405_v28 = vpack.c.bf16 %v6402_v52, %v6402_v52  ;;  %v6228_v42 = vadd.f32 %v12212_v44, %v6227_v60  ;;  %v12361_v56 = vpop.f32.mrb[169].mxu1 }
 0x3a6   :  { %v6230_v40 = vpop.f32.mrb[170].mxu1 }
 0x3a7   :  { %v7522_v34 = vadd.f32 %v16576_v1, %v6228_v42  ;;  %v6231_v6 = vadd.f32 %v12215_v0, %v6230_v40  ;;  %v12362_v37 = vpop.f32.mrb[171].mxu1  ;;  %6769 = vmatmul.mubr.bf16.vlgmr.msra.gmra.mrb[184].mxu0 %v6405_v28 }
 0x3a8   :  { %7018 = vmatpush1.bf16.msra.mxu0 %v13287_v31 }
 0x3a9   :  { %v16690_v17 = vadd.f32 %v7522_v34, %v16663_v29  ;;  %v7925_v44 = vadd.f32 %v16580_v10, %v6231_v6  ;;  %7019 = vmatprep.subr.bf16.mxu0 %v13295_v21  ;;  %v13307_v10 = vld [vmem:[%s18045_s5 + $0x34] ss:$8 sps:$4 sm:$0xff]   ;;  %v13317_v21 = vld [vmem:[%s18045_s5 + $0x50] ss:$8 sps:$4 sm:$0xff]   ;;  %v13325_v34 = vld [vmem:[%s18045_s5 + $0x64] ss:$8 sps:$4 sm:$0xff]  }
 0x3aa   :  { %v13331_v6 = vld [vmem:[%s18045_s5 + $0x74] ss:$8 sps:$4 sm:$0xff]  }
 0x3ab   :  { %v16697_v1 = vadd.f32 %v7925_v44, %v16663_v29 }
 0x3ac   :  { %7020 = vmatpush1.bf16.msra.mxu0 %v13293_v36  ;;  %v6235_v0 = vpop.f32.mrb[172].mxu1  ;;  %v13335_v36 = vld [vmem:[%s18045_s5 + $0x80] ss:$8 sps:$4 sm:$0xff]  }
 0x3ad   :  { %v6236_v48 = vadd.f32 %v12218_v27, %v6235_v0  ;;  %v12365_v8 = vpop.f32.mrb[173].mxu1  ;;  %7021 = vmatprep.subr.bf16.mxu0 %v13301_v54  ;;  %v13343_v54 = vld [vmem:[%s18045_s5 + $0x94] ss:$8 sps:$4 sm:$0xff]  }
 0x3ae   :  { %v6238_v41 = vpop.f32.mrb[174].mxu1 }
 0x3af   :  { %v8328_v45 = vadd.f32 %v16584_v35, %v6236_v48  ;;  %v6239_v13 = vadd.f32 %v12221_v47, %v6238_v41  ;;  %v12366_v46 = vpop.f32.mrb[175].mxu1  ;;  %v13311_v47 = vld [vmem:[%s18045_s5 + $0x40] ss:$8 sps:$4 sm:$0xff]   ;;  %v13341_v41 = vld [vmem:[%s18045_s5 + $0x90] ss:$8 sps:$4 sm:$0xff]  }
 0x3b0   :  { %7022 = vmatpush1.bf16.msra.mxu0 %v13299_v53 }
 0x3b1   :  { %v16710_v55 = vadd.f32 %v8328_v45, %v16663_v29  ;;  %v8731_v27 = vadd.f32 %v16594_v14, %v6239_v13  ;;  %7023 = vmatprep.subr.bf16.mxu0 %v13307_v10  ;;  %v13319_v14 = vld [vmem:[%s18045_s5 + $0x54] ss:$8 sps:$4 sm:$0xff]   ;;  %v16763_v10 = vrot.slane %v16659_v61, %v15410_v5 }
 0x3b3   :  { %v16717_v18 = vadd.f32 %v8731_v27, %v16663_v29  ;;  %v16781_v27 = vrot.slane %v16659_v61, %v15407_v58 }
 0x3b4   :  { %7024 = vmatpush1.bf16.msra.mxu0 %v13305_v38  ;;  %v6243_v35 = vpop.f32.mrb[176].mxu1  ;;  %v13347_v38 = vld [vmem:[%s18045_s5 + $0xa0] ss:$8 sps:$4 sm:$0xff]  }
 0x3b5   :  { %v6244_v52 = vadd.f32 %v16652_v3, %v6243_v35  ;;  %v12369_v60 = vpop.f32.mrb[177].mxu1  ;;  %7025 = vmatprep.subr.bf16.mxu0 %v13313_v9 }
 0x3b6   :  { %v6246_v31 = vpop.f32.mrb[178].mxu1 }
 0x3b7   :  { %v9134_v28 = vadd.f32 %v16604_v57, %v6244_v52  ;;  %v6247_v42 = vadd.f32 %v16654_v49, %v6246_v31  ;;  %v12370_v56 = vpop.f32.mrb[179].mxu1  ;;  %v13323_v49 = vld [vmem:[%s18045_s5 + $0x60] ss:$8 sps:$4 sm:$0xff]  }
 0x3b8   :  { %7026 = vmatpush1.bf16.msra.mxu0 %v13311_v47 }
 0x3b9   :  { %v16732_v40 = vadd.f32 %v9134_v28, %v16663_v29  ;;  %v9537_v3 = vadd.f32 %v16614_v33, %v6247_v42  ;;  %7027 = vmatprep.subr.bf16.mxu0 %v13319_v14  ;;  %v13329_v33 = vld [vmem:[%s18045_s5 + $0x70] ss:$8 sps:$4 sm:$0xff]  }
 0x3ba   :  { %v13353_v42 = vld [vmem:[%s18045_s5 + $0xb0] ss:$8 sps:$4 sm:$0xff]  }
 0x3bb   :  { %v16739_v57 = vadd.f32 %v9537_v3, %v16663_v29  ;;  %v13337_v29 = vld [vmem:[%s18045_s5 + $0x84] ss:$8 sps:$4 sm:$0xff]   ;;  %v13359_v3 = vld [vmem:[%s18045_s5 + $0xc0] ss:$8 sps:$4 sm:$0xff]  }
 0x3bc   :  { %7028 = vmatpush1.bf16.msra.mxu0 %v13317_v21 }
 0x3bd   :  { %7029 = vmatprep.subr.bf16.mxu0 %v13325_v34 }
 0x3c0   :  { %7030 = vmatpush1.bf16.msra.mxu0 %v13323_v49 }
 0x3c1   :  { %7031 = vmatprep.subr.bf16.mxu0 %v13331_v6  ;;  %v13364_v6 = vld [vmem:[%s18045_s5 + $0x114] ss:$8 sps:$4 sm:$0xff]  }
 0x3c4   :  { %v6055_v37 = vpop.f32.mrb[180].mxu0  ;;  %7032 = vmatpush1.bf16.msra.mxu0 %v13329_v33 }
 0x3c5   :  { %v6057_v44 = vpop.f32.mrb[181].mxu0  ;;  %7033 = vmatprep.subr.bf16.mxu0 %v13337_v29 }
 0x3c6   :  { %v6059_v0 = vpop.f32.mrb[182].mxu0 }
 0x3c7   :  { %v6060_v53 = vadd.f32 %v6059_v0, %v16669_v16  ;;  %v6061_v48 = vpop.f32.mrb[183].mxu0  ;;  %v13349_v16 = vld [vmem:[%s18045_s5 + $0xa4] ss:$8 sps:$4 sm:$0xff]  }
 0x3c8   :  { %v6062_v8 = vadd.f32 %v6061_v48, %v16672_v59  ;;  %7034 = vmatpush1.bf16.msra.mxu0 %v13335_v36  ;;  %v13367_v36 = vld [vmem:[%s18045_s5 + $0xd4] ss:$8 sps:$4 sm:$0xff]  }
 0x3c9   :  { %v16769_v45 = vadd.f32 %v16587_v39, %v6060_v53  ;;  %7035 = vmatprep.subr.bf16.mxu0 %v13343_v54 }
 0x3ca   :  { %v6300_v13 = vadd.f32 %v16591_v51, %v6062_v8  ;;  %v13355_v51 = vld [vmem:[%s18045_s5 + $0xb4] ss:$8 sps:$4 sm:$0xff]  }
 0x3cc   :  { %v6320_v59 = vadd.f32 %v16763_v10, %v6300_v13  ;;  %v6065_v46 = vpop.f32.mrb[164].mxu0  ;;  %7036 = vmatpush1.bf16.msra.mxu0 %v13341_v41  ;;  %v13368_v13 = vld [vmem:[%s18045_s5 + $0x120] ss:$8 sps:$4 sm:$0xff]  }
 0x3cd   :  { %v6394_v39 = vadd.f32 %v16597_v32, %v6065_v46  ;;  %v6067_v9 = vpop.f32.mrb[165].mxu0  ;;  %7037 = vmatprep.subr.bf16.mxu0 %v13349_v16  ;;  %v13373_v16 = vld [vmem:[%s18045_s5 + $0xe4] ss:$8 sps:$4 sm:$0xff]   ;;  %v13371_v46 = vld [vmem:[%s18045_s5 + $0xe0] ss:$8 sps:$4 sm:$0xff]  }
 0x3ce   :  { %v6395_v35 = vadd.f32 %v16601_v7, %v6067_v9  ;;  %v6069_v47 = vpop.f32.mrb[166].mxu0  ;;  %v6323_v52 = vmax.f32 %v6320_v59, 0.0 }
 0x3cf   :  { %v6397_v60 = vadd.f32 %v6394_v39, %v16781_v27  ;;  %v7117_v14 = vadd.f32 %v16607_v26, %v6069_v47  ;;  %v6071_v31 = vpop.f32.mrb[167].mxu0  ;;  %v13361_v26 = vld [vmem:[%s18045_s5 + $0xc4] ss:$8 sps:$4 sm:$0xff]  }
 0x3d0   :  { %v6398_v61 = vadd.f32 %v6395_v35, %v16763_v10  ;;  %v16792_v28 = vadd.f32 %v16611_v24, %v6071_v31  ;;  %7038 = vmatpush1.bf16.msra.mxu0 %v13347_v38  ;;  %v6326_v32 = vpack.c.bf16 %v6323_v52, %v6323_v52  ;;  %v13356_v24 = vld [vmem:[%s18045_s5 + $0x100] ss:$8 sps:$4 sm:$0xff]   ;;  %v6319_v38 = vadd.f32 %v16781_v27, %v16769_v45  ;;  %v13379_v35 = vld [vmem:[%s18045_s5 + $0xf4] ss:$8 sps:$4 sm:$0xff]  }
 0x3d1   :  { %v6400_v56 = vmax.f32 %v6397_v60, 0.0  ;;  %v16798_v7 = vadd.f32 %v7117_v14, %v16781_v27  ;;  %7039 = vmatprep.subr.bf16.mxu0 %v13355_v51  ;;  %v13376_v51 = vld [vmem:[%s18045_s5 + $0x134] ss:$8 sps:$4 sm:$0xff]  }
 0x3d2   :  { %v6401_v21 = vmax.f32 %v6398_v61, 0.0  ;;  %7049 = vmatprep.mubr.bf16.mxu0 %v6326_v32  ;;  %v13374_v61 = vld [vmem:[%s18045_s5 + $0x130] ss:$8 sps:$4 sm:$0xff]   ;;  %v6322_v32 = vmax.f32 %v6319_v38, 0.0 }
 0x3d3   :  { %v6403_v33 = vpack.c.bf16 %v6400_v56, %v6400_v56  ;;  %v13401_v38 = vld [vmem:[%s18045_s5 + $0x430] ss:$8 sps:$4 sm:$0xff]  }
 0x3d4   :  { %v6404_v34 = vpack.c.bf16 %v6401_v21, %v6401_v21  ;;  %v6075_v49 = vpop.f32.mrb[168].mxu0  ;;  %7040 = vmatpush1.bf16.msra.mxu0 %v13353_v42  ;;  %v13380_v21 = vld [vmem:[%s18045_s5 + $0x140] ss:$8 sps:$4 sm:$0xff]  }
 0x3d5   :  { %v7520_v29 = vadd.f32 %v16617_v2, %v6075_v49  ;;  %v6077_v37 = vpop.f32.mrb[169].mxu0  ;;  %7041 = vmatprep.subr.bf16.mxu0 %v13361_v26  ;;  %v13362_v2 = vld [vmem:[%s18045_s5 + $0x110] ss:$8 sps:$4 sm:$0xff]  }
 0x3d6   :  { %v16817_v44 = vadd.f32 %v16620_v19, %v6077_v37  ;;  %v6079_v54 = vpop.f32.mrb[170].mxu0  ;;  %6727 = vmatprep.mubr.bf16.mxu1 %v6404_v34  ;;  %v13365_v19 = vld [vmem:[%s18045_s5 + $0xd0] ss:$8 sps:$4 sm:$0xff]  }
 0x3d7   :  { %v16820_v0 = vadd.f32 %v7520_v29, %v16781_v27  ;;  %v7923_v53 = vadd.f32 %v16623_v11, %v6079_v54  ;;  %v6081_v48 = vpop.f32.mrb[171].mxu0  ;;  %6728 = vmatmul.mubr.bf16.vlgmr.msra.gmra.mrb[180].mxu1 %v6403_v33  ;;  %v13370_v11 = vld [vmem:[%s18045_s5 + $0x124] ss:$8 sps:$4 sm:$0xff]   ;;  %v13391_v33 = vld [vmem:[%s18045_s5 + $0x414] ss:$8 sps:$4 sm:$0xff]  }
 0x3d8   :  { %v7924_v8 = vadd.f32 %v16626_v63, %v6081_v48  ;;  %7059 = vmatpush1.bf16.msra.mxu1 %v13356_v24  ;;  %7042 = vmatpush1.bf16.msra.mxu0 %v13359_v3  ;;  %v13383_v24 = vld [vmem:[%s18045_s5 + $0x400] ss:$8 sps:$4 sm:$0xff]   ;;  %v6325_v3 = vpack.c.bf16 %v6322_v32, %v6322_v32  ;;  %v13421_v32 = vld [vmem:[%s18045_s5 + $0x464] ss:$8 sps:$4 sm:$0xff]  }
 0x3d9   :  { %v16831_v41 = vadd.f32 %v7923_v53, %v16781_v27  ;;  %7060 = vmatprep.subr.bf16.mxu1 %v13364_v6  ;;  %7043 = vmatprep.subr.bf16.mxu0 %v13367_v36  ;;  %v13388_v6 = vld [vmem:[%s18045_s5 + $0x154] ss:$8 sps:$4 sm:$0xff]  }
 0x3da   :  { %v16840_v63 = vadd.f32 %v7924_v8, %v16763_v10  ;;  %7090 = vmatprep.mubr.bf16.mxu1 %v18091_v25 }
 0x3dc   :  { %7061 = vmatpush1.bf16.msra.mxu1 %v13362_v2  ;;  %v6085_v59 = vpop.f32.mrb[172].mxu0  ;;  %7044 = vmatpush1.bf16.msra.mxu0 %v13365_v19  ;;  %v13386_v2 = vld [vmem:[%s18045_s5 + $0x150] ss:$8 sps:$4 sm:$0xff]  }
 0x3dd   :  { %v8326_v39 = vadd.f32 %v16629_v12, %v6085_v59  ;;  %v6087_v9 = vpop.f32.mrb[173].mxu0  ;;  %7062 = vmatprep.subr.bf16.mxu1 %v13370_v11  ;;  %7045 = vmatprep.subr.bf16.mxu0 %v13373_v16  ;;  %v13395_v11 = vld [vmem:[%s18045_s5 + $0x420] ss:$8 sps:$4 sm:$0xff]   ;;  %v13400_v16 = vld [vmem:[%s18045_s5 + $0x174] ss:$8 sps:$4 sm:$0xff]   ;;  %v7121_v59 = vadd.f32 %v16792_v28, %v16763_v10 }
 0x3de   :  { %v8327_v47 = vadd.f32 %v16632_v22, %v6087_v9  ;;  %v6089_v52 = vpop.f32.mrb[174].mxu0  ;;  %v13377_v22 = vld [vmem:[%s18045_s5 + $0xf0] ss:$8 sps:$4 sm:$0xff]   ;;  %v13406_v9 = vld [vmem:[%s18045_s5 + $0x304] ss:$8 sps:$4 sm:$0xff]  }
 0x3df   :  { %v16860_v60 = vadd.f32 %v8326_v39, %v16781_v27  ;;  %v8729_v45 = vadd.f32 %v16635_v23, %v6089_v52  ;;  %v6091_v12 = vpop.f32.mrb[175].mxu0  ;;  %v13382_v23 = vld [vmem:[%s18045_s5 + $0x144] ss:$8 sps:$4 sm:$0xff]   ;;  %v6324_v39 = vmax.f32 %v16667_v15, 0.0  ;;  %v13407_v15 = vld [vmem:[%s18045_s5 + $0x440] ss:$8 sps:$4 sm:$0xff]  }
 0x3e0   :  { %v16864_v14 = vadd.f32 %v8327_v47, %v16763_v10  ;;  %v8730_v31 = vadd.f32 %v16638_v20, %v6091_v12  ;;  %7063 = vmatpush1.bf16.msra.mxu1 %v13368_v13  ;;  %7046 = vmatpush1.bf16.msra.mxu0 %v13371_v46  ;;  %v13385_v20 = vld [vmem:[%s18045_s5 + $0x404] ss:$8 sps:$4 sm:$0xff]   ;;  %v13403_v13 = vld [vmem:[%s18045_s5 + $0x434] ss:$8 sps:$4 sm:$0xff]   ;;  %v13398_v46 = vld [vmem:[%s18045_s5 + $0x170] ss:$8 sps:$4 sm:$0xff]  }
 0x3e1   :  { %v16874_v42 = vadd.f32 %v8729_v45, %v16781_v27  ;;  %7064 = vmatprep.subr.bf16.mxu1 %v13376_v51  ;;  %7047 = vmatprep.subr.bf16.mxu0 %v13379_v35  ;;  %v13409_v28 = vld [vmem:[%s18045_s5 + $0x444] ss:$8 sps:$4 sm:$0xff]   ;;  %v7124_v51 = vmax.f32 %v7121_v59, 0.0  ;;  %v13404_v35 = vld [vmem:[%s18045_s5 + $0x300] ss:$8 sps:$4 sm:$0xff]   ;;  %v6327_v47 = vpack.c.bf16 %v6324_v39, %v6324_v39 }
 0x3e2   :  { %v16883_v56 = vadd.f32 %v8730_v31, %v16763_v10  ;;  %v13412_v52 = vld [vmem:[%s18045_s5 + $0x314] ss:$8 sps:$4 sm:$0xff]   ;;  %v13410_v31 = vld [vmem:[%s18045_s5 + $0x310] ss:$8 sps:$4 sm:$0xff]   ;;  %v13452_v39 = vld [vmem:[%s18045_s5 + $0x380] ss:$8 sps:$4 sm:$0xff]  }
 0x3e3   :  { %v7127_v45 = vpack.c.bf16 %v7124_v51, %v7124_v51  ;;  %v13415_v12 = vld [vmem:[%s18045_s5 + $0x454] ss:$8 sps:$4 sm:$0xff]   ;;  %v13449_v59 = vld [vmem:[%s18045_s5 + $0x4b0] ss:$8 sps:$4 sm:$0xff]  }
 0x3e4   :  { %7065 = vmatpush1.bf16.msra.mxu1 %v13374_v61  ;;  %v6095_v26 = vpop.f32.mrb[176].mxu0  ;;  %7048 = vmatpush1.bf16.msra.mxu0 %v13377_v22  ;;  %v13413_v61 = vld [vmem:[%s18045_s5 + $0x450] ss:$8 sps:$4 sm:$0xff]   ;;  %v13418_v22 = vld [vmem:[%s18045_s5 + $0x324] ss:$8 sps:$4 sm:$0xff]  }
 0x3e5   :  { %v9132_v34 = vadd.f32 %v16641_v50, %v6095_v26  ;;  %v6097_v49 = vpop.f32.mrb[177].mxu0  ;;  %7066 = vmatprep.subr.bf16.mxu1 %v13382_v23  ;;  %7459 = vmatprep.subr.bf16.mxu0 %v13385_v20  ;;  %v13416_v23 = vld [vmem:[%s18045_s5 + $0x320] ss:$8 sps:$4 sm:$0xff]   ;;  %v13424_v26 = vld [vmem:[%s18045_s5 + $0x334] ss:$8 sps:$4 sm:$0xff]  }
 0x3e6   :  { %v9133_v29 = vadd.f32 %v16644_v30, %v6097_v49  ;;  %v6099_v37 = vpop.f32.mrb[178].mxu0  ;;  %v13389_v30 = vld [vmem:[%s18045_s5 + $0x410] ss:$8 sps:$4 sm:$0xff]   ;;  %v13419_v20 = vld [vmem:[%s18045_s5 + $0x460] ss:$8 sps:$4 sm:$0xff]  }
 0x3e7   :  { %v16900_v36 = vadd.f32 %v9132_v34, %v16781_v27  ;;  %v9535_v54 = vadd.f32 %v16647_v4, %v6099_v37  ;;  %v6101_v50 = vpop.f32.mrb[179].mxu0  ;;  %7050 = vmatmul.mubr.bf16.vlgmr.msra.gmra.mrb[188].mxu0 %v6325_v3  ;;  %v13394_v4 = vld [vmem:[%s18045_s5 + $0x164] ss:$8 sps:$4 sm:$0xff]   ;;  %v13422_v3 = vld [vmem:[%s18045_s5 + $0x330] ss:$8 sps:$4 sm:$0xff]  }
 0x3e8   :  { %v16904_v53 = vadd.f32 %v9133_v29, %v16763_v10  ;;  %v9536_v48 = vadd.f32 %v16650_v43, %v6101_v50  ;;  %7067 = vmatpush1.bf16.msra.mxu1 %v13380_v21  ;;  %7460 = vmatpush1.bf16.msra.mxu0 %v13383_v24  ;;  %v13397_v43 = vld [vmem:[%s18045_s5 + $0x424] ss:$8 sps:$4 sm:$0xff]   ;;  %v13427_v21 = vld [vmem:[%s18045_s5 + $0x474] ss:$8 sps:$4 sm:$0xff]   ;;  %v7524_v24 = vadd.f32 %v16817_v44, %v16763_v10  ;;  %v13425_v34 = vld [vmem:[%s18045_s5 + $0x470] ss:$8 sps:$4 sm:$0xff]  }
 0x3e9   :  { %v16914_v8 = vadd.f32 %v9535_v54, %v16781_v27  ;;  %7068 = vmatprep.subr.bf16.mxu1 %v13388_v6  ;;  %7461 = vmatprep.subr.bf16.mxu0 %v13391_v33  ;;  %v13392_v27 = vld [vmem:[%s18045_s5 + $0x160] ss:$8 sps:$4 sm:$0xff]   ;;  %v13430_v49 = vld [vmem:[%s18045_s5 + $0x344] ss:$8 sps:$4 sm:$0xff]   ;;  %v7125_v6 = vmax.f32 %v16677_v62, 0.0 }
 0x3ea   :  { %v16923_v19 = vadd.f32 %v9536_v48, %v16763_v10  ;;  %7491 = vmatprep.mubr.bf16.mxu0 %v18091_v25  ;;  %v13433_v10 = vld [vmem:[%s18045_s5 + $0x484] ss:$8 sps:$4 sm:$0xff]   ;;  %v7527_v44 = vmax.f32 %v7524_v24, 0.0  ;;  %v13428_v33 = vld [vmem:[%s18045_s5 + $0x340] ss:$8 sps:$4 sm:$0xff]  }
 0x3eb   :  { %v13431_v29 = vld [vmem:[%s18045_s5 + $0x480] ss:$8 sps:$4 sm:$0xff]   ;;  %v7128_v37 = vpack.c.bf16 %v7125_v6, %v7125_v6  ;;  %v13436_v62 = vld [vmem:[%s18045_s5 + $0x354] ss:$8 sps:$4 sm:$0xff]   ;;  %v13434_v48 = vld [vmem:[%s18045_s5 + $0x350] ss:$8 sps:$4 sm:$0xff]  }
 0x3ec   :  { %7069 = vmatpush1.bf16.msra.mxu1 %v13386_v2  ;;  %7462 = vmatpush1.bf16.msra.mxu0 %v13389_v30  ;;  %v13439_v54 = vld [vmem:[%s18045_s5 + $0x494] ss:$8 sps:$4 sm:$0xff]   ;;  %v7530_v50 = vpack.c.bf16 %v7527_v44, %v7527_v44  ;;  %v13437_v2 = vld [vmem:[%s18045_s5 + $0x490] ss:$8 sps:$4 sm:$0xff]   ;;  %v13442_v30 = vld [vmem:[%s18045_s5 + $0x364] ss:$8 sps:$4 sm:$0xff]  }
 0x3ed   :  { %7070 = vmatprep.subr.bf16.mxu1 %v13394_v4  ;;  %7463 = vmatprep.subr.bf16.mxu0 %v13397_v43  ;;  %v13445_v4 = vld [vmem:[%s18045_s5 + $0x4a4] ss:$8 sps:$4 sm:$0xff]   ;;  %v13440_v43 = vld [vmem:[%s18045_s5 + $0x360] ss:$8 sps:$4 sm:$0xff]   ;;  %v13463_v51 = vld [vmem:[%s18045_s5 + $0x4d4] ss:$8 sps:$4 sm:$0xff]  }
 0x3ee   :  { %v13484_v24 = vld [vmem:[%s18045_s5 + $0x3d4] ss:$8 sps:$4 sm:$0xff]   ;;  %v13490_v6 = vld [vmem:[%s18045_s5 + $0x3e4] ss:$8 sps:$4 sm:$0xff]   ;;  %v13488_v44 = vld [vmem:[%s18045_s5 + $0x3e0] ss:$8 sps:$4 sm:$0xff]  }
 0x3f0   :  { %7071 = vmatpush1.bf16.msra.mxu1 %v13392_v27  ;;  %7464 = vmatpush1.bf16.msra.mxu0 %v13395_v11  ;;  %v13443_v27 = vld [vmem:[%s18045_s5 + $0x4a0] ss:$8 sps:$4 sm:$0xff]   ;;  %v13448_v11 = vld [vmem:[%s18045_s5 + $0x374] ss:$8 sps:$4 sm:$0xff]  }
 0x3f1   :  { %7072 = vmatprep.subr.bf16.mxu1 %v13400_v16  ;;  %7465 = vmatprep.subr.bf16.mxu0 %v13403_v13  ;;  %v13451_v16 = vld [vmem:[%s18045_s5 + $0x4b4] ss:$8 sps:$4 sm:$0xff]   ;;  %v13446_v13 = vld [vmem:[%s18045_s5 + $0x370] ss:$8 sps:$4 sm:$0xff]  }
 0x3f4   :  { %7073 = vmatpush1.bf16.msra.mxu1 %v13398_v46  ;;  %7466 = vmatpush1.bf16.msra.mxu0 %v13401_v38  ;;  %v13454_v46 = vld [vmem:[%s18045_s5 + $0x384] ss:$8 sps:$4 sm:$0xff]  }
 0x3f5   :  { %7418 = vmatprep.subr.bf16.mxu1 %v13406_v9  ;;  %7467 = vmatprep.subr.bf16.mxu0 %v13409_v28  ;;  %v13457_v38 = vld [vmem:[%s18045_s5 + $0x4c4] ss:$8 sps:$4 sm:$0xff]   ;;  %v13455_v9 = vld [vmem:[%s18045_s5 + $0x4c0] ss:$8 sps:$4 sm:$0xff]   ;;  %v13460_v28 = vld [vmem:[%s18045_s5 + $0x394] ss:$8 sps:$4 sm:$0xff]  }
 0x3f7   :  { %7091 = vmatmul.mubr.bf16.vlgmr.msra.gmra.mrb[184].mxu1 %v6327_v47  ;;  %v13461_v47 = vld [vmem:[%s18045_s5 + $0x4d0] ss:$8 sps:$4 sm:$0xff]  }
 0x3f8   :  { %7419 = vmatpush1.bf16.msra.mxu1 %v13404_v35  ;;  %7450 = vmatprep.mubr.bf16.mxu1 %v7127_v45  ;;  %v13458_v35 = vld [vmem:[%s18045_s5 + $0x390] ss:$8 sps:$4 sm:$0xff]   ;;  %v13464_v45 = vld [vmem:[%s18045_s5 + $0x3a0] ss:$8 sps:$4 sm:$0xff]  }
 0x3f9   :  { %7468 = vmatpush1.bf16.msra.mxu0 %v13407_v15  ;;  %7420 = vmatprep.subr.bf16.mxu1 %v13412_v52  ;;  %v13466_v15 = vld [vmem:[%s18045_s5 + $0x3a4] ss:$8 sps:$4 sm:$0xff]  }
 0x3fa   :  { %7469 = vmatprep.subr.bf16.mxu0 %v13415_v12  ;;  %v13469_v52 = vld [vmem:[%s18045_s5 + $0x4e4] ss:$8 sps:$4 sm:$0xff]   ;;  %v13467_v12 = vld [vmem:[%s18045_s5 + $0x4e0] ss:$8 sps:$4 sm:$0xff]  }
 0x3fc   :  { %7421 = vmatpush1.bf16.msra.mxu1 %v13410_v31  ;;  %v13472_v31 = vld [vmem:[%s18045_s5 + $0x3b4] ss:$8 sps:$4 sm:$0xff]  }
 0x3fd   :  { %7470 = vmatpush1.bf16.msra.mxu0 %v13413_v61  ;;  %7422 = vmatprep.subr.bf16.mxu1 %v13418_v22  ;;  %v13475_v61 = vld [vmem:[%s18045_s5 + $0x4f4] ss:$8 sps:$4 sm:$0xff]   ;;  %v13470_v22 = vld [vmem:[%s18045_s5 + $0x3b0] ss:$8 sps:$4 sm:$0xff]  }
 0x3fe   :  { %7471 = vmatprep.subr.bf16.mxu0 %v13421_v32  ;;  %v13473_v32 = vld [vmem:[%s18045_s5 + $0x4f0] ss:$8 sps:$4 sm:$0xff]  }
 0x400   :  { %7423 = vmatpush1.bf16.msra.mxu1 %v13416_v23  ;;  %v13478_v23 = vld [vmem:[%s18045_s5 + $0x3c4] ss:$8 sps:$4 sm:$0xff]  }
 0x401   :  { %7472 = vmatpush1.bf16.msra.mxu0 %v13419_v20  ;;  %7424 = vmatprep.subr.bf16.mxu1 %v13424_v26  ;;  %v13481_v20 = vld [vmem:[%s18045_s5 + $0x504] ss:$8 sps:$4 sm:$0xff]   ;;  %v13476_v26 = vld [vmem:[%s18045_s5 + $0x3c0] ss:$8 sps:$4 sm:$0xff]  }
 0x402   :  { %7473 = vmatprep.subr.bf16.mxu0 %v13427_v21  ;;  %v13479_v21 = vld [vmem:[%s18045_s5 + $0x500] ss:$8 sps:$4 sm:$0xff]  }
 0x404   :  { %7425 = vmatpush1.bf16.msra.mxu1 %v13422_v3  ;;  %v13487_v3 = vld [vmem:[%s18045_s5 + $0x514] ss:$8 sps:$4 sm:$0xff]  }
 0x405   :  { %7474 = vmatpush1.bf16.msra.mxu0 %v13425_v34  ;;  %7426 = vmatprep.subr.bf16.mxu1 %v13430_v49  ;;  %v13482_v34 = vld [vmem:[%s18045_s5 + $0x3d0] ss:$8 sps:$4 sm:$0xff]  }
 0x406   :  { %7821 = vmatprep.subr.bf16.mxu0 %v13433_v10  ;;  %v13485_v49 = vld [vmem:[%s18045_s5 + $0x510] ss:$8 sps:$4 sm:$0xff]   ;;  %v13493_v10 = vld [vmem:[%s18045_s5 + $0x524] ss:$8 sps:$4 sm:$0xff]  }
 0x408   :  { %7427 = vmatpush1.bf16.msra.mxu1 %v13428_v33  ;;  %7492 = vmatmul.mubr.bf16.vlgmr.msra.gmra.mrb[192].mxu0 %v7128_v37  ;;  %v13491_v33 = vld [vmem:[%s18045_s5 + $0x520] ss:$8 sps:$4 sm:$0xff]   ;;  %v13499_v37 = vld [vmem:[%s18045_s5 + $0x534] ss:$8 sps:$4 sm:$0xff]  }
 0x409   :  { %7822 = vmatpush1.bf16.msra.mxu0 %v13431_v29  ;;  %7853 = vmatprep.mubr.bf16.mxu0 %v7530_v50  ;;  %v13496_v29 = vld [vmem:[%s18045_s5 + $0x3f4] ss:$8 sps:$4 sm:$0xff]   ;;  %v13497_v50 = vld [vmem:[%s18045_s5 + $0x530] ss:$8 sps:$4 sm:$0xff]  }
 0x40a   :  { %7428 = vmatprep.subr.bf16.mxu1 %v13436_v62  ;;  %7823 = vmatprep.subr.bf16.mxu0 %v13439_v54  ;;  %v13494_v62 = vld [vmem:[%s18045_s5 + $0x3f0] ss:$8 sps:$4 sm:$0xff]   ;;  %v7123_v54 = vmax.f32 %v16798_v7, 0.0  ;;  %v13500_v7 = vld [vmem:[%s18045_s5 + $0x580] ss:$8 sps:$4 sm:$0xff]  }
 0x40c   :  { %7429 = vmatpush1.bf16.msra.mxu1 %v13434_v48  ;;  %v13502_v48 = vld [vmem:[%s18045_s5 + $0x584] ss:$8 sps:$4 sm:$0xff]  }
 0x40d   :  { %7824 = vmatpush1.bf16.msra.mxu0 %v13437_v2  ;;  %7430 = vmatprep.subr.bf16.mxu1 %v13442_v30  ;;  %v13505_v2 = vld [vmem:[%s18045_s5 + $0x544] ss:$8 sps:$4 sm:$0xff]   ;;  %v7126_v30 = vpack.c.bf16 %v7123_v54, %v7123_v54  ;;  %v13554_v54 = vld [vmem:[%s18045_s5 + $0x610] ss:$8 sps:$4 sm:$0xff]  }
 0x40e   :  { %7825 = vmatprep.subr.bf16.mxu0 %v13445_v4  ;;  %v13503_v4 = vld [vmem:[%s18045_s5 + $0x540] ss:$8 sps:$4 sm:$0xff]  }
 0x410   :  { %7431 = vmatpush1.bf16.msra.mxu1 %v13440_v43  ;;  %v13508_v43 = vld [vmem:[%s18045_s5 + $0x594] ss:$8 sps:$4 sm:$0xff]  }
 0x411   :  { %7826 = vmatpush1.bf16.msra.mxu0 %v13443_v27  ;;  %7432 = vmatprep.subr.bf16.mxu1 %v13448_v11  ;;  %v13511_v27 = vld [vmem:[%s18045_s5 + $0x554] ss:$8 sps:$4 sm:$0xff]   ;;  %v13506_v11 = vld [vmem:[%s18045_s5 + $0x590] ss:$8 sps:$4 sm:$0xff]  }
 0x412   :  { %7827 = vmatprep.subr.bf16.mxu0 %v13451_v16  ;;  %v13509_v16 = vld [vmem:[%s18045_s5 + $0x550] ss:$8 sps:$4 sm:$0xff]  }
 0x414   :  { %7433 = vmatpush1.bf16.msra.mxu1 %v13446_v13  ;;  %v13514_v13 = vld [vmem:[%s18045_s5 + $0x5a4] ss:$8 sps:$4 sm:$0xff]  }
 0x415   :  { %7828 = vmatpush1.bf16.msra.mxu0 %v13449_v59  ;;  %7434 = vmatprep.subr.bf16.mxu1 %v13454_v46  ;;  %v13517_v59 = vld [vmem:[%s18045_s5 + $0x564] ss:$8 sps:$4 sm:$0xff]   ;;  %v13512_v46 = vld [vmem:[%s18045_s5 + $0x5a0] ss:$8 sps:$4 sm:$0xff]  }
 0x416   :  { %7829 = vmatprep.subr.bf16.mxu0 %v13457_v38  ;;  %v13515_v38 = vld [vmem:[%s18045_s5 + $0x560] ss:$8 sps:$4 sm:$0xff]  }
 0x418   :  { %7435 = vmatpush1.bf16.msra.mxu1 %v13452_v39  ;;  %v13520_v39 = vld [vmem:[%s18045_s5 + $0x5b4] ss:$8 sps:$4 sm:$0xff]  }
 0x419   :  { %7830 = vmatpush1.bf16.msra.mxu0 %v13455_v9  ;;  %7436 = vmatprep.subr.bf16.mxu1 %v13460_v28  ;;  %v13523_v9 = vld [vmem:[%s18045_s5 + $0x574] ss:$8 sps:$4 sm:$0xff]   ;;  %v13518_v28 = vld [vmem:[%s18045_s5 + $0x5b0] ss:$8 sps:$4 sm:$0xff]  }
 0x41a   :  { %7831 = vmatprep.subr.bf16.mxu0 %v13463_v51  ;;  %v13521_v51 = vld [vmem:[%s18045_s5 + $0x570] ss:$8 sps:$4 sm:$0xff]  }
 0x41c   :  { %7437 = vmatpush1.bf16.msra.mxu1 %v13458_v35  ;;  %v13526_v35 = vld [vmem:[%s18045_s5 + $0x5c4] ss:$8 sps:$4 sm:$0xff]  }
 0x41d   :  { %7832 = vmatpush1.bf16.msra.mxu0 %v13461_v47  ;;  %7438 = vmatprep.subr.bf16.mxu1 %v13466_v15  ;;  %v7526_v47 = vmax.f32 %v16820_v0, 0.0  ;;  %v13529_v15 = vld [vmem:[%s18045_s5 + $0x704] ss:$8 sps:$4 sm:$0xff]   ;;  %v13532_v0 = vld [vmem:[%s18045_s5 + $0x5d4] ss:$8 sps:$4 sm:$0xff]  }
 0x41e   :  { %7833 = vmatprep.subr.bf16.mxu0 %v13469_v52  ;;  %v13524_v52 = vld [vmem:[%s18045_s5 + $0x5c0] ss:$8 sps:$4 sm:$0xff]  }
 0x420   :  { %7439 = vmatpush1.bf16.msra.mxu1 %v13464_v45  ;;  %v13527_v45 = vld [vmem:[%s18045_s5 + $0x700] ss:$8 sps:$4 sm:$0xff]  }
 0x421   :  { %7834 = vmatpush1.bf16.msra.mxu0 %v13467_v12  ;;  %7440 = vmatprep.subr.bf16.mxu1 %v13472_v31  ;;  %v7529_v12 = vpack.c.bf16 %v7526_v47, %v7526_v47  ;;  %v13535_v31 = vld [vmem:[%s18045_s5 + $0x714] ss:$8 sps:$4 sm:$0xff]   ;;  %v13586_v47 = vld [vmem:[%s18045_s5 + $0x664] ss:$8 sps:$4 sm:$0xff]  }
 0x422   :  { %7835 = vmatprep.subr.bf16.mxu0 %v13475_v61  ;;  %v13530_v61 = vld [vmem:[%s18045_s5 + $0x5d0] ss:$8 sps:$4 sm:$0xff]  }
 0x424   :  { %7441 = vmatpush1.bf16.msra.mxu1 %v13470_v22  ;;  %v13533_v22 = vld [vmem:[%s18045_s5 + $0x710] ss:$8 sps:$4 sm:$0xff]  }
 0x425   :  { %7836 = vmatpush1.bf16.msra.mxu0 %v13473_v32  ;;  %7442 = vmatprep.subr.bf16.mxu1 %v13478_v23  ;;  %v13538_v32 = vld [vmem:[%s18045_s5 + $0x5e4] ss:$8 sps:$4 sm:$0xff]  }
 0x426   :  { %7837 = vmatprep.subr.bf16.mxu0 %v13481_v20  ;;  %v13541_v23 = vld [vmem:[%s18045_s5 + $0x724] ss:$8 sps:$4 sm:$0xff]   ;;  %v13536_v20 = vld [vmem:[%s18045_s5 + $0x5e0] ss:$8 sps:$4 sm:$0xff]  }
 0x428   :  { %7443 = vmatpush1.bf16.msra.mxu1 %v13476_v26  ;;  %v13539_v26 = vld [vmem:[%s18045_s5 + $0x720] ss:$8 sps:$4 sm:$0xff]  }
 0x429   :  { %7838 = vmatpush1.bf16.msra.mxu0 %v13479_v21  ;;  %7444 = vmatprep.subr.bf16.mxu1 %v13484_v24  ;;  %v13544_v21 = vld [vmem:[%s18045_s5 + $0x5f4] ss:$8 sps:$4 sm:$0xff]  }
 0x42a   :  { %7839 = vmatprep.subr.bf16.mxu0 %v13487_v3  ;;  %v13547_v24 = vld [vmem:[%s18045_s5 + $0x734] ss:$8 sps:$4 sm:$0xff]   ;;  %v13542_v3 = vld [vmem:[%s18045_s5 + $0x5f0] ss:$8 sps:$4 sm:$0xff]  }
 0x42c   :  { %7445 = vmatpush1.bf16.msra.mxu1 %v13482_v34  ;;  %v7528_v34 = vmax.f32 %v16690_v17, 0.0  ;;  %v13548_v17 = vld [vmem:[%s18045_s5 + $0x600] ss:$8 sps:$4 sm:$0xff]  }
 0x42d   :  { %7840 = vmatpush1.bf16.msra.mxu0 %v13485_v49  ;;  %7446 = vmatprep.subr.bf16.mxu1 %v13490_v6  ;;  %v13545_v49 = vld [vmem:[%s18045_s5 + $0x730] ss:$8 sps:$4 sm:$0xff]   ;;  %v13550_v6 = vld [vmem:[%s18045_s5 + $0x604] ss:$8 sps:$4 sm:$0xff]  }
 0x42e   :  { %7841 = vmatprep.subr.bf16.mxu0 %v13493_v10  ;;  %v7930_v10 = vmax.f32 %v16840_v63, 0.0  ;;  %v13556_v63 = vld [vmem:[%s18045_s5 + $0x614] ss:$8 sps:$4 sm:$0xff]  }
 0x430   :  { %7447 = vmatpush1.bf16.msra.mxu1 %v13488_v44  ;;  %v13553_v44 = vld [vmem:[%s18045_s5 + $0x744] ss:$8 sps:$4 sm:$0xff]  }
 0x431   :  { %7842 = vmatpush1.bf16.msra.mxu0 %v13491_v33  ;;  %7448 = vmatprep.subr.bf16.mxu1 %v13496_v29  ;;  %v7531_v33 = vpack.c.bf16 %v7528_v34, %v7528_v34  ;;  %v13551_v29 = vld [vmem:[%s18045_s5 + $0x740] ss:$8 sps:$4 sm:$0xff]   ;;  %v13610_v34 = vld [vmem:[%s18045_s5 + $0x6a4] ss:$8 sps:$4 sm:$0xff]  }
 0x432   :  { %7843 = vmatprep.subr.bf16.mxu0 %v13499_v37  ;;  %v7933_v37 = vpack.c.bf16 %v7930_v10, %v7930_v10 }
 0x434   :  { %7449 = vmatpush1.bf16.msra.mxu1 %v13494_v62  ;;  %v13559_v62 = vld [vmem:[%s18045_s5 + $0x754] ss:$8 sps:$4 sm:$0xff]  }
 0x435   :  { %7844 = vmatpush1.bf16.msra.mxu0 %v13497_v50  ;;  %7862 = vmatprep.subr.bf16.mxu1 %v13502_v48  ;;  %v13557_v50 = vld [vmem:[%s18045_s5 + $0x750] ss:$8 sps:$4 sm:$0xff]   ;;  %v13562_v48 = vld [vmem:[%s18045_s5 + $0x624] ss:$8 sps:$4 sm:$0xff]  }
 0x436   :  { %7845 = vmatprep.subr.bf16.mxu0 %v13505_v2  ;;  %v13565_v2 = vld [vmem:[%s18045_s5 + $0x764] ss:$8 sps:$4 sm:$0xff]  }
 0x437   :  { %7451 = vmatmul.mubr.bf16.vlgmr.msra.gmra.mrb[188].mxu1 %v7126_v30  ;;  %v13563_v30 = vld [vmem:[%s18045_s5 + $0x760] ss:$8 sps:$4 sm:$0xff]  }
 0x438   :  { %7863 = vmatpush1.bf16.msra.mxu1 %v13500_v7  ;;  %7894 = vmatprep.mubr.bf16.mxu1 %v18091_v25  ;;  %v13560_v7 = vld [vmem:[%s18045_s5 + $0x620] ss:$8 sps:$4 sm:$0xff]  }
 0x439   :  { %7846 = vmatpush1.bf16.msra.mxu0 %v13503_v4  ;;  %7864 = vmatprep.subr.bf16.mxu1 %v13508_v43  ;;  %v13568_v4 = vld [vmem:[%s18045_s5 + $0x634] ss:$8 sps:$4 sm:$0xff]  }
 0x43a   :  { %7847 = vmatprep.subr.bf16.mxu0 %v13511_v27  ;;  %v13571_v43 = vld [vmem:[%s18045_s5 + $0x774] ss:$8 sps:$4 sm:$0xff]   ;;  %v13566_v27 = vld [vmem:[%s18045_s5 + $0x630] ss:$8 sps:$4 sm:$0xff]  }
 0x43c   :  { %7865 = vmatpush1.bf16.msra.mxu1 %v13506_v11  ;;  %v13569_v11 = vld [vmem:[%s18045_s5 + $0x770] ss:$8 sps:$4 sm:$0xff]  }
 0x43d   :  { %7848 = vmatpush1.bf16.msra.mxu0 %v13509_v16  ;;  %7866 = vmatprep.subr.bf16.mxu1 %v13514_v13  ;;  %v13574_v16 = vld [vmem:[%s18045_s5 + $0x644] ss:$8 sps:$4 sm:$0xff]   ;;  %v7931_v13 = vmax.f32 %v16697_v1, 0.0  ;;  %v13580_v1 = vld [vmem:[%s18045_s5 + $0x654] ss:$8 sps:$4 sm:$0xff]  }
 0x43e   :  { %7849 = vmatprep.subr.bf16.mxu0 %v13517_v59  ;;  %v13577_v59 = vld [vmem:[%s18045_s5 + $0x784] ss:$8 sps:$4 sm:$0xff]  }
 0x440   :  { %7867 = vmatpush1.bf16.msra.mxu1 %v13512_v46  ;;  %v8333_v46 = vmax.f32 %v16864_v14, 0.0  ;;  %v13583_v14 = vld [vmem:[%s18045_s5 + $0x794] ss:$8 sps:$4 sm:$0xff]  }
 0x441   :  { %7850 = vmatpush1.bf16.msra.mxu0 %v13515_v38  ;;  %7868 = vmatprep.subr.bf16.mxu1 %v13520_v39  ;;  %v13572_v38 = vld [vmem:[%s18045_s5 + $0x640] ss:$8 sps:$4 sm:$0xff]  }
 0x442   :  { %7851 = vmatprep.subr.bf16.mxu0 %v13523_v9  ;;  %v13575_v39 = vld [vmem:[%s18045_s5 + $0x780] ss:$8 sps:$4 sm:$0xff]   ;;  %v7934_v9 = vpack.c.bf16 %v7931_v13, %v7931_v13 }
 0x443   :  { %v13632_v13 = vld [vmem:[%s18045_s5 + $0x6e0] ss:$8 sps:$4 sm:$0xff]  }
 0x444   :  { %7869 = vmatpush1.bf16.msra.mxu1 %v13518_v28  ;;  %v8336_v28 = vpack.c.bf16 %v8333_v46, %v8333_v46  ;;  %v13640_v46 = vld [vmem:[%s18045_s5 + $0x6f4] ss:$8 sps:$4 sm:$0xff]  }
 0x445   :  { %7852 = vmatpush1.bf16.msra.mxu0 %v13521_v51  ;;  %7870 = vmatprep.subr.bf16.mxu1 %v13526_v35  ;;  %v13578_v51 = vld [vmem:[%s18045_s5 + $0x650] ss:$8 sps:$4 sm:$0xff]  }
 0x446   :  { %8265 = vmatprep.subr.bf16.mxu0 %v13529_v15  ;;  %v13581_v35 = vld [vmem:[%s18045_s5 + $0x790] ss:$8 sps:$4 sm:$0xff]   ;;  %v13589_v15 = vld [vmem:[%s18045_s5 + $0x7a4] ss:$8 sps:$4 sm:$0xff]  }
 0x448   :  { %7871 = vmatpush1.bf16.msra.mxu1 %v13524_v52  ;;  %7854 = vmatmul.mubr.bf16.vlgmr.msra.gmra.mrb[196].mxu0 %v7529_v12  ;;  %v13584_v52 = vld [vmem:[%s18045_s5 + $0x660] ss:$8 sps:$4 sm:$0xff]   ;;  %v13595_v12 = vld [vmem:[%s18045_s5 + $0x7b4] ss:$8 sps:$4 sm:$0xff]  }
 0x449   :  { %8266 = vmatpush1.bf16.msra.mxu0 %v13527_v45  ;;  %7872 = vmatprep.subr.bf16.mxu1 %v13532_v0  ;;  %v13587_v45 = vld [vmem:[%s18045_s5 + $0x7a0] ss:$8 sps:$4 sm:$0xff]   ;;  %v13592_v0 = vld [vmem:[%s18045_s5 + $0x674] ss:$8 sps:$4 sm:$0xff]  }
 0x44a   :  { %8267 = vmatprep.subr.bf16.mxu0 %v13535_v31  ;;  %8297 = vmatprep.mubr.bf16.mxu0 %v18091_v25  ;;  %v13590_v31 = vld [vmem:[%s18045_s5 + $0x670] ss:$8 sps:$4 sm:$0xff]  }
 0x44c   :  { %7873 = vmatpush1.bf16.msra.mxu1 %v13530_v61  ;;  %v13593_v61 = vld [vmem:[%s18045_s5 + $0x7b0] ss:$8 sps:$4 sm:$0xff]  }
 0x44d   :  { %8268 = vmatpush1.bf16.msra.mxu0 %v13533_v22  ;;  %7874 = vmatprep.subr.bf16.mxu1 %v13538_v32  ;;  %v13598_v22 = vld [vmem:[%s18045_s5 + $0x684] ss:$8 sps:$4 sm:$0xff]  }
 0x44e   :  { %8269 = vmatprep.subr.bf16.mxu0 %v13541_v23  ;;  %v13601_v32 = vld [vmem:[%s18045_s5 + $0x7c4] ss:$8 sps:$4 sm:$0xff]   ;;  %v13596_v23 = vld [vmem:[%s18045_s5 + $0x680] ss:$8 sps:$4 sm:$0xff]  }
 0x450   :  { %7875 = vmatpush1.bf16.msra.mxu1 %v13536_v20  ;;  %v13599_v20 = vld [vmem:[%s18045_s5 + $0x7c0] ss:$8 sps:$4 sm:$0xff]  }
 0x451   :  { %8270 = vmatpush1.bf16.msra.mxu0 %v13539_v26  ;;  %7876 = vmatprep.subr.bf16.mxu1 %v13544_v21  ;;  %v13604_v26 = vld [vmem:[%s18045_s5 + $0x694] ss:$8 sps:$4 sm:$0xff]  }
 0x452   :  { %8271 = vmatprep.subr.bf16.mxu0 %v13547_v24  ;;  %v13607_v21 = vld [vmem:[%s18045_s5 + $0x7d4] ss:$8 sps:$4 sm:$0xff]   ;;  %v13602_v24 = vld [vmem:[%s18045_s5 + $0x690] ss:$8 sps:$4 sm:$0xff]  }
 0x454   :  { %7877 = vmatpush1.bf16.msra.mxu1 %v13542_v3  ;;  %v13605_v3 = vld [vmem:[%s18045_s5 + $0x7d0] ss:$8 sps:$4 sm:$0xff]  }
 0x455   :  { %8272 = vmatpush1.bf16.msra.mxu0 %v13545_v49  ;;  %8224 = vmatprep.subr.bf16.mxu1 %v13550_v6  ;;  %v13613_v6 = vld [vmem:[%s18045_s5 + $0x7e4] ss:$8 sps:$4 sm:$0xff]  }
 0x456   :  { %8273 = vmatprep.subr.bf16.mxu0 %v13553_v44 }
 0x457   :  { %7895 = vmatmul.mubr.bf16.vlgmr.msra.gmra.mrb[192].mxu1 %v7531_v33 }
 0x458   :  { %8225 = vmatpush1.bf16.msra.mxu1 %v13548_v17  ;;  %8256 = vmatprep.mubr.bf16.mxu1 %v7933_v37  ;;  %v13608_v17 = vld [vmem:[%s18045_s5 + $0x6a0] ss:$8 sps:$4 sm:$0xff]   ;;  %v13619_v37 = vld [vmem:[%s18045_s5 + $0x7f4] ss:$8 sps:$4 sm:$0xff]  }
 0x459   :  { %8274 = vmatpush1.bf16.msra.mxu0 %v13551_v29  ;;  %8226 = vmatprep.subr.bf16.mxu1 %v13556_v63  ;;  %v13611_v29 = vld [vmem:[%s18045_s5 + $0x7e0] ss:$8 sps:$4 sm:$0xff]   ;;  %v13616_v63 = vld [vmem:[%s18045_s5 + $0x6b4] ss:$8 sps:$4 sm:$0xff]  }
 0x45a   :  { %8275 = vmatprep.subr.bf16.mxu0 %v13559_v62  ;;  %v13614_v62 = vld [vmem:[%s18045_s5 + $0x6b0] ss:$8 sps:$4 sm:$0xff]  }
 0x45c   :  { %8227 = vmatpush1.bf16.msra.mxu1 %v13554_v54  ;;  %v13617_v54 = vld [vmem:[%s18045_s5 + $0x7f0] ss:$8 sps:$4 sm:$0xff]  }
 0x45d   :  { %8276 = vmatpush1.bf16.msra.mxu0 %v13557_v50  ;;  %8228 = vmatprep.subr.bf16.mxu1 %v13562_v48  ;;  %v13622_v50 = vld [vmem:[%s18045_s5 + $0x6c4] ss:$8 sps:$4 sm:$0xff]  }
 0x45e   :  { %8277 = vmatprep.subr.bf16.mxu0 %v13565_v2  ;;  %v13625_v48 = vld [vmem:[%s18045_s5 + $0x804] ss:$8 sps:$4 sm:$0xff]   ;;  %v13620_v2 = vld [vmem:[%s18045_s5 + $0x6c0] ss:$8 sps:$4 sm:$0xff]  }
 0x460   :  { %8229 = vmatpush1.bf16.msra.mxu1 %v13560_v7  ;;  %v13623_v7 = vld [vmem:[%s18045_s5 + $0x800] ss:$8 sps:$4 sm:$0xff]  }
 0x461   :  { %8278 = vmatpush1.bf16.msra.mxu0 %v13563_v30  ;;  %8230 = vmatprep.subr.bf16.mxu1 %v13568_v4  ;;  %v13628_v30 = vld [vmem:[%s18045_s5 + $0x6d4] ss:$8 sps:$4 sm:$0xff]  }
 0x462   :  { %8279 = vmatprep.subr.bf16.mxu0 %v13571_v43  ;;  %v13631_v4 = vld [vmem:[%s18045_s5 + $0x814] ss:$8 sps:$4 sm:$0xff]   ;;  %v13626_v43 = vld [vmem:[%s18045_s5 + $0x6d0] ss:$8 sps:$4 sm:$0xff]  }
 0x464   :  { %8231 = vmatpush1.bf16.msra.mxu1 %v13566_v27  ;;  %v13629_v27 = vld [vmem:[%s18045_s5 + $0x810] ss:$8 sps:$4 sm:$0xff]  }
 0x465   :  { %8280 = vmatpush1.bf16.msra.mxu0 %v13569_v11  ;;  %8232 = vmatprep.subr.bf16.mxu1 %v13574_v16  ;;  %v13634_v11 = vld [vmem:[%s18045_s5 + $0x6e4] ss:$8 sps:$4 sm:$0xff]  }
 0x466   :  { %8627 = vmatprep.subr.bf16.mxu0 %v13577_v59  ;;  %v13637_v16 = vld [vmem:[%s18045_s5 + $0x824] ss:$8 sps:$4 sm:$0xff]   ;;  %v13635_v59 = vld [vmem:[%s18045_s5 + $0x820] ss:$8 sps:$4 sm:$0xff]  }
 0x468   :  { %8233 = vmatpush1.bf16.msra.mxu1 %v13572_v38  ;;  %8298 = vmatmul.mubr.bf16.vlgmr.msra.gmra.mrb[200].mxu0 %v7934_v9  ;;  %v13643_v38 = vld [vmem:[%s18045_s5 + $0x834] ss:$8 sps:$4 sm:$0xff]   ;;  %v7929_v9 = vmax.f32 %v16831_v41, 0.0  ;;  %v13644_v41 = vld [vmem:[%s18045_s5 + $0x880] ss:$8 sps:$4 sm:$0xff]  }
 0x469   :  { %8628 = vmatpush1.bf16.msra.mxu0 %v13575_v39  ;;  %8659 = vmatprep.mubr.bf16.mxu0 %v8336_v28  ;;  %v13638_v39 = vld [vmem:[%s18045_s5 + $0x6f0] ss:$8 sps:$4 sm:$0xff]   ;;  %v13649_v28 = vld [vmem:[%s18045_s5 + $0x844] ss:$8 sps:$4 sm:$0xff]  }
 0x46a   :  { %8234 = vmatprep.subr.bf16.mxu1 %v13580_v1  ;;  %8629 = vmatprep.subr.bf16.mxu0 %v13583_v14  ;;  %v13641_v1 = vld [vmem:[%s18045_s5 + $0x830] ss:$8 sps:$4 sm:$0xff]   ;;  %v13646_v14 = vld [vmem:[%s18045_s5 + $0x884] ss:$8 sps:$4 sm:$0xff]  }
 0x46c   :  { %8235 = vmatpush1.bf16.msra.mxu1 %v13578_v51  ;;  %v7932_v51 = vpack.c.bf16 %v7929_v9, %v7929_v9  ;;  %v13698_v9 = vld [vmem:[%s18045_s5 + $0x910] ss:$8 sps:$4 sm:$0xff]  }
 0x46d   :  { %8630 = vmatpush1.bf16.msra.mxu0 %v13581_v35  ;;  %8236 = vmatprep.subr.bf16.mxu1 %v13586_v47  ;;  %v13647_v35 = vld [vmem:[%s18045_s5 + $0x840] ss:$8 sps:$4 sm:$0xff]   ;;  %v13652_v47 = vld [vmem:[%s18045_s5 + $0x894] ss:$8 sps:$4 sm:$0xff]  }
 0x46e   :  { %8631 = vmatprep.subr.bf16.mxu0 %v13589_v15  ;;  %v13655_v15 = vld [vmem:[%s18045_s5 + $0x854] ss:$8 sps:$4 sm:$0xff]  }
 0x470   :  { %8237 = vmatpush1.bf16.msra.mxu1 %v13584_v52  ;;  %v13650_v52 = vld [vmem:[%s18045_s5 + $0x890] ss:$8 sps:$4 sm:$0xff]  }
 0x471   :  { %8632 = vmatpush1.bf16.msra.mxu0 %v13587_v45  ;;  %8238 = vmatprep.subr.bf16.mxu1 %v13592_v0  ;;  %v13653_v45 = vld [vmem:[%s18045_s5 + $0x850] ss:$8 sps:$4 sm:$0xff]   ;;  %v13658_v0 = vld [vmem:[%s18045_s5 + $0x8a4] ss:$8 sps:$4 sm:$0xff]  }
 0x472   :  { %8633 = vmatprep.subr.bf16.mxu0 %v13595_v12  ;;  %v13661_v12 = vld [vmem:[%s18045_s5 + $0x864] ss:$8 sps:$4 sm:$0xff]  }
 0x474   :  { %8239 = vmatpush1.bf16.msra.mxu1 %v13590_v31  ;;  %v13656_v31 = vld [vmem:[%s18045_s5 + $0x8a0] ss:$8 sps:$4 sm:$0xff]  }
 0x475   :  { %8634 = vmatpush1.bf16.msra.mxu0 %v13593_v61  ;;  %8240 = vmatprep.subr.bf16.mxu1 %v13598_v22  ;;  %v13659_v61 = vld [vmem:[%s18045_s5 + $0x860] ss:$8 sps:$4 sm:$0xff]   ;;  %v13664_v22 = vld [vmem:[%s18045_s5 + $0x8b4] ss:$8 sps:$4 sm:$0xff]  }
 0x476   :  { %8635 = vmatprep.subr.bf16.mxu0 %v13601_v32  ;;  %v13667_v32 = vld [vmem:[%s18045_s5 + $0x874] ss:$8 sps:$4 sm:$0xff]  }
 0x478   :  { %8241 = vmatpush1.bf16.msra.mxu1 %v13596_v23  ;;  %v13662_v23 = vld [vmem:[%s18045_s5 + $0x8b0] ss:$8 sps:$4 sm:$0xff]  }
 0x479   :  { %8636 = vmatpush1.bf16.msra.mxu0 %v13599_v20  ;;  %8242 = vmatprep.subr.bf16.mxu1 %v13604_v26  ;;  %v13665_v20 = vld [vmem:[%s18045_s5 + $0x870] ss:$8 sps:$4 sm:$0xff]   ;;  %v13670_v26 = vld [vmem:[%s18045_s5 + $0x8c4] ss:$8 sps:$4 sm:$0xff]  }
 0x47a   :  { %v17369_v49 = vpop.f32.mrb[184].mxu0  ;;  %8637 = vmatprep.subr.bf16.mxu0 %v13607_v21  ;;  %v8332_v21 = vmax.f32 %v16860_v60, 0.0  ;;  %v13676_v60 = vld [vmem:[%s18045_s5 + $0x8d4] ss:$8 sps:$4 sm:$0xff]  }
 0x47b   :  { %v17374_v10 = vpop.f32.mrb[185].mxu0 }
 0x47c   :  { %8243 = vmatpush1.bf16.msra.mxu1 %v13602_v24  ;;  %v6774_v44 = vpop.f32.mrb[186].mxu0  ;;  %v13673_v24 = vld [vmem:[%s18045_s5 + $0xa04] ss:$8 sps:$4 sm:$0xff]  }
 0x47d   :  { %8638 = vmatpush1.bf16.msra.mxu0 %v13605_v3  ;;  %8244 = vmatprep.subr.bf16.mxu1 %v13610_v34  ;;  %v6775_v33 = vpop.f32.mrb[187].mxu0  ;;  %v13668_v3 = vld [vmem:[%s18045_s5 + $0x8c0] ss:$8 sps:$4 sm:$0xff]   ;;  %v13679_v44 = vld [vmem:[%s18045_s5 + $0xa14] ss:$8 sps:$4 sm:$0xff]  }
 0x47e   :  { %8639 = vmatprep.subr.bf16.mxu0 %v13613_v6  ;;  %v13671_v34 = vld [vmem:[%s18045_s5 + $0xa00] ss:$8 sps:$4 sm:$0xff]   ;;  %v8335_v6 = vpack.c.bf16 %v8332_v21, %v8332_v21  ;;  %v13677_v33 = vld [vmem:[%s18045_s5 + $0xa10] ss:$8 sps:$4 sm:$0xff]  }
 0x47f   :  { %v13716_v21 = vld [vmem:[%s18045_s5 + $0x940] ss:$8 sps:$4 sm:$0xff]  }
 0x480   :  { %8245 = vmatpush1.bf16.msra.mxu1 %v13608_v17  ;;  %v13674_v17 = vld [vmem:[%s18045_s5 + $0x8d0] ss:$8 sps:$4 sm:$0xff]  }
 0x481   :  { %8640 = vmatpush1.bf16.msra.mxu0 %v13611_v29  ;;  %8246 = vmatprep.subr.bf16.mxu1 %v13616_v63  ;;  %v13682_v29 = vld [vmem:[%s18045_s5 + $0x8e4] ss:$8 sps:$4 sm:$0xff]  }
 0x482   :  { %8641 = vmatprep.subr.bf16.mxu0 %v13619_v37  ;;  %v13685_v37 = vld [vmem:[%s18045_s5 + $0xa24] ss:$8 sps:$4 sm:$0xff]  }
 0x484   :  { %8247 = vmatpush1.bf16.msra.mxu1 %v13614_v62 }
 0x485   :  { %8642 = vmatpush1.bf16.msra.mxu0 %v13617_v54  ;;  %8248 = vmatprep.subr.bf16.mxu1 %v13622_v50 }
 0x486   :  { %8643 = vmatprep.subr.bf16.mxu0 %v13625_v48 }
 0x488   :  { %8249 = vmatpush1.bf16.msra.mxu1 %v13620_v2  ;;  %v13680_v2 = vld [vmem:[%s18045_s5 + $0x8e0] ss:$8 sps:$4 sm:$0xff]  }
 0x489   :  { %8644 = vmatpush1.bf16.msra.mxu0 %v13623_v7  ;;  %8250 = vmatprep.subr.bf16.mxu1 %v13628_v30  ;;  %v13683_v30 = vld [vmem:[%s18045_s5 + $0xa20] ss:$8 sps:$4 sm:$0xff]  }
 0x48a   :  { %8645 = vmatprep.subr.bf16.mxu0 %v13631_v4  ;;  %v13686_v4 = vld [vmem:[%s18045_s5 + $0x8f0] ss:$8 sps:$4 sm:$0xff]  }
 0x48c   :  { %8251 = vmatpush1.bf16.msra.mxu1 %v13626_v43  ;;  %v8334_v43 = vmax.f32 %v16710_v55, 0.0  ;;  %v13692_v55 = vld [vmem:[%s18045_s5 + $0x900] ss:$8 sps:$4 sm:$0xff]  }
 0x48d   :  { %8646 = vmatpush1.bf16.msra.mxu0 %v13629_v27  ;;  %8252 = vmatprep.subr.bf16.mxu1 %v13634_v11  ;;  %v13689_v27 = vld [vmem:[%s18045_s5 + $0xa30] ss:$8 sps:$4 sm:$0xff]   ;;  %v13694_v11 = vld [vmem:[%s18045_s5 + $0x904] ss:$8 sps:$4 sm:$0xff]  }
 0x48e   :  { %8647 = vmatprep.subr.bf16.mxu0 %v13637_v16  ;;  %v8736_v16 = vmax.f32 %v16883_v56, 0.0  ;;  %v13700_v56 = vld [vmem:[%s18045_s5 + $0x914] ss:$8 sps:$4 sm:$0xff]  }
 0x490   :  { %8253 = vmatpush1.bf16.msra.mxu1 %v13632_v13  ;;  %v13697_v13 = vld [vmem:[%s18045_s5 + $0xa44] ss:$8 sps:$4 sm:$0xff]  }
 0x491   :  { %8648 = vmatpush1.bf16.msra.mxu0 %v13635_v59  ;;  %8254 = vmatprep.subr.bf16.mxu1 %v13640_v46  ;;  %v8337_v59 = vpack.c.bf16 %v8334_v43, %v8334_v43  ;;  %v13695_v46 = vld [vmem:[%s18045_s5 + $0xa40] ss:$8 sps:$4 sm:$0xff]  }
 0x492   :  { %8649 = vmatprep.subr.bf16.mxu0 %v13643_v38  ;;  %v8739_v38 = vpack.c.bf16 %v8736_v16, %v8736_v16  ;;  %v13740_v43 = vld [vmem:[%s18045_s5 + $0x980] ss:$8 sps:$4 sm:$0xff]   ;;  %v13751_v16 = vld [vmem:[%s18045_s5 + $0xad4] ss:$8 sps:$4 sm:$0xff]  }
 0x494   :  { %8255 = vmatpush1.bf16.msra.mxu1 %v13638_v39  ;;  %v13703_v39 = vld [vmem:[%s18045_s5 + $0xa54] ss:$8 sps:$4 sm:$0xff]  }
 0x495   :  { %8650 = vmatpush1.bf16.msra.mxu0 %v13641_v1  ;;  %8668 = vmatprep.subr.bf16.mxu1 %v13646_v14  ;;  %v13701_v1 = vld [vmem:[%s18045_s5 + $0xa50] ss:$8 sps:$4 sm:$0xff]   ;;  %v13706_v14 = vld [vmem:[%s18045_s5 + $0x924] ss:$8 sps:$4 sm:$0xff]  }
 0x496   :  { %8651 = vmatprep.subr.bf16.mxu0 %v13649_v28 }
 0x497   :  { %8257 = vmatmul.mubr.bf16.vlgmr.msra.gmra.mrb[196].mxu1 %v7932_v51 }
 0x498   :  { %8669 = vmatpush1.bf16.msra.mxu1 %v13644_v41  ;;  %8700 = vmatprep.mubr.bf16.mxu1 %v18091_v25  ;;  %v13709_v41 = vld [vmem:[%s18045_s5 + $0xa64] ss:$8 sps:$4 sm:$0xff]  }
 0x499   :  { %8652 = vmatpush1.bf16.msra.mxu0 %v13647_v35  ;;  %8670 = vmatprep.subr.bf16.mxu1 %v13652_v47 }
 0x49a   :  { %8653 = vmatprep.subr.bf16.mxu0 %v13655_v15 }
 0x49c   :  { %8671 = vmatpush1.bf16.msra.mxu1 %v13650_v52  ;;  %v13704_v52 = vld [vmem:[%s18045_s5 + $0x920] ss:$8 sps:$4 sm:$0xff]  }
 0x49d   :  { %8654 = vmatpush1.bf16.msra.mxu0 %v13653_v45  ;;  %8672 = vmatprep.subr.bf16.mxu1 %v13658_v0  ;;  %v13707_v0 = vld [vmem:[%s18045_s5 + $0xa60] ss:$8 sps:$4 sm:$0xff]  }
 0x49e   :  { %8655 = vmatprep.subr.bf16.mxu0 %v13661_v12  ;;  %v13712_v12 = vld [vmem:[%s18045_s5 + $0x934] ss:$8 sps:$4 sm:$0xff]  }
 0x4a0   :  { %8673 = vmatpush1.bf16.msra.mxu1 %v13656_v31  ;;  %v13715_v31 = vld [vmem:[%s18045_s5 + $0xa74] ss:$8 sps:$4 sm:$0xff]  }
 0x4a1   :  { %8656 = vmatpush1.bf16.msra.mxu0 %v13659_v61  ;;  %8674 = vmatprep.subr.bf16.mxu1 %v13664_v22  ;;  %v13710_v61 = vld [vmem:[%s18045_s5 + $0x930] ss:$8 sps:$4 sm:$0xff]  }
 0x4a2   :  { %8657 = vmatprep.subr.bf16.mxu0 %v13667_v32  ;;  %v13713_v22 = vld [vmem:[%s18045_s5 + $0xa70] ss:$8 sps:$4 sm:$0xff]   ;;  %v13718_v32 = vld [vmem:[%s18045_s5 + $0x944] ss:$8 sps:$4 sm:$0xff]  }
 0x4a4   :  { %8675 = vmatpush1.bf16.msra.mxu1 %v13662_v23  ;;  %v8737_v23 = vmax.f32 %v16717_v18, 0.0  ;;  %v13724_v18 = vld [vmem:[%s18045_s5 + $0x954] ss:$8 sps:$4 sm:$0xff]  }
 0x4a5   :  { %8658 = vmatpush1.bf16.msra.mxu0 %v13665_v20  ;;  %8676 = vmatprep.subr.bf16.mxu1 %v13670_v26  ;;  %v13721_v20 = vld [vmem:[%s18045_s5 + $0xa84] ss:$8 sps:$4 sm:$0xff]   ;;  %v9139_v26 = vmax.f32 %v16904_v53, 0.0  ;;  %v13727_v53 = vld [vmem:[%s18045_s5 + $0xa94] ss:$8 sps:$4 sm:$0xff]  }
 0x4a6   :  { %9071 = vmatprep.subr.bf16.mxu0 %v13673_v24  ;;  %v13719_v24 = vld [vmem:[%s18045_s5 + $0xa80] ss:$8 sps:$4 sm:$0xff]  }
 0x4a8   :  { %8677 = vmatpush1.bf16.msra.mxu1 %v13668_v3  ;;  %8660 = vmatmul.mubr.bf16.vlgmr.msra.gmra.mrb[204].mxu0 %v8335_v6  ;;  %v8740_v3 = vpack.c.bf16 %v8737_v23, %v8737_v23  ;;  %v13725_v6 = vld [vmem:[%s18045_s5 + $0xa90] ss:$8 sps:$4 sm:$0xff]   ;;  %v13776_v23 = vld [vmem:[%s18045_s5 + $0x9e0] ss:$8 sps:$4 sm:$0xff]  }
 0x4a9   :  { %9072 = vmatpush1.bf16.msra.mxu0 %v13671_v34  ;;  %8678 = vmatprep.subr.bf16.mxu1 %v13676_v60  ;;  %v9142_v34 = vpack.c.bf16 %v9139_v26, %v9139_v26  ;;  %v13722_v60 = vld [vmem:[%s18045_s5 + $0x950] ss:$8 sps:$4 sm:$0xff]   ;;  %v13784_v26 = vld [vmem:[%s18045_s5 + $0x9f4] ss:$8 sps:$4 sm:$0xff]  }
 0x4aa   :  { %v6729_v63 = vpop.f32.mrb[180].mxu1  ;;  %9073 = vmatprep.subr.bf16.mxu0 %v13679_v44  ;;  %9103 = vmatprep.mubr.bf16.mxu0 %v18091_v25  ;;  %v13730_v44 = vld [vmem:[%s18045_s5 + $0x964] ss:$8 sps:$4 sm:$0xff]  }
 0x4ab   :  { %v6771_v62 = vadd.f32 %v17369_v49, %v6729_v63  ;;  %v6731_v54 = vpop.f32.mrb[181].mxu1  ;;  %v13688_v49 = vld [vmem:[%s18045_s5 + $0x8f4] ss:$8 sps:$4 sm:$0xff]  }
 0x4ac   :  { %v6773_v50 = vadd.f32 %v17374_v10, %v6731_v54  ;;  %8679 = vmatpush1.bf16.msra.mxu1 %v13674_v17  ;;  %v6733_v48 = vpop.f32.mrb[182].mxu1  ;;  %v13691_v10 = vld [vmem:[%s18045_s5 + $0xa34] ss:$8 sps:$4 sm:$0xff]   ;;  %v13728_v54 = vld [vmem:[%s18045_s5 + $0x960] ss:$8 sps:$4 sm:$0xff]  }
 0x4ad   :  { %v6734_v7 = vpop.f32.mrb[183].mxu1  ;;  %9074 = vmatpush1.bf16.msra.mxu0 %v13677_v33  ;;  %8680 = vmatprep.subr.bf16.mxu1 %v13682_v29  ;;  %v13733_v33 = vld [vmem:[%s18045_s5 + $0xaa4] ss:$8 sps:$4 sm:$0xff]   ;;  %v13731_v48 = vld [vmem:[%s18045_s5 + $0xaa0] ss:$8 sps:$4 sm:$0xff]  }
 0x4ae   :  { %9075 = vmatprep.subr.bf16.mxu0 %v13685_v37  ;;  %v13739_v7 = vld [vmem:[%s18045_s5 + $0xab4] ss:$8 sps:$4 sm:$0xff]  }
 0x4b0   :  { %8681 = vmatpush1.bf16.msra.mxu1 %v13680_v2  ;;  %v13736_v2 = vld [vmem:[%s18045_s5 + $0x974] ss:$8 sps:$4 sm:$0xff]  }
 0x4b1   :  { %9076 = vmatpush1.bf16.msra.mxu0 %v13683_v30  ;;  %8682 = vmatprep.subr.bf16.mxu1 %v13688_v49  ;;  %v13734_v30 = vld [vmem:[%s18045_s5 + $0x970] ss:$8 sps:$4 sm:$0xff]  }
 0x4b2   :  { %9077 = vmatprep.subr.bf16.mxu0 %v13691_v10  ;;  %v13737_v49 = vld [vmem:[%s18045_s5 + $0xab0] ss:$8 sps:$4 sm:$0xff]   ;;  %v13742_v10 = vld [vmem:[%s18045_s5 + $0x984] ss:$8 sps:$4 sm:$0xff]  }
 0x4b4   :  { %8683 = vmatpush1.bf16.msra.mxu1 %v13686_v4  ;;  %v13745_v4 = vld [vmem:[%s18045_s5 + $0xac4] ss:$8 sps:$4 sm:$0xff]  }
 0x4b5   :  { %9078 = vmatpush1.bf16.msra.mxu0 %v13689_v27  ;;  %9030 = vmatprep.subr.bf16.mxu1 %v13694_v11  ;;  %v13743_v27 = vld [vmem:[%s18045_s5 + $0xac0] ss:$8 sps:$4 sm:$0xff]   ;;  %v13748_v11 = vld [vmem:[%s18045_s5 + $0x994] ss:$8 sps:$4 sm:$0xff]  }
 0x4b6   :  { %9079 = vmatprep.subr.bf16.mxu0 %v13697_v13  ;;  %v13746_v13 = vld [vmem:[%s18045_s5 + $0x990] ss:$8 sps:$4 sm:$0xff]  }
 0x4b7   :  { %8701 = vmatmul.mubr.bf16.vlgmr.msra.gmra.mrb[200].mxu1 %v8337_v59  ;;  %v13754_v59 = vld [vmem:[%s18045_s5 + $0x9a4] ss:$8 sps:$4 sm:$0xff]  }
 0x4b8   :  { %9031 = vmatpush1.bf16.msra.mxu1 %v13692_v55  ;;  %9062 = vmatprep.mubr.bf16.mxu1 %v8739_v38  ;;  %v13749_v55 = vld [vmem:[%s18045_s5 + $0xad0] ss:$8 sps:$4 sm:$0xff]  }
 0x4b9   :  { %9080 = vmatpush1.bf16.msra.mxu0 %v13695_v46  ;;  %9032 = vmatprep.subr.bf16.mxu1 %v13700_v56  ;;  %v13757_v46 = vld [vmem:[%s18045_s5 + $0xae4] ss:$8 sps:$4 sm:$0xff]  }
 0x4ba   :  { %v7051_v28 = vpop.f32.mrb[188].mxu0  ;;  %9081 = vmatprep.subr.bf16.mxu0 %v13703_v39  ;;  %v13752_v39 = vld [vmem:[%s18045_s5 + $0x9a0] ss:$8 sps:$4 sm:$0xff]  }
 0x4bb   :  { %v7052_v51 = vadd.f32 %v7051_v28, %v6771_v62  ;;  %v7053_v35 = vpop.f32.mrb[189].mxu0 }
 0x4bc   :  { %9033 = vmatpush1.bf16.msra.mxu1 %v13698_v9  ;;  %v7054_v47 = vadd.f32 %v7053_v35, %v6773_v50  ;;  %v7055_v15 = vpop.f32.mrb[190].mxu0  ;;  %v13761_v35 = vld [vmem:[%s18045_s5 + $0xaf0] ss:$8 sps:$4 sm:$0xff]  }
 0x4bd   :  { %9082 = vmatpush1.bf16.msra.mxu0 %v13701_v1  ;;  %v7056_v45 = vpop.f32.mrb[191].mxu0  ;;  %9034 = vmatprep.subr.bf16.mxu1 %v13706_v14  ;;  %v13755_v1 = vld [vmem:[%s18045_s5 + $0xae0] ss:$8 sps:$4 sm:$0xff]   ;;  %v13760_v14 = vld [vmem:[%s18045_s5 + $0x9b4] ss:$8 sps:$4 sm:$0xff]  }
 0x4be   :  { %9083 = vmatprep.subr.bf16.mxu0 %v13709_v41  ;;  %v13763_v41 = vld [vmem:[%s18045_s5 + $0xaf4] ss:$8 sps:$4 sm:$0xff]   ;;  %v13769_v15 = vld [vmem:[%s18045_s5 + $0xb04] ss:$8 sps:$4 sm:$0xff]   ;;  %v13767_v45 = vld [vmem:[%s18045_s5 + $0xb00] ss:$8 sps:$4 sm:$0xff]  }
 0x4c0   :  { %9035 = vmatpush1.bf16.msra.mxu1 %v13704_v52  ;;  %v13764_v52 = vld [vmem:[%s18045_s5 + $0x9c0] ss:$8 sps:$4 sm:$0xff]  }
 0x4c1   :  { %9084 = vmatpush1.bf16.msra.mxu0 %v13707_v0  ;;  %9036 = vmatprep.subr.bf16.mxu1 %v13712_v12  ;;  %v13772_v0 = vld [vmem:[%s18045_s5 + $0x9d4] ss:$8 sps:$4 sm:$0xff]  }
 0x4c2   :  { %9085 = vmatprep.subr.bf16.mxu0 %v13715_v31  ;;  %v13775_v12 = vld [vmem:[%s18045_s5 + $0xb14] ss:$8 sps:$4 sm:$0xff]   ;;  %v13770_v31 = vld [vmem:[%s18045_s5 + $0x9d0] ss:$8 sps:$4 sm:$0xff]  }
 0x4c4   :  { %9037 = vmatpush1.bf16.msra.mxu1 %v13710_v61  ;;  %v13773_v61 = vld [vmem:[%s18045_s5 + $0xb10] ss:$8 sps:$4 sm:$0xff]  }
 0x4c5   :  { %9086 = vmatpush1.bf16.msra.mxu0 %v13713_v22  ;;  %9038 = vmatprep.subr.bf16.mxu1 %v13718_v32  ;;  %v13778_v22 = vld [vmem:[%s18045_s5 + $0x9e4] ss:$8 sps:$4 sm:$0xff]  }
 0x4c6   :  { %9433 = vmatprep.subr.bf16.mxu0 %v13721_v20  ;;  %v13781_v32 = vld [vmem:[%s18045_s5 + $0xb24] ss:$8 sps:$4 sm:$0xff]   ;;  %v13779_v20 = vld [vmem:[%s18045_s5 + $0xb20] ss:$8 sps:$4 sm:$0xff]  }
 0x4c8   :  { %9039 = vmatpush1.bf16.msra.mxu1 %v13716_v21  ;;  %9104 = vmatmul.mubr.bf16.vlgmr.msra.gmra.mrb[208].mxu0 %v8740_v3  ;;  %v13787_v21 = vld [vmem:[%s18045_s5 + $0xb34] ss:$8 sps:$4 sm:$0xff]   ;;  %v8735_v3 = vmax.f32 %v16874_v42, 0.0  ;;  %v13788_v42 = vld [vmem:[%s18045_s5 + $0xb80] ss:$8 sps:$4 sm:$0xff]  }
 0x4c9   :  { %9434 = vmatpush1.bf16.msra.mxu0 %v13719_v24  ;;  %9465 = vmatprep.mubr.bf16.mxu0 %v9142_v34  ;;  %v13782_v24 = vld [vmem:[%s18045_s5 + $0x9f0] ss:$8 sps:$4 sm:$0xff]   ;;  %v13793_v34 = vld [vmem:[%s18045_s5 + $0xb44] ss:$8 sps:$4 sm:$0xff]  }
 0x4ca   :  { %v7092_v17 = vpop.f32.mrb[184].mxu1  ;;  %9040 = vmatprep.subr.bf16.mxu1 %v13724_v18  ;;  %9435 = vmatprep.subr.bf16.mxu0 %v13727_v53  ;;  %v13785_v18 = vld [vmem:[%s18045_s5 + $0xb30] ss:$8 sps:$4 sm:$0xff]   ;;  %v13790_v53 = vld [vmem:[%s18045_s5 + $0xb84] ss:$8 sps:$4 sm:$0xff]  }
 0x4cb   :  { %v17626_v29 = vadd.f32 %v7092_v17, %v7052_v51  ;;  %v7094_v63 = vpop.f32.mrb[185].mxu1  ;;  %v13758_v51 = vld [vmem:[%s18045_s5 + $0x9b0] ss:$8 sps:$4 sm:$0xff]   ;;  %v13799_v17 = vld [vmem:[%s18045_s5 + $0xb54] ss:$8 sps:$4 sm:$0xff]  }
 0x4cc   :  { %v17628_v37 = vadd.f32 %v7094_v63, %v7054_v47  ;;  %v7096_v62 = vpop.f32.mrb[186].mxu1  ;;  %9041 = vmatpush1.bf16.msra.mxu1 %v13722_v60  ;;  %v13766_v47 = vld [vmem:[%s18045_s5 + $0x9c4] ss:$8 sps:$4 sm:$0xff]   ;;  %v8738_v60 = vpack.c.bf16 %v8735_v3, %v8735_v3  ;;  %v13797_v63 = vld [vmem:[%s18045_s5 + $0xb50] ss:$8 sps:$4 sm:$0xff]  }
 0x4cd   :  { %v7097_v50 = vpop.f32.mrb[187].mxu1  ;;  %9436 = vmatpush1.bf16.msra.mxu0 %v13725_v6  ;;  %9042 = vmatprep.subr.bf16.mxu1 %v13730_v44  ;;  %v13791_v6 = vld [vmem:[%s18045_s5 + $0xb40] ss:$8 sps:$4 sm:$0xff]   ;;  %v13796_v44 = vld [vmem:[%s18045_s5 + $0xb94] ss:$8 sps:$4 sm:$0xff]  }
 0x4ce   :  { %9437 = vmatprep.subr.bf16.mxu0 %v13733_v33  ;;  %v13794_v33 = vld [vmem:[%s18045_s5 + $0xb90] ss:$8 sps:$4 sm:$0xff]   ;;  %v13802_v62 = vld [vmem:[%s18045_s5 + $0xba4] ss:$8 sps:$4 sm:$0xff]   ;;  %v13800_v50 = vld [vmem:[%s18045_s5 + $0xba0] ss:$8 sps:$4 sm:$0xff]  }
 0x4d0   :  { %9043 = vmatpush1.bf16.msra.mxu1 %v13728_v54  ;;  %v13805_v54 = vld [vmem:[%s18045_s5 + $0xb64] ss:$8 sps:$4 sm:$0xff]  }
 0x4d1   :  { %9438 = vmatpush1.bf16.msra.mxu0 %v13731_v48  ;;  %9044 = vmatprep.subr.bf16.mxu1 %v13736_v2  ;;  %v13803_v48 = vld [vmem:[%s18045_s5 + $0xb60] ss:$8 sps:$4 sm:$0xff]   ;;  %v13808_v2 = vld [vmem:[%s18045_s5 + $0xbb4] ss:$8 sps:$4 sm:$0xff]  }
 0x4d2   :  { %9439 = vmatprep.subr.bf16.mxu0 %v13739_v7  ;;  %v13811_v7 = vld [vmem:[%s18045_s5 + $0xb74] ss:$8 sps:$4 sm:$0xff]  }
 0x4d4   :  { %9045 = vmatpush1.bf16.msra.mxu1 %v13734_v30  ;;  %v13806_v30 = vld [vmem:[%s18045_s5 + $0xbb0] ss:$8 sps:$4 sm:$0xff]  }
 0x4d5   :  { %9440 = vmatpush1.bf16.msra.mxu0 %v13737_v49  ;;  %9046 = vmatprep.subr.bf16.mxu1 %v13742_v10  ;;  %v13809_v49 = vld [vmem:[%s18045_s5 + $0xb70] ss:$8 sps:$4 sm:$0xff]   ;;  %v13814_v10 = vld [vmem:[%s18045_s5 + $0xbc4] ss:$8 sps:$4 sm:$0xff]  }
 0x4d6   :  { %9441 = vmatprep.subr.bf16.mxu0 %v13745_v4  ;;  %v9138_v4 = vmax.f32 %v16900_v36, 0.0  ;;  %v13820_v36 = vld [vmem:[%s18045_s5 + $0xbd4] ss:$8 sps:$4 sm:$0xff]  }
 0x4d8   :  { %9047 = vmatpush1.bf16.msra.mxu1 %v13740_v43  ;;  %v13817_v43 = vld [vmem:[%s18045_s5 + $0xd04] ss:$8 sps:$4 sm:$0xff]  }
 0x4d9   :  { %9442 = vmatpush1.bf16.msra.mxu0 %v13743_v27  ;;  %9048 = vmatprep.subr.bf16.mxu1 %v13748_v11  ;;  %v13812_v27 = vld [vmem:[%s18045_s5 + $0xbc0] ss:$8 sps:$4 sm:$0xff]  }
 0x4da   :  { %9443 = vmatprep.subr.bf16.mxu0 %v13751_v16  ;;  %v13815_v11 = vld [vmem:[%s18045_s5 + $0xd00] ss:$8 sps:$4 sm:$0xff]   ;;  %v9141_v16 = vpack.c.bf16 %v9138_v4, %v9138_v4 }
 0x4db   :  { %v17678_v56 = vpop.f32.mrb[192].mxu0  ;;  %v13866_v4 = vld [vmem:[%s18045_s5 + $0xc60] ss:$8 sps:$4 sm:$0xff]  }
 0x4dc   :  { %9049 = vmatpush1.bf16.msra.mxu1 %v13746_v13  ;;  %v17680_v38 = vpop.f32.mrb[193].mxu0  ;;  %v13823_v13 = vld [vmem:[%s18045_s5 + $0xd14] ss:$8 sps:$4 sm:$0xff]  }
 0x4dd   :  { %v7497_v9 = vpop.f32.mrb[194].mxu0  ;;  %9444 = vmatpush1.bf16.msra.mxu0 %v13749_v55  ;;  %9050 = vmatprep.subr.bf16.mxu1 %v13754_v59  ;;  %v13818_v55 = vld [vmem:[%s18045_s5 + $0xbd0] ss:$8 sps:$4 sm:$0xff]  }
 0x4de   :  { %v7498_v28 = vpop.f32.mrb[195].mxu0  ;;  %9445 = vmatprep.subr.bf16.mxu0 %v13757_v46  ;;  %v13821_v59 = vld [vmem:[%s18045_s5 + $0xd10] ss:$8 sps:$4 sm:$0xff]   ;;  %v13826_v46 = vld [vmem:[%s18045_s5 + $0xbe4] ss:$8 sps:$4 sm:$0xff]  }
 0x4df   :  { %v13829_v9 = vld [vmem:[%s18045_s5 + $0xd24] ss:$8 sps:$4 sm:$0xff]  }
 0x4e0   :  { %9051 = vmatpush1.bf16.msra.mxu1 %v13752_v39 }
 0x4e1   :  { %9446 = vmatpush1.bf16.msra.mxu0 %v13755_v1  ;;  %9052 = vmatprep.subr.bf16.mxu1 %v13760_v14 }
 0x4e2   :  { %9447 = vmatprep.subr.bf16.mxu0 %v13763_v41 }
 0x4e4   :  { %9053 = vmatpush1.bf16.msra.mxu1 %v13758_v51  ;;  %v13824_v51 = vld [vmem:[%s18045_s5 + $0xbe0] ss:$8 sps:$4 sm:$0xff]  }
 0x4e5   :  { %9448 = vmatpush1.bf16.msra.mxu0 %v13761_v35  ;;  %9054 = vmatprep.subr.bf16.mxu1 %v13766_v47 }
 0x4e6   :  { %9449 = vmatprep.subr.bf16.mxu0 %v13769_v15  ;;  %v13830_v15 = vld [vmem:[%s18045_s5 + $0xbf0] ss:$8 sps:$4 sm:$0xff]  }
 0x4e8   :  { %9055 = vmatpush1.bf16.msra.mxu1 %v13764_v52  ;;  %v9140_v52 = vmax.f32 %v16732_v40, 0.0  ;;  %v13836_v40 = vld [vmem:[%s18045_s5 + $0xc00] ss:$8 sps:$4 sm:$0xff]  }
 0x4e9   :  { %9450 = vmatpush1.bf16.msra.mxu0 %v13767_v45  ;;  %9056 = vmatprep.subr.bf16.mxu1 %v13772_v0  ;;  %v13833_v45 = vld [vmem:[%s18045_s5 + $0xd30] ss:$8 sps:$4 sm:$0xff]   ;;  %v9542_v0 = vmax.f32 %v16923_v19, 0.0  ;;  %v13844_v19 = vld [vmem:[%s18045_s5 + $0xc14] ss:$8 sps:$4 sm:$0xff]  }
 0x4ea   :  { %9451 = vmatprep.subr.bf16.mxu0 %v13775_v12  ;;  %v13841_v12 = vld [vmem:[%s18045_s5 + $0xd44] ss:$8 sps:$4 sm:$0xff]  }
 0x4ec   :  { %9057 = vmatpush1.bf16.msra.mxu1 %v13770_v31  ;;  %v9143_v31 = vpack.c.bf16 %v9140_v52, %v9140_v52  ;;  %v13895_v52 = vld [vmem:[%s18045_s5 + $0xcf4] ss:$8 sps:$4 sm:$0xff]  }
 0x4ed   :  { %9452 = vmatpush1.bf16.msra.mxu0 %v13773_v61  ;;  %9058 = vmatprep.subr.bf16.mxu1 %v13778_v22  ;;  %v13839_v61 = vld [vmem:[%s18045_s5 + $0xd40] ss:$8 sps:$4 sm:$0xff]   ;;  %v9545_v22 = vpack.c.bf16 %v9542_v0, %v9542_v0 }
 0x4ee   :  { %9453 = vmatprep.subr.bf16.mxu0 %v13781_v32  ;;  %v13847_v32 = vld [vmem:[%s18045_s5 + $0xd54] ss:$8 sps:$4 sm:$0xff]  }
 0x4f0   :  { %9059 = vmatpush1.bf16.msra.mxu1 %v13776_v23  ;;  %v13842_v23 = vld [vmem:[%s18045_s5 + $0xc10] ss:$8 sps:$4 sm:$0xff]  }
 0x4f1   :  { %9454 = vmatpush1.bf16.msra.mxu0 %v13779_v20  ;;  %9060 = vmatprep.subr.bf16.mxu1 %v13784_v26  ;;  %v13845_v20 = vld [vmem:[%s18045_s5 + $0xd50] ss:$8 sps:$4 sm:$0xff]   ;;  %v13850_v26 = vld [vmem:[%s18045_s5 + $0xc24] ss:$8 sps:$4 sm:$0xff]  }
 0x4f2   :  { %9455 = vmatprep.subr.bf16.mxu0 %v13787_v21  ;;  %v13853_v21 = vld [vmem:[%s18045_s5 + $0xd64] ss:$8 sps:$4 sm:$0xff]  }
 0x4f4   :  { %9061 = vmatpush1.bf16.msra.mxu1 %v13782_v24 }
 0x4f5   :  { %9456 = vmatpush1.bf16.msra.mxu0 %v13785_v18  ;;  %9474 = vmatprep.subr.bf16.mxu1 %v13790_v53  ;;  %v13848_v18 = vld [vmem:[%s18045_s5 + $0xc20] ss:$8 sps:$4 sm:$0xff]  }
 0x4f6   :  { %9457 = vmatprep.subr.bf16.mxu0 %v13793_v34  ;;  %v13851_v34 = vld [vmem:[%s18045_s5 + $0xd60] ss:$8 sps:$4 sm:$0xff]  }
 0x4f7   :  { %9063 = vmatmul.mubr.bf16.vlgmr.msra.gmra.mrb[204].mxu1 %v8738_v60 }
 0x4f8   :  { %9475 = vmatpush1.bf16.msra.mxu1 %v13788_v42  ;;  %9506 = vmatprep.mubr.bf16.mxu1 %v18091_v25  ;;  %v13856_v42 = vld [vmem:[%s18045_s5 + $0xc34] ss:$8 sps:$4 sm:$0xff]  }
 0x4f9   :  { %9458 = vmatpush1.bf16.msra.mxu0 %v13791_v6  ;;  %9476 = vmatprep.subr.bf16.mxu1 %v13796_v44  ;;  %v13859_v6 = vld [vmem:[%s18045_s5 + $0xd74] ss:$8 sps:$4 sm:$0xff]   ;;  %v13854_v44 = vld [vmem:[%s18045_s5 + $0xc30] ss:$8 sps:$4 sm:$0xff]  }
 0x4fa   :  { %9459 = vmatprep.subr.bf16.mxu0 %v13799_v17  ;;  %v13857_v17 = vld [vmem:[%s18045_s5 + $0xd70] ss:$8 sps:$4 sm:$0xff]  }
 0x4fc   :  { %9477 = vmatpush1.bf16.msra.mxu1 %v13794_v33  ;;  %v13862_v33 = vld [vmem:[%s18045_s5 + $0xc44] ss:$8 sps:$4 sm:$0xff]  }
 0x4fd   :  { %9460 = vmatpush1.bf16.msra.mxu0 %v13797_v63  ;;  %9478 = vmatprep.subr.bf16.mxu1 %v13802_v62  ;;  %v9543_v63 = vmax.f32 %v16739_v57, 0.0  ;;  %v13860_v62 = vld [vmem:[%s18045_s5 + $0xc40] ss:$8 sps:$4 sm:$0xff]   ;;  %v13868_v57 = vld [vmem:[%s18045_s5 + $0xc64] ss:$8 sps:$4 sm:$0xff]  }
 0x4fe   :  { %9461 = vmatprep.subr.bf16.mxu0 %v13805_v54  ;;  %v13865_v54 = vld [vmem:[%s18045_s5 + $0xc54] ss:$8 sps:$4 sm:$0xff]  }
 0x500   :  { %9479 = vmatpush1.bf16.msra.mxu1 %v13800_v50  ;;  %v9546_v50 = vpack.c.bf16 %v9543_v63, %v9543_v63  ;;  %v13904_v63 = vld [vmem:[%s18047_s7 + $0x60] sm:$0xff]  }
 0x501   :  { %9462 = vmatpush1.bf16.msra.mxu0 %v13803_v48  ;;  %9480 = vmatprep.subr.bf16.mxu1 %v13808_v2  ;;  %v13863_v48 = vld [vmem:[%s18045_s5 + $0xc50] ss:$8 sps:$4 sm:$0xff]  }
 0x502   :  { %9463 = vmatprep.subr.bf16.mxu0 %v13811_v7 }
 0x504   :  { %9481 = vmatpush1.bf16.msra.mxu1 %v13806_v30 }
 0x505   :  { %9464 = vmatpush1.bf16.msra.mxu0 %v13809_v49  ;;  %9482 = vmatprep.subr.bf16.mxu1 %v13814_v10 }
 0x506   :  { %9877 = vmatprep.subr.bf16.mxu0 %v13817_v43 }
 0x508   :  { %9483 = vmatpush1.bf16.msra.mxu1 %v13812_v27  ;;  %9466 = vmatmul.mubr.bf16.vlgmr.msra.gmra.mrb[212].mxu0 %v9141_v16  ;;  %v13869_v16 = vld [vmem:[%s18045_s5 + $0xc70] ss:$8 sps:$4 sm:$0xff]  }
 0x509   :  { %9878 = vmatpush1.bf16.msra.mxu0 %v13815_v11  ;;  %9484 = vmatprep.subr.bf16.mxu1 %v13820_v36  ;;  %v13871_v11 = vld [vmem:[%s18045_s5 + $0xc74] ss:$8 sps:$4 sm:$0xff]  }
 0x50a   :  { %v7452_v39 = vpop.f32.mrb[188].mxu1  ;;  %9879 = vmatprep.subr.bf16.mxu0 %v13823_v13  ;;  %9909 = vmatprep.mubr.bf16.mxu0 %v18091_v25  ;;  %v13827_v25 = vld [vmem:[%s18045_s5 + $0xd20] ss:$8 sps:$4 sm:$0xff]   ;;  %v13874_v13 = vld [vmem:[%s18045_s5 + $0xc84] ss:$8 sps:$4 sm:$0xff]  }
 0x50b   :  { %v7494_v1 = vadd.f32 %v17678_v56, %v7452_v39  ;;  %v7454_v14 = vpop.f32.mrb[189].mxu1  ;;  %v13832_v56 = vld [vmem:[%s18045_s5 + $0xbf4] ss:$8 sps:$4 sm:$0xff]   ;;  %v13880_v39 = vld [vmem:[%s18045_s5 + $0xca4] ss:$8 sps:$4 sm:$0xff]  }
 0x50c   :  { %v7496_v28 = vadd.f32 %v17680_v38, %v7454_v14  ;;  %v7456_v41 = vpop.f32.mrb[190].mxu1  ;;  %9485 = vmatpush1.bf16.msra.mxu1 %v13818_v55  ;;  %v13872_v55 = vld [vmem:[%s18045_s5 + $0xc80] ss:$8 sps:$4 sm:$0xff]  }
 0x50d   :  { %v17836_v35 = vadd.f32 %v7494_v1, %v17626_v29  ;;  %v7457_v47 = vpop.f32.mrb[191].mxu1  ;;  %9880 = vmatpush1.bf16.msra.mxu0 %v13821_v59  ;;  %9486 = vmatprep.subr.bf16.mxu1 %v13826_v46  ;;  %v13835_v29 = vld [vmem:[%s18045_s5 + $0xd34] ss:$8 sps:$4 sm:$0xff]   ;;  %v13875_v46 = vld [vmem:[%s18045_s5 + $0xc90] ss:$8 sps:$4 sm:$0xff]  }
 0x50e   :  { %v17845_v38 = vadd.f32 %v7496_v28, %v17628_v37  ;;  %9881 = vmatprep.subr.bf16.mxu0 %v13829_v9  ;;  %v13838_v37 = vld [vmem:[%s18045_s5 + $0xc04] ss:$8 sps:$4 sm:$0xff]   ;;  %v13877_v59 = vld [vmem:[%s18045_s5 + $0xc94] ss:$8 sps:$4 sm:$0xff]   ;;  %v13878_v14 = vld [vmem:[%s18045_s5 + $0xca0] ss:$8 sps:$4 sm:$0xff]  }
 0x50f   :  { %v13883_v41 = vld [vmem:[%s18045_s5 + $0xcb4] ss:$8 sps:$4 sm:$0xff]   ;;  %v13886_v47 = vld [vmem:[%s18045_s5 + $0xcc4] ss:$8 sps:$4 sm:$0xff]  }
 0x510   :  { %9487 = vmatpush1.bf16.msra.mxu1 %v13824_v51 }
 0x511   :  { %9882 = vmatpush1.bf16.msra.mxu0 %v13827_v25  ;;  %9488 = vmatprep.subr.bf16.mxu1 %v13832_v56  ;;  %v13884_v25 = vld [vmem:[%s18045_s5 + $0xcc0] ss:$8 sps:$4 sm:$0xff]   ;;  %v13889_v56 = vld [vmem:[%s18045_s5 + $0xcd4] ss:$8 sps:$4 sm:$0xff]  }
 0x512   :  { %9883 = vmatprep.subr.bf16.mxu0 %v13835_v29  ;;  %v13892_v29 = vld [vmem:[%s18045_s5 + $0xce4] ss:$8 sps:$4 sm:$0xff]  }
 0x514   :  { %9489 = vmatpush1.bf16.msra.mxu1 %v13830_v15  ;;  %v13890_v15 = vld [vmem:[%s18045_s5 + $0xce0] ss:$8 sps:$4 sm:$0xff]  }
 0x515   :  { %9884 = vmatpush1.bf16.msra.mxu0 %v13833_v45  ;;  %9836 = vmatprep.subr.bf16.mxu1 %v13838_v37  ;;  %v13893_v45 = vld [vmem:[%s18045_s5 + $0xcf0] ss:$8 sps:$4 sm:$0xff]   ;;  %v9541_v37 = vmax.f32 %v16914_v8, 0.0  ;;  %v13896_v8 = vld [vmem:[%s18047_s7 + $0x40] sm:$0xff]  }
 0x516   :  { %9885 = vmatprep.subr.bf16.mxu0 %v13841_v12 }
 0x517   :  { %9507 = vmatmul.mubr.bf16.vlgmr.msra.gmra.mrb[208].mxu1 %v9143_v31  ;;  %v9544_v0 = vpack.c.bf16 %v9541_v37, %v9541_v37 }
 0x518   :  { %9837 = vmatpush1.bf16.msra.mxu1 %v13836_v40  ;;  %9868 = vmatprep.mubr.bf16.mxu1 %v9545_v22 }
 0x519   :  { %9886 = vmatpush1.bf16.msra.mxu0 %v13839_v61  ;;  %9838 = vmatprep.subr.bf16.mxu1 %v13844_v19 }
 0x51a   :  { %9887 = vmatprep.subr.bf16.mxu0 %v13847_v32 }
 0x51b   :  { %v7855_v24 = vpop.f32.mrb[196].mxu0 }
 0x51c   :  { %9839 = vmatpush1.bf16.msra.mxu1 %v13842_v23  ;;  %v7857_v3 = vpop.f32.mrb[197].mxu0 }
 0x51d   :  { %v7859_v53 = vpop.f32.mrb[198].mxu0  ;;  %9888 = vmatpush1.bf16.msra.mxu0 %v13845_v20  ;;  %9840 = vmatprep.subr.bf16.mxu1 %v13850_v26 }
 0x51e   :  { %v7860_v60 = vpop.f32.mrb[199].mxu0  ;;  %9889 = vmatprep.subr.bf16.mxu0 %v13853_v21  ;;  %v13899_v53 = vld [vmem:[%s18047_s7 + $0x8] sm:$0xff]  }
 0x51f   :  { %v13902_v60 = vld [vmem:[%s18047_s7 + $0x58] sm:$0xff]  }
 0x520   :  { %9841 = vmatpush1.bf16.msra.mxu1 %v13848_v18  ;;  %v13898_v18 = vld [vmem:[%s18047_s7 + $0x48] sm:$0xff]  }
 0x521   :  { %9890 = vmatpush1.bf16.msra.mxu0 %v13851_v34  ;;  %9842 = vmatprep.subr.bf16.mxu1 %v13856_v42  ;;  %v13900_v34 = vld [vmem:[%s18047_s7 + $0x50] sm:$0xff]  }
 0x522   :  { %9891 = vmatprep.subr.bf16.mxu0 %v13859_v6  ;;  %v13901_v42 = vld [vmem:[%s18047_s7 + $0x10] sm:$0xff]  }
 0x524   :  { %9843 = vmatpush1.bf16.msra.mxu1 %v13854_v44  ;;  %v13903_v44 = vld [vmem:[%s18047_s7 + $0x18] sm:$0xff]  }
 0x525   :  { %9892 = vmatpush1.bf16.msra.mxu0 %v13857_v17  ;;  %9844 = vmatprep.subr.bf16.mxu1 %v13862_v33 }
 0x526   :  { %12237 = vmatprep.subr.bf16.mxu0 %v13896_v8 }
 0x528   :  { %9845 = vmatpush1.bf16.msra.mxu1 %v13860_v62  ;;  %9910 = vmatmul.mubr.bf16.vlgmr.msra.gmra.mrb[216].mxu0 %v9546_v50 }
 0x529   :  { %9846 = vmatprep.subr.bf16.mxu1 %v13865_v54 }
 0x52a   :  { %v7896_v2 = vpop.f32.mrb[192].mxu1 }
 0x52b   :  { %v7897_v7 = vadd.f32 %v7896_v2, %v7855_v24  ;;  %v7898_v30 = vpop.f32.mrb[193].mxu1  ;;  %v13905_v2 = vld [vmem:[%s18047_s7 + $0x20] sm:$0xff]  }
 0x52c   :  { %v7899_v49 = vadd.f32 %v7898_v30, %v7857_v3  ;;  %v7900_v10 = vpop.f32.mrb[194].mxu1  ;;  %9847 = vmatpush1.bf16.msra.mxu1 %v13863_v48  ;;  %v13897_v3 = vld [vmem:[%s18047_s7] sm:$0xff]  }
 0x52d   :  { %v7903_v43 = vadd.f32 %v7897_v7, %v17836_v35  ;;  %v7901_v27 = vpop.f32.mrb[195].mxu1  ;;  %9848 = vmatprep.subr.bf16.mxu1 %v13868_v57  ;;  %v13881_v35 = vld [vmem:[%s18045_s5 + $0xcb0] ss:$8 sps:$4 sm:$0xff]   ;;  %12238 = vmatpush3.bf16.msra.mxu0 %v13897_v3 }
 0x52e   :  { %v7904_v36 = vadd.f32 %v7899_v49, %v17845_v38  ;;  %v13887_v38 = vld [vmem:[%s18045_s5 + $0xcd0] ss:$8 sps:$4 sm:$0xff]   ;;  %12239 = vmatprep.subr.bf16.mxu0 %v13898_v18 }
 0x52f   :  { %v13908_v27 = vld [vmem:[%s18047_s7 + $0x70] sm:$0xff]  }
 0x530   :  { %9849 = vmatpush1.bf16.msra.mxu1 %v13866_v4  ;;  %v13906_v4 = vld [vmem:[%s18047_s7 + $0x68] sm:$0xff]  }
 0x531   :  { %9850 = vmatprep.subr.bf16.mxu1 %v13871_v11  ;;  %12240 = vmatpush3.bf16.msra.mxu0 %v13899_v53  ;;  %v13909_v11 = vld [vmem:[%s18047_s7 + $0x30] sm:$0xff]  }
 0x532   :  { %12241 = vmatprep.subr.bf16.mxu0 %v13900_v34 }
 0x534   :  { %9851 = vmatpush1.bf16.msra.mxu1 %v13869_v16  ;;  %v13911_v16 = vld [vmem:[%s18047_s7 + $0x38] sm:$0xff]  }
 0x535   :  { %9852 = vmatprep.subr.bf16.mxu1 %v13874_v13  ;;  %12242 = vmatpush3.bf16.msra.mxu0 %v13901_v42 }
 0x536   :  { %12243 = vmatprep.subr.bf16.mxu0 %v13902_v60 }
 0x538   :  { %9853 = vmatpush1.bf16.msra.mxu1 %v13872_v55 }
 0x539   :  { %9854 = vmatprep.subr.bf16.mxu1 %v13877_v59  ;;  %12244 = vmatpush3.bf16.msra.mxu0 %v13903_v44 }
 0x53a   :  { %12245 = vmatprep.subr.bf16.mxu0 %v13904_v63 }
 0x53b   :  { %v8299_v9 = vpop.f32.mrb[200].mxu0 }
 0x53c   :  { %9855 = vmatpush1.bf16.msra.mxu1 %v13875_v46  ;;  %v8301_v1 = vpop.f32.mrb[201].mxu0 }
 0x53d   :  { %v8303_v28 = vpop.f32.mrb[202].mxu0  ;;  %9856 = vmatprep.subr.bf16.mxu1 %v13880_v39  ;;  %12246 = vmatpush3.bf16.msra.mxu0 %v13905_v2 }
 0x53e   :  { %v8304_v51 = vpop.f32.mrb[203].mxu0  ;;  %12247 = vmatprep.subr.bf16.mxu0 %v13906_v4 }
 0x540   :  { %9857 = vmatpush1.bf16.msra.mxu1 %v13878_v14 }
 0x541   :  { %9858 = vmatprep.subr.bf16.mxu1 %v13883_v41 }
 0x544   :  { %9859 = vmatpush1.bf16.msra.mxu1 %v13881_v35 }
 0x545   :  { %9860 = vmatprep.subr.bf16.mxu1 %v13886_v47 }
 0x548   :  { %9861 = vmatpush1.bf16.msra.mxu1 %v13884_v25 }
 0x549   :  { %9862 = vmatprep.subr.bf16.mxu1 %v13889_v56 }
 0x54c   :  { %9863 = vmatpush1.bf16.msra.mxu1 %v13887_v38 }
 0x54d   :  { %9864 = vmatprep.subr.bf16.mxu1 %v13892_v29 }
 0x550   :  { %9865 = vmatpush1.bf16.msra.mxu1 %v13890_v15 }
 0x551   :  { %9866 = vmatprep.subr.bf16.mxu1 %v13895_v52 }
 0x554   :  { %9867 = vmatpush1.bf16.msra.mxu1 %v13893_v45 }
 0x557   :  { %9869 = vmatmul.mubr.bf16.vlgmr.msra.gmra.mrb[212].mxu1 %v9544_v0 }
 0x56a   :  { %v8258_v12 = vpop.f32.mrb[196].mxu1 }
 0x56b   :  { %v8300_v40 = vadd.f32 %v8299_v9, %v8258_v12  ;;  %v8260_v31 = vpop.f32.mrb[197].mxu1 }
 0x56c   :  { %v8302_v61 = vadd.f32 %v8301_v1, %v8260_v31  ;;  %v8262_v19 = vpop.f32.mrb[198].mxu1  ;;  %v9920_v31 = vld [vmem:[%s18048_s6] sm:$0x3] }
 0x56d   :  { %v8306_v22 = vadd.f32 %v8300_v40, %v7903_v43  ;;  %v8263_v32 = vpop.f32.mrb[199].mxu1  ;;  %v13907_v43 = vld [vmem:[%s18047_s7 + $0x28] sm:$0xff]  }
 0x56e   :  { %v8307_v23 = vadd.f32 %v8302_v61, %v7904_v36  ;;  %12248 = vmatpush3.bf16.msra.mxu0 %v13907_v43  ;;  %v13910_v36 = vld [vmem:[%s18047_s7 + $0x78] sm:$0xff]  }
 0x56f   :  { %12249 = vmatprep.subr.bf16.mxu0 %v13908_v27 }
 0x572   :  { %12250 = vmatpush3.bf16.msra.mxu0 %v13909_v11 }
 0x573   :  { %12251 = vmatprep.subr.bf16.mxu0 %v13910_v36 }
 0x576   :  { %12252 = vmatpush3.bf16.msra.mxu0 %v13911_v16 }
 0x57b   :  { %v8661_v20 = vpop.f32.mrb[204].mxu0 }
 0x57c   :  { %v8663_v26 = vpop.f32.mrb[205].mxu0 }
 0x57d   :  { %v8665_v21 = vpop.f32.mrb[206].mxu0 }
 0x57e   :  { %v8666_v24 = vpop.f32.mrb[207].mxu0 }
 0x58a   :  { %v8702_v6 = vpop.f32.mrb[200].mxu1 }
 0x58b   :  { %v8703_v17 = vadd.f32 %v8702_v6, %v8661_v20  ;;  %v8704_v33 = vpop.f32.mrb[201].mxu1  ;;  %v9929_v20 = vrot.slane %v9920_v31, %v15410_v5 }
 0x58c   :  { %v8705_v62 = vadd.f32 %v8704_v33, %v8663_v26  ;;  %v8706_v54 = vpop.f32.mrb[202].mxu1 }
 0x58d   :  { %v8709_v50 = vadd.f32 %v8703_v17, %v8306_v22  ;;  %v8707_v48 = vpop.f32.mrb[203].mxu1  ;;  %v9925_v22 = vrot.slane %v9920_v31, %v15407_v58  ;;  %v11816_v58 = vld [vmem:[%s18049_s8] ss:$0 sm:$0xff] }
 0x58e   :  { %v8710_v57 = vadd.f32 %v8705_v62, %v8307_v23 }
 0x59b   :  { %v9105_v7 = vpop.f32.mrb[208].mxu0 }
 0x59c   :  { %v9107_v30 = vpop.f32.mrb[209].mxu0 }
 0x59d   :  { %v9109_v49 = vpop.f32.mrb[210].mxu0 }
 0x59e   :  { %v9110_v10 = vpop.f32.mrb[211].mxu0 }
 0x5ca   :  { %v9064_v13 = vpop.f32.mrb[204].mxu1 }
 0x5cb   :  { %v9106_v55 = vadd.f32 %v9105_v7, %v9064_v13  ;;  %v9066_v59 = vpop.f32.mrb[205].mxu1 }
 0x5cc   :  { %v9108_v46 = vadd.f32 %v9107_v30, %v9066_v59  ;;  %v9068_v39 = vpop.f32.mrb[206].mxu1 }
 0x5cd   :  { %v9112_v9 = vadd.f32 %v9106_v55, %v8709_v50  ;;  %v9069_v1 = vpop.f32.mrb[207].mxu1 }
 0x5ce   :  { %v9113_v14 = vadd.f32 %v9108_v46, %v8710_v57 }
 0x5db   :  { %v9467_v28 = vpop.f32.mrb[212].mxu0 }
 0x5dc   :  { %v9469_v41 = vpop.f32.mrb[213].mxu0 }
 0x5dd   :  { %v9471_v51 = vpop.f32.mrb[214].mxu0 }
 0x5de   :  { %v9472_v35 = vpop.f32.mrb[215].mxu0 }
 0x5ea   :  { %v9508_v47 = vpop.f32.mrb[208].mxu1 }
 0x5eb   :  { %v9509_v25 = vadd.f32 %v9508_v47, %v9467_v28  ;;  %v9510_v56 = vpop.f32.mrb[209].mxu1 }
 0x5ec   :  { %v9511_v38 = vadd.f32 %v9510_v56, %v9469_v41  ;;  %v9512_v29 = vpop.f32.mrb[210].mxu1 }
 0x5ed   :  { %v9515_v15 = vadd.f32 %v9509_v25, %v9112_v9  ;;  %v9513_v52 = vpop.f32.mrb[211].mxu1 }
 0x5ee   :  { %v9516_v45 = vadd.f32 %v9511_v38, %v9113_v14 }
 0x5fb   :  { %v9911_v37 = vpop.f32.mrb[216].mxu0 }
 0x5fc   :  { %v9913_v0 = vpop.f32.mrb[217].mxu0 }
 0x5fd   :  { %v9915_v12 = vpop.f32.mrb[218].mxu0 }
 0x5fe   :  { %v9916_v40 = vpop.f32.mrb[219].mxu0 }
 0x62a   :  { %v9870_v61 = vpop.f32.mrb[212].mxu1 }
 0x62b   :  { %v9912_v19 = vadd.f32 %v9911_v37, %v9870_v61  ;;  %v9872_v32 = vpop.f32.mrb[213].mxu1 }
 0x62c   :  { %v9914_v23 = vadd.f32 %v9913_v0, %v9872_v32  ;;  %v9874_v26 = vpop.f32.mrb[214].mxu1 }
 0x62d   :  { %v9918_v21 = vadd.f32 %v9912_v19, %v9515_v15  ;;  %v9875_v24 = vpop.f32.mrb[215].mxu1 }
 0x62e   :  { %v9919_v8 = vadd.f32 %v9914_v23, %v9516_v45 }
 0x62f   :  { %v9932_v3 = vadd.f32 %v9925_v22, %v9918_v21 }
 0x630   :  { %v9933_v18 = vadd.f32 %v9929_v20, %v9919_v8 }
 0x631   :  { %v9934_v53 = vmax.f32 %v9932_v3, 0.0 }
 0x632   :  { %v9935_v34 = vmax.f32 %v9933_v18, 0.0 }
 0x633   :  { %v9936_v60 = vpack.c.bf16 %v9934_v53, %v9934_v53 }
 0x634   :  { %v9937_v42 = vpack.c.bf16 %v9935_v34, %v9935_v34 }
 0x636   :  { %10105 = vmatprep.mubr.bf16.mxu0 %v9937_v42 }
 0x637   :  { %10106 = vmatmul.mubr.bf16.vlgmr.msra.gmra.mrb[220].mxu0 %v9936_v60 }
 0x70a   :  { %v12253_v6 = vpop.f32.mrb[220].mxu0 }
 0x70b   :  { %v12254_v44 = vpop.f32.mrb[221].mxu0 }
 0x70c   :  { %v12255_v17 = vadd.f32 %v12254_v44, %v12253_v6  ;;  %v12256_v5 = vpop.f32.mrb[222].mxu0 }
 0x70d   :  { %v12257_v33 = vpop.f32.mrb[223].mxu0 }
 0x70e   :  { %v10108_v63 = vadd.f32 %v12255_v17, %v11816_v58 }
 0x710   :  { %10113 = vst [vmem:[%s18050_s9] sm:$0xff] %v10108_v63 }

</bundles_post_ra>
